<compile_context>
chip_gen: v7x
topology: tpu7x:2x2x1
jax: 0.10.0
libtpu: 0.0.40
codegen_flags: <defaults>
</compile_context>

<pallas_src>
import functools

import jax
import jax.numpy as jnp
from jax import lax
from jax.experimental import pallas as pl
from jax.experimental.pallas import tpu as pltpu


# ----------------------------------------------------------------------------
# Pallas kernel: one full bidirectional-GRU layer, both directions fused.
#   lens_ref [B, 1]     int32  per-row valid length (padded rows -> 0)
#   x_ref    [T*B, Din] f32    layer input (time-major, flattened)
#   wih_ref  [6*Din, H] f32    input weights, j = dir*3 + gate(r,z,n)
#   whh_ref  [6*H, H]   f32    hidden weights, same ordering
#   bgi_ref  [6, H]     f32    fused input bias (b_ih + b_hh for r,z; b_ih for n)
#   bhn_ref  [2, H]     f32    b_hh of the n gate, per direction
#   out_ref  [T*B, 2H]  f32    per-step output: cols 0:H fwd, H:2H bwd
#   hn_ref   [2*B, H]   f32    final hidden: rows 0:B fwd, B:2B bwd
#   gi_scr   [6*T*B, H] f32    precomputed input projections (scratch)
# ----------------------------------------------------------------------------
def bigru_fused_kernel(lens_ref, x_ref, wih_ref, whh_ref, bgi_ref, bhn_ref,
                       out_ref, hn_ref, gi_scr):
    TB, Din = x_ref.shape
    B = lens_ref.shape[0]
    H = whh_ref.shape[1]
    T = TB // B

    # (1) Input projection for all timesteps, all gates, both directions.
    #     Six MXU matmuls (one per gate/direction), done once per layer.
    x = x_ref[...]
    for j in range(6):
        gi_scr[j * TB:(j + 1) * TB, :] = (
            jnp.dot(x, wih_ref[j * Din:(j + 1) * Din, :],
                    preferred_element_type=jnp.float32)
            + bgi_ref[j:j + 1, :])

    # (2) Hoist loop invariants (weights, broadcast biases, lengths).
    whh = [whh_ref[j * H:(j + 1) * H, :] for j in range(6)]
    bhn_f = jnp.broadcast_to(bhn_ref[0:1, :], (B, H))
    bhn_b = jnp.broadcast_to(bhn_ref[1:2, :], (B, H))
    lens = lens_ref[...]                                   # [B, 1] int32

    def gi(j, row):
        start = pl.multiple_of(j * TB + row, B)
        return gi_scr[pl.ds(start, B), :]                  # [B, H]

    # (3) In-kernel time scan.  Hidden state is carried in registers; the
    #     backward direction reads time T-1-t and writes its output rows
    #     straight into their reversed slots (no flips anywhere).
    def step(t, carry):
        h_f, h_b = carry
        tb = T - 1 - t
        row_f = pl.multiple_of(t * B, B)
        row_b = pl.multiple_of(tb * B, B)

        gh_fr = jnp.dot(h_f, whh[0], preferred_element_type=jnp.float32)
        gh_fz = jnp.dot(h_f, whh[1], preferred_element_type=jnp.float32)
        gh_fn = jnp.dot(h_f, whh[2], preferred_element_type=jnp.float32)
        gh_br = jnp.dot(h_b, whh[3], preferred_element_type=jnp.float32)
        gh_bz = jnp.dot(h_b, whh[4], preferred_element_type=jnp.float32)
        gh_bn = jnp.dot(h_b, whh[5], preferred_element_type=jnp.float32)

        r_f = jax.nn.sigmoid(gi(0, row_f) + gh_fr)
        z_f = jax.nn.sigmoid(gi(1, row_f) + gh_fz)
        n_f = jnp.tanh(gi(2, row_f) + r_f * (gh_fn + bhn_f))
        c_f = (1.0 - z_f) * n_f + z_f * h_f

        r_b = jax.nn.sigmoid(gi(3, row_b) + gh_br)
        z_b = jax.nn.sigmoid(gi(4, row_b) + gh_bz)
        n_b = jnp.tanh(gi(5, row_b) + r_b * (gh_bn + bhn_b))
        c_b = (1.0 - z_b) * n_b + z_b * h_b

        # pack_padded / pad_packed semantics: invalid steps keep the previous
        # hidden and emit exact zeros (vsel, no mask multiplies/broadcasts).
        valid_f = lens > t                                 # [B, 1] bool
        valid_b = lens > tb

        out_ref[pl.ds(row_f, B), 0:H] = jnp.where(valid_f, c_f, 0.0)
        out_ref[pl.ds(row_b, B), H:2 * H] = jnp.where(valid_b, c_b, 0.0)

        return (jnp.where(valid_f, c_f, h_f),
                jnp.where(valid_b, c_b, h_b))

    h0 = jnp.zeros((B, H), jnp.float32)
    h_f, h_b = lax.fori_loop(0, T, step, (h0, h0), unroll=min(T, 8))

    hn_ref[0:B, :] = h_f
    hn_ref[B:2 * B, :] = h_b


def bigru_layer(x2d, lens_col, wih, whh, bgi, bhn, *, batch, hidden):
    """One fused bidirectional GRU layer.

    x2d [T*B, Din] f32, lens_col [B, 1] int32.
    Returns (out [T*B, 2H] with fwd|bwd column halves, hn [2*B, H])."""
    TB = x2d.shape[0]
    H = hidden
    out2d, hn2d = pl.pallas_call(
        bigru_fused_kernel,
        out_shape=(
            jax.ShapeDtypeStruct((TB, 2 * H), jnp.float32),
            jax.ShapeDtypeStruct((2 * batch, H), jnp.float32),
        ),
        scratch_shapes=[pltpu.VMEM((6 * TB, H), jnp.float32)],
    )(lens_col, x2d, wih, whh, bgi, bhn)
    return out2d, hn2d


# ----------------------------------------------------------------------------
# Encoder_RNN forward (embedding / padding glue in JAX, recurrence in Pallas)
# ----------------------------------------------------------------------------
def encoder_rnn_forward(params, input_seq, input_lengths, num_layer, hidden_size):
    """input_seq: [T, B] int32, input_lengths: [B] int32 (descending).
    Returns (output [T, B, H], hidden [2*num_layer, B, H]) like the PyTorch module."""
    T, B = input_seq.shape
    H = hidden_size
    Bp = max(8, -(-B // 8) * 8)          # pad batch to a full sublane group
    pad = Bp - B

    # Embedding lookup (gather) kept as glue.
    embedded = jnp.take(params["embedding"], input_seq, axis=0)   # [T, B, E]
    if pad:
        embedded = jnp.pad(embedded, ((0, 0), (0, pad), (0, 0)))

    # Per-row lengths (padded rows get length 0 -> always masked inside kernel).
    lens = jnp.zeros((Bp,), jnp.int32).at[:B].set(input_lengths.astype(jnp.int32))
    lens_col = lens[:, None]                                      # [Bp, 1]

    layer_in = embedded.reshape(T * Bp, embedded.shape[-1])       # [T*Bp, E]

    hiddens = []
    out2d = None
    for l in range(num_layer):
        p = params["gru"][l]
        out2d, hn2d = bigru_layer(layer_in, lens_col, p["wih"], p["whh"],
                                  p["bgi"], p["bhn"], batch=Bp, hidden=H)
        hiddens.append(hn2d[:B])              # forward final hidden, this layer
        hiddens.append(hn2d[Bp:Bp + B])       # backward final hidden, this layer
        layer_in = out2d                      # [T*Bp, 2H], already concatenated

    hidden = jnp.stack(hiddens, axis=0)                            # [2L, B, H]
    output = (out2d[:, :H] + out2d[:, H:]).reshape(T, Bp, H)[:, :B]
    return output, hidden


# ----------------------------------------------------------------------------
# Pure-JAX reference (lax.scan) for correctness checking
# ----------------------------------------------------------------------------
def _gru_dir_ref(x, mask, wih3, whh3, bgi3, bhn1, reverse):
    H = whh3.shape[-1]
    hp = lax.Precision.HIGHEST

    def step(h, inp):
        xt, mt = inp
        r = jax.nn.sigmoid(jnp.dot(xt, wih3[0], precision=hp) + bgi3[0]
                           + jnp.dot(h, whh3[0], precision=hp))
        z = jax.nn.sigmoid(jnp.dot(xt, wih3[1], precision=hp) + bgi3[1]
                           + jnp.dot(h, whh3[1], precision=hp))
        n = jnp.tanh(jnp.dot(xt, wih3[2], precision=hp) + bgi3[2]
                     + r * (jnp.dot(h, whh3[2], precision=hp) + bhn1))
        h_new = (1.0 - z) * n + z * h
        m = mt[:, None]
        return m * h_new + (1.0 - m) * h, m * h_new

    h0 = jnp.zeros((x.shape[1], H), jnp.float32)
    xs = (jnp.flip(x, 0), jnp.flip(mask, 0)) if reverse else (x, mask)
    hT, outs = lax.scan(step, h0, xs)
    if reverse:
        outs = jnp.flip(outs, 0)
    return outs, hT


def encoder_rnn_reference(params, input_seq, input_lengths, num_layer, hidden_size):
    T, B = input_seq.shape
    H = hidden_size
    emb = jnp.take(params["embedding"], input_seq, axis=0)
    t_idx = jnp.arange(T, dtype=jnp.int32)[:, None]
    mask = (t_idx < input_lengths[None, :]).astype(jnp.float32)
    layer_in = emb
    hiddens = []
    of = ob = None
    for l in range(num_layer):
        p = params["gru"][l]
        d_in = layer_in.shape[-1]
        wih = p["wih"].reshape(6, d_in, H)
        whh = p["whh"].reshape(6, H, H)
        bgi = p["bgi"]
        bhn = p["bhn"]
        of, hf = _gru_dir_ref(layer_in, mask, wih[0:3], whh[0:3], bgi[0:3], bhn[0], False)
        ob, hb = _gru_dir_ref(layer_in, mask, wih[3:6], whh[3:6], bgi[3:6], bhn[1], True)
        layer_in = jnp.concatenate([of, ob], axis=-1)
        hiddens += [hf, hb]
    return of + ob, jnp.stack(hiddens, 0)


# ----------------------------------------------------------------------------
# Deterministic parameter construction (shapes from nn.Embedding / nn.GRU)
# Gate/direction-major storage: index j = dir*3 + gate, gates (r, z, n).
# ----------------------------------------------------------------------------
def init_params(key, len_vocab, dim_embedding, hidden_size, num_layer):
    H = hidden_size
    keys = jax.random.split(key, 1 + num_layer * 4)
    scale = 1.0 / jnp.sqrt(jnp.float32(H))

    def u(k, shape):
        return jax.random.uniform(k, shape, jnp.float32, -scale, scale)

    params = {"embedding": jax.random.normal(keys[0], (len_vocab, dim_embedding),
                                             jnp.float32) * 0.1,
              "gru": []}
    ki = 1
    for l in range(num_layer):
        d_in = dim_embedding if l == 0 else 2 * H
        wih = u(keys[ki + 0], (6, d_in, H))
        whh = u(keys[ki + 1], (6, H, H))
        bih = u(keys[ki + 2], (6, H))
        bhh = u(keys[ki + 3], (6, H))
        # Fused biases: r/z gates take b_ih + b_hh; n gate keeps only b_ih,
        # b_hh_n is applied inside the r-gated term (PyTorch GRU definition).
        fuse = jnp.array([1, 1, 0, 1, 1, 0], jnp.float32)[:, None]
        bgi = bih + fuse * bhh
        bhn = jnp.stack([bhh[2], bhh[5]], axis=0)         # [2, H]
        params["gru"].append({
            "wih": wih.reshape(6 * d_in, H),
            "whh": whh.reshape(6 * H, H),
            "bgi": bgi,
            "bhn": bhn,
        })
        ki += 4
    return params


if __name__ == "__main__":
    # Small config consistent with the module's forward.
    T = 8            # max_seq_len
    B = 4            # batch_size
    E = 32           # dim_embedding
    H = 32           # hidden_size
    L = 2            # num_layer
    VOCAB = 50

    key = jax.random.PRNGKey(0)
    k_param, k_seq = jax.random.split(key)

    params = init_params(k_param, VOCAB, E, H, L)

    # input_seq: [T, B] token ids; input_lengths descending (pack_padded req.)
    input_seq = jax.random.randint(k_seq, (T, B), 0, VOCAB, dtype=jnp.int32)
    input_lengths = jnp.array([8, 6, 5, 3], dtype=jnp.int32)
    t_idx = jnp.arange(T, dtype=jnp.int32)[:, None]
    input_seq = jnp.where(t_idx < input_lengths[None, :], input_seq, 0)

    fwd = jax.jit(functools.partial(encoder_rnn_forward,
                                    num_layer=L, hidden_size=H))
    output, hidden = fwd(params, input_seq, input_lengths)
    output = jax.block_until_ready(output)
    hidden = jax.block_until_ready(hidden)

    assert output.shape == (T, B, H), output.shape
    assert hidden.shape == (2 * L, B, H), hidden.shape
    assert bool(jnp.all(jnp.isfinite(output))) and bool(jnp.all(jnp.isfinite(hidden)))

    # padded positions of the summed output must be exactly zero (pad_packed)
    assert bool(jnp.all(jnp.where(t_idx[:, :, None] < input_lengths[None, :, None],
                                  True, output == 0.0)))

    # Compare against the pure-JAX lax.scan reference.
    ref_out, ref_hid = encoder_rnn_reference(params, input_seq, input_lengths, L, H)
    assert bool(jnp.allclose(output, ref_out, atol=1e-3, rtol=1e-3)), \
        float(jnp.max(jnp.abs(output - ref_out)))
    assert bool(jnp.allclose(hidden, ref_hid, atol=1e-3, rtol=1e-3)), \
        float(jnp.max(jnp.abs(hidden - ref_hid)))

    print("KERNEL_OK")
</pallas_src>

<mosaic_0001>
module attributes {stable_mosaic.version = 11 : i64} {
  func.func @bigru_fused_kernel(%arg0: memref<8x1xi32, #tpu.memory_space<vmem>>, %arg1: memref<64x32xf32, #tpu.memory_space<vmem>>, %arg2: memref<192x32xf32, #tpu.memory_space<vmem>>, %arg3: memref<192x32xf32, #tpu.memory_space<vmem>>, %arg4: memref<6x32xf32, #tpu.memory_space<vmem>>, %arg5: memref<2x32xf32, #tpu.memory_space<vmem>>, %arg6: memref<64x64xf32, #tpu.memory_space<vmem>>, %arg7: memref<16x32xf32, #tpu.memory_space<vmem>>, %arg8: memref<384x32xf32, #tpu.memory_space<vmem>>) attributes {dimension_semantics = [], scalar_prefetch = 0 : i64, scratch_operands = 1 : i64, tpu.core_type = #tpu.core_type<tc>} {
    %c0 = arith.constant 0 : index
    %c0_0 = arith.constant 0 : index
    %0 = vector.load %arg1[%c0, %c0_0] : memref<64x32xf32, #tpu.memory_space<vmem>>, vector<64x32xf32>
    %c0_1 = arith.constant 0 : index
    %c0_2 = arith.constant 0 : index
    %1 = vector.load %arg2[%c0_1, %c0_2] : memref<192x32xf32, #tpu.memory_space<vmem>>, vector<32x32xf32>
    %cst = arith.constant dense<0.000000e+00> : vector<64x32xf32>
    %2 = tpu.matmul %0, %1, %cst {dimension_numbers = #tpu.dot_dimension_numbers<[1], [0], [0], [1], [0, 0, 1, 1], [], []>} : vector<64x32xf32>, vector<32x32xf32>, vector<64x32xf32> -> vector<64x32xf32>
    %c0_3 = arith.constant 0 : index
    %c0_4 = arith.constant 0 : index
    %3 = vector.load %arg4[%c0_3, %c0_4] : memref<6x32xf32, #tpu.memory_space<vmem>>, vector<1x32xf32>
    %4 = vector.broadcast %3 : vector<1x32xf32> to vector<64x32xf32>
    %5 = arith.addf %2, %4 : vector<64x32xf32>
    %c0_5 = arith.constant 0 : index
    %c0_6 = arith.constant 0 : index
    %6 = vector.load %arg8[%c0_5, %c0_6] : memref<384x32xf32, #tpu.memory_space<vmem>>, vector<64x32xf32>
    tpu.vector_store %arg8[%c0_5, %c0_6], %5 {strides = array<i32>} : memref<384x32xf32, #tpu.memory_space<vmem>>, vector<64x32xf32>,
    %c32 = arith.constant 32 : index
    %c0_7 = arith.constant 0 : index
    %7 = vector.load %arg2[%c32, %c0_7] : memref<192x32xf32, #tpu.memory_space<vmem>>, vector<32x32xf32>
    %cst_8 = arith.constant dense<0.000000e+00> : vector<64x32xf32>
    %8 = tpu.matmul %0, %7, %cst_8 {dimension_numbers = #tpu.dot_dimension_numbers<[1], [0], [0], [1], [0, 0, 1, 1], [], []>} : vector<64x32xf32>, vector<32x32xf32>, vector<64x32xf32> -> vector<64x32xf32>
    %c1 = arith.constant 1 : index
    %c0_9 = arith.constant 0 : index
    %9 = vector.load %arg4[%c1, %c0_9] : memref<6x32xf32, #tpu.memory_space<vmem>>, vector<1x32xf32>
    %10 = vector.broadcast %9 : vector<1x32xf32> to vector<64x32xf32>
    %11 = arith.addf %8, %10 : vector<64x32xf32>
    %c64 = arith.constant 64 : index
    %c0_10 = arith.constant 0 : index
    %12 = vector.load %arg8[%c64, %c0_10] : memref<384x32xf32, #tpu.memory_space<vmem>>, vector<64x32xf32>
    tpu.vector_store %arg8[%c64, %c0_10], %11 {strides = array<i32>} : memref<384x32xf32, #tpu.memory_space<vmem>>, vector<64x32xf32>,
    %c64_11 = arith.constant 64 : index
    %c0_12 = arith.constant 0 : index
    %13 = vector.load %arg2[%c64_11, %c0_12] : memref<192x32xf32, #tpu.memory_space<vmem>>, vector<32x32xf32>
    %cst_13 = arith.constant dense<0.000000e+00> : vector<64x32xf32>
    %14 = tpu.matmul %0, %13, %cst_13 {dimension_numbers = #tpu.dot_dimension_numbers<[1], [0], [0], [1], [0, 0, 1, 1], [], []>} : vector<64x32xf32>, vector<32x32xf32>, vector<64x32xf32> -> vector<64x32xf32>
    %c2 = arith.constant 2 : index
    %c0_14 = arith.constant 0 : index
    %15 = vector.load %arg4[%c2, %c0_14] : memref<6x32xf32, #tpu.memory_space<vmem>>, vector<1x32xf32>
    %16 = vector.broadcast %15 : vector<1x32xf32> to vector<64x32xf32>
    %17 = arith.addf %14, %16 : vector<64x32xf32>
    %c128 = arith.constant 128 : index
    %c0_15 = arith.constant 0 : index
    %18 = vector.load %arg8[%c128, %c0_15] : memref<384x32xf32, #tpu.memory_space<vmem>>, vector<64x32xf32>
    tpu.vector_store %arg8[%c128, %c0_15], %17 {strides = array<i32>} : memref<384x32xf32, #tpu.memory_space<vmem>>, vector<64x32xf32>,
    %c96 = arith.constant 96 : index
    %c0_16 = arith.constant 0 : index
    %19 = vector.load %arg2[%c96, %c0_16] : memref<192x32xf32, #tpu.memory_space<vmem>>, vector<32x32xf32>
    %cst_17 = arith.constant dense<0.000000e+00> : vector<64x32xf32>
    %20 = tpu.matmul %0, %19, %cst_17 {dimension_numbers = #tpu.dot_dimension_numbers<[1], [0], [0], [1], [0, 0, 1, 1], [], []>} : vector<64x32xf32>, vector<32x32xf32>, vector<64x32xf32> -> vector<64x32xf32>
    %c3 = arith.constant 3 : index
    %c0_18 = arith.constant 0 : index
    %21 = vector.load %arg4[%c3, %c0_18] : memref<6x32xf32, #tpu.memory_space<vmem>>, vector<1x32xf32>
    %22 = vector.broadcast %21 : vector<1x32xf32> to vector<64x32xf32>
    %23 = arith.addf %20, %22 : vector<64x32xf32>
    %c192 = arith.constant 192 : index
    %c0_19 = arith.constant 0 : index
    %24 = vector.load %arg8[%c192, %c0_19] : memref<384x32xf32, #tpu.memory_space<vmem>>, vector<64x32xf32>
    tpu.vector_store %arg8[%c192, %c0_19], %23 {strides = array<i32>} : memref<384x32xf32, #tpu.memory_space<vmem>>, vector<64x32xf32>,
    %c128_20 = arith.constant 128 : index
    %c0_21 = arith.constant 0 : index
    %25 = vector.load %arg2[%c128_20, %c0_21] : memref<192x32xf32, #tpu.memory_space<vmem>>, vector<32x32xf32>
    %cst_22 = arith.constant dense<0.000000e+00> : vector<64x32xf32>
    %26 = tpu.matmul %0, %25, %cst_22 {dimension_numbers = #tpu.dot_dimension_numbers<[1], [0], [0], [1], [0, 0, 1, 1], [], []>} : vector<64x32xf32>, vector<32x32xf32>, vector<64x32xf32> -> vector<64x32xf32>
    %c4 = arith.constant 4 : index
    %c0_23 = arith.constant 0 : index
    %27 = vector.load %arg4[%c4, %c0_23] : memref<6x32xf32, #tpu.memory_space<vmem>>, vector<1x32xf32>
    %28 = vector.broadcast %27 : vector<1x32xf32> to vector<64x32xf32>
    %29 = arith.addf %26, %28 : vector<64x32xf32>
    %c256 = arith.constant 256 : index
    %c0_24 = arith.constant 0 : index
    %30 = vector.load %arg8[%c256, %c0_24] : memref<384x32xf32, #tpu.memory_space<vmem>>, vector<64x32xf32>
    tpu.vector_store %arg8[%c256, %c0_24], %29 {strides = array<i32>} : memref<384x32xf32, #tpu.memory_space<vmem>>, vector<64x32xf32>,
    %c160 = arith.constant 160 : index
    %c0_25 = arith.constant 0 : index
    %31 = vector.load %arg2[%c160, %c0_25] : memref<192x32xf32, #tpu.memory_space<vmem>>, vector<32x32xf32>
    %cst_26 = arith.constant dense<0.000000e+00> : vector<64x32xf32>
    %32 = tpu.matmul %0, %31, %cst_26 {dimension_numbers = #tpu.dot_dimension_numbers<[1], [0], [0], [1], [0, 0, 1, 1], [], []>} : vector<64x32xf32>, vector<32x32xf32>, vector<64x32xf32> -> vector<64x32xf32>
    %c5 = arith.constant 5 : index
    %c0_27 = arith.constant 0 : index
    %33 = vector.load %arg4[%c5, %c0_27] : memref<6x32xf32, #tpu.memory_space<vmem>>, vector<1x32xf32>
    %34 = vector.broadcast %33 : vector<1x32xf32> to vector<64x32xf32>
    %35 = arith.addf %32, %34 : vector<64x32xf32>
    %c320 = arith.constant 320 : index
    %c0_28 = arith.constant 0 : index
    %36 = vector.load %arg8[%c320, %c0_28] : memref<384x32xf32, #tpu.memory_space<vmem>>, vector<64x32xf32>
    tpu.vector_store %arg8[%c320, %c0_28], %35 {strides = array<i32>} : memref<384x32xf32, #tpu.memory_space<vmem>>, vector<64x32xf32>,
    %c0_29 = arith.constant 0 : index
    %c0_30 = arith.constant 0 : index
    %37 = vector.load %arg3[%c0_29, %c0_30] : memref<192x32xf32, #tpu.memory_space<vmem>>, vector<32x32xf32>
    %c32_31 = arith.constant 32 : index
    %c0_32 = arith.constant 0 : index
    %38 = vector.load %arg3[%c32_31, %c0_32] : memref<192x32xf32, #tpu.memory_space<vmem>>, vector<32x32xf32>
    %c64_33 = arith.constant 64 : index
    %c0_34 = arith.constant 0 : index
    %39 = vector.load %arg3[%c64_33, %c0_34] : memref<192x32xf32, #tpu.memory_space<vmem>>, vector<32x32xf32>
    %c96_35 = arith.constant 96 : index
    %c0_36 = arith.constant 0 : index
    %40 = vector.load %arg3[%c96_35, %c0_36] : memref<192x32xf32, #tpu.memory_space<vmem>>, vector<32x32xf32>
    %c128_37 = arith.constant 128 : index
    %c0_38 = arith.constant 0 : index
    %41 = vector.load %arg3[%c128_37, %c0_38] : memref<192x32xf32, #tpu.memory_space<vmem>>, vector<32x32xf32>
    %c160_39 = arith.constant 160 : index
    %c0_40 = arith.constant 0 : index
    %42 = vector.load %arg3[%c160_39, %c0_40] : memref<192x32xf32, #tpu.memory_space<vmem>>, vector<32x32xf32>
    %c0_41 = arith.constant 0 : index
    %c0_42 = arith.constant 0 : index
    %43 = vector.load %arg5[%c0_41, %c0_42] : memref<2x32xf32, #tpu.memory_space<vmem>>, vector<1x32xf32>
    %44 = vector.shape_cast %43 : vector<1x32xf32> to vector<1x32xf32>
    %45 = vector.broadcast %44 : vector<1x32xf32> to vector<8x32xf32>
    %c1_43 = arith.constant 1 : index
    %c0_44 = arith.constant 0 : index
    %46 = vector.load %arg5[%c1_43, %c0_44] : memref<2x32xf32, #tpu.memory_space<vmem>>, vector<1x32xf32>
    %47 = vector.shape_cast %46 : vector<1x32xf32> to vector<1x32xf32>
    %48 = vector.broadcast %47 : vector<1x32xf32> to vector<8x32xf32>
    %c0_45 = arith.constant 0 : index
    %c0_46 = arith.constant 0 : index
    %49 = vector.load %arg0[%c0_45, %c0_46] : memref<8x1xi32, #tpu.memory_space<vmem>>, vector<8x1xi32>
    %cst_47 = arith.constant 0.000000e+00 : f32
    %50 = vector.broadcast %cst_47 : f32 to vector<8x32xf32>
    %c0_i32 = arith.constant 0 : i32
    %c7_i32 = arith.constant 7 : i32
    %51 = arith.subi %c7_i32, %c0_i32 : i32
    %c8_i32 = arith.constant 8 : i32
    %52 = arith.muli %c0_i32, %c8_i32 : i32
    %53 = tpu.assume_multiple %52, 8 : i32
    %c8_i32_48 = arith.constant 8 : i32
    %54 = arith.muli %51, %c8_i32_48 : i32
    %55 = tpu.assume_multiple %54, 8 : i32
    %cst_49 = arith.constant dense<0.000000e+00> : vector<8x32xf32>
    %56 = tpu.matmul %50, %37, %cst_49 {dimension_numbers = #tpu.dot_dimension_numbers<[1], [0], [0], [1], [0, 0, 1, 1], [], []>} : vector<8x32xf32>, vector<32x32xf32>, vector<8x32xf32> -> vector<8x32xf32>
    %cst_50 = arith.constant dense<0.000000e+00> : vector<8x32xf32>
    %57 = tpu.matmul %50, %38, %cst_50 {dimension_numbers = #tpu.dot_dimension_numbers<[1], [0], [0], [1], [0, 0, 1, 1], [], []>} : vector<8x32xf32>, vector<32x32xf32>, vector<8x32xf32> -> vector<8x32xf32>
    %cst_51 = arith.constant dense<0.000000e+00> : vector<8x32xf32>
    %58 = tpu.matmul %50, %39, %cst_51 {dimension_numbers = #tpu.dot_dimension_numbers<[1], [0], [0], [1], [0, 0, 1, 1], [], []>} : vector<8x32xf32>, vector<32x32xf32>, vector<8x32xf32> -> vector<8x32xf32>
    %cst_52 = arith.constant dense<0.000000e+00> : vector<8x32xf32>
    %59 = tpu.matmul %50, %40, %cst_52 {dimension_numbers = #tpu.dot_dimension_numbers<[1], [0], [0], [1], [0, 0, 1, 1], [], []>} : vector<8x32xf32>, vector<32x32xf32>, vector<8x32xf32> -> vector<8x32xf32>
    %cst_53 = arith.constant dense<0.000000e+00> : vector<8x32xf32>
    %60 = tpu.matmul %50, %41, %cst_53 {dimension_numbers = #tpu.dot_dimension_numbers<[1], [0], [0], [1], [0, 0, 1, 1], [], []>} : vector<8x32xf32>, vector<32x32xf32>, vector<8x32xf32> -> vector<8x32xf32>
    %cst_54 = arith.constant dense<0.000000e+00> : vector<8x32xf32>
    %61 = tpu.matmul %50, %42, %cst_54 {dimension_numbers = #tpu.dot_dimension_numbers<[1], [0], [0], [1], [0, 0, 1, 1], [], []>} : vector<8x32xf32>, vector<32x32xf32>, vector<8x32xf32> -> vector<8x32xf32>
    %c0_i32_55 = arith.constant 0 : i32
    %62 = arith.addi %c0_i32_55, %53 : i32
    %63 = tpu.assume_multiple %62, 8 : i32
    %64 = arith.index_cast %63 : i32 to index
    %c0_56 = arith.constant 0 : index
    %65 = vector.load %arg8[%64, %c0_56] : memref<384x32xf32, #tpu.memory_space<vmem>>, vector<8x32xf32>
    %66 = arith.addf %65, %56 : vector<8x32xf32>
    %67 = arith.negf %66 : vector<8x32xf32>
    %68 = math.exp %67 : vector<8x32xf32>
    %cst_57 = arith.constant 1.000000e+00 : f32
    %69 = vector.broadcast %cst_57 : f32 to vector<8x32xf32>
    %70 = arith.addf %69, %68 : vector<8x32xf32>
    %71 = arith.divf %69, %70 : vector<8x32xf32>
    %c64_i32 = arith.constant 64 : i32
    %72 = arith.addi %c64_i32, %53 : i32
    %73 = tpu.assume_multiple %72, 8 : i32
    %74 = arith.index_cast %73 : i32 to index
    %c0_58 = arith.constant 0 : index
    %75 = vector.load %arg8[%74, %c0_58] : memref<384x32xf32, #tpu.memory_space<vmem>>, vector<8x32xf32>
    %76 = arith.addf %75, %57 : vector<8x32xf32>
    %77 = arith.negf %76 : vector<8x32xf32>
    %78 = math.exp %77 : vector<8x32xf32>
    %cst_59 = arith.constant 1.000000e+00 : f32
    %79 = vector.broadcast %cst_59 : f32 to vector<8x32xf32>
    %80 = arith.addf %79, %78 : vector<8x32xf32>
    %81 = arith.divf %79, %80 : vector<8x32xf32>
    %c128_i32 = arith.constant 128 : i32
    %82 = arith.addi %c128_i32, %53 : i32
    %83 = tpu.assume_multiple %82, 8 : i32
    %84 = arith.index_cast %83 : i32 to index
    %c0_60 = arith.constant 0 : index
    %85 = vector.load %arg8[%84, %c0_60] : memref<384x32xf32, #tpu.memory_space<vmem>>, vector<8x32xf32>
    %86 = arith.addf %58, %45 : vector<8x32xf32>
    %87 = arith.mulf %71, %86 : vector<8x32xf32>
    %88 = arith.addf %85, %87 : vector<8x32xf32>
    %89 = math.tanh %88 : vector<8x32xf32>
    %cst_61 = arith.constant 1.000000e+00 : f32
    %90 = vector.broadcast %cst_61 : f32 to vector<8x32xf32>
    %91 = arith.subf %90, %81 : vector<8x32xf32>
    %92 = arith.mulf %91, %89 : vector<8x32xf32>
    %93 = arith.mulf %81, %50 : vector<8x32xf32>
    %94 = arith.addf %92, %93 : vector<8x32xf32>
    %c192_i32 = arith.constant 192 : i32
    %95 = arith.addi %c192_i32, %55 : i32
    %96 = tpu.assume_multiple %95, 8 : i32
    %97 = arith.index_cast %96 : i32 to index
    %c0_62 = arith.constant 0 : index
    %98 = vector.load %arg8[%97, %c0_62] : memref<384x32xf32, #tpu.memory_space<vmem>>, vector<8x32xf32>
    %99 = arith.addf %98, %59 : vector<8x32xf32>
    %100 = arith.negf %99 : vector<8x32xf32>
    %101 = math.exp %100 : vector<8x32xf32>
    %cst_63 = arith.constant 1.000000e+00 : f32
    %102 = vector.broadcast %cst_63 : f32 to vector<8x32xf32>
    %103 = arith.addf %102, %101 : vector<8x32xf32>
    %104 = arith.divf %102, %103 : vector<8x32xf32>
    %c256_i32 = arith.constant 256 : i32
    %105 = arith.addi %c256_i32, %55 : i32
    %106 = tpu.assume_multiple %105, 8 : i32
    %107 = arith.index_cast %106 : i32 to index
    %c0_64 = arith.constant 0 : index
    %108 = vector.load %arg8[%107, %c0_64] : memref<384x32xf32, #tpu.memory_space<vmem>>, vector<8x32xf32>
    %109 = arith.addf %108, %60 : vector<8x32xf32>
    %110 = arith.negf %109 : vector<8x32xf32>
    %111 = math.exp %110 : vector<8x32xf32>
    %cst_65 = arith.constant 1.000000e+00 : f32
    %112 = vector.broadcast %cst_65 : f32 to vector<8x32xf32>
    %113 = arith.addf %112, %111 : vector<8x32xf32>
    %114 = arith.divf %112, %113 : vector<8x32xf32>
    %c320_i32 = arith.constant 320 : i32
    %115 = arith.addi %c320_i32, %55 : i32
    %116 = tpu.assume_multiple %115, 8 : i32
    %117 = arith.index_cast %116 : i32 to index
    %c0_66 = arith.constant 0 : index
    %118 = vector.load %arg8[%117, %c0_66] : memref<384x32xf32, #tpu.memory_space<vmem>>, vector<8x32xf32>
    %119 = arith.addf %61, %48 : vector<8x32xf32>
    %120 = arith.mulf %104, %119 : vector<8x32xf32>
    %121 = arith.addf %118, %120 : vector<8x32xf32>
    %122 = math.tanh %121 : vector<8x32xf32>
    %cst_67 = arith.constant 1.000000e+00 : f32
    %123 = vector.broadcast %cst_67 : f32 to vector<8x32xf32>
    %124 = arith.subf %123, %114 : vector<8x32xf32>
    %125 = arith.mulf %124, %122 : vector<8x32xf32>
    %126 = arith.mulf %114, %50 : vector<8x32xf32>
    %127 = arith.addf %125, %126 : vector<8x32xf32>
    %128 = vector.broadcast %c0_i32 : i32 to vector<8x1xi32>
    %129 = arith.cmpi sgt, %49, %128 : vector<8x1xi32>
    %130 = vector.broadcast %51 : i32 to vector<8x1xi32>
    %131 = arith.cmpi sgt, %49, %130 : vector<8x1xi32>
    %cst_68 = arith.constant 0.000000e+00 : f32
    %132 = vector.shape_cast %129 : vector<8x1xi1> to vector<8x1xi1>
    %133 = vector.broadcast %132 : vector<8x1xi1> to vector<8x32xi1>
    %134 = vector.broadcast %cst_68 : f32 to vector<8x32xf32>
    %135 = arith.select %133, %94, %134 : vector<8x32xi1>, vector<8x32xf32>
    %136 = arith.index_cast %53 : i32 to index
    %c0_69 = arith.constant 0 : index
    %137 = vector.load %arg6[%136, %c0_69] : memref<64x64xf32, #tpu.memory_space<vmem>>, vector<8x32xf32>
    tpu.vector_store %arg6[%136, %c0_69], %135 {strides = array<i32>} : memref<64x64xf32, #tpu.memory_space<vmem>>, vector<8x32xf32>,
    %cst_70 = arith.constant 0.000000e+00 : f32
    %138 = vector.shape_cast %131 : vector<8x1xi1> to vector<8x1xi1>
    %139 = vector.broadcast %138 : vector<8x1xi1> to vector<8x32xi1>
    %140 = vector.broadcast %cst_70 : f32 to vector<8x32xf32>
    %141 = arith.select %139, %127, %140 : vector<8x32xi1>, vector<8x32xf32>
    %142 = arith.index_cast %55 : i32 to index
    %c32_71 = arith.constant 32 : index
    %143 = vector.load %arg6[%142, %c32_71] : memref<64x64xf32, #tpu.memory_space<vmem>>, vector<8x32xf32>
    tpu.vector_store %arg6[%142, %c32_71], %141 {strides = array<i32>} : memref<64x64xf32, #tpu.memory_space<vmem>>, vector<8x32xf32>,
    %144 = vector.shape_cast %129 : vector<8x1xi1> to vector<8x1xi1>
    %145 = vector.broadcast %144 : vector<8x1xi1> to vector<8x32xi1>
    %146 = arith.select %145, %94, %50 : vector<8x32xi1>, vector<8x32xf32>
    %147 = vector.shape_cast %131 : vector<8x1xi1> to vector<8x1xi1>
    %148 = vector.broadcast %147 : vector<8x1xi1> to vector<8x32xi1>
    %149 = arith.select %148, %127, %50 : vector<8x32xi1>, vector<8x32xf32>
    %c1_i32 = arith.constant 1 : i32
    %c7_i32_72 = arith.constant 7 : i32
    %150 = arith.subi %c7_i32_72, %c1_i32 : i32
    %c8_i32_73 = arith.constant 8 : i32
    %151 = arith.muli %c1_i32, %c8_i32_73 : i32
    %152 = tpu.assume_multiple %151, 8 : i32
    %c8_i32_74 = arith.constant 8 : i32
    %153 = arith.muli %150, %c8_i32_74 : i32
    %154 = tpu.assume_multiple %153, 8 : i32
    %cst_75 = arith.constant dense<0.000000e+00> : vector<8x32xf32>
    %155 = tpu.matmul %146, %37, %cst_75 {dimension_numbers = #tpu.dot_dimension_numbers<[1], [0], [0], [1], [0, 0, 1, 1], [], []>} : vector<8x32xf32>, vector<32x32xf32>, vector<8x32xf32> -> vector<8x32xf32>
    %cst_76 = arith.constant dense<0.000000e+00> : vector<8x32xf32>
    %156 = tpu.matmul %146, %38, %cst_76 {dimension_numbers = #tpu.dot_dimension_numbers<[1], [0], [0], [1], [0, 0, 1, 1], [], []>} : vector<8x32xf32>, vector<32x32xf32>, vector<8x32xf32> -> vector<8x32xf32>
    %cst_77 = arith.constant dense<0.000000e+00> : vector<8x32xf32>
    %157 = tpu.matmul %146, %39, %cst_77 {dimension_numbers = #tpu.dot_dimension_numbers<[1], [0], [0], [1], [0, 0, 1, 1], [], []>} : vector<8x32xf32>, vector<32x32xf32>, vector<8x32xf32> -> vector<8x32xf32>
    %cst_78 = arith.constant dense<0.000000e+00> : vector<8x32xf32>
    %158 = tpu.matmul %149, %40, %cst_78 {dimension_numbers = #tpu.dot_dimension_numbers<[1], [0], [0], [1], [0, 0, 1, 1], [], []>} : vector<8x32xf32>, vector<32x32xf32>, vector<8x32xf32> -> vector<8x32xf32>
    %cst_79 = arith.constant dense<0.000000e+00> : vector<8x32xf32>
    %159 = tpu.matmul %149, %41, %cst_79 {dimension_numbers = #tpu.dot_dimension_numbers<[1], [0], [0], [1], [0, 0, 1, 1], [], []>} : vector<8x32xf32>, vector<32x32xf32>, vector<8x32xf32> -> vector<8x32xf32>
    %cst_80 = arith.constant dense<0.000000e+00> : vector<8x32xf32>
    %160 = tpu.matmul %149, %42, %cst_80 {dimension_numbers = #tpu.dot_dimension_numbers<[1], [0], [0], [1], [0, 0, 1, 1], [], []>} : vector<8x32xf32>, vector<32x32xf32>, vector<8x32xf32> -> vector<8x32xf32>
    %c0_i32_81 = arith.constant 0 : i32
    %161 = arith.addi %c0_i32_81, %152 : i32
    %162 = tpu.assume_multiple %161, 8 : i32
    %163 = arith.index_cast %162 : i32 to index
    %c0_82 = arith.constant 0 : index
    %164 = vector.load %arg8[%163, %c0_82] : memref<384x32xf32, #tpu.memory_space<vmem>>, vector<8x32xf32>
    %165 = arith.addf %164, %155 : vector<8x32xf32>
    %166 = arith.negf %165 : vector<8x32xf32>
    %167 = math.exp %166 : vector<8x32xf32>
    %cst_83 = arith.constant 1.000000e+00 : f32
    %168 = vector.broadcast %cst_83 : f32 to vector<8x32xf32>
    %169 = arith.addf %168, %167 : vector<8x32xf32>
    %170 = arith.divf %168, %169 : vector<8x32xf32>
    %c64_i32_84 = arith.constant 64 : i32
    %171 = arith.addi %c64_i32_84, %152 : i32
    %172 = tpu.assume_multiple %171, 8 : i32
    %173 = arith.index_cast %172 : i32 to index
    %c0_85 = arith.constant 0 : index
    %174 = vector.load %arg8[%173, %c0_85] : memref<384x32xf32, #tpu.memory_space<vmem>>, vector<8x32xf32>
    %175 = arith.addf %174, %156 : vector<8x32xf32>
    %176 = arith.negf %175 : vector<8x32xf32>
    %177 = math.exp %176 : vector<8x32xf32>
    %cst_86 = arith.constant 1.000000e+00 : f32
    %178 = vector.broadcast %cst_86 : f32 to vector<8x32xf32>
    %179 = arith.addf %178, %177 : vector<8x32xf32>
    %180 = arith.divf %178, %179 : vector<8x32xf32>
    %c128_i32_87 = arith.constant 128 : i32
    %181 = arith.addi %c128_i32_87, %152 : i32
    %182 = tpu.assume_multiple %181, 8 : i32
    %183 = arith.index_cast %182 : i32 to index
    %c0_88 = arith.constant 0 : index
    %184 = vector.load %arg8[%183, %c0_88] : memref<384x32xf32, #tpu.memory_space<vmem>>, vector<8x32xf32>
    %185 = arith.addf %157, %45 : vector<8x32xf32>
    %186 = arith.mulf %170, %185 : vector<8x32xf32>
    %187 = arith.addf %184, %186 : vector<8x32xf32>
    %188 = math.tanh %187 : vector<8x32xf32>
    %cst_89 = arith.constant 1.000000e+00 : f32
    %189 = vector.broadcast %cst_89 : f32 to vector<8x32xf32>
    %190 = arith.subf %189, %180 : vector<8x32xf32>
    %191 = arith.mulf %190, %188 : vector<8x32xf32>
    %192 = arith.mulf %180, %146 : vector<8x32xf32>
    %193 = arith.addf %191, %192 : vector<8x32xf32>
    %c192_i32_90 = arith.constant 192 : i32
    %194 = arith.addi %c192_i32_90, %154 : i32
    %195 = tpu.assume_multiple %194, 8 : i32
    %196 = arith.index_cast %195 : i32 to index
    %c0_91 = arith.constant 0 : index
    %197 = vector.load %arg8[%196, %c0_91] : memref<384x32xf32, #tpu.memory_space<vmem>>, vector<8x32xf32>
    %198 = arith.addf %197, %158 : vector<8x32xf32>
    %199 = arith.negf %198 : vector<8x32xf32>
    %200 = math.exp %199 : vector<8x32xf32>
    %cst_92 = arith.constant 1.000000e+00 : f32
    %201 = vector.broadcast %cst_92 : f32 to vector<8x32xf32>
    %202 = arith.addf %201, %200 : vector<8x32xf32>
    %203 = arith.divf %201, %202 : vector<8x32xf32>
    %c256_i32_93 = arith.constant 256 : i32
    %204 = arith.addi %c256_i32_93, %154 : i32
    %205 = tpu.assume_multiple %204, 8 : i32
    %206 = arith.index_cast %205 : i32 to index
    %c0_94 = arith.constant 0 : index
    %207 = vector.load %arg8[%206, %c0_94] : memref<384x32xf32, #tpu.memory_space<vmem>>, vector<8x32xf32>
    %208 = arith.addf %207, %159 : vector<8x32xf32>
    %209 = arith.negf %208 : vector<8x32xf32>
    %210 = math.exp %209 : vector<8x32xf32>
    %cst_95 = arith.constant 1.000000e+00 : f32
    %211 = vector.broadcast %cst_95 : f32 to vector<8x32xf32>
    %212 = arith.addf %211, %210 : vector<8x32xf32>
    %213 = arith.divf %211, %212 : vector<8x32xf32>
    %c320_i32_96 = arith.constant 320 : i32
    %214 = arith.addi %c320_i32_96, %154 : i32
    %215 = tpu.assume_multiple %214, 8 : i32
    %216 = arith.index_cast %215 : i32 to index
    %c0_97 = arith.constant 0 : index
    %217 = vector.load %arg8[%216, %c0_97] : memref<384x32xf32, #tpu.memory_space<vmem>>, vector<8x32xf32>
    %218 = arith.addf %160, %48 : vector<8x32xf32>
    %219 = arith.mulf %203, %218 : vector<8x32xf32>
    %220 = arith.addf %217, %219 : vector<8x32xf32>
    %221 = math.tanh %220 : vector<8x32xf32>
    %cst_98 = arith.constant 1.000000e+00 : f32
    %222 = vector.broadcast %cst_98 : f32 to vector<8x32xf32>
    %223 = arith.subf %222, %213 : vector<8x32xf32>
    %224 = arith.mulf %223, %221 : vector<8x32xf32>
    %225 = arith.mulf %213, %149 : vector<8x32xf32>
    %226 = arith.addf %224, %225 : vector<8x32xf32>
    %227 = vector.broadcast %c1_i32 : i32 to vector<8x1xi32>
    %228 = arith.cmpi sgt, %49, %227 : vector<8x1xi32>
    %229 = vector.broadcast %150 : i32 to vector<8x1xi32>
    %230 = arith.cmpi sgt, %49, %229 : vector<8x1xi32>
    %cst_99 = arith.constant 0.000000e+00 : f32
    %231 = vector.shape_cast %228 : vector<8x1xi1> to vector<8x1xi1>
    %232 = vector.broadcast %231 : vector<8x1xi1> to vector<8x32xi1>
    %233 = vector.broadcast %cst_99 : f32 to vector<8x32xf32>
    %234 = arith.select %232, %193, %233 : vector<8x32xi1>, vector<8x32xf32>
    %235 = arith.index_cast %152 : i32 to index
    %c0_100 = arith.constant 0 : index
    %236 = vector.load %arg6[%235, %c0_100] : memref<64x64xf32, #tpu.memory_space<vmem>>, vector<8x32xf32>
    tpu.vector_store %arg6[%235, %c0_100], %234 {strides = array<i32>} : memref<64x64xf32, #tpu.memory_space<vmem>>, vector<8x32xf32>,
    %cst_101 = arith.constant 0.000000e+00 : f32
    %237 = vector.shape_cast %230 : vector<8x1xi1> to vector<8x1xi1>
    %238 = vector.broadcast %237 : vector<8x1xi1> to vector<8x32xi1>
    %239 = vector.broadcast %cst_101 : f32 to vector<8x32xf32>
    %240 = arith.select %238, %226, %239 : vector<8x32xi1>, vector<8x32xf32>
    %241 = arith.index_cast %154 : i32 to index
    %c32_102 = arith.constant 32 : index
    %242 = vector.load %arg6[%241, %c32_102] : memref<64x64xf32, #tpu.memory_space<vmem>>, vector<8x32xf32>
    tpu.vector_store %arg6[%241, %c32_102], %240 {strides = array<i32>} : memref<64x64xf32, #tpu.memory_space<vmem>>, vector<8x32xf32>,
    %243 = vector.shape_cast %228 : vector<8x1xi1> to vector<8x1xi1>
    %244 = vector.broadcast %243 : vector<8x1xi1> to vector<8x32xi1>
    %245 = arith.select %244, %193, %146 : vector<8x32xi1>, vector<8x32xf32>
    %246 = vector.shape_cast %230 : vector<8x1xi1> to vector<8x1xi1>
    %247 = vector.broadcast %246 : vector<8x1xi1> to vector<8x32xi1>
    %248 = arith.select %247, %226, %149 : vector<8x32xi1>, vector<8x32xf32>
    %c2_i32 = arith.constant 2 : i32
    %c7_i32_103 = arith.constant 7 : i32
    %249 = arith.subi %c7_i32_103, %c2_i32 : i32
    %c8_i32_104 = arith.constant 8 : i32
    %250 = arith.muli %c2_i32, %c8_i32_104 : i32
    %251 = tpu.assume_multiple %250, 8 : i32
    %c8_i32_105 = arith.constant 8 : i32
    %252 = arith.muli %249, %c8_i32_105 : i32
    %253 = tpu.assume_multiple %252, 8 : i32
    %cst_106 = arith.constant dense<0.000000e+00> : vector<8x32xf32>
    %254 = tpu.matmul %245, %37, %cst_106 {dimension_numbers = #tpu.dot_dimension_numbers<[1], [0], [0], [1], [0, 0, 1, 1], [], []>} : vector<8x32xf32>, vector<32x32xf32>, vector<8x32xf32> -> vector<8x32xf32>
    %cst_107 = arith.constant dense<0.000000e+00> : vector<8x32xf32>
    %255 = tpu.matmul %245, %38, %cst_107 {dimension_numbers = #tpu.dot_dimension_numbers<[1], [0], [0], [1], [0, 0, 1, 1], [], []>} : vector<8x32xf32>, vector<32x32xf32>, vector<8x32xf32> -> vector<8x32xf32>
    %cst_108 = arith.constant dense<0.000000e+00> : vector<8x32xf32>
    %256 = tpu.matmul %245, %39, %cst_108 {dimension_numbers = #tpu.dot_dimension_numbers<[1], [0], [0], [1], [0, 0, 1, 1], [], []>} : vector<8x32xf32>, vector<32x32xf32>, vector<8x32xf32> -> vector<8x32xf32>
    %cst_109 = arith.constant dense<0.000000e+00> : vector<8x32xf32>
    %257 = tpu.matmul %248, %40, %cst_109 {dimension_numbers = #tpu.dot_dimension_numbers<[1], [0], [0], [1], [0, 0, 1, 1], [], []>} : vector<8x32xf32>, vector<32x32xf32>, vector<8x32xf32> -> vector<8x32xf32>
    %cst_110 = arith.constant dense<0.000000e+00> : vector<8x32xf32>
    %258 = tpu.matmul %248, %41, %cst_110 {dimension_numbers = #tpu.dot_dimension_numbers<[1], [0], [0], [1], [0, 0, 1, 1], [], []>} : vector<8x32xf32>, vector<32x32xf32>, vector<8x32xf32> -> vector<8x32xf32>
    %cst_111 = arith.constant dense<0.000000e+00> : vector<8x32xf32>
    %259 = tpu.matmul %248, %42, %cst_111 {dimension_numbers = #tpu.dot_dimension_numbers<[1], [0], [0], [1], [0, 0, 1, 1], [], []>} : vector<8x32xf32>, vector<32x32xf32>, vector<8x32xf32> -> vector<8x32xf32>
    %c0_i32_112 = arith.constant 0 : i32
    %260 = arith.addi %c0_i32_112, %251 : i32
    %261 = tpu.assume_multiple %260, 8 : i32
    %262 = arith.index_cast %261 : i32 to index
    %c0_113 = arith.constant 0 : index
    %263 = vector.load %arg8[%262, %c0_113] : memref<384x32xf32, #tpu.memory_space<vmem>>, vector<8x32xf32>
    %264 = arith.addf %263, %254 : vector<8x32xf32>
    %265 = arith.negf %264 : vector<8x32xf32>
    %266 = math.exp %265 : vector<8x32xf32>
    %cst_114 = arith.constant 1.000000e+00 : f32
    %267 = vector.broadcast %cst_114 : f32 to vector<8x32xf32>
    %268 = arith.addf %267, %266 : vector<8x32xf32>
    %269 = arith.divf %267, %268 : vector<8x32xf32>
    %c64_i32_115 = arith.constant 64 : i32
    %270 = arith.addi %c64_i32_115, %251 : i32
    %271 = tpu.assume_multiple %270, 8 : i32
    %272 = arith.index_cast %271 : i32 to index
    %c0_116 = arith.constant 0 : index
    %273 = vector.load %arg8[%272, %c0_116] : memref<384x32xf32, #tpu.memory_space<vmem>>, vector<8x32xf32>
    %274 = arith.addf %273, %255 : vector<8x32xf32>
    %275 = arith.negf %274 : vector<8x32xf32>
    %276 = math.exp %275 : vector<8x32xf32>
    %cst_117 = arith.constant 1.000000e+00 : f32
    %277 = vector.broadcast %cst_117 : f32 to vector<8x32xf32>
    %278 = arith.addf %277, %276 : vector<8x32xf32>
    %279 = arith.divf %277, %278 : vector<8x32xf32>
    %c128_i32_118 = arith.constant 128 : i32
    %280 = arith.addi %c128_i32_118, %251 : i32
    %281 = tpu.assume_multiple %280, 8 : i32
    %282 = arith.index_cast %281 : i32 to index
    %c0_119 = arith.constant 0 : index
    %283 = vector.load %arg8[%282, %c0_119] : memref<384x32xf32, #tpu.memory_space<vmem>>, vector<8x32xf32>
    %284 = arith.addf %256, %45 : vector<8x32xf32>
    %285 = arith.mulf %269, %284 : vector<8x32xf32>
    %286 = arith.addf %283, %285 : vector<8x32xf32>
    %287 = math.tanh %286 : vector<8x32xf32>
    %cst_120 = arith.constant 1.000000e+00 : f32
    %288 = vector.broadcast %cst_120 : f32 to vector<8x32xf32>
    %289 = arith.subf %288, %279 : vector<8x32xf32>
    %290 = arith.mulf %289, %287 : vector<8x32xf32>
    %291 = arith.mulf %279, %245 : vector<8x32xf32>
    %292 = arith.addf %290, %291 : vector<8x32xf32>
    %c192_i32_121 = arith.constant 192 : i32
    %293 = arith.addi %c192_i32_121, %253 : i32
    %294 = tpu.assume_multiple %293, 8 : i32
    %295 = arith.index_cast %294 : i32 to index
    %c0_122 = arith.constant 0 : index
    %296 = vector.load %arg8[%295, %c0_122] : memref<384x32xf32, #tpu.memory_space<vmem>>, vector<8x32xf32>
    %297 = arith.addf %296, %257 : vector<8x32xf32>
    %298 = arith.negf %297 : vector<8x32xf32>
    %299 = math.exp %298 : vector<8x32xf32>
    %cst_123 = arith.constant 1.000000e+00 : f32
    %300 = vector.broadcast %cst_123 : f32 to vector<8x32xf32>
    %301 = arith.addf %300, %299 : vector<8x32xf32>
    %302 = arith.divf %300, %301 : vector<8x32xf32>
    %c256_i32_124 = arith.constant 256 : i32
    %303 = arith.addi %c256_i32_124, %253 : i32
    %304 = tpu.assume_multiple %303, 8 : i32
    %305 = arith.index_cast %304 : i32 to index
    %c0_125 = arith.constant 0 : index
    %306 = vector.load %arg8[%305, %c0_125] : memref<384x32xf32, #tpu.memory_space<vmem>>, vector<8x32xf32>
    %307 = arith.addf %306, %258 : vector<8x32xf32>
    %308 = arith.negf %307 : vector<8x32xf32>
    %309 = math.exp %308 : vector<8x32xf32>
    %cst_126 = arith.constant 1.000000e+00 : f32
    %310 = vector.broadcast %cst_126 : f32 to vector<8x32xf32>
    %311 = arith.addf %310, %309 : vector<8x32xf32>
    %312 = arith.divf %310, %311 : vector<8x32xf32>
    %c320_i32_127 = arith.constant 320 : i32
    %313 = arith.addi %c320_i32_127, %253 : i32
    %314 = tpu.assume_multiple %313, 8 : i32
    %315 = arith.index_cast %314 : i32 to index
    %c0_128 = arith.constant 0 : index
    %316 = vector.load %arg8[%315, %c0_128] : memref<384x32xf32, #tpu.memory_space<vmem>>, vector<8x32xf32>
    %317 = arith.addf %259, %48 : vector<8x32xf32>
    %318 = arith.mulf %302, %317 : vector<8x32xf32>
    %319 = arith.addf %316, %318 : vector<8x32xf32>
    %320 = math.tanh %319 : vector<8x32xf32>
    %cst_129 = arith.constant 1.000000e+00 : f32
    %321 = vector.broadcast %cst_129 : f32 to vector<8x32xf32>
    %322 = arith.subf %321, %312 : vector<8x32xf32>
    %323 = arith.mulf %322, %320 : vector<8x32xf32>
    %324 = arith.mulf %312, %248 : vector<8x32xf32>
    %325 = arith.addf %323, %324 : vector<8x32xf32>
    %326 = vector.broadcast %c2_i32 : i32 to vector<8x1xi32>
    %327 = arith.cmpi sgt, %49, %326 : vector<8x1xi32>
    %328 = vector.broadcast %249 : i32 to vector<8x1xi32>
    %329 = arith.cmpi sgt, %49, %328 : vector<8x1xi32>
    %cst_130 = arith.constant 0.000000e+00 : f32
    %330 = vector.shape_cast %327 : vector<8x1xi1> to vector<8x1xi1>
    %331 = vector.broadcast %330 : vector<8x1xi1> to vector<8x32xi1>
    %332 = vector.broadcast %cst_130 : f32 to vector<8x32xf32>
    %333 = arith.select %331, %292, %332 : vector<8x32xi1>, vector<8x32xf32>
    %334 = arith.index_cast %251 : i32 to index
    %c0_131 = arith.constant 0 : index
    %335 = vector.load %arg6[%334, %c0_131] : memref<64x64xf32, #tpu.memory_space<vmem>>, vector<8x32xf32>
    tpu.vector_store %arg6[%334, %c0_131], %333 {strides = array<i32>} : memref<64x64xf32, #tpu.memory_space<vmem>>, vector<8x32xf32>,
    %cst_132 = arith.constant 0.000000e+00 : f32
    %336 = vector.shape_cast %329 : vector<8x1xi1> to vector<8x1xi1>
    %337 = vector.broadcast %336 : vector<8x1xi1> to vector<8x32xi1>
    %338 = vector.broadcast %cst_132 : f32 to vector<8x32xf32>
    %339 = arith.select %337, %325, %338 : vector<8x32xi1>, vector<8x32xf32>
    %340 = arith.index_cast %253 : i32 to index
    %c32_133 = arith.constant 32 : index
    %341 = vector.load %arg6[%340, %c32_133] : memref<64x64xf32, #tpu.memory_space<vmem>>, vector<8x32xf32>
    tpu.vector_store %arg6[%340, %c32_133], %339 {strides = array<i32>} : memref<64x64xf32, #tpu.memory_space<vmem>>, vector<8x32xf32>,
    %342 = vector.shape_cast %327 : vector<8x1xi1> to vector<8x1xi1>
    %343 = vector.broadcast %342 : vector<8x1xi1> to vector<8x32xi1>
    %344 = arith.select %343, %292, %245 : vector<8x32xi1>, vector<8x32xf32>
    %345 = vector.shape_cast %329 : vector<8x1xi1> to vector<8x1xi1>
    %346 = vector.broadcast %345 : vector<8x1xi1> to vector<8x32xi1>
    %347 = arith.select %346, %325, %248 : vector<8x32xi1>, vector<8x32xf32>
    %c3_i32 = arith.constant 3 : i32
    %c7_i32_134 = arith.constant 7 : i32
    %348 = arith.subi %c7_i32_134, %c3_i32 : i32
    %c8_i32_135 = arith.constant 8 : i32
    %349 = arith.muli %c3_i32, %c8_i32_135 : i32
    %350 = tpu.assume_multiple %349, 8 : i32
    %c8_i32_136 = arith.constant 8 : i32
    %351 = arith.muli %348, %c8_i32_136 : i32
    %352 = tpu.assume_multiple %351, 8 : i32
    %cst_137 = arith.constant dense<0.000000e+00> : vector<8x32xf32>
    %353 = tpu.matmul %344, %37, %cst_137 {dimension_numbers = #tpu.dot_dimension_numbers<[1], [0], [0], [1], [0, 0, 1, 1], [], []>} : vector<8x32xf32>, vector<32x32xf32>, vector<8x32xf32> -> vector<8x32xf32>
    %cst_138 = arith.constant dense<0.000000e+00> : vector<8x32xf32>
    %354 = tpu.matmul %344, %38, %cst_138 {dimension_numbers = #tpu.dot_dimension_numbers<[1], [0], [0], [1], [0, 0, 1, 1], [], []>} : vector<8x32xf32>, vector<32x32xf32>, vector<8x32xf32> -> vector<8x32xf32>
    %cst_139 = arith.constant dense<0.000000e+00> : vector<8x32xf32>
    %355 = tpu.matmul %344, %39, %cst_139 {dimension_numbers = #tpu.dot_dimension_numbers<[1], [0], [0], [1], [0, 0, 1, 1], [], []>} : vector<8x32xf32>, vector<32x32xf32>, vector<8x32xf32> -> vector<8x32xf32>
    %cst_140 = arith.constant dense<0.000000e+00> : vector<8x32xf32>
    %356 = tpu.matmul %347, %40, %cst_140 {dimension_numbers = #tpu.dot_dimension_numbers<[1], [0], [0], [1], [0, 0, 1, 1], [], []>} : vector<8x32xf32>, vector<32x32xf32>, vector<8x32xf32> -> vector<8x32xf32>
    %cst_141 = arith.constant dense<0.000000e+00> : vector<8x32xf32>
    %357 = tpu.matmul %347, %41, %cst_141 {dimension_numbers = #tpu.dot_dimension_numbers<[1], [0], [0], [1], [0, 0, 1, 1], [], []>} : vector<8x32xf32>, vector<32x32xf32>, vector<8x32xf32> -> vector<8x32xf32>
    %cst_142 = arith.constant dense<0.000000e+00> : vector<8x32xf32>
    %358 = tpu.matmul %347, %42, %cst_142 {dimension_numbers = #tpu.dot_dimension_numbers<[1], [0], [0], [1], [0, 0, 1, 1], [], []>} : vector<8x32xf32>, vector<32x32xf32>, vector<8x32xf32> -> vector<8x32xf32>
    %c0_i32_143 = arith.constant 0 : i32
    %359 = arith.addi %c0_i32_143, %350 : i32
    %360 = tpu.assume_multiple %359, 8 : i32
    %361 = arith.index_cast %360 : i32 to index
    %c0_144 = arith.constant 0 : index
    %362 = vector.load %arg8[%361, %c0_144] : memref<384x32xf32, #tpu.memory_space<vmem>>, vector<8x32xf32>
    %363 = arith.addf %362, %353 : vector<8x32xf32>
    %364 = arith.negf %363 : vector<8x32xf32>
    %365 = math.exp %364 : vector<8x32xf32>
    %cst_145 = arith.constant 1.000000e+00 : f32
    %366 = vector.broadcast %cst_145 : f32 to vector<8x32xf32>
    %367 = arith.addf %366, %365 : vector<8x32xf32>
    %368 = arith.divf %366, %367 : vector<8x32xf32>
    %c64_i32_146 = arith.constant 64 : i32
    %369 = arith.addi %c64_i32_146, %350 : i32
    %370 = tpu.assume_multiple %369, 8 : i32
    %371 = arith.index_cast %370 : i32 to index
    %c0_147 = arith.constant 0 : index
    %372 = vector.load %arg8[%371, %c0_147] : memref<384x32xf32, #tpu.memory_space<vmem>>, vector<8x32xf32>
    %373 = arith.addf %372, %354 : vector<8x32xf32>
    %374 = arith.negf %373 : vector<8x32xf32>
    %375 = math.exp %374 : vector<8x32xf32>
    %cst_148 = arith.constant 1.000000e+00 : f32
    %376 = vector.broadcast %cst_148 : f32 to vector<8x32xf32>
    %377 = arith.addf %376, %375 : vector<8x32xf32>
    %378 = arith.divf %376, %377 : vector<8x32xf32>
    %c128_i32_149 = arith.constant 128 : i32
    %379 = arith.addi %c128_i32_149, %350 : i32
    %380 = tpu.assume_multiple %379, 8 : i32
    %381 = arith.index_cast %380 : i32 to index
    %c0_150 = arith.constant 0 : index
    %382 = vector.load %arg8[%381, %c0_150] : memref<384x32xf32, #tpu.memory_space<vmem>>, vector<8x32xf32>
    %383 = arith.addf %355, %45 : vector<8x32xf32>
    %384 = arith.mulf %368, %383 : vector<8x32xf32>
    %385 = arith.addf %382, %384 : vector<8x32xf32>
    %386 = math.tanh %385 : vector<8x32xf32>
    %cst_151 = arith.constant 1.000000e+00 : f32
    %387 = vector.broadcast %cst_151 : f32 to vector<8x32xf32>
    %388 = arith.subf %387, %378 : vector<8x32xf32>
    %389 = arith.mulf %388, %386 : vector<8x32xf32>
    %390 = arith.mulf %378, %344 : vector<8x32xf32>
    %391 = arith.addf %389, %390 : vector<8x32xf32>
    %c192_i32_152 = arith.constant 192 : i32
    %392 = arith.addi %c192_i32_152, %352 : i32
    %393 = tpu.assume_multiple %392, 8 : i32
    %394 = arith.index_cast %393 : i32 to index
    %c0_153 = arith.constant 0 : index
    %395 = vector.load %arg8[%394, %c0_153] : memref<384x32xf32, #tpu.memory_space<vmem>>, vector<8x32xf32>
    %396 = arith.addf %395, %356 : vector<8x32xf32>
    %397 = arith.negf %396 : vector<8x32xf32>
    %398 = math.exp %397 : vector<8x32xf32>
    %cst_154 = arith.constant 1.000000e+00 : f32
    %399 = vector.broadcast %cst_154 : f32 to vector<8x32xf32>
    %400 = arith.addf %399, %398 : vector<8x32xf32>
    %401 = arith.divf %399, %400 : vector<8x32xf32>
    %c256_i32_155 = arith.constant 256 : i32
    %402 = arith.addi %c256_i32_155, %352 : i32
    %403 = tpu.assume_multiple %402, 8 : i32
    %404 = arith.index_cast %403 : i32 to index
    %c0_156 = arith.constant 0 : index
    %405 = vector.load %arg8[%404, %c0_156] : memref<384x32xf32, #tpu.memory_space<vmem>>, vector<8x32xf32>
    %406 = arith.addf %405, %357 : vector<8x32xf32>
    %407 = arith.negf %406 : vector<8x32xf32>
    %408 = math.exp %407 : vector<8x32xf32>
    %cst_157 = arith.constant 1.000000e+00 : f32
    %409 = vector.broadcast %cst_157 : f32 to vector<8x32xf32>
    %410 = arith.addf %409, %408 : vector<8x32xf32>
    %411 = arith.divf %409, %410 : vector<8x32xf32>
    %c320_i32_158 = arith.constant 320 : i32
    %412 = arith.addi %c320_i32_158, %352 : i32
    %413 = tpu.assume_multiple %412, 8 : i32
    %414 = arith.index_cast %413 : i32 to index
    %c0_159 = arith.constant 0 : index
    %415 = vector.load %arg8[%414, %c0_159] : memref<384x32xf32, #tpu.memory_space<vmem>>, vector<8x32xf32>
    %416 = arith.addf %358, %48 : vector<8x32xf32>
    %417 = arith.mulf %401, %416 : vector<8x32xf32>
    %418 = arith.addf %415, %417 : vector<8x32xf32>
    %419 = math.tanh %418 : vector<8x32xf32>
    %cst_160 = arith.constant 1.000000e+00 : f32
    %420 = vector.broadcast %cst_160 : f32 to vector<8x32xf32>
    %421 = arith.subf %420, %411 : vector<8x32xf32>
    %422 = arith.mulf %421, %419 : vector<8x32xf32>
    %423 = arith.mulf %411, %347 : vector<8x32xf32>
    %424 = arith.addf %422, %423 : vector<8x32xf32>
    %425 = vector.broadcast %c3_i32 : i32 to vector<8x1xi32>
    %426 = arith.cmpi sgt, %49, %425 : vector<8x1xi32>
    %427 = vector.broadcast %348 : i32 to vector<8x1xi32>
    %428 = arith.cmpi sgt, %49, %427 : vector<8x1xi32>
    %cst_161 = arith.constant 0.000000e+00 : f32
    %429 = vector.shape_cast %426 : vector<8x1xi1> to vector<8x1xi1>
    %430 = vector.broadcast %429 : vector<8x1xi1> to vector<8x32xi1>
    %431 = vector.broadcast %cst_161 : f32 to vector<8x32xf32>
    %432 = arith.select %430, %391, %431 : vector<8x32xi1>, vector<8x32xf32>
    %433 = arith.index_cast %350 : i32 to index
    %c0_162 = arith.constant 0 : index
    %434 = vector.load %arg6[%433, %c0_162] : memref<64x64xf32, #tpu.memory_space<vmem>>, vector<8x32xf32>
    tpu.vector_store %arg6[%433, %c0_162], %432 {strides = array<i32>} : memref<64x64xf32, #tpu.memory_space<vmem>>, vector<8x32xf32>,
    %cst_163 = arith.constant 0.000000e+00 : f32
    %435 = vector.shape_cast %428 : vector<8x1xi1> to vector<8x1xi1>
    %436 = vector.broadcast %435 : vector<8x1xi1> to vector<8x32xi1>
    %437 = vector.broadcast %cst_163 : f32 to vector<8x32xf32>
    %438 = arith.select %436, %424, %437 : vector<8x32xi1>, vector<8x32xf32>
    %439 = arith.index_cast %352 : i32 to index
    %c32_164 = arith.constant 32 : index
    %440 = vector.load %arg6[%439, %c32_164] : memref<64x64xf32, #tpu.memory_space<vmem>>, vector<8x32xf32>
    tpu.vector_store %arg6[%439, %c32_164], %438 {strides = array<i32>} : memref<64x64xf32, #tpu.memory_space<vmem>>, vector<8x32xf32>,
    %441 = vector.shape_cast %426 : vector<8x1xi1> to vector<8x1xi1>
    %442 = vector.broadcast %441 : vector<8x1xi1> to vector<8x32xi1>
    %443 = arith.select %442, %391, %344 : vector<8x32xi1>, vector<8x32xf32>
    %444 = vector.shape_cast %428 : vector<8x1xi1> to vector<8x1xi1>
    %445 = vector.broadcast %444 : vector<8x1xi1> to vector<8x32xi1>
    %446 = arith.select %445, %424, %347 : vector<8x32xi1>, vector<8x32xf32>
    %c4_i32 = arith.constant 4 : i32
    %c7_i32_165 = arith.constant 7 : i32
    %447 = arith.subi %c7_i32_165, %c4_i32 : i32
    %c8_i32_166 = arith.constant 8 : i32
    %448 = arith.muli %c4_i32, %c8_i32_166 : i32
    %449 = tpu.assume_multiple %448, 8 : i32
    %c8_i32_167 = arith.constant 8 : i32
    %450 = arith.muli %447, %c8_i32_167 : i32
    %451 = tpu.assume_multiple %450, 8 : i32
    %cst_168 = arith.constant dense<0.000000e+00> : vector<8x32xf32>
    %452 = tpu.matmul %443, %37, %cst_168 {dimension_numbers = #tpu.dot_dimension_numbers<[1], [0], [0], [1], [0, 0, 1, 1], [], []>} : vector<8x32xf32>, vector<32x32xf32>, vector<8x32xf32> -> vector<8x32xf32>
    %cst_169 = arith.constant dense<0.000000e+00> : vector<8x32xf32>
    %453 = tpu.matmul %443, %38, %cst_169 {dimension_numbers = #tpu.dot_dimension_numbers<[1], [0], [0], [1], [0, 0, 1, 1], [], []>} : vector<8x32xf32>, vector<32x32xf32>, vector<8x32xf32> -> vector<8x32xf32>
    %cst_170 = arith.constant dense<0.000000e+00> : vector<8x32xf32>
    %454 = tpu.matmul %443, %39, %cst_170 {dimension_numbers = #tpu.dot_dimension_numbers<[1], [0], [0], [1], [0, 0, 1, 1], [], []>} : vector<8x32xf32>, vector<32x32xf32>, vector<8x32xf32> -> vector<8x32xf32>
    %cst_171 = arith.constant dense<0.000000e+00> : vector<8x32xf32>
    %455 = tpu.matmul %446, %40, %cst_171 {dimension_numbers = #tpu.dot_dimension_numbers<[1], [0], [0], [1], [0, 0, 1, 1], [], []>} : vector<8x32xf32>, vector<32x32xf32>, vector<8x32xf32> -> vector<8x32xf32>
    %cst_172 = arith.constant dense<0.000000e+00> : vector<8x32xf32>
    %456 = tpu.matmul %446, %41, %cst_172 {dimension_numbers = #tpu.dot_dimension_numbers<[1], [0], [0], [1], [0, 0, 1, 1], [], []>} : vector<8x32xf32>, vector<32x32xf32>, vector<8x32xf32> -> vector<8x32xf32>
    %cst_173 = arith.constant dense<0.000000e+00> : vector<8x32xf32>
    %457 = tpu.matmul %446, %42, %cst_173 {dimension_numbers = #tpu.dot_dimension_numbers<[1], [0], [0], [1], [0, 0, 1, 1], [], []>} : vector<8x32xf32>, vector<32x32xf32>, vector<8x32xf32> -> vector<8x32xf32>
    %c0_i32_174 = arith.constant 0 : i32
    %458 = arith.addi %c0_i32_174, %449 : i32
    %459 = tpu.assume_multiple %458, 8 : i32
    %460 = arith.index_cast %459 : i32 to index
    %c0_175 = arith.constant 0 : index
    %461 = vector.load %arg8[%460, %c0_175] : memref<384x32xf32, #tpu.memory_space<vmem>>, vector<8x32xf32>
    %462 = arith.addf %461, %452 : vector<8x32xf32>
    %463 = arith.negf %462 : vector<8x32xf32>
    %464 = math.exp %463 : vector<8x32xf32>
    %cst_176 = arith.constant 1.000000e+00 : f32
    %465 = vector.broadcast %cst_176 : f32 to vector<8x32xf32>
    %466 = arith.addf %465, %464 : vector<8x32xf32>
    %467 = arith.divf %465, %466 : vector<8x32xf32>
    %c64_i32_177 = arith.constant 64 : i32
    %468 = arith.addi %c64_i32_177, %449 : i32
    %469 = tpu.assume_multiple %468, 8 : i32
    %470 = arith.index_cast %469 : i32 to index
    %c0_178 = arith.constant 0 : index
    %471 = vector.load %arg8[%470, %c0_178] : memref<384x32xf32, #tpu.memory_space<vmem>>, vector<8x32xf32>
    %472 = arith.addf %471, %453 : vector<8x32xf32>
    %473 = arith.negf %472 : vector<8x32xf32>
    %474 = math.exp %473 : vector<8x32xf32>
    %cst_179 = arith.constant 1.000000e+00 : f32
    %475 = vector.broadcast %cst_179 : f32 to vector<8x32xf32>
    %476 = arith.addf %475, %474 : vector<8x32xf32>
    %477 = arith.divf %475, %476 : vector<8x32xf32>
    %c128_i32_180 = arith.constant 128 : i32
    %478 = arith.addi %c128_i32_180, %449 : i32
    %479 = tpu.assume_multiple %478, 8 : i32
    %480 = arith.index_cast %479 : i32 to index
    %c0_181 = arith.constant 0 : index
    %481 = vector.load %arg8[%480, %c0_181] : memref<384x32xf32, #tpu.memory_space<vmem>>, vector<8x32xf32>
    %482 = arith.addf %454, %45 : vector<8x32xf32>
    %483 = arith.mulf %467, %482 : vector<8x32xf32>
    %484 = arith.addf %481, %483 : vector<8x32xf32>
    %485 = math.tanh %484 : vector<8x32xf32>
    %cst_182 = arith.constant 1.000000e+00 : f32
    %486 = vector.broadcast %cst_182 : f32 to vector<8x32xf32>
    %487 = arith.subf %486, %477 : vector<8x32xf32>
    %488 = arith.mulf %487, %485 : vector<8x32xf32>
    %489 = arith.mulf %477, %443 : vector<8x32xf32>
    %490 = arith.addf %488, %489 : vector<8x32xf32>
    %c192_i32_183 = arith.constant 192 : i32
    %491 = arith.addi %c192_i32_183, %451 : i32
    %492 = tpu.assume_multiple %491, 8 : i32
    %493 = arith.index_cast %492 : i32 to index
    %c0_184 = arith.constant 0 : index
    %494 = vector.load %arg8[%493, %c0_184] : memref<384x32xf32, #tpu.memory_space<vmem>>, vector<8x32xf32>
    %495 = arith.addf %494, %455 : vector<8x32xf32>
    %496 = arith.negf %495 : vector<8x32xf32>
    %497 = math.exp %496 : vector<8x32xf32>
    %cst_185 = arith.constant 1.000000e+00 : f32
    %498 = vector.broadcast %cst_185 : f32 to vector<8x32xf32>
    %499 = arith.addf %498, %497 : vector<8x32xf32>
    %500 = arith.divf %498, %499 : vector<8x32xf32>
    %c256_i32_186 = arith.constant 256 : i32
    %501 = arith.addi %c256_i32_186, %451 : i32
    %502 = tpu.assume_multiple %501, 8 : i32
    %503 = arith.index_cast %502 : i32 to index
    %c0_187 = arith.constant 0 : index
    %504 = vector.load %arg8[%503, %c0_187] : memref<384x32xf32, #tpu.memory_space<vmem>>, vector<8x32xf32>
    %505 = arith.addf %504, %456 : vector<8x32xf32>
    %506 = arith.negf %505 : vector<8x32xf32>
    %507 = math.exp %506 : vector<8x32xf32>
    %cst_188 = arith.constant 1.000000e+00 : f32
    %508 = vector.broadcast %cst_188 : f32 to vector<8x32xf32>
    %509 = arith.addf %508, %507 : vector<8x32xf32>
    %510 = arith.divf %508, %509 : vector<8x32xf32>
    %c320_i32_189 = arith.constant 320 : i32
    %511 = arith.addi %c320_i32_189, %451 : i32
    %512 = tpu.assume_multiple %511, 8 : i32
    %513 = arith.index_cast %512 : i32 to index
    %c0_190 = arith.constant 0 : index
    %514 = vector.load %arg8[%513, %c0_190] : memref<384x32xf32, #tpu.memory_space<vmem>>, vector<8x32xf32>
    %515 = arith.addf %457, %48 : vector<8x32xf32>
    %516 = arith.mulf %500, %515 : vector<8x32xf32>
    %517 = arith.addf %514, %516 : vector<8x32xf32>
    %518 = math.tanh %517 : vector<8x32xf32>
    %cst_191 = arith.constant 1.000000e+00 : f32
    %519 = vector.broadcast %cst_191 : f32 to vector<8x32xf32>
    %520 = arith.subf %519, %510 : vector<8x32xf32>
    %521 = arith.mulf %520, %518 : vector<8x32xf32>
    %522 = arith.mulf %510, %446 : vector<8x32xf32>
    %523 = arith.addf %521, %522 : vector<8x32xf32>
    %524 = vector.broadcast %c4_i32 : i32 to vector<8x1xi32>
    %525 = arith.cmpi sgt, %49, %524 : vector<8x1xi32>
    %526 = vector.broadcast %447 : i32 to vector<8x1xi32>
    %527 = arith.cmpi sgt, %49, %526 : vector<8x1xi32>
    %cst_192 = arith.constant 0.000000e+00 : f32
    %528 = vector.shape_cast %525 : vector<8x1xi1> to vector<8x1xi1>
    %529 = vector.broadcast %528 : vector<8x1xi1> to vector<8x32xi1>
    %530 = vector.broadcast %cst_192 : f32 to vector<8x32xf32>
    %531 = arith.select %529, %490, %530 : vector<8x32xi1>, vector<8x32xf32>
    %532 = arith.index_cast %449 : i32 to index
    %c0_193 = arith.constant 0 : index
    %533 = vector.load %arg6[%532, %c0_193] : memref<64x64xf32, #tpu.memory_space<vmem>>, vector<8x32xf32>
    tpu.vector_store %arg6[%532, %c0_193], %531 {strides = array<i32>} : memref<64x64xf32, #tpu.memory_space<vmem>>, vector<8x32xf32>,
    %cst_194 = arith.constant 0.000000e+00 : f32
    %534 = vector.shape_cast %527 : vector<8x1xi1> to vector<8x1xi1>
    %535 = vector.broadcast %534 : vector<8x1xi1> to vector<8x32xi1>
    %536 = vector.broadcast %cst_194 : f32 to vector<8x32xf32>
    %537 = arith.select %535, %523, %536 : vector<8x32xi1>, vector<8x32xf32>
    %538 = arith.index_cast %451 : i32 to index
    %c32_195 = arith.constant 32 : index
    %539 = vector.load %arg6[%538, %c32_195] : memref<64x64xf32, #tpu.memory_space<vmem>>, vector<8x32xf32>
    tpu.vector_store %arg6[%538, %c32_195], %537 {strides = array<i32>} : memref<64x64xf32, #tpu.memory_space<vmem>>, vector<8x32xf32>,
    %540 = vector.shape_cast %525 : vector<8x1xi1> to vector<8x1xi1>
    %541 = vector.broadcast %540 : vector<8x1xi1> to vector<8x32xi1>
    %542 = arith.select %541, %490, %443 : vector<8x32xi1>, vector<8x32xf32>
    %543 = vector.shape_cast %527 : vector<8x1xi1> to vector<8x1xi1>
    %544 = vector.broadcast %543 : vector<8x1xi1> to vector<8x32xi1>
    %545 = arith.select %544, %523, %446 : vector<8x32xi1>, vector<8x32xf32>
    %c5_i32 = arith.constant 5 : i32
    %c7_i32_196 = arith.constant 7 : i32
    %546 = arith.subi %c7_i32_196, %c5_i32 : i32
    %c8_i32_197 = arith.constant 8 : i32
    %547 = arith.muli %c5_i32, %c8_i32_197 : i32
    %548 = tpu.assume_multiple %547, 8 : i32
    %c8_i32_198 = arith.constant 8 : i32
    %549 = arith.muli %546, %c8_i32_198 : i32
    %550 = tpu.assume_multiple %549, 8 : i32
    %cst_199 = arith.constant dense<0.000000e+00> : vector<8x32xf32>
    %551 = tpu.matmul %542, %37, %cst_199 {dimension_numbers = #tpu.dot_dimension_numbers<[1], [0], [0], [1], [0, 0, 1, 1], [], []>} : vector<8x32xf32>, vector<32x32xf32>, vector<8x32xf32> -> vector<8x32xf32>
    %cst_200 = arith.constant dense<0.000000e+00> : vector<8x32xf32>
    %552 = tpu.matmul %542, %38, %cst_200 {dimension_numbers = #tpu.dot_dimension_numbers<[1], [0], [0], [1], [0, 0, 1, 1], [], []>} : vector<8x32xf32>, vector<32x32xf32>, vector<8x32xf32> -> vector<8x32xf32>
    %cst_201 = arith.constant dense<0.000000e+00> : vector<8x32xf32>
    %553 = tpu.matmul %542, %39, %cst_201 {dimension_numbers = #tpu.dot_dimension_numbers<[1], [0], [0], [1], [0, 0, 1, 1], [], []>} : vector<8x32xf32>, vector<32x32xf32>, vector<8x32xf32> -> vector<8x32xf32>
    %cst_202 = arith.constant dense<0.000000e+00> : vector<8x32xf32>
    %554 = tpu.matmul %545, %40, %cst_202 {dimension_numbers = #tpu.dot_dimension_numbers<[1], [0], [0], [1], [0, 0, 1, 1], [], []>} : vector<8x32xf32>, vector<32x32xf32>, vector<8x32xf32> -> vector<8x32xf32>
    %cst_203 = arith.constant dense<0.000000e+00> : vector<8x32xf32>
    %555 = tpu.matmul %545, %41, %cst_203 {dimension_numbers = #tpu.dot_dimension_numbers<[1], [0], [0], [1], [0, 0, 1, 1], [], []>} : vector<8x32xf32>, vector<32x32xf32>, vector<8x32xf32> -> vector<8x32xf32>
    %cst_204 = arith.constant dense<0.000000e+00> : vector<8x32xf32>
    %556 = tpu.matmul %545, %42, %cst_204 {dimension_numbers = #tpu.dot_dimension_numbers<[1], [0], [0], [1], [0, 0, 1, 1], [], []>} : vector<8x32xf32>, vector<32x32xf32>, vector<8x32xf32> -> vector<8x32xf32>
    %c0_i32_205 = arith.constant 0 : i32
    %557 = arith.addi %c0_i32_205, %548 : i32
    %558 = tpu.assume_multiple %557, 8 : i32
    %559 = arith.index_cast %558 : i32 to index
    %c0_206 = arith.constant 0 : index
    %560 = vector.load %arg8[%559, %c0_206] : memref<384x32xf32, #tpu.memory_space<vmem>>, vector<8x32xf32>
    %561 = arith.addf %560, %551 : vector<8x32xf32>
    %562 = arith.negf %561 : vector<8x32xf32>
    %563 = math.exp %562 : vector<8x32xf32>
    %cst_207 = arith.constant 1.000000e+00 : f32
    %564 = vector.broadcast %cst_207 : f32 to vector<8x32xf32>
    %565 = arith.addf %564, %563 : vector<8x32xf32>
    %566 = arith.divf %564, %565 : vector<8x32xf32>
    %c64_i32_208 = arith.constant 64 : i32
    %567 = arith.addi %c64_i32_208, %548 : i32
    %568 = tpu.assume_multiple %567, 8 : i32
    %569 = arith.index_cast %568 : i32 to index
    %c0_209 = arith.constant 0 : index
    %570 = vector.load %arg8[%569, %c0_209] : memref<384x32xf32, #tpu.memory_space<vmem>>, vector<8x32xf32>
    %571 = arith.addf %570, %552 : vector<8x32xf32>
    %572 = arith.negf %571 : vector<8x32xf32>
    %573 = math.exp %572 : vector<8x32xf32>
    %cst_210 = arith.constant 1.000000e+00 : f32
    %574 = vector.broadcast %cst_210 : f32 to vector<8x32xf32>
    %575 = arith.addf %574, %573 : vector<8x32xf32>
    %576 = arith.divf %574, %575 : vector<8x32xf32>
    %c128_i32_211 = arith.constant 128 : i32
    %577 = arith.addi %c128_i32_211, %548 : i32
    %578 = tpu.assume_multiple %577, 8 : i32
    %579 = arith.index_cast %578 : i32 to index
    %c0_212 = arith.constant 0 : index
    %580 = vector.load %arg8[%579, %c0_212] : memref<384x32xf32, #tpu.memory_space<vmem>>, vector<8x32xf32>
    %581 = arith.addf %553, %45 : vector<8x32xf32>
    %582 = arith.mulf %566, %581 : vector<8x32xf32>
    %583 = arith.addf %580, %582 : vector<8x32xf32>
    %584 = math.tanh %583 : vector<8x32xf32>
    %cst_213 = arith.constant 1.000000e+00 : f32
    %585 = vector.broadcast %cst_213 : f32 to vector<8x32xf32>
    %586 = arith.subf %585, %576 : vector<8x32xf32>
    %587 = arith.mulf %586, %584 : vector<8x32xf32>
    %588 = arith.mulf %576, %542 : vector<8x32xf32>
    %589 = arith.addf %587, %588 : vector<8x32xf32>
    %c192_i32_214 = arith.constant 192 : i32
    %590 = arith.addi %c192_i32_214, %550 : i32
    %591 = tpu.assume_multiple %590, 8 : i32
    %592 = arith.index_cast %591 : i32 to index
    %c0_215 = arith.constant 0 : index
    %593 = vector.load %arg8[%592, %c0_215] : memref<384x32xf32, #tpu.memory_space<vmem>>, vector<8x32xf32>
    %594 = arith.addf %593, %554 : vector<8x32xf32>
    %595 = arith.negf %594 : vector<8x32xf32>
    %596 = math.exp %595 : vector<8x32xf32>
    %cst_216 = arith.constant 1.000000e+00 : f32
    %597 = vector.broadcast %cst_216 : f32 to vector<8x32xf32>
    %598 = arith.addf %597, %596 : vector<8x32xf32>
    %599 = arith.divf %597, %598 : vector<8x32xf32>
    %c256_i32_217 = arith.constant 256 : i32
    %600 = arith.addi %c256_i32_217, %550 : i32
    %601 = tpu.assume_multiple %600, 8 : i32
    %602 = arith.index_cast %601 : i32 to index
    %c0_218 = arith.constant 0 : index
    %603 = vector.load %arg8[%602, %c0_218] : memref<384x32xf32, #tpu.memory_space<vmem>>, vector<8x32xf32>
    %604 = arith.addf %603, %555 : vector<8x32xf32>
    %605 = arith.negf %604 : vector<8x32xf32>
    %606 = math.exp %605 : vector<8x32xf32>
    %cst_219 = arith.constant 1.000000e+00 : f32
    %607 = vector.broadcast %cst_219 : f32 to vector<8x32xf32>
    %608 = arith.addf %607, %606 : vector<8x32xf32>
    %609 = arith.divf %607, %608 : vector<8x32xf32>
    %c320_i32_220 = arith.constant 320 : i32
    %610 = arith.addi %c320_i32_220, %550 : i32
    %611 = tpu.assume_multiple %610, 8 : i32
    %612 = arith.index_cast %611 : i32 to index
    %c0_221 = arith.constant 0 : index
    %613 = vector.load %arg8[%612, %c0_221] : memref<384x32xf32, #tpu.memory_space<vmem>>, vector<8x32xf32>
    %614 = arith.addf %556, %48 : vector<8x32xf32>
    %615 = arith.mulf %599, %614 : vector<8x32xf32>
    %616 = arith.addf %613, %615 : vector<8x32xf32>
    %617 = math.tanh %616 : vector<8x32xf32>
    %cst_222 = arith.constant 1.000000e+00 : f32
    %618 = vector.broadcast %cst_222 : f32 to vector<8x32xf32>
    %619 = arith.subf %618, %609 : vector<8x32xf32>
    %620 = arith.mulf %619, %617 : vector<8x32xf32>
    %621 = arith.mulf %609, %545 : vector<8x32xf32>
    %622 = arith.addf %620, %621 : vector<8x32xf32>
    %623 = vector.broadcast %c5_i32 : i32 to vector<8x1xi32>
    %624 = arith.cmpi sgt, %49, %623 : vector<8x1xi32>
    %625 = vector.broadcast %546 : i32 to vector<8x1xi32>
    %626 = arith.cmpi sgt, %49, %625 : vector<8x1xi32>
    %cst_223 = arith.constant 0.000000e+00 : f32
    %627 = vector.shape_cast %624 : vector<8x1xi1> to vector<8x1xi1>
    %628 = vector.broadcast %627 : vector<8x1xi1> to vector<8x32xi1>
    %629 = vector.broadcast %cst_223 : f32 to vector<8x32xf32>
    %630 = arith.select %628, %589, %629 : vector<8x32xi1>, vector<8x32xf32>
    %631 = arith.index_cast %548 : i32 to index
    %c0_224 = arith.constant 0 : index
    %632 = vector.load %arg6[%631, %c0_224] : memref<64x64xf32, #tpu.memory_space<vmem>>, vector<8x32xf32>
    tpu.vector_store %arg6[%631, %c0_224], %630 {strides = array<i32>} : memref<64x64xf32, #tpu.memory_space<vmem>>, vector<8x32xf32>,
    %cst_225 = arith.constant 0.000000e+00 : f32
    %633 = vector.shape_cast %626 : vector<8x1xi1> to vector<8x1xi1>
    %634 = vector.broadcast %633 : vector<8x1xi1> to vector<8x32xi1>
    %635 = vector.broadcast %cst_225 : f32 to vector<8x32xf32>
    %636 = arith.select %634, %622, %635 : vector<8x32xi1>, vector<8x32xf32>
    %637 = arith.index_cast %550 : i32 to index
    %c32_226 = arith.constant 32 : index
    %638 = vector.load %arg6[%637, %c32_226] : memref<64x64xf32, #tpu.memory_space<vmem>>, vector<8x32xf32>
    tpu.vector_store %arg6[%637, %c32_226], %636 {strides = array<i32>} : memref<64x64xf32, #tpu.memory_space<vmem>>, vector<8x32xf32>,
    %639 = vector.shape_cast %624 : vector<8x1xi1> to vector<8x1xi1>
    %640 = vector.broadcast %639 : vector<8x1xi1> to vector<8x32xi1>
    %641 = arith.select %640, %589, %542 : vector<8x32xi1>, vector<8x32xf32>
    %642 = vector.shape_cast %626 : vector<8x1xi1> to vector<8x1xi1>
    %643 = vector.broadcast %642 : vector<8x1xi1> to vector<8x32xi1>
    %644 = arith.select %643, %622, %545 : vector<8x32xi1>, vector<8x32xf32>
    %c6_i32 = arith.constant 6 : i32
    %c7_i32_227 = arith.constant 7 : i32
    %645 = arith.subi %c7_i32_227, %c6_i32 : i32
    %c8_i32_228 = arith.constant 8 : i32
    %646 = arith.muli %c6_i32, %c8_i32_228 : i32
    %647 = tpu.assume_multiple %646, 8 : i32
    %c8_i32_229 = arith.constant 8 : i32
    %648 = arith.muli %645, %c8_i32_229 : i32
    %649 = tpu.assume_multiple %648, 8 : i32
    %cst_230 = arith.constant dense<0.000000e+00> : vector<8x32xf32>
    %650 = tpu.matmul %641, %37, %cst_230 {dimension_numbers = #tpu.dot_dimension_numbers<[1], [0], [0], [1], [0, 0, 1, 1], [], []>} : vector<8x32xf32>, vector<32x32xf32>, vector<8x32xf32> -> vector<8x32xf32>
    %cst_231 = arith.constant dense<0.000000e+00> : vector<8x32xf32>
    %651 = tpu.matmul %641, %38, %cst_231 {dimension_numbers = #tpu.dot_dimension_numbers<[1], [0], [0], [1], [0, 0, 1, 1], [], []>} : vector<8x32xf32>, vector<32x32xf32>, vector<8x32xf32> -> vector<8x32xf32>
    %cst_232 = arith.constant dense<0.000000e+00> : vector<8x32xf32>
    %652 = tpu.matmul %641, %39, %cst_232 {dimension_numbers = #tpu.dot_dimension_numbers<[1], [0], [0], [1], [0, 0, 1, 1], [], []>} : vector<8x32xf32>, vector<32x32xf32>, vector<8x32xf32> -> vector<8x32xf32>
    %cst_233 = arith.constant dense<0.000000e+00> : vector<8x32xf32>
    %653 = tpu.matmul %644, %40, %cst_233 {dimension_numbers = #tpu.dot_dimension_numbers<[1], [0], [0], [1], [0, 0, 1, 1], [], []>} : vector<8x32xf32>, vector<32x32xf32>, vector<8x32xf32> -> vector<8x32xf32>
    %cst_234 = arith.constant dense<0.000000e+00> : vector<8x32xf32>
    %654 = tpu.matmul %644, %41, %cst_234 {dimension_numbers = #tpu.dot_dimension_numbers<[1], [0], [0], [1], [0, 0, 1, 1], [], []>} : vector<8x32xf32>, vector<32x32xf32>, vector<8x32xf32> -> vector<8x32xf32>
    %cst_235 = arith.constant dense<0.000000e+00> : vector<8x32xf32>
    %655 = tpu.matmul %644, %42, %cst_235 {dimension_numbers = #tpu.dot_dimension_numbers<[1], [0], [0], [1], [0, 0, 1, 1], [], []>} : vector<8x32xf32>, vector<32x32xf32>, vector<8x32xf32> -> vector<8x32xf32>
    %c0_i32_236 = arith.constant 0 : i32
    %656 = arith.addi %c0_i32_236, %647 : i32
    %657 = tpu.assume_multiple %656, 8 : i32
    %658 = arith.index_cast %657 : i32 to index
    %c0_237 = arith.constant 0 : index
    %659 = vector.load %arg8[%658, %c0_237] : memref<384x32xf32, #tpu.memory_space<vmem>>, vector<8x32xf32>
    %660 = arith.addf %659, %650 : vector<8x32xf32>
    %661 = arith.negf %660 : vector<8x32xf32>
    %662 = math.exp %661 : vector<8x32xf32>
    %cst_238 = arith.constant 1.000000e+00 : f32
    %663 = vector.broadcast %cst_238 : f32 to vector<8x32xf32>
    %664 = arith.addf %663, %662 : vector<8x32xf32>
    %665 = arith.divf %663, %664 : vector<8x32xf32>
    %c64_i32_239 = arith.constant 64 : i32
    %666 = arith.addi %c64_i32_239, %647 : i32
    %667 = tpu.assume_multiple %666, 8 : i32
    %668 = arith.index_cast %667 : i32 to index
    %c0_240 = arith.constant 0 : index
    %669 = vector.load %arg8[%668, %c0_240] : memref<384x32xf32, #tpu.memory_space<vmem>>, vector<8x32xf32>
    %670 = arith.addf %669, %651 : vector<8x32xf32>
    %671 = arith.negf %670 : vector<8x32xf32>
    %672 = math.exp %671 : vector<8x32xf32>
    %cst_241 = arith.constant 1.000000e+00 : f32
    %673 = vector.broadcast %cst_241 : f32 to vector<8x32xf32>
    %674 = arith.addf %673, %672 : vector<8x32xf32>
    %675 = arith.divf %673, %674 : vector<8x32xf32>
    %c128_i32_242 = arith.constant 128 : i32
    %676 = arith.addi %c128_i32_242, %647 : i32
    %677 = tpu.assume_multiple %676, 8 : i32
    %678 = arith.index_cast %677 : i32 to index
    %c0_243 = arith.constant 0 : index
    %679 = vector.load %arg8[%678, %c0_243] : memref<384x32xf32, #tpu.memory_space<vmem>>, vector<8x32xf32>
    %680 = arith.addf %652, %45 : vector<8x32xf32>
    %681 = arith.mulf %665, %680 : vector<8x32xf32>
    %682 = arith.addf %679, %681 : vector<8x32xf32>
    %683 = math.tanh %682 : vector<8x32xf32>
    %cst_244 = arith.constant 1.000000e+00 : f32
    %684 = vector.broadcast %cst_244 : f32 to vector<8x32xf32>
    %685 = arith.subf %684, %675 : vector<8x32xf32>
    %686 = arith.mulf %685, %683 : vector<8x32xf32>
    %687 = arith.mulf %675, %641 : vector<8x32xf32>
    %688 = arith.addf %686, %687 : vector<8x32xf32>
    %c192_i32_245 = arith.constant 192 : i32
    %689 = arith.addi %c192_i32_245, %649 : i32
    %690 = tpu.assume_multiple %689, 8 : i32
    %691 = arith.index_cast %690 : i32 to index
    %c0_246 = arith.constant 0 : index
    %692 = vector.load %arg8[%691, %c0_246] : memref<384x32xf32, #tpu.memory_space<vmem>>, vector<8x32xf32>
    %693 = arith.addf %692, %653 : vector<8x32xf32>
    %694 = arith.negf %693 : vector<8x32xf32>
    %695 = math.exp %694 : vector<8x32xf32>
    %cst_247 = arith.constant 1.000000e+00 : f32
    %696 = vector.broadcast %cst_247 : f32 to vector<8x32xf32>
    %697 = arith.addf %696, %695 : vector<8x32xf32>
    %698 = arith.divf %696, %697 : vector<8x32xf32>
    %c256_i32_248 = arith.constant 256 : i32
    %699 = arith.addi %c256_i32_248, %649 : i32
    %700 = tpu.assume_multiple %699, 8 : i32
    %701 = arith.index_cast %700 : i32 to index
    %c0_249 = arith.constant 0 : index
    %702 = vector.load %arg8[%701, %c0_249] : memref<384x32xf32, #tpu.memory_space<vmem>>, vector<8x32xf32>
    %703 = arith.addf %702, %654 : vector<8x32xf32>
    %704 = arith.negf %703 : vector<8x32xf32>
    %705 = math.exp %704 : vector<8x32xf32>
    %cst_250 = arith.constant 1.000000e+00 : f32
    %706 = vector.broadcast %cst_250 : f32 to vector<8x32xf32>
    %707 = arith.addf %706, %705 : vector<8x32xf32>
    %708 = arith.divf %706, %707 : vector<8x32xf32>
    %c320_i32_251 = arith.constant 320 : i32
    %709 = arith.addi %c320_i32_251, %649 : i32
    %710 = tpu.assume_multiple %709, 8 : i32
    %711 = arith.index_cast %710 : i32 to index
    %c0_252 = arith.constant 0 : index
    %712 = vector.load %arg8[%711, %c0_252] : memref<384x32xf32, #tpu.memory_space<vmem>>, vector<8x32xf32>
    %713 = arith.addf %655, %48 : vector<8x32xf32>
    %714 = arith.mulf %698, %713 : vector<8x32xf32>
    %715 = arith.addf %712, %714 : vector<8x32xf32>
    %716 = math.tanh %715 : vector<8x32xf32>
    %cst_253 = arith.constant 1.000000e+00 : f32
    %717 = vector.broadcast %cst_253 : f32 to vector<8x32xf32>
    %718 = arith.subf %717, %708 : vector<8x32xf32>
    %719 = arith.mulf %718, %716 : vector<8x32xf32>
    %720 = arith.mulf %708, %644 : vector<8x32xf32>
    %721 = arith.addf %719, %720 : vector<8x32xf32>
    %722 = vector.broadcast %c6_i32 : i32 to vector<8x1xi32>
    %723 = arith.cmpi sgt, %49, %722 : vector<8x1xi32>
    %724 = vector.broadcast %645 : i32 to vector<8x1xi32>
    %725 = arith.cmpi sgt, %49, %724 : vector<8x1xi32>
    %cst_254 = arith.constant 0.000000e+00 : f32
    %726 = vector.shape_cast %723 : vector<8x1xi1> to vector<8x1xi1>
    %727 = vector.broadcast %726 : vector<8x1xi1> to vector<8x32xi1>
    %728 = vector.broadcast %cst_254 : f32 to vector<8x32xf32>
    %729 = arith.select %727, %688, %728 : vector<8x32xi1>, vector<8x32xf32>
    %730 = arith.index_cast %647 : i32 to index
    %c0_255 = arith.constant 0 : index
    %731 = vector.load %arg6[%730, %c0_255] : memref<64x64xf32, #tpu.memory_space<vmem>>, vector<8x32xf32>
    tpu.vector_store %arg6[%730, %c0_255], %729 {strides = array<i32>} : memref<64x64xf32, #tpu.memory_space<vmem>>, vector<8x32xf32>,
    %cst_256 = arith.constant 0.000000e+00 : f32
    %732 = vector.shape_cast %725 : vector<8x1xi1> to vector<8x1xi1>
    %733 = vector.broadcast %732 : vector<8x1xi1> to vector<8x32xi1>
    %734 = vector.broadcast %cst_256 : f32 to vector<8x32xf32>
    %735 = arith.select %733, %721, %734 : vector<8x32xi1>, vector<8x32xf32>
    %736 = arith.index_cast %649 : i32 to index
    %c32_257 = arith.constant 32 : index
    %737 = vector.load %arg6[%736, %c32_257] : memref<64x64xf32, #tpu.memory_space<vmem>>, vector<8x32xf32>
    tpu.vector_store %arg6[%736, %c32_257], %735 {strides = array<i32>} : memref<64x64xf32, #tpu.memory_space<vmem>>, vector<8x32xf32>,
    %738 = vector.shape_cast %723 : vector<8x1xi1> to vector<8x1xi1>
    %739 = vector.broadcast %738 : vector<8x1xi1> to vector<8x32xi1>
    %740 = arith.select %739, %688, %641 : vector<8x32xi1>, vector<8x32xf32>
    %741 = vector.shape_cast %725 : vector<8x1xi1> to vector<8x1xi1>
    %742 = vector.broadcast %741 : vector<8x1xi1> to vector<8x32xi1>
    %743 = arith.select %742, %721, %644 : vector<8x32xi1>, vector<8x32xf32>
    %c7_i32_258 = arith.constant 7 : i32
    %c7_i32_259 = arith.constant 7 : i32
    %744 = arith.subi %c7_i32_259, %c7_i32_258 : i32
    %c8_i32_260 = arith.constant 8 : i32
    %745 = arith.muli %c7_i32_258, %c8_i32_260 : i32
    %746 = tpu.assume_multiple %745, 8 : i32
    %c8_i32_261 = arith.constant 8 : i32
    %747 = arith.muli %744, %c8_i32_261 : i32
    %748 = tpu.assume_multiple %747, 8 : i32
    %cst_262 = arith.constant dense<0.000000e+00> : vector<8x32xf32>
    %749 = tpu.matmul %740, %37, %cst_262 {dimension_numbers = #tpu.dot_dimension_numbers<[1], [0], [0], [1], [0, 0, 1, 1], [], []>} : vector<8x32xf32>, vector<32x32xf32>, vector<8x32xf32> -> vector<8x32xf32>
    %cst_263 = arith.constant dense<0.000000e+00> : vector<8x32xf32>
    %750 = tpu.matmul %740, %38, %cst_263 {dimension_numbers = #tpu.dot_dimension_numbers<[1], [0], [0], [1], [0, 0, 1, 1], [], []>} : vector<8x32xf32>, vector<32x32xf32>, vector<8x32xf32> -> vector<8x32xf32>
    %cst_264 = arith.constant dense<0.000000e+00> : vector<8x32xf32>
    %751 = tpu.matmul %740, %39, %cst_264 {dimension_numbers = #tpu.dot_dimension_numbers<[1], [0], [0], [1], [0, 0, 1, 1], [], []>} : vector<8x32xf32>, vector<32x32xf32>, vector<8x32xf32> -> vector<8x32xf32>
    %cst_265 = arith.constant dense<0.000000e+00> : vector<8x32xf32>
    %752 = tpu.matmul %743, %40, %cst_265 {dimension_numbers = #tpu.dot_dimension_numbers<[1], [0], [0], [1], [0, 0, 1, 1], [], []>} : vector<8x32xf32>, vector<32x32xf32>, vector<8x32xf32> -> vector<8x32xf32>
    %cst_266 = arith.constant dense<0.000000e+00> : vector<8x32xf32>
    %753 = tpu.matmul %743, %41, %cst_266 {dimension_numbers = #tpu.dot_dimension_numbers<[1], [0], [0], [1], [0, 0, 1, 1], [], []>} : vector<8x32xf32>, vector<32x32xf32>, vector<8x32xf32> -> vector<8x32xf32>
    %cst_267 = arith.constant dense<0.000000e+00> : vector<8x32xf32>
    %754 = tpu.matmul %743, %42, %cst_267 {dimension_numbers = #tpu.dot_dimension_numbers<[1], [0], [0], [1], [0, 0, 1, 1], [], []>} : vector<8x32xf32>, vector<32x32xf32>, vector<8x32xf32> -> vector<8x32xf32>
    %c0_i32_268 = arith.constant 0 : i32
    %755 = arith.addi %c0_i32_268, %746 : i32
    %756 = tpu.assume_multiple %755, 8 : i32
    %757 = arith.index_cast %756 : i32 to index
    %c0_269 = arith.constant 0 : index
    %758 = vector.load %arg8[%757, %c0_269] : memref<384x32xf32, #tpu.memory_space<vmem>>, vector<8x32xf32>
    %759 = arith.addf %758, %749 : vector<8x32xf32>
    %760 = arith.negf %759 : vector<8x32xf32>
    %761 = math.exp %760 : vector<8x32xf32>
    %cst_270 = arith.constant 1.000000e+00 : f32
    %762 = vector.broadcast %cst_270 : f32 to vector<8x32xf32>
    %763 = arith.addf %762, %761 : vector<8x32xf32>
    %764 = arith.divf %762, %763 : vector<8x32xf32>
    %c64_i32_271 = arith.constant 64 : i32
    %765 = arith.addi %c64_i32_271, %746 : i32
    %766 = tpu.assume_multiple %765, 8 : i32
    %767 = arith.index_cast %766 : i32 to index
    %c0_272 = arith.constant 0 : index
    %768 = vector.load %arg8[%767, %c0_272] : memref<384x32xf32, #tpu.memory_space<vmem>>, vector<8x32xf32>
    %769 = arith.addf %768, %750 : vector<8x32xf32>
    %770 = arith.negf %769 : vector<8x32xf32>
    %771 = math.exp %770 : vector<8x32xf32>
    %cst_273 = arith.constant 1.000000e+00 : f32
    %772 = vector.broadcast %cst_273 : f32 to vector<8x32xf32>
    %773 = arith.addf %772, %771 : vector<8x32xf32>
    %774 = arith.divf %772, %773 : vector<8x32xf32>
    %c128_i32_274 = arith.constant 128 : i32
    %775 = arith.addi %c128_i32_274, %746 : i32
    %776 = tpu.assume_multiple %775, 8 : i32
    %777 = arith.index_cast %776 : i32 to index
    %c0_275 = arith.constant 0 : index
    %778 = vector.load %arg8[%777, %c0_275] : memref<384x32xf32, #tpu.memory_space<vmem>>, vector<8x32xf32>
    %779 = arith.addf %751, %45 : vector<8x32xf32>
    %780 = arith.mulf %764, %779 : vector<8x32xf32>
    %781 = arith.addf %778, %780 : vector<8x32xf32>
    %782 = math.tanh %781 : vector<8x32xf32>
    %cst_276 = arith.constant 1.000000e+00 : f32
    %783 = vector.broadcast %cst_276 : f32 to vector<8x32xf32>
    %784 = arith.subf %783, %774 : vector<8x32xf32>
    %785 = arith.mulf %784, %782 : vector<8x32xf32>
    %786 = arith.mulf %774, %740 : vector<8x32xf32>
    %787 = arith.addf %785, %786 : vector<8x32xf32>
    %c192_i32_277 = arith.constant 192 : i32
    %788 = arith.addi %c192_i32_277, %748 : i32
    %789 = tpu.assume_multiple %788, 8 : i32
    %790 = arith.index_cast %789 : i32 to index
    %c0_278 = arith.constant 0 : index
    %791 = vector.load %arg8[%790, %c0_278] : memref<384x32xf32, #tpu.memory_space<vmem>>, vector<8x32xf32>
    %792 = arith.addf %791, %752 : vector<8x32xf32>
    %793 = arith.negf %792 : vector<8x32xf32>
    %794 = math.exp %793 : vector<8x32xf32>
    %cst_279 = arith.constant 1.000000e+00 : f32
    %795 = vector.broadcast %cst_279 : f32 to vector<8x32xf32>
    %796 = arith.addf %795, %794 : vector<8x32xf32>
    %797 = arith.divf %795, %796 : vector<8x32xf32>
    %c256_i32_280 = arith.constant 256 : i32
    %798 = arith.addi %c256_i32_280, %748 : i32
    %799 = tpu.assume_multiple %798, 8 : i32
    %800 = arith.index_cast %799 : i32 to index
    %c0_281 = arith.constant 0 : index
    %801 = vector.load %arg8[%800, %c0_281] : memref<384x32xf32, #tpu.memory_space<vmem>>, vector<8x32xf32>
    %802 = arith.addf %801, %753 : vector<8x32xf32>
    %803 = arith.negf %802 : vector<8x32xf32>
    %804 = math.exp %803 : vector<8x32xf32>
    %cst_282 = arith.constant 1.000000e+00 : f32
    %805 = vector.broadcast %cst_282 : f32 to vector<8x32xf32>
    %806 = arith.addf %805, %804 : vector<8x32xf32>
    %807 = arith.divf %805, %806 : vector<8x32xf32>
    %c320_i32_283 = arith.constant 320 : i32
    %808 = arith.addi %c320_i32_283, %748 : i32
    %809 = tpu.assume_multiple %808, 8 : i32
    %810 = arith.index_cast %809 : i32 to index
    %c0_284 = arith.constant 0 : index
    %811 = vector.load %arg8[%810, %c0_284] : memref<384x32xf32, #tpu.memory_space<vmem>>, vector<8x32xf32>
    %812 = arith.addf %754, %48 : vector<8x32xf32>
    %813 = arith.mulf %797, %812 : vector<8x32xf32>
    %814 = arith.addf %811, %813 : vector<8x32xf32>
    %815 = math.tanh %814 : vector<8x32xf32>
    %cst_285 = arith.constant 1.000000e+00 : f32
    %816 = vector.broadcast %cst_285 : f32 to vector<8x32xf32>
    %817 = arith.subf %816, %807 : vector<8x32xf32>
    %818 = arith.mulf %817, %815 : vector<8x32xf32>
    %819 = arith.mulf %807, %743 : vector<8x32xf32>
    %820 = arith.addf %818, %819 : vector<8x32xf32>
    %821 = vector.broadcast %c7_i32_258 : i32 to vector<8x1xi32>
    %822 = arith.cmpi sgt, %49, %821 : vector<8x1xi32>
    %823 = vector.broadcast %744 : i32 to vector<8x1xi32>
    %824 = arith.cmpi sgt, %49, %823 : vector<8x1xi32>
    %cst_286 = arith.constant 0.000000e+00 : f32
    %825 = vector.shape_cast %822 : vector<8x1xi1> to vector<8x1xi1>
    %826 = vector.broadcast %825 : vector<8x1xi1> to vector<8x32xi1>
    %827 = vector.broadcast %cst_286 : f32 to vector<8x32xf32>
    %828 = arith.select %826, %787, %827 : vector<8x32xi1>, vector<8x32xf32>
    %829 = arith.index_cast %746 : i32 to index
    %c0_287 = arith.constant 0 : index
    %830 = vector.load %arg6[%829, %c0_287] : memref<64x64xf32, #tpu.memory_space<vmem>>, vector<8x32xf32>
    tpu.vector_store %arg6[%829, %c0_287], %828 {strides = array<i32>} : memref<64x64xf32, #tpu.memory_space<vmem>>, vector<8x32xf32>,
    %cst_288 = arith.constant 0.000000e+00 : f32
    %831 = vector.shape_cast %824 : vector<8x1xi1> to vector<8x1xi1>
    %832 = vector.broadcast %831 : vector<8x1xi1> to vector<8x32xi1>
    %833 = vector.broadcast %cst_288 : f32 to vector<8x32xf32>
    %834 = arith.select %832, %820, %833 : vector<8x32xi1>, vector<8x32xf32>
    %835 = arith.index_cast %748 : i32 to index
    %c32_289 = arith.constant 32 : index
    %836 = vector.load %arg6[%835, %c32_289] : memref<64x64xf32, #tpu.memory_space<vmem>>, vector<8x32xf32>
    tpu.vector_store %arg6[%835, %c32_289], %834 {strides = array<i32>} : memref<64x64xf32, #tpu.memory_space<vmem>>, vector<8x32xf32>,
    %837 = vector.shape_cast %822 : vector<8x1xi1> to vector<8x1xi1>
    %838 = vector.broadcast %837 : vector<8x1xi1> to vector<8x32xi1>
    %839 = arith.select %838, %787, %740 : vector<8x32xi1>, vector<8x32xf32>
    %840 = vector.shape_cast %824 : vector<8x1xi1> to vector<8x1xi1>
    %841 = vector.broadcast %840 : vector<8x1xi1> to vector<8x32xi1>
    %842 = arith.select %841, %820, %743 : vector<8x32xi1>, vector<8x32xf32>
    %c8_i32_290 = arith.constant 8 : i32
    %c0_291 = arith.constant 0 : index
    %c0_292 = arith.constant 0 : index
    %843 = vector.load %arg7[%c0_291, %c0_292] : memref<16x32xf32, #tpu.memory_space<vmem>>, vector<8x32xf32>
    tpu.vector_store %arg7[%c0_291, %c0_292], %839 {strides = array<i32>} : memref<16x32xf32, #tpu.memory_space<vmem>>, vector<8x32xf32>,
    %c8 = arith.constant 8 : index
    %c0_293 = arith.constant 0 : index
    %844 = vector.load %arg7[%c8, %c0_293] : memref<16x32xf32, #tpu.memory_space<vmem>>, vector<8x32xf32>
    tpu.vector_store %arg7[%c8, %c0_293], %842 {strides = array<i32>} : memref<16x32xf32, #tpu.memory_space<vmem>>, vector<8x32xf32>,
    return
  }
}

module attributes {stable_mosaic.version = 11 : i64} {
  func.func @bigru_fused_kernel(%arg0: memref<8x1xi32, #tpu.memory_space<vmem>>, %arg1: memref<64x64xf32, #tpu.memory_space<vmem>>, %arg2: memref<384x32xf32, #tpu.memory_space<vmem>>, %arg3: memref<192x32xf32, #tpu.memory_space<vmem>>, %arg4: memref<6x32xf32, #tpu.memory_space<vmem>>, %arg5: memref<2x32xf32, #tpu.memory_space<vmem>>, %arg6: memref<64x64xf32, #tpu.memory_space<vmem>>, %arg7: memref<16x32xf32, #tpu.memory_space<vmem>>, %arg8: memref<384x32xf32, #tpu.memory_space<vmem>>) attributes {dimension_semantics = [], scalar_prefetch = 0 : i64, scratch_operands = 1 : i64, tpu.core_type = #tpu.core_type<tc>} {
    %c0 = arith.constant 0 : index
    %c0_0 = arith.constant 0 : index
    %0 = vector.load %arg1[%c0, %c0_0] : memref<64x64xf32, #tpu.memory_space<vmem>>, vector<64x64xf32>
    %c0_1 = arith.constant 0 : index
    %c0_2 = arith.constant 0 : index
    %1 = vector.load %arg2[%c0_1, %c0_2] : memref<384x32xf32, #tpu.memory_space<vmem>>, vector<64x32xf32>
    %cst = arith.constant dense<0.000000e+00> : vector<64x32xf32>
    %2 = tpu.matmul %0, %1, %cst {dimension_numbers = #tpu.dot_dimension_numbers<[1], [0], [0], [1], [0, 0, 1, 1], [], []>} : vector<64x64xf32>, vector<64x32xf32>, vector<64x32xf32> -> vector<64x32xf32>
    %c0_3 = arith.constant 0 : index
    %c0_4 = arith.constant 0 : index
    %3 = vector.load %arg4[%c0_3, %c0_4] : memref<6x32xf32, #tpu.memory_space<vmem>>, vector<1x32xf32>
    %4 = vector.broadcast %3 : vector<1x32xf32> to vector<64x32xf32>
    %5 = arith.addf %2, %4 : vector<64x32xf32>
    %c0_5 = arith.constant 0 : index
    %c0_6 = arith.constant 0 : index
    %6 = vector.load %arg8[%c0_5, %c0_6] : memref<384x32xf32, #tpu.memory_space<vmem>>, vector<64x32xf32>
    tpu.vector_store %arg8[%c0_5, %c0_6], %5 {strides = array<i32>} : memref<384x32xf32, #tpu.memory_space<vmem>>, vector<64x32xf32>,
    %c64 = arith.constant 64 : index
    %c0_7 = arith.constant 0 : index
    %7 = vector.load %arg2[%c64, %c0_7] : memref<384x32xf32, #tpu.memory_space<vmem>>, vector<64x32xf32>
    %cst_8 = arith.constant dense<0.000000e+00> : vector<64x32xf32>
    %8 = tpu.matmul %0, %7, %cst_8 {dimension_numbers = #tpu.dot_dimension_numbers<[1], [0], [0], [1], [0, 0, 1, 1], [], []>} : vector<64x64xf32>, vector<64x32xf32>, vector<64x32xf32> -> vector<64x32xf32>
    %c1 = arith.constant 1 : index
    %c0_9 = arith.constant 0 : index
    %9 = vector.load %arg4[%c1, %c0_9] : memref<6x32xf32, #tpu.memory_space<vmem>>, vector<1x32xf32>
    %10 = vector.broadcast %9 : vector<1x32xf32> to vector<64x32xf32>
    %11 = arith.addf %8, %10 : vector<64x32xf32>
    %c64_10 = arith.constant 64 : index
    %c0_11 = arith.constant 0 : index
    %12 = vector.load %arg8[%c64_10, %c0_11] : memref<384x32xf32, #tpu.memory_space<vmem>>, vector<64x32xf32>
    tpu.vector_store %arg8[%c64_10, %c0_11], %11 {strides = array<i32>} : memref<384x32xf32, #tpu.memory_space<vmem>>, vector<64x32xf32>,
    %c128 = arith.constant 128 : index
    %c0_12 = arith.constant 0 : index
    %13 = vector.load %arg2[%c128, %c0_12] : memref<384x32xf32, #tpu.memory_space<vmem>>, vector<64x32xf32>
    %cst_13 = arith.constant dense<0.000000e+00> : vector<64x32xf32>
    %14 = tpu.matmul %0, %13, %cst_13 {dimension_numbers = #tpu.dot_dimension_numbers<[1], [0], [0], [1], [0, 0, 1, 1], [], []>} : vector<64x64xf32>, vector<64x32xf32>, vector<64x32xf32> -> vector<64x32xf32>
    %c2 = arith.constant 2 : index
    %c0_14 = arith.constant 0 : index
    %15 = vector.load %arg4[%c2, %c0_14] : memref<6x32xf32, #tpu.memory_space<vmem>>, vector<1x32xf32>
    %16 = vector.broadcast %15 : vector<1x32xf32> to vector<64x32xf32>
    %17 = arith.addf %14, %16 : vector<64x32xf32>
    %c128_15 = arith.constant 128 : index
    %c0_16 = arith.constant 0 : index
    %18 = vector.load %arg8[%c128_15, %c0_16] : memref<384x32xf32, #tpu.memory_space<vmem>>, vector<64x32xf32>
    tpu.vector_store %arg8[%c128_15, %c0_16], %17 {strides = array<i32>} : memref<384x32xf32, #tpu.memory_space<vmem>>, vector<64x32xf32>,
    %c192 = arith.constant 192 : index
    %c0_17 = arith.constant 0 : index
    %19 = vector.load %arg2[%c192, %c0_17] : memref<384x32xf32, #tpu.memory_space<vmem>>, vector<64x32xf32>
    %cst_18 = arith.constant dense<0.000000e+00> : vector<64x32xf32>
    %20 = tpu.matmul %0, %19, %cst_18 {dimension_numbers = #tpu.dot_dimension_numbers<[1], [0], [0], [1], [0, 0, 1, 1], [], []>} : vector<64x64xf32>, vector<64x32xf32>, vector<64x32xf32> -> vector<64x32xf32>
    %c3 = arith.constant 3 : index
    %c0_19 = arith.constant 0 : index
    %21 = vector.load %arg4[%c3, %c0_19] : memref<6x32xf32, #tpu.memory_space<vmem>>, vector<1x32xf32>
    %22 = vector.broadcast %21 : vector<1x32xf32> to vector<64x32xf32>
    %23 = arith.addf %20, %22 : vector<64x32xf32>
    %c192_20 = arith.constant 192 : index
    %c0_21 = arith.constant 0 : index
    %24 = vector.load %arg8[%c192_20, %c0_21] : memref<384x32xf32, #tpu.memory_space<vmem>>, vector<64x32xf32>
    tpu.vector_store %arg8[%c192_20, %c0_21], %23 {strides = array<i32>} : memref<384x32xf32, #tpu.memory_space<vmem>>, vector<64x32xf32>,
    %c256 = arith.constant 256 : index
    %c0_22 = arith.constant 0 : index
    %25 = vector.load %arg2[%c256, %c0_22] : memref<384x32xf32, #tpu.memory_space<vmem>>, vector<64x32xf32>
    %cst_23 = arith.constant dense<0.000000e+00> : vector<64x32xf32>
    %26 = tpu.matmul %0, %25, %cst_23 {dimension_numbers = #tpu.dot_dimension_numbers<[1], [0], [0], [1], [0, 0, 1, 1], [], []>} : vector<64x64xf32>, vector<64x32xf32>, vector<64x32xf32> -> vector<64x32xf32>
    %c4 = arith.constant 4 : index
    %c0_24 = arith.constant 0 : index
    %27 = vector.load %arg4[%c4, %c0_24] : memref<6x32xf32, #tpu.memory_space<vmem>>, vector<1x32xf32>
    %28 = vector.broadcast %27 : vector<1x32xf32> to vector<64x32xf32>
    %29 = arith.addf %26, %28 : vector<64x32xf32>
    %c256_25 = arith.constant 256 : index
    %c0_26 = arith.constant 0 : index
    %30 = vector.load %arg8[%c256_25, %c0_26] : memref<384x32xf32, #tpu.memory_space<vmem>>, vector<64x32xf32>
    tpu.vector_store %arg8[%c256_25, %c0_26], %29 {strides = array<i32>} : memref<384x32xf32, #tpu.memory_space<vmem>>, vector<64x32xf32>,
    %c320 = arith.constant 320 : index
    %c0_27 = arith.constant 0 : index
    %31 = vector.load %arg2[%c320, %c0_27] : memref<384x32xf32, #tpu.memory_space<vmem>>, vector<64x32xf32>
    %cst_28 = arith.constant dense<0.000000e+00> : vector<64x32xf32>
    %32 = tpu.matmul %0, %31, %cst_28 {dimension_numbers = #tpu.dot_dimension_numbers<[1], [0], [0], [1], [0, 0, 1, 1], [], []>} : vector<64x64xf32>, vector<64x32xf32>, vector<64x32xf32> -> vector<64x32xf32>
    %c5 = arith.constant 5 : index
    %c0_29 = arith.constant 0 : index
    %33 = vector.load %arg4[%c5, %c0_29] : memref<6x32xf32, #tpu.memory_space<vmem>>, vector<1x32xf32>
    %34 = vector.broadcast %33 : vector<1x32xf32> to vector<64x32xf32>
    %35 = arith.addf %32, %34 : vector<64x32xf32>
    %c320_30 = arith.constant 320 : index
    %c0_31 = arith.constant 0 : index
    %36 = vector.load %arg8[%c320_30, %c0_31] : memref<384x32xf32, #tpu.memory_space<vmem>>, vector<64x32xf32>
    tpu.vector_store %arg8[%c320_30, %c0_31], %35 {strides = array<i32>} : memref<384x32xf32, #tpu.memory_space<vmem>>, vector<64x32xf32>,
    %c0_32 = arith.constant 0 : index
    %c0_33 = arith.constant 0 : index
    %37 = vector.load %arg3[%c0_32, %c0_33] : memref<192x32xf32, #tpu.memory_space<vmem>>, vector<32x32xf32>
    %c32 = arith.constant 32 : index
    %c0_34 = arith.constant 0 : index
    %38 = vector.load %arg3[%c32, %c0_34] : memref<192x32xf32, #tpu.memory_space<vmem>>, vector<32x32xf32>
    %c64_35 = arith.constant 64 : index
    %c0_36 = arith.constant 0 : index
    %39 = vector.load %arg3[%c64_35, %c0_36] : memref<192x32xf32, #tpu.memory_space<vmem>>, vector<32x32xf32>
    %c96 = arith.constant 96 : index
    %c0_37 = arith.constant 0 : index
    %40 = vector.load %arg3[%c96, %c0_37] : memref<192x32xf32, #tpu.memory_space<vmem>>, vector<32x32xf32>
    %c128_38 = arith.constant 128 : index
    %c0_39 = arith.constant 0 : index
    %41 = vector.load %arg3[%c128_38, %c0_39] : memref<192x32xf32, #tpu.memory_space<vmem>>, vector<32x32xf32>
    %c160 = arith.constant 160 : index
    %c0_40 = arith.constant 0 : index
    %42 = vector.load %arg3[%c160, %c0_40] : memref<192x32xf32, #tpu.memory_space<vmem>>, vector<32x32xf32>
    %c0_41 = arith.constant 0 : index
    %c0_42 = arith.constant 0 : index
    %43 = vector.load %arg5[%c0_41, %c0_42] : memref<2x32xf32, #tpu.memory_space<vmem>>, vector<1x32xf32>
    %44 = vector.shape_cast %43 : vector<1x32xf32> to vector<1x32xf32>
    %45 = vector.broadcast %44 : vector<1x32xf32> to vector<8x32xf32>
    %c1_43 = arith.constant 1 : index
    %c0_44 = arith.constant 0 : index
    %46 = vector.load %arg5[%c1_43, %c0_44] : memref<2x32xf32, #tpu.memory_space<vmem>>, vector<1x32xf32>
    %47 = vector.shape_cast %46 : vector<1x32xf32> to vector<1x32xf32>
    %48 = vector.broadcast %47 : vector<1x32xf32> to vector<8x32xf32>
    %c0_45 = arith.constant 0 : index
    %c0_46 = arith.constant 0 : index
    %49 = vector.load %arg0[%c0_45, %c0_46] : memref<8x1xi32, #tpu.memory_space<vmem>>, vector<8x1xi32>
    %cst_47 = arith.constant 0.000000e+00 : f32
    %50 = vector.broadcast %cst_47 : f32 to vector<8x32xf32>
    %c0_i32 = arith.constant 0 : i32
    %c7_i32 = arith.constant 7 : i32
    %51 = arith.subi %c7_i32, %c0_i32 : i32
    %c8_i32 = arith.constant 8 : i32
    %52 = arith.muli %c0_i32, %c8_i32 : i32
    %53 = tpu.assume_multiple %52, 8 : i32
    %c8_i32_48 = arith.constant 8 : i32
    %54 = arith.muli %51, %c8_i32_48 : i32
    %55 = tpu.assume_multiple %54, 8 : i32
    %cst_49 = arith.constant dense<0.000000e+00> : vector<8x32xf32>
    %56 = tpu.matmul %50, %37, %cst_49 {dimension_numbers = #tpu.dot_dimension_numbers<[1], [0], [0], [1], [0, 0, 1, 1], [], []>} : vector<8x32xf32>, vector<32x32xf32>, vector<8x32xf32> -> vector<8x32xf32>
    %cst_50 = arith.constant dense<0.000000e+00> : vector<8x32xf32>
    %57 = tpu.matmul %50, %38, %cst_50 {dimension_numbers = #tpu.dot_dimension_numbers<[1], [0], [0], [1], [0, 0, 1, 1], [], []>} : vector<8x32xf32>, vector<32x32xf32>, vector<8x32xf32> -> vector<8x32xf32>
    %cst_51 = arith.constant dense<0.000000e+00> : vector<8x32xf32>
    %58 = tpu.matmul %50, %39, %cst_51 {dimension_numbers = #tpu.dot_dimension_numbers<[1], [0], [0], [1], [0, 0, 1, 1], [], []>} : vector<8x32xf32>, vector<32x32xf32>, vector<8x32xf32> -> vector<8x32xf32>
    %cst_52 = arith.constant dense<0.000000e+00> : vector<8x32xf32>
    %59 = tpu.matmul %50, %40, %cst_52 {dimension_numbers = #tpu.dot_dimension_numbers<[1], [0], [0], [1], [0, 0, 1, 1], [], []>} : vector<8x32xf32>, vector<32x32xf32>, vector<8x32xf32> -> vector<8x32xf32>
    %cst_53 = arith.constant dense<0.000000e+00> : vector<8x32xf32>
    %60 = tpu.matmul %50, %41, %cst_53 {dimension_numbers = #tpu.dot_dimension_numbers<[1], [0], [0], [1], [0, 0, 1, 1], [], []>} : vector<8x32xf32>, vector<32x32xf32>, vector<8x32xf32> -> vector<8x32xf32>
    %cst_54 = arith.constant dense<0.000000e+00> : vector<8x32xf32>
    %61 = tpu.matmul %50, %42, %cst_54 {dimension_numbers = #tpu.dot_dimension_numbers<[1], [0], [0], [1], [0, 0, 1, 1], [], []>} : vector<8x32xf32>, vector<32x32xf32>, vector<8x32xf32> -> vector<8x32xf32>
    %c0_i32_55 = arith.constant 0 : i32
    %62 = arith.addi %c0_i32_55, %53 : i32
    %63 = tpu.assume_multiple %62, 8 : i32
    %64 = arith.index_cast %63 : i32 to index
    %c0_56 = arith.constant 0 : index
    %65 = vector.load %arg8[%64, %c0_56] : memref<384x32xf32, #tpu.memory_space<vmem>>, vector<8x32xf32>
    %66 = arith.addf %65, %56 : vector<8x32xf32>
    %67 = arith.negf %66 : vector<8x32xf32>
    %68 = math.exp %67 : vector<8x32xf32>
    %cst_57 = arith.constant 1.000000e+00 : f32
    %69 = vector.broadcast %cst_57 : f32 to vector<8x32xf32>
    %70 = arith.addf %69, %68 : vector<8x32xf32>
    %71 = arith.divf %69, %70 : vector<8x32xf32>
    %c64_i32 = arith.constant 64 : i32
    %72 = arith.addi %c64_i32, %53 : i32
    %73 = tpu.assume_multiple %72, 8 : i32
    %74 = arith.index_cast %73 : i32 to index
    %c0_58 = arith.constant 0 : index
    %75 = vector.load %arg8[%74, %c0_58] : memref<384x32xf32, #tpu.memory_space<vmem>>, vector<8x32xf32>
    %76 = arith.addf %75, %57 : vector<8x32xf32>
    %77 = arith.negf %76 : vector<8x32xf32>
    %78 = math.exp %77 : vector<8x32xf32>
    %cst_59 = arith.constant 1.000000e+00 : f32
    %79 = vector.broadcast %cst_59 : f32 to vector<8x32xf32>
    %80 = arith.addf %79, %78 : vector<8x32xf32>
    %81 = arith.divf %79, %80 : vector<8x32xf32>
    %c128_i32 = arith.constant 128 : i32
    %82 = arith.addi %c128_i32, %53 : i32
    %83 = tpu.assume_multiple %82, 8 : i32
    %84 = arith.index_cast %83 : i32 to index
    %c0_60 = arith.constant 0 : index
    %85 = vector.load %arg8[%84, %c0_60] : memref<384x32xf32, #tpu.memory_space<vmem>>, vector<8x32xf32>
    %86 = arith.addf %58, %45 : vector<8x32xf32>
    %87 = arith.mulf %71, %86 : vector<8x32xf32>
    %88 = arith.addf %85, %87 : vector<8x32xf32>
    %89 = math.tanh %88 : vector<8x32xf32>
    %cst_61 = arith.constant 1.000000e+00 : f32
    %90 = vector.broadcast %cst_61 : f32 to vector<8x32xf32>
    %91 = arith.subf %90, %81 : vector<8x32xf32>
    %92 = arith.mulf %91, %89 : vector<8x32xf32>
    %93 = arith.mulf %81, %50 : vector<8x32xf32>
    %94 = arith.addf %92, %93 : vector<8x32xf32>
    %c192_i32 = arith.constant 192 : i32
    %95 = arith.addi %c192_i32, %55 : i32
    %96 = tpu.assume_multiple %95, 8 : i32
    %97 = arith.index_cast %96 : i32 to index
    %c0_62 = arith.constant 0 : index
    %98 = vector.load %arg8[%97, %c0_62] : memref<384x32xf32, #tpu.memory_space<vmem>>, vector<8x32xf32>
    %99 = arith.addf %98, %59 : vector<8x32xf32>
    %100 = arith.negf %99 : vector<8x32xf32>
    %101 = math.exp %100 : vector<8x32xf32>
    %cst_63 = arith.constant 1.000000e+00 : f32
    %102 = vector.broadcast %cst_63 : f32 to vector<8x32xf32>
    %103 = arith.addf %102, %101 : vector<8x32xf32>
    %104 = arith.divf %102, %103 : vector<8x32xf32>
    %c256_i32 = arith.constant 256 : i32
    %105 = arith.addi %c256_i32, %55 : i32
    %106 = tpu.assume_multiple %105, 8 : i32
    %107 = arith.index_cast %106 : i32 to index
    %c0_64 = arith.constant 0 : index
    %108 = vector.load %arg8[%107, %c0_64] : memref<384x32xf32, #tpu.memory_space<vmem>>, vector<8x32xf32>
    %109 = arith.addf %108, %60 : vector<8x32xf32>
    %110 = arith.negf %109 : vector<8x32xf32>
    %111 = math.exp %110 : vector<8x32xf32>
    %cst_65 = arith.constant 1.000000e+00 : f32
    %112 = vector.broadcast %cst_65 : f32 to vector<8x32xf32>
    %113 = arith.addf %112, %111 : vector<8x32xf32>
    %114 = arith.divf %112, %113 : vector<8x32xf32>
    %c320_i32 = arith.constant 320 : i32
    %115 = arith.addi %c320_i32, %55 : i32
    %116 = tpu.assume_multiple %115, 8 : i32
    %117 = arith.index_cast %116 : i32 to index
    %c0_66 = arith.constant 0 : index
    %118 = vector.load %arg8[%117, %c0_66] : memref<384x32xf32, #tpu.memory_space<vmem>>, vector<8x32xf32>
    %119 = arith.addf %61, %48 : vector<8x32xf32>
    %120 = arith.mulf %104, %119 : vector<8x32xf32>
    %121 = arith.addf %118, %120 : vector<8x32xf32>
    %122 = math.tanh %121 : vector<8x32xf32>
    %cst_67 = arith.constant 1.000000e+00 : f32
    %123 = vector.broadcast %cst_67 : f32 to vector<8x32xf32>
    %124 = arith.subf %123, %114 : vector<8x32xf32>
    %125 = arith.mulf %124, %122 : vector<8x32xf32>
    %126 = arith.mulf %114, %50 : vector<8x32xf32>
    %127 = arith.addf %125, %126 : vector<8x32xf32>
    %128 = vector.broadcast %c0_i32 : i32 to vector<8x1xi32>
    %129 = arith.cmpi sgt, %49, %128 : vector<8x1xi32>
    %130 = vector.broadcast %51 : i32 to vector<8x1xi32>
    %131 = arith.cmpi sgt, %49, %130 : vector<8x1xi32>
    %cst_68 = arith.constant 0.000000e+00 : f32
    %132 = vector.shape_cast %129 : vector<8x1xi1> to vector<8x1xi1>
    %133 = vector.broadcast %132 : vector<8x1xi1> to vector<8x32xi1>
    %134 = vector.broadcast %cst_68 : f32 to vector<8x32xf32>
    %135 = arith.select %133, %94, %134 : vector<8x32xi1>, vector<8x32xf32>
    %136 = arith.index_cast %53 : i32 to index
    %c0_69 = arith.constant 0 : index
    %137 = vector.load %arg6[%136, %c0_69] : memref<64x64xf32, #tpu.memory_space<vmem>>, vector<8x32xf32>
    tpu.vector_store %arg6[%136, %c0_69], %135 {strides = array<i32>} : memref<64x64xf32, #tpu.memory_space<vmem>>, vector<8x32xf32>,
    %cst_70 = arith.constant 0.000000e+00 : f32
    %138 = vector.shape_cast %131 : vector<8x1xi1> to vector<8x1xi1>
    %139 = vector.broadcast %138 : vector<8x1xi1> to vector<8x32xi1>
    %140 = vector.broadcast %cst_70 : f32 to vector<8x32xf32>
    %141 = arith.select %139, %127, %140 : vector<8x32xi1>, vector<8x32xf32>
    %142 = arith.index_cast %55 : i32 to index
    %c32_71 = arith.constant 32 : index
    %143 = vector.load %arg6[%142, %c32_71] : memref<64x64xf32, #tpu.memory_space<vmem>>, vector<8x32xf32>
    tpu.vector_store %arg6[%142, %c32_71], %141 {strides = array<i32>} : memref<64x64xf32, #tpu.memory_space<vmem>>, vector<8x32xf32>,
    %144 = vector.shape_cast %129 : vector<8x1xi1> to vector<8x1xi1>
    %145 = vector.broadcast %144 : vector<8x1xi1> to vector<8x32xi1>
    %146 = arith.select %145, %94, %50 : vector<8x32xi1>, vector<8x32xf32>
    %147 = vector.shape_cast %131 : vector<8x1xi1> to vector<8x1xi1>
    %148 = vector.broadcast %147 : vector<8x1xi1> to vector<8x32xi1>
    %149 = arith.select %148, %127, %50 : vector<8x32xi1>, vector<8x32xf32>
    %c1_i32 = arith.constant 1 : i32
    %c7_i32_72 = arith.constant 7 : i32
    %150 = arith.subi %c7_i32_72, %c1_i32 : i32
    %c8_i32_73 = arith.constant 8 : i32
    %151 = arith.muli %c1_i32, %c8_i32_73 : i32
    %152 = tpu.assume_multiple %151, 8 : i32
    %c8_i32_74 = arith.constant 8 : i32
    %153 = arith.muli %150, %c8_i32_74 : i32
    %154 = tpu.assume_multiple %153, 8 : i32
    %cst_75 = arith.constant dense<0.000000e+00> : vector<8x32xf32>
    %155 = tpu.matmul %146, %37, %cst_75 {dimension_numbers = #tpu.dot_dimension_numbers<[1], [0], [0], [1], [0, 0, 1, 1], [], []>} : vector<8x32xf32>, vector<32x32xf32>, vector<8x32xf32> -> vector<8x32xf32>
    %cst_76 = arith.constant dense<0.000000e+00> : vector<8x32xf32>
    %156 = tpu.matmul %146, %38, %cst_76 {dimension_numbers = #tpu.dot_dimension_numbers<[1], [0], [0], [1], [0, 0, 1, 1], [], []>} : vector<8x32xf32>, vector<32x32xf32>, vector<8x32xf32> -> vector<8x32xf32>
    %cst_77 = arith.constant dense<0.000000e+00> : vector<8x32xf32>
    %157 = tpu.matmul %146, %39, %cst_77 {dimension_numbers = #tpu.dot_dimension_numbers<[1], [0], [0], [1], [0, 0, 1, 1], [], []>} : vector<8x32xf32>, vector<32x32xf32>, vector<8x32xf32> -> vector<8x32xf32>
    %cst_78 = arith.constant dense<0.000000e+00> : vector<8x32xf32>
    %158 = tpu.matmul %149, %40, %cst_78 {dimension_numbers = #tpu.dot_dimension_numbers<[1], [0], [0], [1], [0, 0, 1, 1], [], []>} : vector<8x32xf32>, vector<32x32xf32>, vector<8x32xf32> -> vector<8x32xf32>
    %cst_79 = arith.constant dense<0.000000e+00> : vector<8x32xf32>
    %159 = tpu.matmul %149, %41, %cst_79 {dimension_numbers = #tpu.dot_dimension_numbers<[1], [0], [0], [1], [0, 0, 1, 1], [], []>} : vector<8x32xf32>, vector<32x32xf32>, vector<8x32xf32> -> vector<8x32xf32>
    %cst_80 = arith.constant dense<0.000000e+00> : vector<8x32xf32>
    %160 = tpu.matmul %149, %42, %cst_80 {dimension_numbers = #tpu.dot_dimension_numbers<[1], [0], [0], [1], [0, 0, 1, 1], [], []>} : vector<8x32xf32>, vector<32x32xf32>, vector<8x32xf32> -> vector<8x32xf32>
    %c0_i32_81 = arith.constant 0 : i32
    %161 = arith.addi %c0_i32_81, %152 : i32
    %162 = tpu.assume_multiple %161, 8 : i32
    %163 = arith.index_cast %162 : i32 to index
    %c0_82 = arith.constant 0 : index
    %164 = vector.load %arg8[%163, %c0_82] : memref<384x32xf32, #tpu.memory_space<vmem>>, vector<8x32xf32>
    %165 = arith.addf %164, %155 : vector<8x32xf32>
    %166 = arith.negf %165 : vector<8x32xf32>
    %167 = math.exp %166 : vector<8x32xf32>
    %cst_83 = arith.constant 1.000000e+00 : f32
    %168 = vector.broadcast %cst_83 : f32 to vector<8x32xf32>
    %169 = arith.addf %168, %167 : vector<8x32xf32>
    %170 = arith.divf %168, %169 : vector<8x32xf32>
    %c64_i32_84 = arith.constant 64 : i32
    %171 = arith.addi %c64_i32_84, %152 : i32
    %172 = tpu.assume_multiple %171, 8 : i32
    %173 = arith.index_cast %172 : i32 to index
    %c0_85 = arith.constant 0 : index
    %174 = vector.load %arg8[%173, %c0_85] : memref<384x32xf32, #tpu.memory_space<vmem>>, vector<8x32xf32>
    %175 = arith.addf %174, %156 : vector<8x32xf32>
    %176 = arith.negf %175 : vector<8x32xf32>
    %177 = math.exp %176 : vector<8x32xf32>
    %cst_86 = arith.constant 1.000000e+00 : f32
    %178 = vector.broadcast %cst_86 : f32 to vector<8x32xf32>
    %179 = arith.addf %178, %177 : vector<8x32xf32>
    %180 = arith.divf %178, %179 : vector<8x32xf32>
    %c128_i32_87 = arith.constant 128 : i32
    %181 = arith.addi %c128_i32_87, %152 : i32
    %182 = tpu.assume_multiple %181, 8 : i32
    %183 = arith.index_cast %182 : i32 to index
    %c0_88 = arith.constant 0 : index
    %184 = vector.load %arg8[%183, %c0_88] : memref<384x32xf32, #tpu.memory_space<vmem>>, vector<8x32xf32>
    %185 = arith.addf %157, %45 : vector<8x32xf32>
    %186 = arith.mulf %170, %185 : vector<8x32xf32>
    %187 = arith.addf %184, %186 : vector<8x32xf32>
    %188 = math.tanh %187 : vector<8x32xf32>
    %cst_89 = arith.constant 1.000000e+00 : f32
    %189 = vector.broadcast %cst_89 : f32 to vector<8x32xf32>
    %190 = arith.subf %189, %180 : vector<8x32xf32>
    %191 = arith.mulf %190, %188 : vector<8x32xf32>
    %192 = arith.mulf %180, %146 : vector<8x32xf32>
    %193 = arith.addf %191, %192 : vector<8x32xf32>
    %c192_i32_90 = arith.constant 192 : i32
    %194 = arith.addi %c192_i32_90, %154 : i32
    %195 = tpu.assume_multiple %194, 8 : i32
    %196 = arith.index_cast %195 : i32 to index
    %c0_91 = arith.constant 0 : index
    %197 = vector.load %arg8[%196, %c0_91] : memref<384x32xf32, #tpu.memory_space<vmem>>, vector<8x32xf32>
    %198 = arith.addf %197, %158 : vector<8x32xf32>
    %199 = arith.negf %198 : vector<8x32xf32>
    %200 = math.exp %199 : vector<8x32xf32>
    %cst_92 = arith.constant 1.000000e+00 : f32
    %201 = vector.broadcast %cst_92 : f32 to vector<8x32xf32>
    %202 = arith.addf %201, %200 : vector<8x32xf32>
    %203 = arith.divf %201, %202 : vector<8x32xf32>
    %c256_i32_93 = arith.constant 256 : i32
    %204 = arith.addi %c256_i32_93, %154 : i32
    %205 = tpu.assume_multiple %204, 8 : i32
    %206 = arith.index_cast %205 : i32 to index
    %c0_94 = arith.constant 0 : index
    %207 = vector.load %arg8[%206, %c0_94] : memref<384x32xf32, #tpu.memory_space<vmem>>, vector<8x32xf32>
    %208 = arith.addf %207, %159 : vector<8x32xf32>
    %209 = arith.negf %208 : vector<8x32xf32>
    %210 = math.exp %209 : vector<8x32xf32>
    %cst_95 = arith.constant 1.000000e+00 : f32
    %211 = vector.broadcast %cst_95 : f32 to vector<8x32xf32>
    %212 = arith.addf %211, %210 : vector<8x32xf32>
    %213 = arith.divf %211, %212 : vector<8x32xf32>
    %c320_i32_96 = arith.constant 320 : i32
    %214 = arith.addi %c320_i32_96, %154 : i32
    %215 = tpu.assume_multiple %214, 8 : i32
    %216 = arith.index_cast %215 : i32 to index
    %c0_97 = arith.constant 0 : index
    %217 = vector.load %arg8[%216, %c0_97] : memref<384x32xf32, #tpu.memory_space<vmem>>, vector<8x32xf32>
    %218 = arith.addf %160, %48 : vector<8x32xf32>
    %219 = arith.mulf %203, %218 : vector<8x32xf32>
    %220 = arith.addf %217, %219 : vector<8x32xf32>
    %221 = math.tanh %220 : vector<8x32xf32>
    %cst_98 = arith.constant 1.000000e+00 : f32
    %222 = vector.broadcast %cst_98 : f32 to vector<8x32xf32>
    %223 = arith.subf %222, %213 : vector<8x32xf32>
    %224 = arith.mulf %223, %221 : vector<8x32xf32>
    %225 = arith.mulf %213, %149 : vector<8x32xf32>
    %226 = arith.addf %224, %225 : vector<8x32xf32>
    %227 = vector.broadcast %c1_i32 : i32 to vector<8x1xi32>
    %228 = arith.cmpi sgt, %49, %227 : vector<8x1xi32>
    %229 = vector.broadcast %150 : i32 to vector<8x1xi32>
    %230 = arith.cmpi sgt, %49, %229 : vector<8x1xi32>
    %cst_99 = arith.constant 0.000000e+00 : f32
    %231 = vector.shape_cast %228 : vector<8x1xi1> to vector<8x1xi1>
    %232 = vector.broadcast %231 : vector<8x1xi1> to vector<8x32xi1>
    %233 = vector.broadcast %cst_99 : f32 to vector<8x32xf32>
    %234 = arith.select %232, %193, %233 : vector<8x32xi1>, vector<8x32xf32>
    %235 = arith.index_cast %152 : i32 to index
    %c0_100 = arith.constant 0 : index
    %236 = vector.load %arg6[%235, %c0_100] : memref<64x64xf32, #tpu.memory_space<vmem>>, vector<8x32xf32>
    tpu.vector_store %arg6[%235, %c0_100], %234 {strides = array<i32>} : memref<64x64xf32, #tpu.memory_space<vmem>>, vector<8x32xf32>,
    %cst_101 = arith.constant 0.000000e+00 : f32
    %237 = vector.shape_cast %230 : vector<8x1xi1> to vector<8x1xi1>
    %238 = vector.broadcast %237 : vector<8x1xi1> to vector<8x32xi1>
    %239 = vector.broadcast %cst_101 : f32 to vector<8x32xf32>
    %240 = arith.select %238, %226, %239 : vector<8x32xi1>, vector<8x32xf32>
    %241 = arith.index_cast %154 : i32 to index
    %c32_102 = arith.constant 32 : index
    %242 = vector.load %arg6[%241, %c32_102] : memref<64x64xf32, #tpu.memory_space<vmem>>, vector<8x32xf32>
    tpu.vector_store %arg6[%241, %c32_102], %240 {strides = array<i32>} : memref<64x64xf32, #tpu.memory_space<vmem>>, vector<8x32xf32>,
    %243 = vector.shape_cast %228 : vector<8x1xi1> to vector<8x1xi1>
    %244 = vector.broadcast %243 : vector<8x1xi1> to vector<8x32xi1>
    %245 = arith.select %244, %193, %146 : vector<8x32xi1>, vector<8x32xf32>
    %246 = vector.shape_cast %230 : vector<8x1xi1> to vector<8x1xi1>
    %247 = vector.broadcast %246 : vector<8x1xi1> to vector<8x32xi1>
    %248 = arith.select %247, %226, %149 : vector<8x32xi1>, vector<8x32xf32>
    %c2_i32 = arith.constant 2 : i32
    %c7_i32_103 = arith.constant 7 : i32
    %249 = arith.subi %c7_i32_103, %c2_i32 : i32
    %c8_i32_104 = arith.constant 8 : i32
    %250 = arith.muli %c2_i32, %c8_i32_104 : i32
    %251 = tpu.assume_multiple %250, 8 : i32
    %c8_i32_105 = arith.constant 8 : i32
    %252 = arith.muli %249, %c8_i32_105 : i32
    %253 = tpu.assume_multiple %252, 8 : i32
    %cst_106 = arith.constant dense<0.000000e+00> : vector<8x32xf32>
    %254 = tpu.matmul %245, %37, %cst_106 {dimension_numbers = #tpu.dot_dimension_numbers<[1], [0], [0], [1], [0, 0, 1, 1], [], []>} : vector<8x32xf32>, vector<32x32xf32>, vector<8x32xf32> -> vector<8x32xf32>
    %cst_107 = arith.constant dense<0.000000e+00> : vector<8x32xf32>
    %255 = tpu.matmul %245, %38, %cst_107 {dimension_numbers = #tpu.dot_dimension_numbers<[1], [0], [0], [1], [0, 0, 1, 1], [], []>} : vector<8x32xf32>, vector<32x32xf32>, vector<8x32xf32> -> vector<8x32xf32>
    %cst_108 = arith.constant dense<0.000000e+00> : vector<8x32xf32>
    %256 = tpu.matmul %245, %39, %cst_108 {dimension_numbers = #tpu.dot_dimension_numbers<[1], [0], [0], [1], [0, 0, 1, 1], [], []>} : vector<8x32xf32>, vector<32x32xf32>, vector<8x32xf32> -> vector<8x32xf32>
    %cst_109 = arith.constant dense<0.000000e+00> : vector<8x32xf32>
    %257 = tpu.matmul %248, %40, %cst_109 {dimension_numbers = #tpu.dot_dimension_numbers<[1], [0], [0], [1], [0, 0, 1, 1], [], []>} : vector<8x32xf32>, vector<32x32xf32>, vector<8x32xf32> -> vector<8x32xf32>
    %cst_110 = arith.constant dense<0.000000e+00> : vector<8x32xf32>
    %258 = tpu.matmul %248, %41, %cst_110 {dimension_numbers = #tpu.dot_dimension_numbers<[1], [0], [0], [1], [0, 0, 1, 1], [], []>} : vector<8x32xf32>, vector<32x32xf32>, vector<8x32xf32> -> vector<8x32xf32>
    %cst_111 = arith.constant dense<0.000000e+00> : vector<8x32xf32>
    %259 = tpu.matmul %248, %42, %cst_111 {dimension_numbers = #tpu.dot_dimension_numbers<[1], [0], [0], [1], [0, 0, 1, 1], [], []>} : vector<8x32xf32>, vector<32x32xf32>, vector<8x32xf32> -> vector<8x32xf32>
    %c0_i32_112 = arith.constant 0 : i32
    %260 = arith.addi %c0_i32_112, %251 : i32
    %261 = tpu.assume_multiple %260, 8 : i32
    %262 = arith.index_cast %261 : i32 to index
    %c0_113 = arith.constant 0 : index
    %263 = vector.load %arg8[%262, %c0_113] : memref<384x32xf32, #tpu.memory_space<vmem>>, vector<8x32xf32>
    %264 = arith.addf %263, %254 : vector<8x32xf32>
    %265 = arith.negf %264 : vector<8x32xf32>
    %266 = math.exp %265 : vector<8x32xf32>
    %cst_114 = arith.constant 1.000000e+00 : f32
    %267 = vector.broadcast %cst_114 : f32 to vector<8x32xf32>
    %268 = arith.addf %267, %266 : vector<8x32xf32>
    %269 = arith.divf %267, %268 : vector<8x32xf32>
    %c64_i32_115 = arith.constant 64 : i32
    %270 = arith.addi %c64_i32_115, %251 : i32
    %271 = tpu.assume_multiple %270, 8 : i32
    %272 = arith.index_cast %271 : i32 to index
    %c0_116 = arith.constant 0 : index
    %273 = vector.load %arg8[%272, %c0_116] : memref<384x32xf32, #tpu.memory_space<vmem>>, vector<8x32xf32>
    %274 = arith.addf %273, %255 : vector<8x32xf32>
    %275 = arith.negf %274 : vector<8x32xf32>
    %276 = math.exp %275 : vector<8x32xf32>
    %cst_117 = arith.constant 1.000000e+00 : f32
    %277 = vector.broadcast %cst_117 : f32 to vector<8x32xf32>
    %278 = arith.addf %277, %276 : vector<8x32xf32>
    %279 = arith.divf %277, %278 : vector<8x32xf32>
    %c128_i32_118 = arith.constant 128 : i32
    %280 = arith.addi %c128_i32_118, %251 : i32
    %281 = tpu.assume_multiple %280, 8 : i32
    %282 = arith.index_cast %281 : i32 to index
    %c0_119 = arith.constant 0 : index
    %283 = vector.load %arg8[%282, %c0_119] : memref<384x32xf32, #tpu.memory_space<vmem>>, vector<8x32xf32>
    %284 = arith.addf %256, %45 : vector<8x32xf32>
    %285 = arith.mulf %269, %284 : vector<8x32xf32>
    %286 = arith.addf %283, %285 : vector<8x32xf32>
    %287 = math.tanh %286 : vector<8x32xf32>
    %cst_120 = arith.constant 1.000000e+00 : f32
    %288 = vector.broadcast %cst_120 : f32 to vector<8x32xf32>
    %289 = arith.subf %288, %279 : vector<8x32xf32>
    %290 = arith.mulf %289, %287 : vector<8x32xf32>
    %291 = arith.mulf %279, %245 : vector<8x32xf32>
    %292 = arith.addf %290, %291 : vector<8x32xf32>
    %c192_i32_121 = arith.constant 192 : i32
    %293 = arith.addi %c192_i32_121, %253 : i32
    %294 = tpu.assume_multiple %293, 8 : i32
    %295 = arith.index_cast %294 : i32 to index
    %c0_122 = arith.constant 0 : index
    %296 = vector.load %arg8[%295, %c0_122] : memref<384x32xf32, #tpu.memory_space<vmem>>, vector<8x32xf32>
    %297 = arith.addf %296, %257 : vector<8x32xf32>
    %298 = arith.negf %297 : vector<8x32xf32>
    %299 = math.exp %298 : vector<8x32xf32>
    %cst_123 = arith.constant 1.000000e+00 : f32
    %300 = vector.broadcast %cst_123 : f32 to vector<8x32xf32>
    %301 = arith.addf %300, %299 : vector<8x32xf32>
    %302 = arith.divf %300, %301 : vector<8x32xf32>
    %c256_i32_124 = arith.constant 256 : i32
    %303 = arith.addi %c256_i32_124, %253 : i32
    %304 = tpu.assume_multiple %303, 8 : i32
    %305 = arith.index_cast %304 : i32 to index
    %c0_125 = arith.constant 0 : index
    %306 = vector.load %arg8[%305, %c0_125] : memref<384x32xf32, #tpu.memory_space<vmem>>, vector<8x32xf32>
    %307 = arith.addf %306, %258 : vector<8x32xf32>
    %308 = arith.negf %307 : vector<8x32xf32>
    %309 = math.exp %308 : vector<8x32xf32>
    %cst_126 = arith.constant 1.000000e+00 : f32
    %310 = vector.broadcast %cst_126 : f32 to vector<8x32xf32>
    %311 = arith.addf %310, %309 : vector<8x32xf32>
    %312 = arith.divf %310, %311 : vector<8x32xf32>
    %c320_i32_127 = arith.constant 320 : i32
    %313 = arith.addi %c320_i32_127, %253 : i32
    %314 = tpu.assume_multiple %313, 8 : i32
    %315 = arith.index_cast %314 : i32 to index
    %c0_128 = arith.constant 0 : index
    %316 = vector.load %arg8[%315, %c0_128] : memref<384x32xf32, #tpu.memory_space<vmem>>, vector<8x32xf32>
    %317 = arith.addf %259, %48 : vector<8x32xf32>
    %318 = arith.mulf %302, %317 : vector<8x32xf32>
    %319 = arith.addf %316, %318 : vector<8x32xf32>
    %320 = math.tanh %319 : vector<8x32xf32>
    %cst_129 = arith.constant 1.000000e+00 : f32
    %321 = vector.broadcast %cst_129 : f32 to vector<8x32xf32>
    %322 = arith.subf %321, %312 : vector<8x32xf32>
    %323 = arith.mulf %322, %320 : vector<8x32xf32>
    %324 = arith.mulf %312, %248 : vector<8x32xf32>
    %325 = arith.addf %323, %324 : vector<8x32xf32>
    %326 = vector.broadcast %c2_i32 : i32 to vector<8x1xi32>
    %327 = arith.cmpi sgt, %49, %326 : vector<8x1xi32>
    %328 = vector.broadcast %249 : i32 to vector<8x1xi32>
    %329 = arith.cmpi sgt, %49, %328 : vector<8x1xi32>
    %cst_130 = arith.constant 0.000000e+00 : f32
    %330 = vector.shape_cast %327 : vector<8x1xi1> to vector<8x1xi1>
    %331 = vector.broadcast %330 : vector<8x1xi1> to vector<8x32xi1>
    %332 = vector.broadcast %cst_130 : f32 to vector<8x32xf32>
    %333 = arith.select %331, %292, %332 : vector<8x32xi1>, vector<8x32xf32>
    %334 = arith.index_cast %251 : i32 to index
    %c0_131 = arith.constant 0 : index
    %335 = vector.load %arg6[%334, %c0_131] : memref<64x64xf32, #tpu.memory_space<vmem>>, vector<8x32xf32>
    tpu.vector_store %arg6[%334, %c0_131], %333 {strides = array<i32>} : memref<64x64xf32, #tpu.memory_space<vmem>>, vector<8x32xf32>,
    %cst_132 = arith.constant 0.000000e+00 : f32
    %336 = vector.shape_cast %329 : vector<8x1xi1> to vector<8x1xi1>
    %337 = vector.broadcast %336 : vector<8x1xi1> to vector<8x32xi1>
    %338 = vector.broadcast %cst_132 : f32 to vector<8x32xf32>
    %339 = arith.select %337, %325, %338 : vector<8x32xi1>, vector<8x32xf32>
    %340 = arith.index_cast %253 : i32 to index
    %c32_133 = arith.constant 32 : index
    %341 = vector.load %arg6[%340, %c32_133] : memref<64x64xf32, #tpu.memory_space<vmem>>, vector<8x32xf32>
    tpu.vector_store %arg6[%340, %c32_133], %339 {strides = array<i32>} : memref<64x64xf32, #tpu.memory_space<vmem>>, vector<8x32xf32>,
    %342 = vector.shape_cast %327 : vector<8x1xi1> to vector<8x1xi1>
    %343 = vector.broadcast %342 : vector<8x1xi1> to vector<8x32xi1>
    %344 = arith.select %343, %292, %245 : vector<8x32xi1>, vector<8x32xf32>
    %345 = vector.shape_cast %329 : vector<8x1xi1> to vector<8x1xi1>
    %346 = vector.broadcast %345 : vector<8x1xi1> to vector<8x32xi1>
    %347 = arith.select %346, %325, %248 : vector<8x32xi1>, vector<8x32xf32>
    %c3_i32 = arith.constant 3 : i32
    %c7_i32_134 = arith.constant 7 : i32
    %348 = arith.subi %c7_i32_134, %c3_i32 : i32
    %c8_i32_135 = arith.constant 8 : i32
    %349 = arith.muli %c3_i32, %c8_i32_135 : i32
    %350 = tpu.assume_multiple %349, 8 : i32
    %c8_i32_136 = arith.constant 8 : i32
    %351 = arith.muli %348, %c8_i32_136 : i32
    %352 = tpu.assume_multiple %351, 8 : i32
    %cst_137 = arith.constant dense<0.000000e+00> : vector<8x32xf32>
    %353 = tpu.matmul %344, %37, %cst_137 {dimension_numbers = #tpu.dot_dimension_numbers<[1], [0], [0], [1], [0, 0, 1, 1], [], []>} : vector<8x32xf32>, vector<32x32xf32>, vector<8x32xf32> -> vector<8x32xf32>
    %cst_138 = arith.constant dense<0.000000e+00> : vector<8x32xf32>
    %354 = tpu.matmul %344, %38, %cst_138 {dimension_numbers = #tpu.dot_dimension_numbers<[1], [0], [0], [1], [0, 0, 1, 1], [], []>} : vector<8x32xf32>, vector<32x32xf32>, vector<8x32xf32> -> vector<8x32xf32>
    %cst_139 = arith.constant dense<0.000000e+00> : vector<8x32xf32>
    %355 = tpu.matmul %344, %39, %cst_139 {dimension_numbers = #tpu.dot_dimension_numbers<[1], [0], [0], [1], [0, 0, 1, 1], [], []>} : vector<8x32xf32>, vector<32x32xf32>, vector<8x32xf32> -> vector<8x32xf32>
    %cst_140 = arith.constant dense<0.000000e+00> : vector<8x32xf32>
    %356 = tpu.matmul %347, %40, %cst_140 {dimension_numbers = #tpu.dot_dimension_numbers<[1], [0], [0], [1], [0, 0, 1, 1], [], []>} : vector<8x32xf32>, vector<32x32xf32>, vector<8x32xf32> -> vector<8x32xf32>
    %cst_141 = arith.constant dense<0.000000e+00> : vector<8x32xf32>
    %357 = tpu.matmul %347, %41, %cst_141 {dimension_numbers = #tpu.dot_dimension_numbers<[1], [0], [0], [1], [0, 0, 1, 1], [], []>} : vector<8x32xf32>, vector<32x32xf32>, vector<8x32xf32> -> vector<8x32xf32>
    %cst_142 = arith.constant dense<0.000000e+00> : vector<8x32xf32>
    %358 = tpu.matmul %347, %42, %cst_142 {dimension_numbers = #tpu.dot_dimension_numbers<[1], [0], [0], [1], [0, 0, 1, 1], [], []>} : vector<8x32xf32>, vector<32x32xf32>, vector<8x32xf32> -> vector<8x32xf32>
    %c0_i32_143 = arith.constant 0 : i32
    %359 = arith.addi %c0_i32_143, %350 : i32
    %360 = tpu.assume_multiple %359, 8 : i32
    %361 = arith.index_cast %360 : i32 to index
    %c0_144 = arith.constant 0 : index
    %362 = vector.load %arg8[%361, %c0_144] : memref<384x32xf32, #tpu.memory_space<vmem>>, vector<8x32xf32>
    %363 = arith.addf %362, %353 : vector<8x32xf32>
    %364 = arith.negf %363 : vector<8x32xf32>
    %365 = math.exp %364 : vector<8x32xf32>
    %cst_145 = arith.constant 1.000000e+00 : f32
    %366 = vector.broadcast %cst_145 : f32 to vector<8x32xf32>
    %367 = arith.addf %366, %365 : vector<8x32xf32>
    %368 = arith.divf %366, %367 : vector<8x32xf32>
    %c64_i32_146 = arith.constant 64 : i32
    %369 = arith.addi %c64_i32_146, %350 : i32
    %370 = tpu.assume_multiple %369, 8 : i32
    %371 = arith.index_cast %370 : i32 to index
    %c0_147 = arith.constant 0 : index
    %372 = vector.load %arg8[%371, %c0_147] : memref<384x32xf32, #tpu.memory_space<vmem>>, vector<8x32xf32>
    %373 = arith.addf %372, %354 : vector<8x32xf32>
    %374 = arith.negf %373 : vector<8x32xf32>
    %375 = math.exp %374 : vector<8x32xf32>
    %cst_148 = arith.constant 1.000000e+00 : f32
    %376 = vector.broadcast %cst_148 : f32 to vector<8x32xf32>
    %377 = arith.addf %376, %375 : vector<8x32xf32>
    %378 = arith.divf %376, %377 : vector<8x32xf32>
    %c128_i32_149 = arith.constant 128 : i32
    %379 = arith.addi %c128_i32_149, %350 : i32
    %380 = tpu.assume_multiple %379, 8 : i32
    %381 = arith.index_cast %380 : i32 to index
    %c0_150 = arith.constant 0 : index
    %382 = vector.load %arg8[%381, %c0_150] : memref<384x32xf32, #tpu.memory_space<vmem>>, vector<8x32xf32>
    %383 = arith.addf %355, %45 : vector<8x32xf32>
    %384 = arith.mulf %368, %383 : vector<8x32xf32>
    %385 = arith.addf %382, %384 : vector<8x32xf32>
    %386 = math.tanh %385 : vector<8x32xf32>
    %cst_151 = arith.constant 1.000000e+00 : f32
    %387 = vector.broadcast %cst_151 : f32 to vector<8x32xf32>
    %388 = arith.subf %387, %378 : vector<8x32xf32>
    %389 = arith.mulf %388, %386 : vector<8x32xf32>
    %390 = arith.mulf %378, %344 : vector<8x32xf32>
    %391 = arith.addf %389, %390 : vector<8x32xf32>
    %c192_i32_152 = arith.constant 192 : i32
    %392 = arith.addi %c192_i32_152, %352 : i32
    %393 = tpu.assume_multiple %392, 8 : i32
    %394 = arith.index_cast %393 : i32 to index
    %c0_153 = arith.constant 0 : index
    %395 = vector.load %arg8[%394, %c0_153] : memref<384x32xf32, #tpu.memory_space<vmem>>, vector<8x32xf32>
    %396 = arith.addf %395, %356 : vector<8x32xf32>
    %397 = arith.negf %396 : vector<8x32xf32>
    %398 = math.exp %397 : vector<8x32xf32>
    %cst_154 = arith.constant 1.000000e+00 : f32
    %399 = vector.broadcast %cst_154 : f32 to vector<8x32xf32>
    %400 = arith.addf %399, %398 : vector<8x32xf32>
    %401 = arith.divf %399, %400 : vector<8x32xf32>
    %c256_i32_155 = arith.constant 256 : i32
    %402 = arith.addi %c256_i32_155, %352 : i32
    %403 = tpu.assume_multiple %402, 8 : i32
    %404 = arith.index_cast %403 : i32 to index
    %c0_156 = arith.constant 0 : index
    %405 = vector.load %arg8[%404, %c0_156] : memref<384x32xf32, #tpu.memory_space<vmem>>, vector<8x32xf32>
    %406 = arith.addf %405, %357 : vector<8x32xf32>
    %407 = arith.negf %406 : vector<8x32xf32>
    %408 = math.exp %407 : vector<8x32xf32>
    %cst_157 = arith.constant 1.000000e+00 : f32
    %409 = vector.broadcast %cst_157 : f32 to vector<8x32xf32>
    %410 = arith.addf %409, %408 : vector<8x32xf32>
    %411 = arith.divf %409, %410 : vector<8x32xf32>
    %c320_i32_158 = arith.constant 320 : i32
    %412 = arith.addi %c320_i32_158, %352 : i32
    %413 = tpu.assume_multiple %412, 8 : i32
    %414 = arith.index_cast %413 : i32 to index
    %c0_159 = arith.constant 0 : index
    %415 = vector.load %arg8[%414, %c0_159] : memref<384x32xf32, #tpu.memory_space<vmem>>, vector<8x32xf32>
    %416 = arith.addf %358, %48 : vector<8x32xf32>
    %417 = arith.mulf %401, %416 : vector<8x32xf32>
    %418 = arith.addf %415, %417 : vector<8x32xf32>
    %419 = math.tanh %418 : vector<8x32xf32>
    %cst_160 = arith.constant 1.000000e+00 : f32
    %420 = vector.broadcast %cst_160 : f32 to vector<8x32xf32>
    %421 = arith.subf %420, %411 : vector<8x32xf32>
    %422 = arith.mulf %421, %419 : vector<8x32xf32>
    %423 = arith.mulf %411, %347 : vector<8x32xf32>
    %424 = arith.addf %422, %423 : vector<8x32xf32>
    %425 = vector.broadcast %c3_i32 : i32 to vector<8x1xi32>
    %426 = arith.cmpi sgt, %49, %425 : vector<8x1xi32>
    %427 = vector.broadcast %348 : i32 to vector<8x1xi32>
    %428 = arith.cmpi sgt, %49, %427 : vector<8x1xi32>
    %cst_161 = arith.constant 0.000000e+00 : f32
    %429 = vector.shape_cast %426 : vector<8x1xi1> to vector<8x1xi1>
    %430 = vector.broadcast %429 : vector<8x1xi1> to vector<8x32xi1>
    %431 = vector.broadcast %cst_161 : f32 to vector<8x32xf32>
    %432 = arith.select %430, %391, %431 : vector<8x32xi1>, vector<8x32xf32>
    %433 = arith.index_cast %350 : i32 to index
    %c0_162 = arith.constant 0 : index
    %434 = vector.load %arg6[%433, %c0_162] : memref<64x64xf32, #tpu.memory_space<vmem>>, vector<8x32xf32>
    tpu.vector_store %arg6[%433, %c0_162], %432 {strides = array<i32>} : memref<64x64xf32, #tpu.memory_space<vmem>>, vector<8x32xf32>,
    %cst_163 = arith.constant 0.000000e+00 : f32
    %435 = vector.shape_cast %428 : vector<8x1xi1> to vector<8x1xi1>
    %436 = vector.broadcast %435 : vector<8x1xi1> to vector<8x32xi1>
    %437 = vector.broadcast %cst_163 : f32 to vector<8x32xf32>
    %438 = arith.select %436, %424, %437 : vector<8x32xi1>, vector<8x32xf32>
    %439 = arith.index_cast %352 : i32 to index
    %c32_164 = arith.constant 32 : index
    %440 = vector.load %arg6[%439, %c32_164] : memref<64x64xf32, #tpu.memory_space<vmem>>, vector<8x32xf32>
    tpu.vector_store %arg6[%439, %c32_164], %438 {strides = array<i32>} : memref<64x64xf32, #tpu.memory_space<vmem>>, vector<8x32xf32>,
    %441 = vector.shape_cast %426 : vector<8x1xi1> to vector<8x1xi1>
    %442 = vector.broadcast %441 : vector<8x1xi1> to vector<8x32xi1>
    %443 = arith.select %442, %391, %344 : vector<8x32xi1>, vector<8x32xf32>
    %444 = vector.shape_cast %428 : vector<8x1xi1> to vector<8x1xi1>
    %445 = vector.broadcast %444 : vector<8x1xi1> to vector<8x32xi1>
    %446 = arith.select %445, %424, %347 : vector<8x32xi1>, vector<8x32xf32>
    %c4_i32 = arith.constant 4 : i32
    %c7_i32_165 = arith.constant 7 : i32
    %447 = arith.subi %c7_i32_165, %c4_i32 : i32
    %c8_i32_166 = arith.constant 8 : i32
    %448 = arith.muli %c4_i32, %c8_i32_166 : i32
    %449 = tpu.assume_multiple %448, 8 : i32
    %c8_i32_167 = arith.constant 8 : i32
    %450 = arith.muli %447, %c8_i32_167 : i32
    %451 = tpu.assume_multiple %450, 8 : i32
    %cst_168 = arith.constant dense<0.000000e+00> : vector<8x32xf32>
    %452 = tpu.matmul %443, %37, %cst_168 {dimension_numbers = #tpu.dot_dimension_numbers<[1], [0], [0], [1], [0, 0, 1, 1], [], []>} : vector<8x32xf32>, vector<32x32xf32>, vector<8x32xf32> -> vector<8x32xf32>
    %cst_169 = arith.constant dense<0.000000e+00> : vector<8x32xf32>
    %453 = tpu.matmul %443, %38, %cst_169 {dimension_numbers = #tpu.dot_dimension_numbers<[1], [0], [0], [1], [0, 0, 1, 1], [], []>} : vector<8x32xf32>, vector<32x32xf32>, vector<8x32xf32> -> vector<8x32xf32>
    %cst_170 = arith.constant dense<0.000000e+00> : vector<8x32xf32>
    %454 = tpu.matmul %443, %39, %cst_170 {dimension_numbers = #tpu.dot_dimension_numbers<[1], [0], [0], [1], [0, 0, 1, 1], [], []>} : vector<8x32xf32>, vector<32x32xf32>, vector<8x32xf32> -> vector<8x32xf32>
    %cst_171 = arith.constant dense<0.000000e+00> : vector<8x32xf32>
    %455 = tpu.matmul %446, %40, %cst_171 {dimension_numbers = #tpu.dot_dimension_numbers<[1], [0], [0], [1], [0, 0, 1, 1], [], []>} : vector<8x32xf32>, vector<32x32xf32>, vector<8x32xf32> -> vector<8x32xf32>
    %cst_172 = arith.constant dense<0.000000e+00> : vector<8x32xf32>
    %456 = tpu.matmul %446, %41, %cst_172 {dimension_numbers = #tpu.dot_dimension_numbers<[1], [0], [0], [1], [0, 0, 1, 1], [], []>} : vector<8x32xf32>, vector<32x32xf32>, vector<8x32xf32> -> vector<8x32xf32>
    %cst_173 = arith.constant dense<0.000000e+00> : vector<8x32xf32>
    %457 = tpu.matmul %446, %42, %cst_173 {dimension_numbers = #tpu.dot_dimension_numbers<[1], [0], [0], [1], [0, 0, 1, 1], [], []>} : vector<8x32xf32>, vector<32x32xf32>, vector<8x32xf32> -> vector<8x32xf32>
    %c0_i32_174 = arith.constant 0 : i32
    %458 = arith.addi %c0_i32_174, %449 : i32
    %459 = tpu.assume_multiple %458, 8 : i32
    %460 = arith.index_cast %459 : i32 to index
    %c0_175 = arith.constant 0 : index
    %461 = vector.load %arg8[%460, %c0_175] : memref<384x32xf32, #tpu.memory_space<vmem>>, vector<8x32xf32>
    %462 = arith.addf %461, %452 : vector<8x32xf32>
    %463 = arith.negf %462 : vector<8x32xf32>
    %464 = math.exp %463 : vector<8x32xf32>
    %cst_176 = arith.constant 1.000000e+00 : f32
    %465 = vector.broadcast %cst_176 : f32 to vector<8x32xf32>
    %466 = arith.addf %465, %464 : vector<8x32xf32>
    %467 = arith.divf %465, %466 : vector<8x32xf32>
    %c64_i32_177 = arith.constant 64 : i32
    %468 = arith.addi %c64_i32_177, %449 : i32
    %469 = tpu.assume_multiple %468, 8 : i32
    %470 = arith.index_cast %469 : i32 to index
    %c0_178 = arith.constant 0 : index
    %471 = vector.load %arg8[%470, %c0_178] : memref<384x32xf32, #tpu.memory_space<vmem>>, vector<8x32xf32>
    %472 = arith.addf %471, %453 : vector<8x32xf32>
    %473 = arith.negf %472 : vector<8x32xf32>
    %474 = math.exp %473 : vector<8x32xf32>
    %cst_179 = arith.constant 1.000000e+00 : f32
    %475 = vector.broadcast %cst_179 : f32 to vector<8x32xf32>
    %476 = arith.addf %475, %474 : vector<8x32xf32>
    %477 = arith.divf %475, %476 : vector<8x32xf32>
    %c128_i32_180 = arith.constant 128 : i32
    %478 = arith.addi %c128_i32_180, %449 : i32
    %479 = tpu.assume_multiple %478, 8 : i32
    %480 = arith.index_cast %479 : i32 to index
    %c0_181 = arith.constant 0 : index
    %481 = vector.load %arg8[%480, %c0_181] : memref<384x32xf32, #tpu.memory_space<vmem>>, vector<8x32xf32>
    %482 = arith.addf %454, %45 : vector<8x32xf32>
    %483 = arith.mulf %467, %482 : vector<8x32xf32>
    %484 = arith.addf %481, %483 : vector<8x32xf32>
    %485 = math.tanh %484 : vector<8x32xf32>
    %cst_182 = arith.constant 1.000000e+00 : f32
    %486 = vector.broadcast %cst_182 : f32 to vector<8x32xf32>
    %487 = arith.subf %486, %477 : vector<8x32xf32>
    %488 = arith.mulf %487, %485 : vector<8x32xf32>
    %489 = arith.mulf %477, %443 : vector<8x32xf32>
    %490 = arith.addf %488, %489 : vector<8x32xf32>
    %c192_i32_183 = arith.constant 192 : i32
    %491 = arith.addi %c192_i32_183, %451 : i32
    %492 = tpu.assume_multiple %491, 8 : i32
    %493 = arith.index_cast %492 : i32 to index
    %c0_184 = arith.constant 0 : index
    %494 = vector.load %arg8[%493, %c0_184] : memref<384x32xf32, #tpu.memory_space<vmem>>, vector<8x32xf32>
    %495 = arith.addf %494, %455 : vector<8x32xf32>
    %496 = arith.negf %495 : vector<8x32xf32>
    %497 = math.exp %496 : vector<8x32xf32>
    %cst_185 = arith.constant 1.000000e+00 : f32
    %498 = vector.broadcast %cst_185 : f32 to vector<8x32xf32>
    %499 = arith.addf %498, %497 : vector<8x32xf32>
    %500 = arith.divf %498, %499 : vector<8x32xf32>
    %c256_i32_186 = arith.constant 256 : i32
    %501 = arith.addi %c256_i32_186, %451 : i32
    %502 = tpu.assume_multiple %501, 8 : i32
    %503 = arith.index_cast %502 : i32 to index
    %c0_187 = arith.constant 0 : index
    %504 = vector.load %arg8[%503, %c0_187] : memref<384x32xf32, #tpu.memory_space<vmem>>, vector<8x32xf32>
    %505 = arith.addf %504, %456 : vector<8x32xf32>
    %506 = arith.negf %505 : vector<8x32xf32>
    %507 = math.exp %506 : vector<8x32xf32>
    %cst_188 = arith.constant 1.000000e+00 : f32
    %508 = vector.broadcast %cst_188 : f32 to vector<8x32xf32>
    %509 = arith.addf %508, %507 : vector<8x32xf32>
    %510 = arith.divf %508, %509 : vector<8x32xf32>
    %c320_i32_189 = arith.constant 320 : i32
    %511 = arith.addi %c320_i32_189, %451 : i32
    %512 = tpu.assume_multiple %511, 8 : i32
    %513 = arith.index_cast %512 : i32 to index
    %c0_190 = arith.constant 0 : index
    %514 = vector.load %arg8[%513, %c0_190] : memref<384x32xf32, #tpu.memory_space<vmem>>, vector<8x32xf32>
    %515 = arith.addf %457, %48 : vector<8x32xf32>
    %516 = arith.mulf %500, %515 : vector<8x32xf32>
    %517 = arith.addf %514, %516 : vector<8x32xf32>
    %518 = math.tanh %517 : vector<8x32xf32>
    %cst_191 = arith.constant 1.000000e+00 : f32
    %519 = vector.broadcast %cst_191 : f32 to vector<8x32xf32>
    %520 = arith.subf %519, %510 : vector<8x32xf32>
    %521 = arith.mulf %520, %518 : vector<8x32xf32>
    %522 = arith.mulf %510, %446 : vector<8x32xf32>
    %523 = arith.addf %521, %522 : vector<8x32xf32>
    %524 = vector.broadcast %c4_i32 : i32 to vector<8x1xi32>
    %525 = arith.cmpi sgt, %49, %524 : vector<8x1xi32>
    %526 = vector.broadcast %447 : i32 to vector<8x1xi32>
    %527 = arith.cmpi sgt, %49, %526 : vector<8x1xi32>
    %cst_192 = arith.constant 0.000000e+00 : f32
    %528 = vector.shape_cast %525 : vector<8x1xi1> to vector<8x1xi1>
    %529 = vector.broadcast %528 : vector<8x1xi1> to vector<8x32xi1>
    %530 = vector.broadcast %cst_192 : f32 to vector<8x32xf32>
    %531 = arith.select %529, %490, %530 : vector<8x32xi1>, vector<8x32xf32>
    %532 = arith.index_cast %449 : i32 to index
    %c0_193 = arith.constant 0 : index
    %533 = vector.load %arg6[%532, %c0_193] : memref<64x64xf32, #tpu.memory_space<vmem>>, vector<8x32xf32>
    tpu.vector_store %arg6[%532, %c0_193], %531 {strides = array<i32>} : memref<64x64xf32, #tpu.memory_space<vmem>>, vector<8x32xf32>,
    %cst_194 = arith.constant 0.000000e+00 : f32
    %534 = vector.shape_cast %527 : vector<8x1xi1> to vector<8x1xi1>
    %535 = vector.broadcast %534 : vector<8x1xi1> to vector<8x32xi1>
    %536 = vector.broadcast %cst_194 : f32 to vector<8x32xf32>
    %537 = arith.select %535, %523, %536 : vector<8x32xi1>, vector<8x32xf32>
    %538 = arith.index_cast %451 : i32 to index
    %c32_195 = arith.constant 32 : index
    %539 = vector.load %arg6[%538, %c32_195] : memref<64x64xf32, #tpu.memory_space<vmem>>, vector<8x32xf32>
    tpu.vector_store %arg6[%538, %c32_195], %537 {strides = array<i32>} : memref<64x64xf32, #tpu.memory_space<vmem>>, vector<8x32xf32>,
    %540 = vector.shape_cast %525 : vector<8x1xi1> to vector<8x1xi1>
    %541 = vector.broadcast %540 : vector<8x1xi1> to vector<8x32xi1>
    %542 = arith.select %541, %490, %443 : vector<8x32xi1>, vector<8x32xf32>
    %543 = vector.shape_cast %527 : vector<8x1xi1> to vector<8x1xi1>
    %544 = vector.broadcast %543 : vector<8x1xi1> to vector<8x32xi1>
    %545 = arith.select %544, %523, %446 : vector<8x32xi1>, vector<8x32xf32>
    %c5_i32 = arith.constant 5 : i32
    %c7_i32_196 = arith.constant 7 : i32
    %546 = arith.subi %c7_i32_196, %c5_i32 : i32
    %c8_i32_197 = arith.constant 8 : i32
    %547 = arith.muli %c5_i32, %c8_i32_197 : i32
    %548 = tpu.assume_multiple %547, 8 : i32
    %c8_i32_198 = arith.constant 8 : i32
    %549 = arith.muli %546, %c8_i32_198 : i32
    %550 = tpu.assume_multiple %549, 8 : i32
    %cst_199 = arith.constant dense<0.000000e+00> : vector<8x32xf32>
    %551 = tpu.matmul %542, %37, %cst_199 {dimension_numbers = #tpu.dot_dimension_numbers<[1], [0], [0], [1], [0, 0, 1, 1], [], []>} : vector<8x32xf32>, vector<32x32xf32>, vector<8x32xf32> -> vector<8x32xf32>
    %cst_200 = arith.constant dense<0.000000e+00> : vector<8x32xf32>
    %552 = tpu.matmul %542, %38, %cst_200 {dimension_numbers = #tpu.dot_dimension_numbers<[1], [0], [0], [1], [0, 0, 1, 1], [], []>} : vector<8x32xf32>, vector<32x32xf32>, vector<8x32xf32> -> vector<8x32xf32>
    %cst_201 = arith.constant dense<0.000000e+00> : vector<8x32xf32>
    %553 = tpu.matmul %542, %39, %cst_201 {dimension_numbers = #tpu.dot_dimension_numbers<[1], [0], [0], [1], [0, 0, 1, 1], [], []>} : vector<8x32xf32>, vector<32x32xf32>, vector<8x32xf32> -> vector<8x32xf32>
    %cst_202 = arith.constant dense<0.000000e+00> : vector<8x32xf32>
    %554 = tpu.matmul %545, %40, %cst_202 {dimension_numbers = #tpu.dot_dimension_numbers<[1], [0], [0], [1], [0, 0, 1, 1], [], []>} : vector<8x32xf32>, vector<32x32xf32>, vector<8x32xf32> -> vector<8x32xf32>
    %cst_203 = arith.constant dense<0.000000e+00> : vector<8x32xf32>
    %555 = tpu.matmul %545, %41, %cst_203 {dimension_numbers = #tpu.dot_dimension_numbers<[1], [0], [0], [1], [0, 0, 1, 1], [], []>} : vector<8x32xf32>, vector<32x32xf32>, vector<8x32xf32> -> vector<8x32xf32>
    %cst_204 = arith.constant dense<0.000000e+00> : vector<8x32xf32>
    %556 = tpu.matmul %545, %42, %cst_204 {dimension_numbers = #tpu.dot_dimension_numbers<[1], [0], [0], [1], [0, 0, 1, 1], [], []>} : vector<8x32xf32>, vector<32x32xf32>, vector<8x32xf32> -> vector<8x32xf32>
    %c0_i32_205 = arith.constant 0 : i32
    %557 = arith.addi %c0_i32_205, %548 : i32
    %558 = tpu.assume_multiple %557, 8 : i32
    %559 = arith.index_cast %558 : i32 to index
    %c0_206 = arith.constant 0 : index
    %560 = vector.load %arg8[%559, %c0_206] : memref<384x32xf32, #tpu.memory_space<vmem>>, vector<8x32xf32>
    %561 = arith.addf %560, %551 : vector<8x32xf32>
    %562 = arith.negf %561 : vector<8x32xf32>
    %563 = math.exp %562 : vector<8x32xf32>
    %cst_207 = arith.constant 1.000000e+00 : f32
    %564 = vector.broadcast %cst_207 : f32 to vector<8x32xf32>
    %565 = arith.addf %564, %563 : vector<8x32xf32>
    %566 = arith.divf %564, %565 : vector<8x32xf32>
    %c64_i32_208 = arith.constant 64 : i32
    %567 = arith.addi %c64_i32_208, %548 : i32
    %568 = tpu.assume_multiple %567, 8 : i32
    %569 = arith.index_cast %568 : i32 to index
    %c0_209 = arith.constant 0 : index
    %570 = vector.load %arg8[%569, %c0_209] : memref<384x32xf32, #tpu.memory_space<vmem>>, vector<8x32xf32>
    %571 = arith.addf %570, %552 : vector<8x32xf32>
    %572 = arith.negf %571 : vector<8x32xf32>
    %573 = math.exp %572 : vector<8x32xf32>
    %cst_210 = arith.constant 1.000000e+00 : f32
    %574 = vector.broadcast %cst_210 : f32 to vector<8x32xf32>
    %575 = arith.addf %574, %573 : vector<8x32xf32>
    %576 = arith.divf %574, %575 : vector<8x32xf32>
    %c128_i32_211 = arith.constant 128 : i32
    %577 = arith.addi %c128_i32_211, %548 : i32
    %578 = tpu.assume_multiple %577, 8 : i32
    %579 = arith.index_cast %578 : i32 to index
    %c0_212 = arith.constant 0 : index
    %580 = vector.load %arg8[%579, %c0_212] : memref<384x32xf32, #tpu.memory_space<vmem>>, vector<8x32xf32>
    %581 = arith.addf %553, %45 : vector<8x32xf32>
    %582 = arith.mulf %566, %581 : vector<8x32xf32>
    %583 = arith.addf %580, %582 : vector<8x32xf32>
    %584 = math.tanh %583 : vector<8x32xf32>
    %cst_213 = arith.constant 1.000000e+00 : f32
    %585 = vector.broadcast %cst_213 : f32 to vector<8x32xf32>
    %586 = arith.subf %585, %576 : vector<8x32xf32>
    %587 = arith.mulf %586, %584 : vector<8x32xf32>
    %588 = arith.mulf %576, %542 : vector<8x32xf32>
    %589 = arith.addf %587, %588 : vector<8x32xf32>
    %c192_i32_214 = arith.constant 192 : i32
    %590 = arith.addi %c192_i32_214, %550 : i32
    %591 = tpu.assume_multiple %590, 8 : i32
    %592 = arith.index_cast %591 : i32 to index
    %c0_215 = arith.constant 0 : index
    %593 = vector.load %arg8[%592, %c0_215] : memref<384x32xf32, #tpu.memory_space<vmem>>, vector<8x32xf32>
    %594 = arith.addf %593, %554 : vector<8x32xf32>
    %595 = arith.negf %594 : vector<8x32xf32>
    %596 = math.exp %595 : vector<8x32xf32>
    %cst_216 = arith.constant 1.000000e+00 : f32
    %597 = vector.broadcast %cst_216 : f32 to vector<8x32xf32>
    %598 = arith.addf %597, %596 : vector<8x32xf32>
    %599 = arith.divf %597, %598 : vector<8x32xf32>
    %c256_i32_217 = arith.constant 256 : i32
    %600 = arith.addi %c256_i32_217, %550 : i32
    %601 = tpu.assume_multiple %600, 8 : i32
    %602 = arith.index_cast %601 : i32 to index
    %c0_218 = arith.constant 0 : index
    %603 = vector.load %arg8[%602, %c0_218] : memref<384x32xf32, #tpu.memory_space<vmem>>, vector<8x32xf32>
    %604 = arith.addf %603, %555 : vector<8x32xf32>
    %605 = arith.negf %604 : vector<8x32xf32>
    %606 = math.exp %605 : vector<8x32xf32>
    %cst_219 = arith.constant 1.000000e+00 : f32
    %607 = vector.broadcast %cst_219 : f32 to vector<8x32xf32>
    %608 = arith.addf %607, %606 : vector<8x32xf32>
    %609 = arith.divf %607, %608 : vector<8x32xf32>
    %c320_i32_220 = arith.constant 320 : i32
    %610 = arith.addi %c320_i32_220, %550 : i32
    %611 = tpu.assume_multiple %610, 8 : i32
    %612 = arith.index_cast %611 : i32 to index
    %c0_221 = arith.constant 0 : index
    %613 = vector.load %arg8[%612, %c0_221] : memref<384x32xf32, #tpu.memory_space<vmem>>, vector<8x32xf32>
    %614 = arith.addf %556, %48 : vector<8x32xf32>
    %615 = arith.mulf %599, %614 : vector<8x32xf32>
    %616 = arith.addf %613, %615 : vector<8x32xf32>
    %617 = math.tanh %616 : vector<8x32xf32>
    %cst_222 = arith.constant 1.000000e+00 : f32
    %618 = vector.broadcast %cst_222 : f32 to vector<8x32xf32>
    %619 = arith.subf %618, %609 : vector<8x32xf32>
    %620 = arith.mulf %619, %617 : vector<8x32xf32>
    %621 = arith.mulf %609, %545 : vector<8x32xf32>
    %622 = arith.addf %620, %621 : vector<8x32xf32>
    %623 = vector.broadcast %c5_i32 : i32 to vector<8x1xi32>
    %624 = arith.cmpi sgt, %49, %623 : vector<8x1xi32>
    %625 = vector.broadcast %546 : i32 to vector<8x1xi32>
    %626 = arith.cmpi sgt, %49, %625 : vector<8x1xi32>
    %cst_223 = arith.constant 0.000000e+00 : f32
    %627 = vector.shape_cast %624 : vector<8x1xi1> to vector<8x1xi1>
    %628 = vector.broadcast %627 : vector<8x1xi1> to vector<8x32xi1>
    %629 = vector.broadcast %cst_223 : f32 to vector<8x32xf32>
    %630 = arith.select %628, %589, %629 : vector<8x32xi1>, vector<8x32xf32>
    %631 = arith.index_cast %548 : i32 to index
    %c0_224 = arith.constant 0 : index
    %632 = vector.load %arg6[%631, %c0_224] : memref<64x64xf32, #tpu.memory_space<vmem>>, vector<8x32xf32>
    tpu.vector_store %arg6[%631, %c0_224], %630 {strides = array<i32>} : memref<64x64xf32, #tpu.memory_space<vmem>>, vector<8x32xf32>,
    %cst_225 = arith.constant 0.000000e+00 : f32
    %633 = vector.shape_cast %626 : vector<8x1xi1> to vector<8x1xi1>
    %634 = vector.broadcast %633 : vector<8x1xi1> to vector<8x32xi1>
    %635 = vector.broadcast %cst_225 : f32 to vector<8x32xf32>
    %636 = arith.select %634, %622, %635 : vector<8x32xi1>, vector<8x32xf32>
    %637 = arith.index_cast %550 : i32 to index
    %c32_226 = arith.constant 32 : index
    %638 = vector.load %arg6[%637, %c32_226] : memref<64x64xf32, #tpu.memory_space<vmem>>, vector<8x32xf32>
    tpu.vector_store %arg6[%637, %c32_226], %636 {strides = array<i32>} : memref<64x64xf32, #tpu.memory_space<vmem>>, vector<8x32xf32>,
    %639 = vector.shape_cast %624 : vector<8x1xi1> to vector<8x1xi1>
    %640 = vector.broadcast %639 : vector<8x1xi1> to vector<8x32xi1>
    %641 = arith.select %640, %589, %542 : vector<8x32xi1>, vector<8x32xf32>
    %642 = vector.shape_cast %626 : vector<8x1xi1> to vector<8x1xi1>
    %643 = vector.broadcast %642 : vector<8x1xi1> to vector<8x32xi1>
    %644 = arith.select %643, %622, %545 : vector<8x32xi1>, vector<8x32xf32>
    %c6_i32 = arith.constant 6 : i32
    %c7_i32_227 = arith.constant 7 : i32
    %645 = arith.subi %c7_i32_227, %c6_i32 : i32
    %c8_i32_228 = arith.constant 8 : i32
    %646 = arith.muli %c6_i32, %c8_i32_228 : i32
    %647 = tpu.assume_multiple %646, 8 : i32
    %c8_i32_229 = arith.constant 8 : i32
    %648 = arith.muli %645, %c8_i32_229 : i32
    %649 = tpu.assume_multiple %648, 8 : i32
    %cst_230 = arith.constant dense<0.000000e+00> : vector<8x32xf32>
    %650 = tpu.matmul %641, %37, %cst_230 {dimension_numbers = #tpu.dot_dimension_numbers<[1], [0], [0], [1], [0, 0, 1, 1], [], []>} : vector<8x32xf32>, vector<32x32xf32>, vector<8x32xf32> -> vector<8x32xf32>
    %cst_231 = arith.constant dense<0.000000e+00> : vector<8x32xf32>
    %651 = tpu.matmul %641, %38, %cst_231 {dimension_numbers = #tpu.dot_dimension_numbers<[1], [0], [0], [1], [0, 0, 1, 1], [], []>} : vector<8x32xf32>, vector<32x32xf32>, vector<8x32xf32> -> vector<8x32xf32>
    %cst_232 = arith.constant dense<0.000000e+00> : vector<8x32xf32>
    %652 = tpu.matmul %641, %39, %cst_232 {dimension_numbers = #tpu.dot_dimension_numbers<[1], [0], [0], [1], [0, 0, 1, 1], [], []>} : vector<8x32xf32>, vector<32x32xf32>, vector<8x32xf32> -> vector<8x32xf32>
    %cst_233 = arith.constant dense<0.000000e+00> : vector<8x32xf32>
    %653 = tpu.matmul %644, %40, %cst_233 {dimension_numbers = #tpu.dot_dimension_numbers<[1], [0], [0], [1], [0, 0, 1, 1], [], []>} : vector<8x32xf32>, vector<32x32xf32>, vector<8x32xf32> -> vector<8x32xf32>
    %cst_234 = arith.constant dense<0.000000e+00> : vector<8x32xf32>
    %654 = tpu.matmul %644, %41, %cst_234 {dimension_numbers = #tpu.dot_dimension_numbers<[1], [0], [0], [1], [0, 0, 1, 1], [], []>} : vector<8x32xf32>, vector<32x32xf32>, vector<8x32xf32> -> vector<8x32xf32>
    %cst_235 = arith.constant dense<0.000000e+00> : vector<8x32xf32>
    %655 = tpu.matmul %644, %42, %cst_235 {dimension_numbers = #tpu.dot_dimension_numbers<[1], [0], [0], [1], [0, 0, 1, 1], [], []>} : vector<8x32xf32>, vector<32x32xf32>, vector<8x32xf32> -> vector<8x32xf32>
    %c0_i32_236 = arith.constant 0 : i32
    %656 = arith.addi %c0_i32_236, %647 : i32
    %657 = tpu.assume_multiple %656, 8 : i32
    %658 = arith.index_cast %657 : i32 to index
    %c0_237 = arith.constant 0 : index
    %659 = vector.load %arg8[%658, %c0_237] : memref<384x32xf32, #tpu.memory_space<vmem>>, vector<8x32xf32>
    %660 = arith.addf %659, %650 : vector<8x32xf32>
    %661 = arith.negf %660 : vector<8x32xf32>
    %662 = math.exp %661 : vector<8x32xf32>
    %cst_238 = arith.constant 1.000000e+00 : f32
    %663 = vector.broadcast %cst_238 : f32 to vector<8x32xf32>
    %664 = arith.addf %663, %662 : vector<8x32xf32>
    %665 = arith.divf %663, %664 : vector<8x32xf32>
    %c64_i32_239 = arith.constant 64 : i32
    %666 = arith.addi %c64_i32_239, %647 : i32
    %667 = tpu.assume_multiple %666, 8 : i32
    %668 = arith.index_cast %667 : i32 to index
    %c0_240 = arith.constant 0 : index
    %669 = vector.load %arg8[%668, %c0_240] : memref<384x32xf32, #tpu.memory_space<vmem>>, vector<8x32xf32>
    %670 = arith.addf %669, %651 : vector<8x32xf32>
    %671 = arith.negf %670 : vector<8x32xf32>
    %672 = math.exp %671 : vector<8x32xf32>
    %cst_241 = arith.constant 1.000000e+00 : f32
    %673 = vector.broadcast %cst_241 : f32 to vector<8x32xf32>
    %674 = arith.addf %673, %672 : vector<8x32xf32>
    %675 = arith.divf %673, %674 : vector<8x32xf32>
    %c128_i32_242 = arith.constant 128 : i32
    %676 = arith.addi %c128_i32_242, %647 : i32
    %677 = tpu.assume_multiple %676, 8 : i32
    %678 = arith.index_cast %677 : i32 to index
    %c0_243 = arith.constant 0 : index
    %679 = vector.load %arg8[%678, %c0_243] : memref<384x32xf32, #tpu.memory_space<vmem>>, vector<8x32xf32>
    %680 = arith.addf %652, %45 : vector<8x32xf32>
    %681 = arith.mulf %665, %680 : vector<8x32xf32>
    %682 = arith.addf %679, %681 : vector<8x32xf32>
    %683 = math.tanh %682 : vector<8x32xf32>
    %cst_244 = arith.constant 1.000000e+00 : f32
    %684 = vector.broadcast %cst_244 : f32 to vector<8x32xf32>
    %685 = arith.subf %684, %675 : vector<8x32xf32>
    %686 = arith.mulf %685, %683 : vector<8x32xf32>
    %687 = arith.mulf %675, %641 : vector<8x32xf32>
    %688 = arith.addf %686, %687 : vector<8x32xf32>
    %c192_i32_245 = arith.constant 192 : i32
    %689 = arith.addi %c192_i32_245, %649 : i32
    %690 = tpu.assume_multiple %689, 8 : i32
    %691 = arith.index_cast %690 : i32 to index
    %c0_246 = arith.constant 0 : index
    %692 = vector.load %arg8[%691, %c0_246] : memref<384x32xf32, #tpu.memory_space<vmem>>, vector<8x32xf32>
    %693 = arith.addf %692, %653 : vector<8x32xf32>
    %694 = arith.negf %693 : vector<8x32xf32>
    %695 = math.exp %694 : vector<8x32xf32>
    %cst_247 = arith.constant 1.000000e+00 : f32
    %696 = vector.broadcast %cst_247 : f32 to vector<8x32xf32>
    %697 = arith.addf %696, %695 : vector<8x32xf32>
    %698 = arith.divf %696, %697 : vector<8x32xf32>
    %c256_i32_248 = arith.constant 256 : i32
    %699 = arith.addi %c256_i32_248, %649 : i32
    %700 = tpu.assume_multiple %699, 8 : i32
    %701 = arith.index_cast %700 : i32 to index
    %c0_249 = arith.constant 0 : index
    %702 = vector.load %arg8[%701, %c0_249] : memref<384x32xf32, #tpu.memory_space<vmem>>, vector<8x32xf32>
    %703 = arith.addf %702, %654 : vector<8x32xf32>
    %704 = arith.negf %703 : vector<8x32xf32>
    %705 = math.exp %704 : vector<8x32xf32>
    %cst_250 = arith.constant 1.000000e+00 : f32
    %706 = vector.broadcast %cst_250 : f32 to vector<8x32xf32>
    %707 = arith.addf %706, %705 : vector<8x32xf32>
    %708 = arith.divf %706, %707 : vector<8x32xf32>
    %c320_i32_251 = arith.constant 320 : i32
    %709 = arith.addi %c320_i32_251, %649 : i32
    %710 = tpu.assume_multiple %709, 8 : i32
    %711 = arith.index_cast %710 : i32 to index
    %c0_252 = arith.constant 0 : index
    %712 = vector.load %arg8[%711, %c0_252] : memref<384x32xf32, #tpu.memory_space<vmem>>, vector<8x32xf32>
    %713 = arith.addf %655, %48 : vector<8x32xf32>
    %714 = arith.mulf %698, %713 : vector<8x32xf32>
    %715 = arith.addf %712, %714 : vector<8x32xf32>
    %716 = math.tanh %715 : vector<8x32xf32>
    %cst_253 = arith.constant 1.000000e+00 : f32
    %717 = vector.broadcast %cst_253 : f32 to vector<8x32xf32>
    %718 = arith.subf %717, %708 : vector<8x32xf32>
    %719 = arith.mulf %718, %716 : vector<8x32xf32>
    %720 = arith.mulf %708, %644 : vector<8x32xf32>
    %721 = arith.addf %719, %720 : vector<8x32xf32>
    %722 = vector.broadcast %c6_i32 : i32 to vector<8x1xi32>
    %723 = arith.cmpi sgt, %49, %722 : vector<8x1xi32>
    %724 = vector.broadcast %645 : i32 to vector<8x1xi32>
    %725 = arith.cmpi sgt, %49, %724 : vector<8x1xi32>
    %cst_254 = arith.constant 0.000000e+00 : f32
    %726 = vector.shape_cast %723 : vector<8x1xi1> to vector<8x1xi1>
    %727 = vector.broadcast %726 : vector<8x1xi1> to vector<8x32xi1>
    %728 = vector.broadcast %cst_254 : f32 to vector<8x32xf32>
    %729 = arith.select %727, %688, %728 : vector<8x32xi1>, vector<8x32xf32>
    %730 = arith.index_cast %647 : i32 to index
    %c0_255 = arith.constant 0 : index
    %731 = vector.load %arg6[%730, %c0_255] : memref<64x64xf32, #tpu.memory_space<vmem>>, vector<8x32xf32>
    tpu.vector_store %arg6[%730, %c0_255], %729 {strides = array<i32>} : memref<64x64xf32, #tpu.memory_space<vmem>>, vector<8x32xf32>,
    %cst_256 = arith.constant 0.000000e+00 : f32
    %732 = vector.shape_cast %725 : vector<8x1xi1> to vector<8x1xi1>
    %733 = vector.broadcast %732 : vector<8x1xi1> to vector<8x32xi1>
    %734 = vector.broadcast %cst_256 : f32 to vector<8x32xf32>
    %735 = arith.select %733, %721, %734 : vector<8x32xi1>, vector<8x32xf32>
    %736 = arith.index_cast %649 : i32 to index
    %c32_257 = arith.constant 32 : index
    %737 = vector.load %arg6[%736, %c32_257] : memref<64x64xf32, #tpu.memory_space<vmem>>, vector<8x32xf32>
    tpu.vector_store %arg6[%736, %c32_257], %735 {strides = array<i32>} : memref<64x64xf32, #tpu.memory_space<vmem>>, vector<8x32xf32>,
    %738 = vector.shape_cast %723 : vector<8x1xi1> to vector<8x1xi1>
    %739 = vector.broadcast %738 : vector<8x1xi1> to vector<8x32xi1>
    %740 = arith.select %739, %688, %641 : vector<8x32xi1>, vector<8x32xf32>
    %741 = vector.shape_cast %725 : vector<8x1xi1> to vector<8x1xi1>
    %742 = vector.broadcast %741 : vector<8x1xi1> to vector<8x32xi1>
    %743 = arith.select %742, %721, %644 : vector<8x32xi1>, vector<8x32xf32>
    %c7_i32_258 = arith.constant 7 : i32
    %c7_i32_259 = arith.constant 7 : i32
    %744 = arith.subi %c7_i32_259, %c7_i32_258 : i32
    %c8_i32_260 = arith.constant 8 : i32
    %745 = arith.muli %c7_i32_258, %c8_i32_260 : i32
    %746 = tpu.assume_multiple %745, 8 : i32
    %c8_i32_261 = arith.constant 8 : i32
    %747 = arith.muli %744, %c8_i32_261 : i32
    %748 = tpu.assume_multiple %747, 8 : i32
    %cst_262 = arith.constant dense<0.000000e+00> : vector<8x32xf32>
    %749 = tpu.matmul %740, %37, %cst_262 {dimension_numbers = #tpu.dot_dimension_numbers<[1], [0], [0], [1], [0, 0, 1, 1], [], []>} : vector<8x32xf32>, vector<32x32xf32>, vector<8x32xf32> -> vector<8x32xf32>
    %cst_263 = arith.constant dense<0.000000e+00> : vector<8x32xf32>
    %750 = tpu.matmul %740, %38, %cst_263 {dimension_numbers = #tpu.dot_dimension_numbers<[1], [0], [0], [1], [0, 0, 1, 1], [], []>} : vector<8x32xf32>, vector<32x32xf32>, vector<8x32xf32> -> vector<8x32xf32>
    %cst_264 = arith.constant dense<0.000000e+00> : vector<8x32xf32>
    %751 = tpu.matmul %740, %39, %cst_264 {dimension_numbers = #tpu.dot_dimension_numbers<[1], [0], [0], [1], [0, 0, 1, 1], [], []>} : vector<8x32xf32>, vector<32x32xf32>, vector<8x32xf32> -> vector<8x32xf32>
    %cst_265 = arith.constant dense<0.000000e+00> : vector<8x32xf32>
    %752 = tpu.matmul %743, %40, %cst_265 {dimension_numbers = #tpu.dot_dimension_numbers<[1], [0], [0], [1], [0, 0, 1, 1], [], []>} : vector<8x32xf32>, vector<32x32xf32>, vector<8x32xf32> -> vector<8x32xf32>
    %cst_266 = arith.constant dense<0.000000e+00> : vector<8x32xf32>
    %753 = tpu.matmul %743, %41, %cst_266 {dimension_numbers = #tpu.dot_dimension_numbers<[1], [0], [0], [1], [0, 0, 1, 1], [], []>} : vector<8x32xf32>, vector<32x32xf32>, vector<8x32xf32> -> vector<8x32xf32>
    %cst_267 = arith.constant dense<0.000000e+00> : vector<8x32xf32>
    %754 = tpu.matmul %743, %42, %cst_267 {dimension_numbers = #tpu.dot_dimension_numbers<[1], [0], [0], [1], [0, 0, 1, 1], [], []>} : vector<8x32xf32>, vector<32x32xf32>, vector<8x32xf32> -> vector<8x32xf32>
    %c0_i32_268 = arith.constant 0 : i32
    %755 = arith.addi %c0_i32_268, %746 : i32
    %756 = tpu.assume_multiple %755, 8 : i32
    %757 = arith.index_cast %756 : i32 to index
    %c0_269 = arith.constant 0 : index
    %758 = vector.load %arg8[%757, %c0_269] : memref<384x32xf32, #tpu.memory_space<vmem>>, vector<8x32xf32>
    %759 = arith.addf %758, %749 : vector<8x32xf32>
    %760 = arith.negf %759 : vector<8x32xf32>
    %761 = math.exp %760 : vector<8x32xf32>
    %cst_270 = arith.constant 1.000000e+00 : f32
    %762 = vector.broadcast %cst_270 : f32 to vector<8x32xf32>
    %763 = arith.addf %762, %761 : vector<8x32xf32>
    %764 = arith.divf %762, %763 : vector<8x32xf32>
    %c64_i32_271 = arith.constant 64 : i32
    %765 = arith.addi %c64_i32_271, %746 : i32
    %766 = tpu.assume_multiple %765, 8 : i32
    %767 = arith.index_cast %766 : i32 to index
    %c0_272 = arith.constant 0 : index
    %768 = vector.load %arg8[%767, %c0_272] : memref<384x32xf32, #tpu.memory_space<vmem>>, vector<8x32xf32>
    %769 = arith.addf %768, %750 : vector<8x32xf32>
    %770 = arith.negf %769 : vector<8x32xf32>
    %771 = math.exp %770 : vector<8x32xf32>
    %cst_273 = arith.constant 1.000000e+00 : f32
    %772 = vector.broadcast %cst_273 : f32 to vector<8x32xf32>
    %773 = arith.addf %772, %771 : vector<8x32xf32>
    %774 = arith.divf %772, %773 : vector<8x32xf32>
    %c128_i32_274 = arith.constant 128 : i32
    %775 = arith.addi %c128_i32_274, %746 : i32
    %776 = tpu.assume_multiple %775, 8 : i32
    %777 = arith.index_cast %776 : i32 to index
    %c0_275 = arith.constant 0 : index
    %778 = vector.load %arg8[%777, %c0_275] : memref<384x32xf32, #tpu.memory_space<vmem>>, vector<8x32xf32>
    %779 = arith.addf %751, %45 : vector<8x32xf32>
    %780 = arith.mulf %764, %779 : vector<8x32xf32>
    %781 = arith.addf %778, %780 : vector<8x32xf32>
    %782 = math.tanh %781 : vector<8x32xf32>
    %cst_276 = arith.constant 1.000000e+00 : f32
    %783 = vector.broadcast %cst_276 : f32 to vector<8x32xf32>
    %784 = arith.subf %783, %774 : vector<8x32xf32>
    %785 = arith.mulf %784, %782 : vector<8x32xf32>
    %786 = arith.mulf %774, %740 : vector<8x32xf32>
    %787 = arith.addf %785, %786 : vector<8x32xf32>
    %c192_i32_277 = arith.constant 192 : i32
    %788 = arith.addi %c192_i32_277, %748 : i32
    %789 = tpu.assume_multiple %788, 8 : i32
    %790 = arith.index_cast %789 : i32 to index
    %c0_278 = arith.constant 0 : index
    %791 = vector.load %arg8[%790, %c0_278] : memref<384x32xf32, #tpu.memory_space<vmem>>, vector<8x32xf32>
    %792 = arith.addf %791, %752 : vector<8x32xf32>
    %793 = arith.negf %792 : vector<8x32xf32>
    %794 = math.exp %793 : vector<8x32xf32>
    %cst_279 = arith.constant 1.000000e+00 : f32
    %795 = vector.broadcast %cst_279 : f32 to vector<8x32xf32>
    %796 = arith.addf %795, %794 : vector<8x32xf32>
    %797 = arith.divf %795, %796 : vector<8x32xf32>
    %c256_i32_280 = arith.constant 256 : i32
    %798 = arith.addi %c256_i32_280, %748 : i32
    %799 = tpu.assume_multiple %798, 8 : i32
    %800 = arith.index_cast %799 : i32 to index
    %c0_281 = arith.constant 0 : index
    %801 = vector.load %arg8[%800, %c0_281] : memref<384x32xf32, #tpu.memory_space<vmem>>, vector<8x32xf32>
    %802 = arith.addf %801, %753 : vector<8x32xf32>
    %803 = arith.negf %802 : vector<8x32xf32>
    %804 = math.exp %803 : vector<8x32xf32>
    %cst_282 = arith.constant 1.000000e+00 : f32
    %805 = vector.broadcast %cst_282 : f32 to vector<8x32xf32>
    %806 = arith.addf %805, %804 : vector<8x32xf32>
    %807 = arith.divf %805, %806 : vector<8x32xf32>
    %c320_i32_283 = arith.constant 320 : i32
    %808 = arith.addi %c320_i32_283, %748 : i32
    %809 = tpu.assume_multiple %808, 8 : i32
    %810 = arith.index_cast %809 : i32 to index
    %c0_284 = arith.constant 0 : index
    %811 = vector.load %arg8[%810, %c0_284] : memref<384x32xf32, #tpu.memory_space<vmem>>, vector<8x32xf32>
    %812 = arith.addf %754, %48 : vector<8x32xf32>
    %813 = arith.mulf %797, %812 : vector<8x32xf32>
    %814 = arith.addf %811, %813 : vector<8x32xf32>
    %815 = math.tanh %814 : vector<8x32xf32>
    %cst_285 = arith.constant 1.000000e+00 : f32
    %816 = vector.broadcast %cst_285 : f32 to vector<8x32xf32>
    %817 = arith.subf %816, %807 : vector<8x32xf32>
    %818 = arith.mulf %817, %815 : vector<8x32xf32>
    %819 = arith.mulf %807, %743 : vector<8x32xf32>
    %820 = arith.addf %818, %819 : vector<8x32xf32>
    %821 = vector.broadcast %c7_i32_258 : i32 to vector<8x1xi32>
    %822 = arith.cmpi sgt, %49, %821 : vector<8x1xi32>
    %823 = vector.broadcast %744 : i32 to vector<8x1xi32>
    %824 = arith.cmpi sgt, %49, %823 : vector<8x1xi32>
    %cst_286 = arith.constant 0.000000e+00 : f32
    %825 = vector.shape_cast %822 : vector<8x1xi1> to vector<8x1xi1>
    %826 = vector.broadcast %825 : vector<8x1xi1> to vector<8x32xi1>
    %827 = vector.broadcast %cst_286 : f32 to vector<8x32xf32>
    %828 = arith.select %826, %787, %827 : vector<8x32xi1>, vector<8x32xf32>
    %829 = arith.index_cast %746 : i32 to index
    %c0_287 = arith.constant 0 : index
    %830 = vector.load %arg6[%829, %c0_287] : memref<64x64xf32, #tpu.memory_space<vmem>>, vector<8x32xf32>
    tpu.vector_store %arg6[%829, %c0_287], %828 {strides = array<i32>} : memref<64x64xf32, #tpu.memory_space<vmem>>, vector<8x32xf32>,
    %cst_288 = arith.constant 0.000000e+00 : f32
    %831 = vector.shape_cast %824 : vector<8x1xi1> to vector<8x1xi1>
    %832 = vector.broadcast %831 : vector<8x1xi1> to vector<8x32xi1>
    %833 = vector.broadcast %cst_288 : f32 to vector<8x32xf32>
    %834 = arith.select %832, %820, %833 : vector<8x32xi1>, vector<8x32xf32>
    %835 = arith.index_cast %748 : i32 to index
    %c32_289 = arith.constant 32 : index
    %836 = vector.load %arg6[%835, %c32_289] : memref<64x64xf32, #tpu.memory_space<vmem>>, vector<8x32xf32>
    tpu.vector_store %arg6[%835, %c32_289], %834 {strides = array<i32>} : memref<64x64xf32, #tpu.memory_space<vmem>>, vector<8x32xf32>,
    %837 = vector.shape_cast %822 : vector<8x1xi1> to vector<8x1xi1>
    %838 = vector.broadcast %837 : vector<8x1xi1> to vector<8x32xi1>
    %839 = arith.select %838, %787, %740 : vector<8x32xi1>, vector<8x32xf32>
    %840 = vector.shape_cast %824 : vector<8x1xi1> to vector<8x1xi1>
    %841 = vector.broadcast %840 : vector<8x1xi1> to vector<8x32xi1>
    %842 = arith.select %841, %820, %743 : vector<8x32xi1>, vector<8x32xf32>
    %c8_i32_290 = arith.constant 8 : i32
    %c0_291 = arith.constant 0 : index
    %c0_292 = arith.constant 0 : index
    %843 = vector.load %arg7[%c0_291, %c0_292] : memref<16x32xf32, #tpu.memory_space<vmem>>, vector<8x32xf32>
    tpu.vector_store %arg7[%c0_291, %c0_292], %839 {strides = array<i32>} : memref<16x32xf32, #tpu.memory_space<vmem>>, vector<8x32xf32>,
    %c8 = arith.constant 8 : index
    %c0_293 = arith.constant 0 : index
    %844 = vector.load %arg7[%c8, %c0_293] : memref<16x32xf32, #tpu.memory_space<vmem>>, vector<8x32xf32>
    tpu.vector_store %arg7[%c8, %c0_293], %842 {strides = array<i32>} : memref<16x32xf32, #tpu.memory_space<vmem>>, vector<8x32xf32>,
    return
  }
}

</mosaic_0001>

<bundles_post_ra>
// kernel: encoder_rnn_forward.2
= control target key start
LH: loop header
LB: loop body
LE: loop exit
PB: predicated region body
PF: predicated region fallthrough
CT: control target
= control target key end

     0   :  { %vm42_vm0 = vcmask 261120   ;;  %v6493_v7 = vmov 0   ;;  %v6494_v48 = vmov 0.0|0.0   ;;  %vm6495_vm5 = vmmov 0   ;;  %s6497_s30 = smov 32   ;;  %s7567_s2 = inlined_call_operand.vmem [shape: f32[192,32], index: 2, kind: input, shape index: {}]   ;;  %s7568_s1 = inlined_call_operand.vmem [shape: f32[64,32], index: 1, kind: input, shape index: {}]   ;;  %s7569_s0 = inlined_call_operand.vmem [shape: s32[8,1], index: 0, kind: input, shape index: {}]   ;;  %s7570_s3 = inlined_call_operand.vmem [shape: f32[192,32], index: 3, kind: input, shape index: {}]   ;;  %s7571_s4 = inlined_call_operand.vmem [shape: f32[6,32], index: 4, kind: input, shape index: {}]   ;;  %s7572_s5 = inlined_call_operand.vmem [shape: f32[2,32], index: 5, kind: input, shape index: {}]   ;;  %s7573_s6 = inlined_call_operand.vmem [shape: f32[64,64], index: 6, kind: output, shape index: {0}]   ;;  %s7574_s7 = inlined_call_operand.vmem [shape: f32[16,32], index: 7, kind: output, shape index: {1}]  }
   0x1   :  { %v33_v0 = vld [vmem:[%s7567_s2] sm:$0xff]  ;;  %v34_v1 = vld [vmem:[%s7567_s2 + $0x8] sm:$0xff]  ;;  %v35_v5 = vld [vmem:[%s7567_s2 + $0x10] sm:$0xff]  ;;  %6329 = vset.pattern.permute.xlu0 %v6493_v7  ;;  %6330 = vset.pattern.permute.xlu1 %v6493_v7  ;;  %vm1326_vm12 = vcmask 523520  }
   0x2   :  { %v180_v2 = vld [vmem:[%s7567_s2 + $0x20] sm:$0xff]  ;;  %v5988_v3 = vpack.c.bf16 %v34_v1, %v33_v0  ;;  %v181_v4 = vld [vmem:[%s7567_s2 + $0x28] sm:$0xff]  ;;  %v36_v6 = vld [vmem:[%s7567_s2 + $0x18] sm:$0xff] }
   0x3   :  { %v5996_v8 = vpack.c.bf16 %v181_v4, %v180_v2  ;;  %v5992_v9 = vpack.c.bf16 %v36_v6, %v35_v5  ;;  %v182_v10 = vld [vmem:[%s7567_s2 + $0x30] sm:$0xff]  ;;  %v183_v11 = vld [vmem:[%s7567_s2 + $0x38] sm:$0xff]  ;;  %v6567_v12 = vld [vmem:[%s7568_s1] sm:$0xff] }
   0x4   :  { %5989 = vmatprep.subr.bf16.mxu0 %v5988_v3  ;;  %v6000_v13 = vpack.c.bf16 %v183_v11, %v182_v10  ;;  %5348 = vmatprep.mubr.msk.f32.mxu0 %vm42_vm0, %v6567_v12  ;;  %v302_v14 = vld [vmem:[%s7567_s2 + $0x40] sm:$0xff]  ;;  %v303_v15 = vld [vmem:[%s7567_s2 + $0x48] sm:$0xff]  ;;  %v304_v19 = vld [vmem:[%s7567_s2 + $0x50] sm:$0xff] }
   0x5   :  { %5997 = vmatprep.subr.bf16.mxu1 %v5996_v8  ;;  %5991 = vmatpush3.bf16.msra.mxu0 %v5988_v3  ;;  %v6004_v16 = vpack.c.bf16 %v303_v15, %v302_v14  ;;  %v424_v17 = vld [vmem:[%s7567_s2 + $0x60] sm:$0xff]  ;;  %v425_v18 = vld [vmem:[%s7567_s2 + $0x68] sm:$0xff]  ;;  %v305_v20 = vld [vmem:[%s7567_s2 + $0x58] sm:$0xff]  ;;  %v6496_v3 = vmov 0.0  }
   0x6   :  { %5999 = vmatpush3.bf16.msra.mxu1 %v5996_v8  ;;  %5993 = vmatprep.subr.bf16.mxu0 %v5992_v9  ;;  %v6012_v21 = vpack.c.bf16 %v425_v18, %v424_v17  ;;  %v6594_v22 = vld [vmem:[%s7568_s1 + $0x8] sm:$0xff]  ;;  %v426_v23 = vld [vmem:[%s7567_s2 + $0x70] sm:$0xff]  ;;  %v427_v24 = vld [vmem:[%s7567_s2 + $0x78] sm:$0xff]  ;;  %v6008_v26 = vpack.c.bf16 %v305_v20, %v304_v19 }
   0x7   :  { %6001 = vmatprep.subr.bf16.mxu1 %v6000_v13  ;;  %5368 = vmatprep.mubr.msk.f32.mxu1 %vm42_vm0, %v6567_v12  ;;  %v6605_v25 = vld [vmem:[%s7568_s1 + $0x10] sm:$0xff]  ;;  %v6016_v27 = vpack.c.bf16 %v427_v24, %v426_v23  ;;  %v546_v28 = vld [vmem:[%s7567_s2 + $0x80] sm:$0xff]  ;;  %v547_v29 = vld [vmem:[%s7567_s2 + $0x88] sm:$0xff] }
   0x8   :  { %v6620_v30 = vld [vmem:[%s7568_s1 + $0x18] sm:$0xff]  ;;  %v668_v31 = vld [vmem:[%s7567_s2 + $0xa0] sm:$0xff]  ;;  %v669_v32 = vld [vmem:[%s7567_s2 + $0xa8] sm:$0xff]  ;;  %v6020_v34 = vpack.c.bf16 %v547_v29, %v546_v28 }
   0x9   :  { %5995 = vmatpush3.bf16.msra.mxu0 %v5992_v9  ;;  %v6635_v33 = vld [vmem:[%s7568_s1 + $0x20] sm:$0xff]  ;;  %v6028_v35 = vpack.c.bf16 %v669_v32, %v668_v31  ;;  %v6646_v36 = vld [vmem:[%s7568_s1 + $0x28] sm:$0xff]  ;;  %v6653_v37 = vld [vmem:[%s7568_s1 + $0x30] sm:$0xff] }
   0xa   :  { %6003 = vmatpush3.bf16.msra.mxu1 %v6000_v13  ;;  %6005 = vmatprep.subr.bf16.mxu0 %v6004_v16  ;;  %v6658_v38 = vld [vmem:[%s7569_s0] sm:$0xff]  ;;  %v6671_v39 = vld [vmem:[%s7568_s1 + $0x38] sm:$0xff]  ;;  %v548_v42 = vld [vmem:[%s7567_s2 + $0x90] sm:$0xff] }
   0xb   :  { %6013 = vmatprep.subr.bf16.mxu1 %v6012_v21  ;;  %vm1306_vm1 = vcmp.gt.s32.totalorder %v6658_v38, 0  ;;  %vm1307_vm2 = vcmp.gt.s32.totalorder %v6658_v38, 7  ;;  %v549_v43 = vld [vmem:[%s7567_s2 + $0x98] sm:$0xff]  ;;  %v670_v44 = vld [vmem:[%s7567_s2 + $0xb0] sm:$0xff]  ;;  %vm2321_vm3 = vcmp.gt.s32.totalorder %v6658_v38, 2  ;;  %vm2830_vm4 = vcmp.gt.s32.totalorder %v6658_v38, 3 }
   0xc   :  { %5349 = vmatmul.mubr.msk.f32.vlgmr.msra.gmra.mrb[0].mxu0 %vm42_vm0, %v6594_v22  ;;  %v1308_v40 = vsel %vm1306_vm1, 1, %v6493_v7  ;;  %v1315_v41 = vsel %vm1307_vm2, 1, %v6493_v7  ;;  %v671_v45 = vld [vmem:[%s7567_s2 + $0xb8] sm:$0xff]  ;;  %v6024_v46 = vpack.c.bf16 %v549_v43, %v548_v42  ;;  %v2323_v49 = vsel %vm2321_vm3, 1, %v6493_v7  ;;  %v790_v50 = vld [vmem:[%s7570_s3] sm:$0xff]  ;;  %v791_v51 = vld [vmem:[%s7570_s3 + $0x8] sm:$0xff] }
   0xd   :  { %5369 = vmatmul.mubr.msk.f32.vlgmr.msra.gmra.mrb[0].mxu1 %vm42_vm0, %v6594_v22  ;;  %6007 = vmatpush3.bf16.msra.mxu0 %v6004_v16  ;;  %v6032_v47 = vpack.c.bf16 %v671_v45, %v670_v44  ;;  %v2832_v52 = vsel %vm2830_vm4, 1, %v6493_v7  ;;  %v794_v53 = vld [vmem:[%s7570_s3 + $0x20] sm:$0xff]  ;;  %v795_v54 = vld [vmem:[%s7570_s3 + $0x28] sm:$0xff]  ;;  %v6745_v55 = vpack.c.bf16 %v791_v51, %v790_v50  ;;  %v792_v57 = vld [vmem:[%s7570_s3 + $0x10] sm:$0xff]  ;;  %vm1812_vm6 = vcmp.gt.s32.totalorder %v6658_v38, 1 }
   0xe   :  { %5351 = vmatprep.mubr.msk.f32.mxu0 %vm42_vm0, %v6605_v25  ;;  %5371 = vmatprep.mubr.msk.f32.mxu1 %vm42_vm0, %v6605_v25  ;;  %v6749_v56 = vpack.c.bf16 %v795_v54, %v794_v53  ;;  %v793_v58 = vld [vmem:[%s7570_s3 + $0x18] sm:$0xff]  ;;  %v796_v59 = vld [vmem:[%s7570_s3 + $0x30] sm:$0xff]  ;;  %v802_v63 = vld [vmem:[%s7570_s3 + $0x60] sm:$0xff]  ;;  %vm1813_vm7 = vcmp.gt.s32.totalorder %v6658_v38, 6  ;;  %vm2322_vm9 = vcmp.gt.s32.totalorder %v6658_v38, 5  ;;  %vm2831_vm11 = vcmp.gt.s32.totalorder %v6658_v38, 4 }
   0xf   :  { %6009 = vmatprep.subr.bf16.mxu0 %v6008_v26  ;;  %6015 = vmatpush3.bf16.msra.mxu1 %v6012_v21  ;;  %v797_v60 = vld [vmem:[%s7570_s3 + $0x38] sm:$0xff]  ;;  %v6772_v61 = vpack.c.bf16 %v793_v58, %v792_v57  ;;  %v803_v0 = vld [vmem:[%s7570_s3 + $0x68] sm:$0xff]  ;;  %v806_v1 = vld [vmem:[%s7570_s3 + $0x80] sm:$0xff] }
  0x10   :  { %5352 = vmatmul.mubr.msk.f32.gmra.mrb[2].mxu0 %vm42_vm0, %v6620_v30  ;;  %6017 = vmatprep.subr.bf16.mxu1 %v6016_v27  ;;  %v6776_v62 = vpack.c.bf16 %v797_v60, %v796_v59  ;;  %v807_v2 = vld [vmem:[%s7570_s3 + $0x88] sm:$0xff]  ;;  %v6817_v4 = vpack.c.bf16 %v803_v0, %v802_v63  ;;  %v804_v6 = vld [vmem:[%s7570_s3 + $0x70] sm:$0xff]  ;;  %v805_v8 = vld [vmem:[%s7570_s3 + $0x78] sm:$0xff] }
  0x11   :  { %5372 = vmatmul.mubr.msk.f32.gmra.mrb[2].mxu1 %vm42_vm0, %v6620_v30  ;;  %5354 = vmatprep.mubr.msk.f32.mxu0 %vm42_vm0, %v6635_v33  ;;  %v6821_v5 = vpack.c.bf16 %v807_v2, %v806_v1  ;;  %v808_v9 = vld [vmem:[%s7570_s3 + $0x90] sm:$0xff]  ;;  %v809_v10 = vld [vmem:[%s7570_s3 + $0x98] sm:$0xff]  ;;  %v6838_v11 = vpack.c.bf16 %v805_v8, %v804_v6  ;;  %v798_v13 = vld [vmem:[%s7570_s3 + $0x40] sm:$0xff] }
  0x12   :  { %5374 = vmatprep.mubr.msk.f32.mxu1 %vm42_vm0, %v6635_v33  ;;  %6011 = vmatpush3.bf16.msra.mxu0 %v6008_v26  ;;  %v799_v14 = vld [vmem:[%s7570_s3 + $0x48] sm:$0xff]  ;;  %v810_v15 = vld [vmem:[%s7570_s3 + $0xa0] sm:$0xff]  ;;  %v800_v18 = vld [vmem:[%s7570_s3 + $0x50] sm:$0xff] }
  0x13   :  { %6019 = vmatpush3.bf16.msra.mxu1 %v6016_v27  ;;  %6021 = vmatprep.subr.bf16.mxu0 %v6020_v34  ;;  %v811_v16 = vld [vmem:[%s7570_s3 + $0xa8] sm:$0xff]  ;;  %v6862_v17 = vpack.c.bf16 %v799_v14, %v798_v13  ;;  %v801_v19 = vld [vmem:[%s7570_s3 + $0x58] sm:$0xff]  ;;  %v812_v21 = vld [vmem:[%s7570_s3 + $0xb0] sm:$0xff] }
  0x14   :  { %5355 = vmatmul.mubr.msk.f32.gmra.mrb[4].mxu0 %vm42_vm0, %v6646_v36  ;;  %6029 = vmatprep.subr.bf16.mxu1 %v6028_v35  ;;  %v6873_v20 = vpack.c.bf16 %v811_v16, %v810_v15  ;;  %v6884_v23 = vpack.c.bf16 %v801_v19, %v800_v18  ;;  %v4884_v26 = vld [vmem:[%s7571_s4] ss:$0 sm:$0xff]  ;;  %v4893_v27 = vld [vmem:[%s7571_s4 + $0x1] ss:$0 sm:$0xff]  ;;  %v4902_v63 = vld [vmem:[%s7571_s4 + $0x2] ss:$0 sm:$0xff] }
  0x15   :  { %5375 = vmatmul.mubr.msk.f32.gmra.mrb[4].mxu1 %vm42_vm0, %v6646_v36  ;;  %5357 = vmatprep.mubr.msk.f32.mxu0 %vm42_vm0, %v6653_v37  ;;  %v4911_v6 = vld [vmem:[%s7571_s4 + $0x3] ss:$0 sm:$0xff] }
  0x16   :  { %5377 = vmatprep.mubr.msk.f32.mxu1 %vm42_vm0, %v6653_v37  ;;  %1310 = vperm.xlu0 %6329, %v1308_v40  }
  0x18   :  { %5358 = vmatmul.mubr.msk.f32.gmra.mrb[6].mxu0 %vm42_vm0, %v6671_v39 }
  0x19   :  { %5378 = vmatmul.mubr.msk.f32.gmra.mrb[6].mxu1 %vm42_vm0, %v6671_v39  ;;  %5388 = vmatprep.mubr.msk.f32.mxu0 %vm42_vm0, %v6567_v12 }
  0x1a   :  { %5408 = vmatprep.mubr.msk.f32.mxu1 %vm42_vm0, %v6567_v12  ;;  %1317 = vperm.xlu0 %6329, %v1315_v41  }
  0x1c   :  { %5389 = vmatmul.mubr.msk.f32.vlgmr.msra.gmra.mrb[8].mxu0 %vm42_vm0, %v6594_v22 }
  0x1d   :  { %5409 = vmatmul.mubr.msk.f32.vlgmr.msra.gmra.mrb[8].mxu1 %vm42_vm0, %v6594_v22  ;;  %6023 = vmatpush3.bf16.msra.mxu0 %v6020_v34 }
  0x1e   :  { %5391 = vmatprep.mubr.msk.f32.mxu0 %vm42_vm0, %v6605_v25  ;;  %5411 = vmatprep.mubr.msk.f32.mxu1 %vm42_vm0, %v6605_v25 }
  0x1f   :  { %6025 = vmatprep.subr.bf16.mxu0 %v6024_v46  ;;  %6031 = vmatpush3.bf16.msra.mxu1 %v6028_v35 }
  0x20   :  { %5392 = vmatmul.mubr.msk.f32.gmra.mrb[10].mxu0 %vm42_vm0, %v6620_v30  ;;  %6033 = vmatprep.subr.bf16.mxu1 %v6032_v47 }
  0x21   :  { %5412 = vmatmul.mubr.msk.f32.gmra.mrb[10].mxu1 %vm42_vm0, %v6620_v30  ;;  %5394 = vmatprep.mubr.msk.f32.mxu0 %vm42_vm0, %v6635_v33 }
  0x22   :  { %5414 = vmatprep.mubr.msk.f32.mxu1 %vm42_vm0, %v6635_v33  ;;  %6027 = vmatpush3.bf16.msra.mxu0 %v6024_v46 }
  0x23   :  { %6035 = vmatpush3.bf16.msra.mxu1 %v6032_v47  ;;  %6036 = vmatprep.subr.bf16.mxu0 %v6494_v48 }
  0x24   :  { %5395 = vmatmul.mubr.msk.f32.gmra.mrb[12].mxu0 %vm42_vm0, %v6646_v36  ;;  %6042 = vmatprep.subr.bf16.mxu1 %v6494_v48 }
  0x25   :  { %5415 = vmatmul.mubr.msk.f32.gmra.mrb[12].mxu1 %vm42_vm0, %v6646_v36  ;;  %5397 = vmatprep.mubr.msk.f32.mxu0 %vm42_vm0, %v6653_v37 }
  0x26   :  { %5417 = vmatprep.mubr.msk.f32.mxu1 %vm42_vm0, %v6653_v37  ;;  %2325 = vperm.xlu0 %6329, %v2323_v49  }
  0x28   :  { %5398 = vmatmul.mubr.msk.f32.gmra.mrb[14].mxu0 %vm42_vm0, %v6671_v39 }
  0x29   :  { %5418 = vmatmul.mubr.msk.f32.gmra.mrb[14].mxu1 %vm42_vm0, %v6671_v39  ;;  %5428 = vmatprep.mubr.msk.f32.mxu0 %vm42_vm0, %v6567_v12 }
  0x2a   :  { %5448 = vmatprep.mubr.msk.f32.mxu1 %vm42_vm0, %v6567_v12  ;;  %2834 = vperm.xlu0 %6329, %v2832_v52   ;;  %v6842_v12 = vpack.c.bf16 %v809_v10, %v808_v9 }
  0x2c   :  { %5429 = vmatmul.mubr.msk.f32.vlgmr.msra.gmra.mrb[16].mxu0 %vm42_vm0, %v6594_v22 }
  0x2d   :  { %5449 = vmatmul.mubr.msk.f32.vlgmr.msra.gmra.mrb[16].mxu1 %vm42_vm0, %v6594_v22  ;;  %6038 = vmatpush3.bf16.msra.mxu0 %v6745_v55  ;;  %v813_v22 = vld [vmem:[%s7570_s3 + $0xb8] sm:$0xff] }
  0x2e   :  { %5431 = vmatprep.mubr.msk.f32.mxu0 %vm42_vm0, %v6605_v25  ;;  %5451 = vmatprep.mubr.msk.f32.mxu1 %vm42_vm0, %v6605_v25  ;;  %v6890_v24 = vpack.c.bf16 %v813_v22, %v812_v21  ;;  %v1814_v25 = vsel %vm1812_vm6, 1, %v6493_v7 }
  0x2f   :  { %6039 = vmatprep.subr.bf16.mxu0 %v6494_v48  ;;  %6044 = vmatpush3.bf16.msra.mxu1 %v6749_v56 }
  0x30   :  { %5432 = vmatmul.mubr.msk.f32.gmra.mrb[18].mxu0 %vm42_vm0, %v6620_v30  ;;  %6045 = vmatprep.subr.bf16.mxu1 %v6494_v48 }
  0x31   :  { %5452 = vmatmul.mubr.msk.f32.gmra.mrb[18].mxu1 %vm42_vm0, %v6620_v30  ;;  %5434 = vmatprep.mubr.msk.f32.mxu0 %vm42_vm0, %v6635_v33 }
  0x32   :  { %5454 = vmatprep.mubr.msk.f32.mxu1 %vm42_vm0, %v6635_v33  ;;  %6041 = vmatpush3.bf16.msra.mxu0 %v6772_v61 }
  0x33   :  { %6047 = vmatpush3.bf16.msra.mxu1 %v6776_v62  ;;  %6048 = vmatprep.subr.bf16.mxu0 %v6494_v48 }
  0x34   :  { %5435 = vmatmul.mubr.msk.f32.gmra.mrb[20].mxu0 %vm42_vm0, %v6646_v36  ;;  %6054 = vmatprep.subr.bf16.mxu1 %v6494_v48 }
  0x35   :  { %5455 = vmatmul.mubr.msk.f32.gmra.mrb[20].mxu1 %vm42_vm0, %v6646_v36  ;;  %5437 = vmatprep.mubr.msk.f32.mxu0 %vm42_vm0, %v6653_v37 }
  0x36   :  { %5457 = vmatprep.mubr.msk.f32.mxu1 %vm42_vm0, %v6653_v37  ;;  %1816 = vperm.xlu1 %6330, %v1814_v25  }
  0x38   :  { %5438 = vmatmul.mubr.msk.f32.gmra.mrb[22].mxu0 %vm42_vm0, %v6671_v39 }
  0x39   :  { %5458 = vmatmul.mubr.msk.f32.gmra.mrb[22].mxu1 %vm42_vm0, %v6671_v39  ;;  %5468 = vmatprep.mubr.msk.f32.mxu0 %vm6495_vm5, %v6496_v3 }
  0x3a   :  { %5479 = vmatprep.mubr.msk.f32.mxu1 %vm6495_vm5, %v6496_v3 }
  0x3c   :  { %5469 = vmatmul.mubr.f32.vlgmr.msra.gmra.mrb[24].mxu0 %v6496_v3 }
  0x3d   :  { %5480 = vmatmul.mubr.f32.vlgmr.msra.gmra.mrb[24].mxu1 %v6496_v3  ;;  %6050 = vmatpush3.bf16.msra.mxu0 %v6817_v4 }
  0x3e   :  { %6056 = vmatpush3.bf16.msra.mxu1 %v6821_v5  ;;  %6051 = vmatprep.subr.bf16.mxu0 %v6494_v48 }
  0x3f   :  { %6057 = vmatprep.subr.bf16.mxu1 %v6494_v48  ;;  %5490 = vmatprep.mubr.msk.f32.mxu0 %vm6495_vm5, %v6496_v3 }
  0x40   :  { %5501 = vmatprep.mubr.msk.f32.mxu1 %vm6495_vm5, %v6496_v3 }
  0x41   :  { %6053 = vmatpush3.bf16.msra.mxu0 %v6838_v11 }
  0x42   :  { %6059 = vmatpush3.bf16.msra.mxu1 %v6842_v12  ;;  %6060 = vmatprep.subr.bf16.mxu0 %v6494_v48 }
  0x43   :  { %6066 = vmatprep.subr.bf16.mxu1 %v6494_v48 }
  0x44   :  { %5491 = vmatmul.mubr.f32.vlgmr.msra.gmra.mrb[26].mxu0 %v6496_v3 }
  0x45   :  { %5502 = vmatmul.mubr.f32.vlgmr.msra.gmra.mrb[26].mxu1 %v6496_v3  ;;  %6062 = vmatpush3.bf16.msra.mxu0 %v6862_v17 }
  0x46   :  { %6063 = vmatprep.subr.bf16.mxu0 %v6494_v48  ;;  %5512 = vmatprep.mubr.msk.f32.mxu0 %vm6495_vm5, %v6496_v3 }
  0x47   :  { %6068 = vmatpush3.bf16.msra.mxu1 %v6873_v20  ;;  %5523 = vmatprep.mubr.msk.f32.mxu1 %vm6495_vm5, %v6496_v3 }
  0x48   :  { %6069 = vmatprep.subr.bf16.mxu1 %v6494_v48 }
  0x49   :  { %6065 = vmatpush3.bf16.msra.mxu0 %v6884_v23 }
  0x4a   :  { %6072 = vmatprep.subr.bf16.mxu0 %v6494_v48 }
  0x4b   :  { %6071 = vmatpush3.bf16.msra.mxu1 %v6890_v24 }
  0x4c   :  { %5513 = vmatmul.mubr.f32.vlgmr.msra.gmra.mrb[28].mxu0 %v6496_v3  ;;  %6078 = vmatprep.subr.bf16.mxu1 %v6494_v48 }
  0x4d   :  { %6074 = vmatpush3.bf16.msra.mxu0 %v6745_v55  ;;  %5534 = vmatprep.mubr.msk.f32.mxu0 %vm6495_vm5, %v6496_v3 }
  0x4e   :  { %5524 = vmatmul.mubr.f32.vlgmr.msra.gmra.mrb[28].mxu1 %v6496_v3  ;;  %6075 = vmatprep.subr.bf16.mxu0 %v6494_v48 }
  0x4f   :  { %6080 = vmatpush3.bf16.msra.mxu1 %v6749_v56  ;;  %5545 = vmatprep.mubr.msk.f32.mxu1 %vm6495_vm5, %v6496_v3 }
  0x50   :  { %6081 = vmatprep.subr.bf16.mxu1 %v6494_v48 }
  0x51   :  { %6077 = vmatpush3.bf16.msra.mxu0 %v6772_v61 }
  0x52   :  { %6084 = vmatprep.subr.bf16.mxu0 %v6494_v48 }
  0x53   :  { %6083 = vmatpush3.bf16.msra.mxu1 %v6776_v62 }
  0x54   :  { %6090 = vmatprep.subr.bf16.mxu1 %v6494_v48 }
  0xdf   :  { %v5350_v28 = vpop.f32.mrb[0].mxu0 }
  0xe0   :  { %v139_v29 = vadd.f32 %v5350_v28, %v4884_v26  ;;  %v133_v30 = vpop.f32.mrb[1].mxu0  ;;  %v5370_v31 = vpop.f32.mrb[0].mxu1 }
  0xe1   :  { %v134_v32 = vadd.f32 %v4884_v26, %v133_v30  ;;  %v261_v33 = vadd.f32 %v5370_v31, %v4893_v27  ;;  %v255_v34 = vpop.f32.mrb[1].mxu1 }
  0xe2   :  { %173 = vst.msk [vmem:[#allocation2 + $0x8] sm:$0xff] %vm42_vm0, %v139_v29  ;;  %v256_v35 = vadd.f32 %v4893_v27, %v255_v34 }
  0xe3   :  { %172 = vst.msk [vmem:[#allocation2] sm:$0xff] %vm42_vm0, %v134_v32  ;;  %v5353_v36 = vpop.f32.mrb[2].mxu0  ;;  %295 = vst.msk [vmem:[#allocation2 + $0x48] sm:$0xff] %vm42_vm0, %v261_v33 }
  0xe4   :  { %v149_v37 = vadd.f32 %v5353_v36, %v4884_v26  ;;  %v143_v39 = vpop.f32.mrb[3].mxu0  ;;  %294 = vst.msk [vmem:[#allocation2 + $0x40] sm:$0xff] %vm42_vm0, %v256_v35  ;;  %v5373_v40 = vpop.f32.mrb[2].mxu1 }
  0xe5   :  { %v144_v41 = vadd.f32 %v4884_v26, %v143_v39  ;;  %v271_v42 = vadd.f32 %v5373_v40, %v4893_v27  ;;  %v265_v43 = vpop.f32.mrb[3].mxu1 }
  0xe6   :  { %175 = vst.msk [vmem:[#allocation2 + $0x18] sm:$0xff] %vm42_vm0, %v149_v37  ;;  %v266_v44 = vadd.f32 %v4893_v27, %v265_v43 }
  0xe7   :  { %174 = vst.msk [vmem:[#allocation2 + $0x10] sm:$0xff] %vm42_vm0, %v144_v41  ;;  %v5356_v45 = vpop.f32.mrb[4].mxu0  ;;  %297 = vst.msk [vmem:[#allocation2 + $0x58] sm:$0xff] %vm42_vm0, %v271_v42 }
  0xe8   :  { %v159_v46 = vadd.f32 %v5356_v45, %v4884_v26  ;;  %v153_v47 = vpop.f32.mrb[5].mxu0  ;;  %296 = vst.msk [vmem:[#allocation2 + $0x50] sm:$0xff] %vm42_vm0, %v266_v44  ;;  %v5376_v49 = vpop.f32.mrb[4].mxu1  ;;  %v4920_v44 = vld [vmem:[%s7571_s4 + $0x4] ss:$0 sm:$0xff] }
  0xe9   :  { %v154_v50 = vadd.f32 %v4884_v26, %v153_v47  ;;  %v281_v51 = vadd.f32 %v5376_v49, %v4893_v27  ;;  %v275_v52 = vpop.f32.mrb[5].mxu1  ;;  %v4929_v49 = vld [vmem:[%s7571_s4 + $0x5] ss:$0 sm:$0xff] }
  0xea   :  { %177 = vst.msk [vmem:[#allocation2 + $0x28] sm:$0xff] %vm42_vm0, %v159_v46  ;;  %v276_v53 = vadd.f32 %v4893_v27, %v275_v52 }
  0xeb   :  { %176 = vst.msk [vmem:[#allocation2 + $0x20] sm:$0xff] %vm42_vm0, %v154_v50  ;;  %v5359_v54 = vpop.f32.mrb[6].mxu0  ;;  %299 = vst.msk [vmem:[#allocation2 + $0x68] sm:$0xff] %vm42_vm0, %v281_v51 }
  0xec   :  { %v169_v57 = vadd.f32 %v5359_v54, %v4884_v26  ;;  %v163_v58 = vpop.f32.mrb[7].mxu0  ;;  %298 = vst.msk [vmem:[#allocation2 + $0x60] sm:$0xff] %vm42_vm0, %v276_v53  ;;  %v5379_v59 = vpop.f32.mrb[6].mxu1 }
  0xed   :  { %v164_v60 = vadd.f32 %v4884_v26, %v163_v58  ;;  %v291_v0 = vadd.f32 %v5379_v59, %v4893_v27  ;;  %v285_v1 = vpop.f32.mrb[7].mxu1 }
  0xee   :  { %179 = vst.msk [vmem:[#allocation2 + $0x38] sm:$0xff] %vm42_vm0, %v169_v57  ;;  %v286_v2 = vadd.f32 %v4893_v27, %v285_v1 }
  0xef   :  { %178 = vst.msk [vmem:[#allocation2 + $0x30] sm:$0xff] %vm42_vm0, %v164_v60  ;;  %v5390_v8 = vpop.f32.mrb[8].mxu0  ;;  %301 = vst.msk [vmem:[#allocation2 + $0x78] sm:$0xff] %vm42_vm0, %v291_v0 }
  0xf0   :  { %v383_v9 = vadd.f32 %v5390_v8, %v4902_v63  ;;  %v377_v10 = vpop.f32.mrb[9].mxu0  ;;  %300 = vst.msk [vmem:[#allocation2 + $0x70] sm:$0xff] %vm42_vm0, %v286_v2  ;;  %v5410_v13 = vpop.f32.mrb[8].mxu1 }
  0xf1   :  { %v378_v14 = vadd.f32 %v4902_v63, %v377_v10  ;;  %v505_v15 = vadd.f32 %v5410_v13, %v4911_v6  ;;  %v499_v16 = vpop.f32.mrb[9].mxu1 }
  0xf2   :  { %417 = vst.msk [vmem:[#allocation2 + $0x88] sm:$0xff] %vm42_vm0, %v383_v9  ;;  %v500_v18 = vadd.f32 %v4911_v6, %v499_v16 }
  0xf3   :  { %416 = vst.msk [vmem:[#allocation2 + $0x80] sm:$0xff] %vm42_vm0, %v378_v14  ;;  %v5393_v19 = vpop.f32.mrb[10].mxu0  ;;  %539 = vst.msk [vmem:[#allocation2 + $0xc8] sm:$0xff] %vm42_vm0, %v505_v15 }
  0xf4   :  { %v393_v21 = vadd.f32 %v5393_v19, %v4902_v63  ;;  %v387_v22 = vpop.f32.mrb[11].mxu0  ;;  %538 = vst.msk [vmem:[#allocation2 + $0xc0] sm:$0xff] %vm42_vm0, %v500_v18  ;;  %v5413_v25 = vpop.f32.mrb[10].mxu1 }
  0xf5   :  { %v388_v26 = vadd.f32 %v4902_v63, %v387_v22  ;;  %v515_v27 = vadd.f32 %v5413_v25, %v4911_v6  ;;  %v509_v28 = vpop.f32.mrb[11].mxu1 }
  0xf6   :  { %419 = vst.msk [vmem:[#allocation2 + $0x98] sm:$0xff] %vm42_vm0, %v393_v21  ;;  %v510_v29 = vadd.f32 %v4911_v6, %v509_v28 }
  0xf7   :  { %418 = vst.msk [vmem:[#allocation2 + $0x90] sm:$0xff] %vm42_vm0, %v388_v26  ;;  %v5396_v30 = vpop.f32.mrb[12].mxu0  ;;  %541 = vst.msk [vmem:[#allocation2 + $0xd8] sm:$0xff] %vm42_vm0, %v515_v27 }
  0xf8   :  { %v403_v31 = vadd.f32 %v5396_v30, %v4902_v63  ;;  %v397_v32 = vpop.f32.mrb[13].mxu0  ;;  %540 = vst.msk [vmem:[#allocation2 + $0xd0] sm:$0xff] %vm42_vm0, %v510_v29  ;;  %v5416_v33 = vpop.f32.mrb[12].mxu1 }
  0xf9   :  { %v398_v34 = vadd.f32 %v4902_v63, %v397_v32  ;;  %v525_v35 = vadd.f32 %v5416_v33, %v4911_v6  ;;  %v519_v36 = vpop.f32.mrb[13].mxu1  ;;  %v1108_v33 = vld [vmem:[#allocation2] sm:$0xff] }
  0xfa   :  { %421 = vst.msk [vmem:[#allocation2 + $0xa8] sm:$0xff] %vm42_vm0, %v403_v31  ;;  %v520_v37 = vadd.f32 %v4911_v6, %v519_v36 }
  0xfb   :  { %420 = vst.msk [vmem:[#allocation2 + $0xa0] sm:$0xff] %vm42_vm0, %v398_v34  ;;  %v5399_v39 = vpop.f32.mrb[14].mxu0  ;;  %543 = vst.msk [vmem:[#allocation2 + $0xe8] sm:$0xff] %vm42_vm0, %v525_v35 }
  0xfc   :  { %v413_v40 = vadd.f32 %v5399_v39, %v4902_v63  ;;  %v407_v41 = vpop.f32.mrb[15].mxu0  ;;  %542 = vst.msk [vmem:[#allocation2 + $0xe0] sm:$0xff] %vm42_vm0, %v520_v37  ;;  %v5419_v42 = vpop.f32.mrb[14].mxu1 }
  0xfd   :  { %v408_v43 = vadd.f32 %v4902_v63, %v407_v41  ;;  %v535_v45 = vadd.f32 %v5419_v42, %v4911_v6  ;;  %v529_v46 = vpop.f32.mrb[15].mxu1 }
  0xfe   :  { %423 = vst.msk [vmem:[#allocation2 + $0xb8] sm:$0xff] %vm42_vm0, %v413_v40  ;;  %v530_v47 = vadd.f32 %v4911_v6, %v529_v46  ;;  %v1118_v40 = vld [vmem:[#allocation2 + $0x40] sm:$0xff] }
  0xff   :  { %422 = vst.msk [vmem:[#allocation2 + $0xb0] sm:$0xff] %vm42_vm0, %v408_v43  ;;  %v5430_v50 = vpop.f32.mrb[16].mxu0  ;;  %545 = vst.msk [vmem:[#allocation2 + $0xf8] sm:$0xff] %vm42_vm0, %v535_v45 }
 0x100   :  { %v627_v51 = vadd.f32 %v5430_v50, %v4920_v44  ;;  %v621_v52 = vpop.f32.mrb[17].mxu0  ;;  %544 = vst.msk [vmem:[#allocation2 + $0xf0] sm:$0xff] %vm42_vm0, %v530_v47  ;;  %v5450_v53 = vpop.f32.mrb[16].mxu1 }
 0x101   :  { %v622_v54 = vadd.f32 %v4920_v44, %v621_v52  ;;  %v749_v57 = vadd.f32 %v5450_v53, %v4929_v49  ;;  %v743_v58 = vpop.f32.mrb[17].mxu1 }
 0x102   :  { %661 = vst.msk [vmem:[#allocation2 + $0x108] sm:$0xff] %vm42_vm0, %v627_v51  ;;  %v744_v59 = vadd.f32 %v4929_v49, %v743_v58 }
 0x103   :  { %660 = vst.msk [vmem:[#allocation2 + $0x100] sm:$0xff] %vm42_vm0, %v622_v54  ;;  %v5433_v60 = vpop.f32.mrb[18].mxu0  ;;  %783 = vst.msk [vmem:[#allocation2 + $0x148] sm:$0xff] %vm42_vm0, %v749_v57 }
 0x104   :  { %v637_v63 = vadd.f32 %v5433_v60, %v4920_v44  ;;  %v631_v0 = vpop.f32.mrb[19].mxu0  ;;  %782 = vst.msk [vmem:[#allocation2 + $0x140] sm:$0xff] %vm42_vm0, %v744_v59  ;;  %v5453_v1 = vpop.f32.mrb[18].mxu1 }
 0x105   :  { %v632_v2 = vadd.f32 %v4920_v44, %v631_v0  ;;  %v759_v6 = vadd.f32 %v5453_v1, %v4929_v49  ;;  %v753_v8 = vpop.f32.mrb[19].mxu1  ;;  %v6984_v1 = vld [vmem:[%s7572_s5] ss:$0 sm:$0xff] }
 0x106   :  { %663 = vst.msk [vmem:[#allocation2 + $0x118] sm:$0xff] %vm42_vm0, %v637_v63  ;;  %v754_v9 = vadd.f32 %v4929_v49, %v753_v8 }
 0x107   :  { %662 = vst.msk [vmem:[#allocation2 + $0x110] sm:$0xff] %vm42_vm0, %v632_v2  ;;  %v5436_v10 = vpop.f32.mrb[20].mxu0  ;;  %785 = vst.msk [vmem:[#allocation2 + $0x158] sm:$0xff] %vm42_vm0, %v759_v6 }
 0x108   :  { %v647_v13 = vadd.f32 %v5436_v10, %v4920_v44  ;;  %v641_v14 = vpop.f32.mrb[21].mxu0  ;;  %784 = vst.msk [vmem:[#allocation2 + $0x150] sm:$0xff] %vm42_vm0, %v754_v9  ;;  %v5456_v15 = vpop.f32.mrb[20].mxu1 }
 0x109   :  { %v642_v16 = vadd.f32 %v4920_v44, %v641_v14  ;;  %v769_v18 = vadd.f32 %v5456_v15, %v4929_v49  ;;  %v763_v19 = vpop.f32.mrb[21].mxu1  ;;  %v1128_v15 = vld [vmem:[#allocation2 + $0x80] sm:$0xff] }
 0x10a   :  { %665 = vst.msk [vmem:[#allocation2 + $0x128] sm:$0xff] %vm42_vm0, %v647_v13  ;;  %v764_v21 = vadd.f32 %v4929_v49, %v763_v19 }
 0x10b   :  { %664 = vst.msk [vmem:[#allocation2 + $0x120] sm:$0xff] %vm42_vm0, %v642_v16  ;;  %v5439_v22 = vpop.f32.mrb[22].mxu0  ;;  %787 = vst.msk [vmem:[#allocation2 + $0x168] sm:$0xff] %vm42_vm0, %v769_v18  ;;  %v6990_v16 = vld [vmem:[%s7572_s5 + $0x1] ss:$0 sm:$0xff] }
 0x10c   :  { %v657_v25 = vadd.f32 %v5439_v22, %v4920_v44  ;;  %v651_v26 = vpop.f32.mrb[23].mxu0  ;;  %786 = vst.msk [vmem:[#allocation2 + $0x160] sm:$0xff] %vm42_vm0, %v764_v21  ;;  %v5459_v27 = vpop.f32.mrb[22].mxu1 }
 0x10d   :  { %v652_v28 = vadd.f32 %v4920_v44, %v651_v26  ;;  %v779_v29 = vadd.f32 %v5459_v27, %v4929_v49  ;;  %v773_v30 = vpop.f32.mrb[23].mxu1  ;;  %v1208_v44 = vld [vmem:[#allocation2 + $0xf8] sm:$0xff] }
 0x10e   :  { %667 = vst.msk [vmem:[#allocation2 + $0x138] sm:$0xff] %vm42_vm0, %v657_v25  ;;  %v774_v31 = vadd.f32 %v4929_v49, %v773_v30 }
 0x10f   :  { %666 = vst.msk [vmem:[#allocation2 + $0x130] sm:$0xff] %vm42_vm0, %v652_v28  ;;  %789 = vst.msk [vmem:[#allocation2 + $0x178] sm:$0xff] %vm42_vm0, %v779_v29  ;;  %v894_v32 = vpop.f32.mrb[24].mxu0 }
 0x110   :  { %788 = vst.msk [vmem:[#allocation2 + $0x170] sm:$0xff] %vm42_vm0, %v774_v31  ;;  %v1109_v34 = vadd.f32 %v1108_v33, %v894_v32  ;;  %v964_v35 = vpop.f32.mrb[24].mxu1  ;;  %v5470_v36 = vpop.f32.mrb[25].mxu0 }
 0x111   :  { %v5481_v37 = vpop.f32.mrb[25].mxu1  ;;  %v1119_v41 = vadd.f32 %v1118_v40, %v964_v35  ;;  %v6994_v33 = vpop.permute.xlu0 %1310  ;;  %v2331_v40 = vsel %vm2322_vm9, 1, %v6493_v7 }
 0x112   :  { %v4940_v39 = vmul.f32 -1.442695, %v1109_v34  ;;  %v1822_v34 = vsel %vm1813_vm7, 1, %v6493_v7  ;;  %vm1312_vm8 = vcmp.eq.s32.totalorder %v6994_v33, 1 }
 0x113   :  { %v4941_v42 = vmul.f32 -1.442695, %v1119_v41  ;;  %1824 = vperm.xlu1 %6330, %v1822_v34  }
 0x114   :  { %6331 = vpow2.f32 %v4940_v39 }
 0x115   :  { %v1218_v47 = vld [vmem:[#allocation2 + $0x138] sm:$0xff]  ;;  %6333 = vpow2.f32 %v4941_v42 }
 0x116   :  { %v1228_v26 = vld [vmem:[#allocation2 + $0x178] sm:$0xff] }
 0x117   :  { %v1034_v43 = vpop.f32.mrb[26].mxu0  ;;  %2333 = vperm.xlu1 %6330, %v2331_v40  }
 0x118   :  { %v1209_v45 = vadd.f32 %v1208_v44, %v1034_v43  ;;  %v1104_v46 = vpop.f32.mrb[26].mxu1  ;;  %v5492_v49 = vpop.f32.mrb[27].mxu0 }
 0x119   :  { %v5503_v50 = vpop.f32.mrb[27].mxu1  ;;  %v1219_v52 = vadd.f32 %v1218_v47, %v1104_v46  ;;  %v2840_v47 = vsel %vm2831_vm11, 1, %v6493_v7 }
 0x11a   :  { %v4942_v51 = vmul.f32 -1.442695, %v1209_v45  ;;  %v7021_v45 = vpop.permute.xlu0 %1317 }
 0x11b   :  { %v4943_v57 = vmul.f32 -1.442695, %v1219_v52  ;;  %vm1319_vm10 = vcmp.eq.s32.totalorder %v7021_v45, 1  ;;  %2842 = vperm.xlu1 %6330, %v2840_v47   ;;  %v1734_v47 = vld [vmem:[#allocation2 + $0x170] sm:$0xff] }
 0x11c   :  { %6335 = vpow2.f32 %v4942_v51  ;;  %v1614_v51 = vld [vmem:[#allocation2 + $0x8] sm:$0xff] }
 0x11e   :  { %v6332_v53 = vpop.eup %6331  ;;  %v7068_v7 = vpop.permute.xlu0 %2325 }
 0x11f   :  { %v1113_v54 = vadd.f32 1.0, %v6332_v53  ;;  %v1195_v58 = vpop.f32.mrb[28].mxu0  ;;  %v6334_v0 = vpop.eup %6333  ;;  %vm2327_vm15 = vcmp.eq.s32.totalorder %v7068_v7, 1  ;;  %v4131_v7 = vld [vmem:[#allocation2 + $0x30] sm:$0xff] }
 0x120   :  { %v5514_v59 = vpop.f32.mrb[29].mxu0  ;;  %v1123_v8 = vadd.f32 1.0, %v6334_v0  ;;  %v1196_v9 = vadd.f32 %v6984_v1, %v1195_v58 }
 0x121   :  { %6337 = vrcp.f32 %v1113_v54  ;;  %v1295_v60 = vpop.f32.mrb[28].mxu1  ;;  %v1624_v59 = vld [vmem:[#allocation2 + $0x48] sm:$0xff] }
 0x122   :  { %v5525_v63 = vpop.f32.mrb[29].mxu1  ;;  %6339 = vpow2.f32 %v4943_v57  ;;  %v1296_v21 = vadd.f32 %v6990_v16, %v1295_v60  ;;  %v7070_v38 = vpop.permute.xlu0 %2834 }
 0x123   :  { %vm2836_vm2 = vcmp.eq.s32.totalorder %v7070_v38, 1 }
 0x126   :  { %v6336_v2 = vpop.eup %6335 }
 0x127   :  { %v1213_v6 = vadd.f32 1.0, %v6336_v2  ;;  %v1714_v2 = vld [vmem:[#allocation2 + $0xf0] sm:$0xff] }
 0x129   :  { %6341 = vrcp.f32 %v1213_v6 }
 0x12a   :  { %6343 = vrcp.f32 %v1123_v8 }
 0x12b   :  { %v6338_v10 = vpop.eup %6337 }
 0x12c   :  { %v1199_v13 = vmul.f32 %v6338_v10, %v1196_v9  ;;  %v6340_v14 = vpop.eup %6339 }
 0x12d   :  { %v1223_v19 = vadd.f32 1.0, %v6340_v14  ;;  %v1724_v14 = vld [vmem:[#allocation2 + $0x130] sm:$0xff] }
 0x12e   :  { %v1200_v18 = vadd.f32 %v1199_v13, %v1128_v15 }
 0x130   :  { %6345 = vtanh.f32 %v1200_v18 }
 0x131   :  { %6347 = vrcp.f32 %v1223_v19 }
 0x133   :  { %v6342_v22 = vpop.eup %6341 }
 0x134   :  { %v1299_v25 = vmul.f32 %v6342_v22, %v1296_v21  ;;  %v6344_v27 = vpop.eup %6343 }
 0x135   :  { %v1202_v29 = vsub.f32 1.0, %v6344_v27  ;;  %v1204_v32 = vmul.f32 0.0, %v6344_v27 }
 0x136   :  { %v1300_v28 = vadd.f32 %v1299_v25, %v1228_v26 }
 0x138   :  { %6349 = vtanh.f32 %v1300_v28 }
 0x13a   :  { %v6346_v30 = vpop.eup %6345 }
 0x13b   :  { %v1203_v31 = vmul.f32 %v6346_v30, %v1202_v29  ;;  %v6348_v36 = vpop.eup %6347 }
 0x13c   :  { %v1302_v39 = vsub.f32 1.0, %v6348_v36  ;;  %v1304_v43 = vmul.f32 0.0, %v6348_v36 }
 0x13d   :  { %v1205_v35 = vadd.f32 %v1204_v32, %v1203_v31 }
 0x13f   :  { %v7001_v37 = vsel %vm1312_vm8, %v1205_v35, 0.0 }
 0x140   :  { %5535 = vmatmul.mubr.msk.f32.vlgmr.msra.gmra.mrb[30].mxu0 %vm42_vm0, %v7001_v37  ;;  %5546 = vmatmul.mubr.msk.f32.vlgmr.msra.gmra.mrb[30].mxu1 %vm42_vm0, %v7001_v37  ;;  %1314 = vst.msk [vmem:[%s7573_s6] sm:$0xff] %vm42_vm0, %v7001_v37 }
 0x141   :  { %6086 = vmatpush3.bf16.msra.mxu0 %v6817_v4  ;;  %6092 = vmatpush3.bf16.msra.mxu1 %v6821_v5 }
 0x142   :  { %v6350_v41 = vpop.eup %6349  ;;  %6087 = vmatprep.subr.bf16.mxu0 %v6494_v48  ;;  %6093 = vmatprep.subr.bf16.mxu1 %v6494_v48 }
 0x143   :  { %v1303_v42 = vmul.f32 %v6350_v41, %v1302_v39  ;;  %5556 = vmatprep.mubr.msk.f32.mxu0 %vm6495_vm5, %v6496_v3  ;;  %5567 = vmatprep.mubr.msk.f32.mxu1 %vm6495_vm5, %v6496_v3  ;;  %v1634_v39 = vld [vmem:[#allocation2 + $0x88] sm:$0xff] }
 0x145   :  { %v1305_v44 = vadd.f32 %v1304_v43, %v1303_v42  ;;  %6089 = vmatpush3.bf16.msra.mxu0 %v6838_v11  ;;  %6095 = vmatpush3.bf16.msra.mxu1 %v6842_v12 }
 0x146   :  { %6096 = vmatprep.subr.bf16.mxu0 %v6494_v48  ;;  %6102 = vmatprep.subr.bf16.mxu1 %v6494_v48 }
 0x147   :  { %v7031_v46 = vsel %vm1319_vm10, %v1305_v44, 0.0 }
 0x148   :  { %1322 = vrot.lane.b32.xlu0 %v7031_v46, %s6497_s30  ;;  %5557 = vmatmul.mubr.msk.f32.vlgmr.msra.gmra.mrb[32].mxu0 %vm42_vm0, %v7031_v46 }
 0x149   :  { %5568 = vmatmul.mubr.msk.f32.vlgmr.msra.gmra.mrb[32].mxu1 %vm42_vm0, %v7031_v46  ;;  %6098 = vmatpush3.bf16.msra.mxu0 %v6862_v17 }
 0x14a   :  { %6104 = vmatpush3.bf16.msra.mxu1 %v6873_v20  ;;  %6099 = vmatprep.subr.bf16.mxu0 %v6494_v48 }
 0x14b   :  { %6105 = vmatprep.subr.bf16.mxu1 %v6494_v48  ;;  %5578 = vmatprep.mubr.msk.f32.mxu0 %vm6495_vm5, %v6496_v3 }
 0x14c   :  { %5589 = vmatprep.mubr.msk.f32.mxu1 %vm6495_vm5, %v6496_v3 }
 0x14d   :  { %6101 = vmatpush3.bf16.msra.mxu0 %v6884_v23 }
 0x14e   :  { %6107 = vmatpush3.bf16.msra.mxu1 %v6890_v24  ;;  %6108 = vmatprep.subr.bf16.mxu0 %v6494_v48 }
 0x14f   :  { %6114 = vmatprep.subr.bf16.mxu1 %v6494_v48 }
 0x150   :  { %5579 = vmatmul.mubr.msk.f32.vlgmr.msra.gmra.mrb[34].mxu0 %vm42_vm0, %v7001_v37 }
 0x151   :  { %5590 = vmatmul.mubr.msk.f32.vlgmr.msra.gmra.mrb[34].mxu1 %vm42_vm0, %v7031_v46  ;;  %6110 = vmatpush3.bf16.msra.mxu0 %v6745_v55 }
 0x152   :  { %6116 = vmatpush3.bf16.msra.mxu1 %v6749_v56  ;;  %6111 = vmatprep.subr.bf16.mxu0 %v6494_v48 }
 0x153   :  { %6117 = vmatprep.subr.bf16.mxu1 %v6494_v48  ;;  %5600 = vmatprep.mubr.msk.f32.mxu0 %vm6495_vm5, %v6496_v3 }
 0x154   :  { %5611 = vmatprep.mubr.msk.f32.mxu1 %vm6495_vm5, %v6496_v3 }
 0x155   :  { %6113 = vmatpush3.bf16.msra.mxu0 %v6772_v61 }
 0x156   :  { %6119 = vmatpush3.bf16.msra.mxu1 %v6776_v62  ;;  %6120 = vmatprep.subr.bf16.mxu0 %v6494_v48 }
 0x157   :  { %6126 = vmatprep.subr.bf16.mxu1 %v6494_v48 }
 0x1ba   :  { %v1323_v49 = vpop.permute.xlu0 %1322 }
 0x1bb   :  { %4944 = vst.msk [vmem:[%s7573_s6 + $0x38] sm:$0xff] %vm1326_vm12, %v1323_v49 }
 0x213   :  { %v1397_v50 = vpop.f32.mrb[30].mxu0  ;;  %v1467_v52 = vpop.f32.mrb[30].mxu1 }
 0x214   :  { %v1615_v53 = vadd.f32 %v1614_v51, %v1397_v50  ;;  %v5536_v54 = vpop.f32.mrb[31].mxu0  ;;  %v5547_v57 = vpop.f32.mrb[31].mxu1  ;;  %v1625_v60 = vadd.f32 %v1624_v59, %v1467_v52 }
 0x216   :  { %v4949_v58 = vmul.f32 -1.442695, %v1615_v53  ;;  %v4950_v63 = vmul.f32 -1.442695, %v1625_v60  ;;  %v7078_v53 = vpop.permute.xlu1 %1816 }
 0x217   :  { %vm1818_vm13 = vcmp.eq.s32.totalorder %v7078_v53, 1 }
 0x218   :  { %6351 = vpow2.f32 %v4949_v58 }
 0x219   :  { %6353 = vpow2.f32 %v4950_v63 }
 0x21b   :  { %v1539_v0 = vpop.f32.mrb[32].mxu0 }
 0x21c   :  { %v1715_v6 = vadd.f32 %v1714_v2, %v1539_v0  ;;  %v1609_v8 = vpop.f32.mrb[32].mxu1  ;;  %v5558_v9 = vpop.f32.mrb[33].mxu0 }
 0x21d   :  { %v5569_v10 = vpop.f32.mrb[33].mxu1  ;;  %v1725_v15 = vadd.f32 %v1724_v14, %v1609_v8  ;;  %v7106_v8 = vpop.permute.xlu1 %1824 }
 0x21e   :  { %v4952_v13 = vmul.f32 -1.442695, %v1715_v6  ;;  %vm1826_vm14 = vcmp.eq.s32.totalorder %v7106_v8, 1 }
 0x21f   :  { %v4953_v21 = vmul.f32 -1.442695, %v1725_v15 }
 0x220   :  { %6355 = vpow2.f32 %v4952_v13 }
 0x222   :  { %v6352_v18 = vpop.eup %6351 }
 0x223   :  { %v1619_v19 = vadd.f32 1.0, %v6352_v18  ;;  %v1701_v22 = vpop.f32.mrb[34].mxu0  ;;  %v6354_v28 = vpop.eup %6353 }
 0x224   :  { %v1801_v25 = vpop.f32.mrb[34].mxu1  ;;  %v5580_v26 = vpop.f32.mrb[35].mxu0  ;;  %v1629_v31 = vadd.f32 1.0, %v6354_v28  ;;  %v1702_v32 = vadd.f32 %v6984_v1, %v1701_v22  ;;  %v2133_v28 = vld [vmem:[#allocation2 + $0x50] sm:$0xff] }
 0x225   :  { %6357 = vrcp.f32 %v1619_v19  ;;  %v5591_v27 = vpop.f32.mrb[35].mxu1  ;;  %v1802_v42 = vadd.f32 %v6990_v16, %v1801_v25  ;;  %v2123_v19 = vld [vmem:[#allocation2 + $0x10] sm:$0xff] }
 0x226   :  { %6359 = vpow2.f32 %v4953_v21 }
 0x22a   :  { %v6356_v29 = vpop.eup %6355 }
 0x22b   :  { %v1719_v30 = vadd.f32 1.0, %v6356_v29 }
 0x22d   :  { %6361 = vrcp.f32 %v1719_v30 }
 0x22e   :  { %6363 = vrcp.f32 %v1629_v31 }
 0x22f   :  { %v6358_v34 = vpop.eup %6357 }
 0x230   :  { %v1705_v35 = vmul.f32 %v6358_v34, %v1702_v32  ;;  %v6360_v36 = vpop.eup %6359  ;;  %v2223_v32 = vld [vmem:[#allocation2 + $0xe8] sm:$0xff] }
 0x231   :  { %v1729_v41 = vadd.f32 1.0, %v6360_v36 }
 0x232   :  { %v1706_v40 = vadd.f32 %v1705_v35, %v1634_v39 }
 0x234   :  { %6365 = vtanh.f32 %v1706_v40 }
 0x235   :  { %6367 = vrcp.f32 %v1729_v41  ;;  %v2233_v41 = vld [vmem:[#allocation2 + $0x128] sm:$0xff] }
 0x237   :  { %v6362_v43 = vpop.eup %6361 }
 0x238   :  { %v1805_v44 = vmul.f32 %v6362_v43, %v1802_v42  ;;  %v6364_v49 = vpop.eup %6363 }
 0x239   :  { %v1708_v51 = vsub.f32 1.0, %v6364_v49  ;;  %v1710_v57 = vmul.f32 %v6364_v49, %v7001_v37 }
 0x23a   :  { %v1806_v50 = vadd.f32 %v1805_v44, %v1734_v47 }
 0x23c   :  { %6369 = vtanh.f32 %v1806_v50 }
 0x23e   :  { %v6366_v52 = vpop.eup %6365 }
 0x23f   :  { %v1709_v54 = vmul.f32 %v6366_v52, %v1708_v51  ;;  %v6368_v59 = vpop.eup %6367 }
 0x240   :  { %v1808_v0 = vsub.f32 1.0, %v6368_v59  ;;  %v1810_v6 = vmul.f32 %v6368_v59, %v7031_v46 }
 0x241   :  { %v1711_v58 = vadd.f32 %v1710_v57, %v1709_v54 }
 0x243   :  { %v1819_v60 = vsel %vm1818_vm13, %v1711_v58, 0.0  ;;  %v7087_v63 = vsel %vm1818_vm13, %v1711_v58, %v7001_v37 }
 0x244   :  { %4955 = vst.msk [vmem:[%s7573_s6 + $0x8] sm:$0xff] %vm42_vm0, %v1819_v60  ;;  %5601 = vmatmul.mubr.msk.f32.vlgmr.msra.gmra.mrb[36].mxu0 %vm42_vm0, %v7087_v63  ;;  %5612 = vmatmul.mubr.msk.f32.vlgmr.msra.gmra.mrb[36].mxu1 %vm42_vm0, %v7087_v63 }
 0x245   :  { %6122 = vmatpush3.bf16.msra.mxu0 %v6817_v4  ;;  %6128 = vmatpush3.bf16.msra.mxu1 %v6821_v5 }
 0x246   :  { %v6370_v2 = vpop.eup %6369  ;;  %6123 = vmatprep.subr.bf16.mxu0 %v6494_v48  ;;  %6129 = vmatprep.subr.bf16.mxu1 %v6494_v48 }
 0x247   :  { %5622 = vmatprep.mubr.msk.f32.mxu0 %vm6495_vm5, %v6496_v3  ;;  %5633 = vmatprep.mubr.msk.f32.mxu1 %vm6495_vm5, %v6496_v3  ;;  %v1809_v37 = vmul.f32 %v6370_v2, %v1808_v0 }
 0x249   :  { %6125 = vmatpush3.bf16.msra.mxu0 %v6838_v11  ;;  %6131 = vmatpush3.bf16.msra.mxu1 %v6842_v12  ;;  %v1811_v9 = vadd.f32 %v1810_v6, %v1809_v37  ;;  %v2143_v6 = vld [vmem:[#allocation2 + $0x90] sm:$0xff] }
 0x24a   :  { %6132 = vmatprep.subr.bf16.mxu0 %v6494_v48  ;;  %6138 = vmatprep.subr.bf16.mxu1 %v6494_v48 }
 0x24b   :  { %v1827_v10 = vsel %vm1826_vm14, %v1811_v9, 0.0  ;;  %v7118_v13 = vsel %vm1826_vm14, %v1811_v9, %v7031_v46  ;;  %v7153_v46 = vpop.permute.xlu1 %2333 }
 0x24c   :  { %1829 = vrot.lane.b32.xlu1 %v1827_v10, %s6497_s30  ;;  %5623 = vmatmul.mubr.msk.f32.vlgmr.msra.gmra.mrb[38].mxu0 %vm42_vm0, %v7118_v13  ;;  %vm2335_vm1 = vcmp.eq.s32.totalorder %v7153_v46, 1 }
 0x24d   :  { %5634 = vmatmul.mubr.msk.f32.vlgmr.msra.gmra.mrb[38].mxu1 %vm42_vm0, %v7118_v13  ;;  %6134 = vmatpush3.bf16.msra.mxu0 %v6862_v17 }
 0x24e   :  { %6140 = vmatpush3.bf16.msra.mxu1 %v6873_v20  ;;  %6135 = vmatprep.subr.bf16.mxu0 %v6494_v48 }
 0x24f   :  { %6141 = vmatprep.subr.bf16.mxu1 %v6494_v48  ;;  %5644 = vmatprep.mubr.msk.f32.mxu0 %vm6495_vm5, %v6496_v3  ;;  %v7155_v14 = vpop.permute.xlu1 %2842 }
 0x250   :  { %5655 = vmatprep.mubr.msk.f32.mxu1 %vm6495_vm5, %v6496_v3  ;;  %vm2844_vm3 = vcmp.eq.s32.totalorder %v7155_v14, 1 }
 0x251   :  { %6137 = vmatpush3.bf16.msra.mxu0 %v6884_v23 }
 0x252   :  { %6143 = vmatpush3.bf16.msra.mxu1 %v6890_v24  ;;  %6144 = vmatprep.subr.bf16.mxu0 %v6494_v48 }
 0x253   :  { %6150 = vmatprep.subr.bf16.mxu1 %v6494_v48 }
 0x254   :  { %5645 = vmatmul.mubr.msk.f32.vlgmr.msra.gmra.mrb[40].mxu0 %vm42_vm0, %v7087_v63 }
 0x255   :  { %5656 = vmatmul.mubr.msk.f32.vlgmr.msra.gmra.mrb[40].mxu1 %vm42_vm0, %v7118_v13  ;;  %6146 = vmatpush3.bf16.msra.mxu0 %v6745_v55 }
 0x256   :  { %6152 = vmatpush3.bf16.msra.mxu1 %v6749_v56  ;;  %6147 = vmatprep.subr.bf16.mxu0 %v6494_v48 }
 0x257   :  { %6153 = vmatprep.subr.bf16.mxu1 %v6494_v48  ;;  %5666 = vmatprep.mubr.msk.f32.mxu0 %vm6495_vm5, %v6496_v3 }
 0x258   :  { %5677 = vmatprep.mubr.msk.f32.mxu1 %vm6495_vm5, %v6496_v3 }
 0x259   :  { %6149 = vmatpush3.bf16.msra.mxu0 %v6772_v61 }
 0x25a   :  { %6155 = vmatpush3.bf16.msra.mxu1 %v6776_v62  ;;  %6156 = vmatprep.subr.bf16.mxu0 %v6494_v48 }
 0x25b   :  { %6162 = vmatprep.subr.bf16.mxu1 %v6494_v48 }
 0x2be   :  { %v1830_v15 = vpop.permute.xlu1 %1829 }
 0x2bf   :  { %4956 = vst.msk [vmem:[%s7573_s6 + $0x30] sm:$0xff] %vm1326_vm12, %v1830_v15 }
 0x317   :  { %v1905_v18 = vpop.f32.mrb[36].mxu0  ;;  %v1975_v21 = vpop.f32.mrb[36].mxu1 }
 0x318   :  { %v2124_v22 = vadd.f32 %v2123_v19, %v1905_v18  ;;  %v5602_v25 = vpop.f32.mrb[37].mxu0  ;;  %v5613_v26 = vpop.f32.mrb[37].mxu1  ;;  %v2134_v29 = vadd.f32 %v2133_v28, %v1975_v21  ;;  %v2243_v21 = vld [vmem:[#allocation2 + $0x168] sm:$0xff] }
 0x31a   :  { %v4961_v27 = vmul.f32 -1.442695, %v2124_v22  ;;  %v4962_v30 = vmul.f32 -1.442695, %v2134_v29 }
 0x31c   :  { %6371 = vpow2.f32 %v4961_v27 }
 0x31d   :  { %6373 = vpow2.f32 %v4962_v30 }
 0x31f   :  { %v2048_v31 = vpop.f32.mrb[38].mxu0 }
 0x320   :  { %v2224_v34 = vadd.f32 %v2223_v32, %v2048_v31  ;;  %v2118_v35 = vpop.f32.mrb[38].mxu1  ;;  %v5624_v36 = vpop.f32.mrb[39].mxu0 }
 0x321   :  { %v5635_v39 = vpop.f32.mrb[39].mxu1  ;;  %v2234_v42 = vadd.f32 %v2233_v41, %v2118_v35 }
 0x322   :  { %v4964_v40 = vmul.f32 -1.442695, %v2224_v34 }
 0x323   :  { %v4965_v47 = vmul.f32 -1.442695, %v2234_v42 }
 0x324   :  { %6375 = vpow2.f32 %v4964_v40 }
 0x326   :  { %v6372_v43 = vpop.eup %6371 }
 0x327   :  { %v2128_v44 = vadd.f32 1.0, %v6372_v43  ;;  %v2210_v49 = vpop.f32.mrb[40].mxu0  ;;  %v6374_v54 = vpop.eup %6373 }
 0x328   :  { %v2310_v50 = vpop.f32.mrb[40].mxu1  ;;  %v5646_v51 = vpop.f32.mrb[41].mxu0  ;;  %v2138_v59 = vadd.f32 1.0, %v6374_v54  ;;  %v2211_v60 = vadd.f32 %v6984_v1, %v2210_v49  ;;  %v2642_v54 = vld [vmem:[#allocation2 + $0x58] sm:$0xff] }
 0x329   :  { %6377 = vrcp.f32 %v2128_v44  ;;  %v5657_v52 = vpop.f32.mrb[41].mxu1  ;;  %v2311_v15 = vadd.f32 %v6990_v16, %v2310_v50  ;;  %v2632_v44 = vld [vmem:[#allocation2 + $0x18] sm:$0xff] }
 0x32a   :  { %6379 = vpow2.f32 %v4965_v47 }
 0x32e   :  { %v6376_v57 = vpop.eup %6375 }
 0x32f   :  { %v2228_v58 = vadd.f32 1.0, %v6376_v57 }
 0x331   :  { %6381 = vrcp.f32 %v2228_v58 }
 0x332   :  { %6383 = vrcp.f32 %v2138_v59 }
 0x333   :  { %v6378_v0 = vpop.eup %6377 }
 0x334   :  { %v2214_v2 = vmul.f32 %v6378_v0, %v2211_v60  ;;  %v6380_v37 = vpop.eup %6379  ;;  %v2732_v60 = vld [vmem:[#allocation2 + $0xe0] sm:$0xff] }
 0x335   :  { %v2238_v10 = vadd.f32 1.0, %v6380_v37 }
 0x336   :  { %v2215_v9 = vadd.f32 %v2214_v2, %v2143_v6 }
 0x338   :  { %6385 = vtanh.f32 %v2215_v9 }
 0x339   :  { %6387 = vrcp.f32 %v2238_v10  ;;  %v2742_v10 = vld [vmem:[#allocation2 + $0x120] sm:$0xff] }
 0x33b   :  { %v6382_v18 = vpop.eup %6381 }
 0x33c   :  { %v2314_v19 = vmul.f32 %v6382_v18, %v2311_v15  ;;  %v6384_v22 = vpop.eup %6383 }
 0x33d   :  { %v2217_v26 = vsub.f32 1.0, %v6384_v22  ;;  %v2219_v29 = vmul.f32 %v6384_v22, %v7087_v63 }
 0x33e   :  { %v2315_v25 = vadd.f32 %v2314_v19, %v2243_v21 }
 0x340   :  { %6389 = vtanh.f32 %v2315_v25 }
 0x342   :  { %v6386_v27 = vpop.eup %6385 }
 0x343   :  { %v2218_v28 = vmul.f32 %v6386_v27, %v2217_v26  ;;  %v6388_v31 = vpop.eup %6387 }
 0x344   :  { %v2319_v39 = vmul.f32 %v6388_v31, %v7118_v13 }
 0x345   :  { %v2220_v30 = vadd.f32 %v2219_v29, %v2218_v28 }
 0x347   :  { %v7168_v32 = vsel %vm2327_vm15, %v2220_v30, %v7087_v63  ;;  %v2328_v34 = vsel %vm2327_vm15, %v2220_v30, 0.0  ;;  %v2317_v63 = vsub.f32 1.0, %v6388_v31 }
 0x348   :  { %5667 = vmatmul.mubr.msk.f32.vlgmr.msra.gmra.mrb[42].mxu0 %vm42_vm0, %v7168_v32  ;;  %5678 = vmatmul.mubr.msk.f32.vlgmr.msra.gmra.mrb[42].mxu1 %vm42_vm0, %v7168_v32  ;;  %4967 = vst.msk [vmem:[%s7573_s6 + $0x10] sm:$0xff] %vm42_vm0, %v2328_v34 }
 0x349   :  { %6158 = vmatpush3.bf16.msra.mxu0 %v6817_v4  ;;  %6164 = vmatpush3.bf16.msra.mxu1 %v6821_v5 }
 0x34a   :  { %v6390_v35 = vpop.eup %6389  ;;  %6159 = vmatprep.subr.bf16.mxu0 %v6494_v48  ;;  %6165 = vmatprep.subr.bf16.mxu1 %v6494_v48 }
 0x34b   :  { %5688 = vmatprep.mubr.msk.f32.mxu0 %vm6495_vm5, %v6496_v3  ;;  %5699 = vmatprep.mubr.msk.f32.mxu1 %vm6495_vm5, %v6496_v3  ;;  %v2318_v36 = vmul.f32 %v6390_v35, %v2317_v63 }
 0x34d   :  { %6161 = vmatpush3.bf16.msra.mxu0 %v6838_v11  ;;  %6167 = vmatpush3.bf16.msra.mxu1 %v6842_v12  ;;  %v2320_v40 = vadd.f32 %v2319_v39, %v2318_v36  ;;  %v2652_v39 = vld [vmem:[#allocation2 + $0x98] sm:$0xff] }
 0x34e   :  { %6168 = vmatprep.subr.bf16.mxu0 %v6494_v48  ;;  %6174 = vmatprep.subr.bf16.mxu1 %v6494_v48 }
 0x34f   :  { %v2336_v41 = vsel %vm2335_vm1, %v2320_v40, 0.0  ;;  %v7199_v42 = vsel %vm2335_vm1, %v2320_v40, %v7118_v13 }
 0x350   :  { %2338 = vrot.lane.b32.xlu0 %v2336_v41, %s6497_s30  ;;  %5689 = vmatmul.mubr.msk.f32.vlgmr.msra.gmra.mrb[44].mxu0 %vm42_vm0, %v7199_v42 }
 0x351   :  { %5700 = vmatmul.mubr.msk.f32.vlgmr.msra.gmra.mrb[44].mxu1 %vm42_vm0, %v7199_v42  ;;  %6170 = vmatpush3.bf16.msra.mxu0 %v6862_v17 }
 0x352   :  { %6176 = vmatpush3.bf16.msra.mxu1 %v6873_v20  ;;  %6171 = vmatprep.subr.bf16.mxu0 %v6494_v48 }
 0x353   :  { %6177 = vmatprep.subr.bf16.mxu1 %v6494_v48  ;;  %5710 = vmatprep.mubr.msk.f32.mxu0 %vm6495_vm5, %v6496_v3 }
 0x354   :  { %5721 = vmatprep.mubr.msk.f32.mxu1 %vm6495_vm5, %v6496_v3 }
 0x355   :  { %6173 = vmatpush3.bf16.msra.mxu0 %v6884_v23 }
 0x356   :  { %6179 = vmatpush3.bf16.msra.mxu1 %v6890_v24  ;;  %6180 = vmatprep.subr.bf16.mxu0 %v6494_v48 }
 0x357   :  { %6186 = vmatprep.subr.bf16.mxu1 %v6494_v48 }
 0x358   :  { %5711 = vmatmul.mubr.msk.f32.vlgmr.msra.gmra.mrb[46].mxu0 %vm42_vm0, %v7168_v32 }
 0x359   :  { %5722 = vmatmul.mubr.msk.f32.vlgmr.msra.gmra.mrb[46].mxu1 %vm42_vm0, %v7199_v42  ;;  %6182 = vmatpush3.bf16.msra.mxu0 %v6745_v55 }
 0x35a   :  { %6188 = vmatpush3.bf16.msra.mxu1 %v6749_v56  ;;  %6183 = vmatprep.subr.bf16.mxu0 %v6494_v48 }
 0x35b   :  { %6189 = vmatprep.subr.bf16.mxu1 %v6494_v48  ;;  %5732 = vmatprep.mubr.msk.f32.mxu0 %vm6495_vm5, %v6496_v3 }
 0x35c   :  { %5743 = vmatprep.mubr.msk.f32.mxu1 %vm6495_vm5, %v6496_v3 }
 0x35d   :  { %6185 = vmatpush3.bf16.msra.mxu0 %v6772_v61 }
 0x35e   :  { %6191 = vmatpush3.bf16.msra.mxu1 %v6776_v62  ;;  %6192 = vmatprep.subr.bf16.mxu0 %v6494_v48 }
 0x35f   :  { %6198 = vmatprep.subr.bf16.mxu1 %v6494_v48 }
 0x3c2   :  { %v2339_v13 = vpop.permute.xlu0 %2338 }
 0x3c3   :  { %4968 = vst.msk [vmem:[%s7573_s6 + $0x28] sm:$0xff] %vm1326_vm12, %v2339_v13 }
 0x41b   :  { %v2414_v43 = vpop.f32.mrb[42].mxu0  ;;  %v2484_v47 = vpop.f32.mrb[42].mxu1 }
 0x41c   :  { %v2633_v49 = vadd.f32 %v2632_v44, %v2414_v43  ;;  %v5668_v50 = vpop.f32.mrb[43].mxu0  ;;  %v5679_v51 = vpop.f32.mrb[43].mxu1  ;;  %v2643_v57 = vadd.f32 %v2642_v54, %v2484_v47  ;;  %v2752_v47 = vld [vmem:[#allocation2 + $0x160] sm:$0xff] }
 0x41e   :  { %v4973_v52 = vmul.f32 -1.442695, %v2633_v49  ;;  %v4974_v58 = vmul.f32 -1.442695, %v2643_v57 }
 0x420   :  { %6391 = vpow2.f32 %v4973_v52 }
 0x421   :  { %6393 = vpow2.f32 %v4974_v58 }
 0x423   :  { %v2557_v59 = vpop.f32.mrb[44].mxu0 }
 0x424   :  { %v2733_v0 = vadd.f32 %v2732_v60, %v2557_v59  ;;  %v2627_v2 = vpop.f32.mrb[44].mxu1  ;;  %v5690_v37 = vpop.f32.mrb[45].mxu0 }
 0x425   :  { %v5701_v6 = vpop.f32.mrb[45].mxu1  ;;  %v2743_v15 = vadd.f32 %v2742_v10, %v2627_v2 }
 0x426   :  { %v4976_v9 = vmul.f32 -1.442695, %v2733_v0 }
 0x427   :  { %v4977_v21 = vmul.f32 -1.442695, %v2743_v15 }
 0x428   :  { %6395 = vpow2.f32 %v4976_v9 }
 0x42a   :  { %v6392_v18 = vpop.eup %6391 }
 0x42b   :  { %v2637_v19 = vadd.f32 1.0, %v6392_v18  ;;  %v2719_v22 = vpop.f32.mrb[46].mxu0  ;;  %v6394_v28 = vpop.eup %6393 }
 0x42c   :  { %v2819_v25 = vpop.f32.mrb[46].mxu1  ;;  %v5712_v26 = vpop.f32.mrb[47].mxu0  ;;  %v2647_v31 = vadd.f32 1.0, %v6394_v28  ;;  %v2720_v34 = vadd.f32 %v6984_v1, %v2719_v22  ;;  %v3151_v28 = vld [vmem:[#allocation2 + $0x60] sm:$0xff] }
 0x42d   :  { %6397 = vrcp.f32 %v2637_v19  ;;  %v5723_v27 = vpop.f32.mrb[47].mxu1  ;;  %v2820_v13 = vadd.f32 %v6990_v16, %v2819_v25  ;;  %v3141_v19 = vld [vmem:[#allocation2 + $0x20] sm:$0xff] }
 0x42e   :  { %6399 = vpow2.f32 %v4977_v21 }
 0x432   :  { %v6396_v29 = vpop.eup %6395 }
 0x433   :  { %v2737_v30 = vadd.f32 1.0, %v6396_v29 }
 0x435   :  { %6401 = vrcp.f32 %v2737_v30 }
 0x436   :  { %6403 = vrcp.f32 %v2647_v31 }
 0x437   :  { %v6398_v63 = vpop.eup %6397 }
 0x438   :  { %v2723_v35 = vmul.f32 %v6398_v63, %v2720_v34  ;;  %v6400_v36 = vpop.eup %6399  ;;  %v3241_v34 = vld [vmem:[#allocation2 + $0xd8] sm:$0xff] }
 0x439   :  { %v2747_v41 = vadd.f32 1.0, %v6400_v36 }
 0x43a   :  { %v2724_v40 = vadd.f32 %v2723_v35, %v2652_v39 }
 0x43c   :  { %6405 = vtanh.f32 %v2724_v40 }
 0x43d   :  { %6407 = vrcp.f32 %v2747_v41  ;;  %v3251_v41 = vld [vmem:[#allocation2 + $0x118] sm:$0xff] }
 0x43f   :  { %v6402_v43 = vpop.eup %6401 }
 0x440   :  { %v2823_v44 = vmul.f32 %v6402_v43, %v2820_v13  ;;  %v6404_v49 = vpop.eup %6403 }
 0x441   :  { %v2726_v51 = vsub.f32 1.0, %v6404_v49  ;;  %v2728_v57 = vmul.f32 %v6404_v49, %v7168_v32 }
 0x442   :  { %v2824_v50 = vadd.f32 %v2823_v44, %v2752_v47 }
 0x444   :  { %6409 = vtanh.f32 %v2824_v50 }
 0x446   :  { %v6406_v52 = vpop.eup %6405 }
 0x447   :  { %v2727_v54 = vmul.f32 %v6406_v52, %v2726_v51  ;;  %v6408_v59 = vpop.eup %6407 }
 0x448   :  { %v2828_v6 = vmul.f32 %v6408_v59, %v7199_v42 }
 0x449   :  { %v2729_v58 = vadd.f32 %v2728_v57, %v2727_v54 }
 0x44b   :  { %v7245_v60 = vsel %vm2836_vm2, %v2729_v58, %v7168_v32  ;;  %v2837_v0 = vsel %vm2836_vm2, %v2729_v58, 0.0  ;;  %v2826_v32 = vsub.f32 1.0, %v6408_v59 }
 0x44c   :  { %5733 = vmatmul.mubr.msk.f32.vlgmr.msra.gmra.mrb[48].mxu0 %vm42_vm0, %v7245_v60  ;;  %5744 = vmatmul.mubr.msk.f32.vlgmr.msra.gmra.mrb[48].mxu1 %vm42_vm0, %v7245_v60  ;;  %4979 = vst.msk [vmem:[%s7573_s6 + $0x18] sm:$0xff] %vm42_vm0, %v2837_v0 }
 0x44d   :  { %6194 = vmatpush3.bf16.msra.mxu0 %v6817_v4  ;;  %6200 = vmatpush3.bf16.msra.mxu1 %v6821_v5 }
 0x44e   :  { %v6410_v2 = vpop.eup %6409  ;;  %6195 = vmatprep.subr.bf16.mxu0 %v6494_v48  ;;  %6201 = vmatprep.subr.bf16.mxu1 %v6494_v48 }
 0x44f   :  { %5754 = vmatprep.mubr.msk.f32.mxu0 %vm6495_vm5, %v6496_v3  ;;  %5765 = vmatprep.mubr.msk.f32.mxu1 %vm6495_vm5, %v6496_v3  ;;  %v2827_v37 = vmul.f32 %v6410_v2, %v2826_v32 }
 0x451   :  { %6197 = vmatpush3.bf16.msra.mxu0 %v6838_v11  ;;  %6203 = vmatpush3.bf16.msra.mxu1 %v6842_v12  ;;  %v2829_v9 = vadd.f32 %v2828_v6, %v2827_v37  ;;  %v3161_v6 = vld [vmem:[#allocation2 + $0xa0] sm:$0xff] }
 0x452   :  { %6204 = vmatprep.subr.bf16.mxu0 %v6494_v48  ;;  %6210 = vmatprep.subr.bf16.mxu1 %v6494_v48 }
 0x453   :  { %v2845_v10 = vsel %vm2844_vm3, %v2829_v9, 0.0  ;;  %v7276_v15 = vsel %vm2844_vm3, %v2829_v9, %v7199_v42 }
 0x454   :  { %2847 = vrot.lane.b32.xlu1 %v2845_v10, %s6497_s30  ;;  %5755 = vmatmul.mubr.msk.f32.vlgmr.msra.gmra.mrb[50].mxu0 %vm42_vm0, %v7276_v15 }
 0x455   :  { %5766 = vmatmul.mubr.msk.f32.vlgmr.msra.gmra.mrb[50].mxu1 %vm42_vm0, %v7276_v15  ;;  %6206 = vmatpush3.bf16.msra.mxu0 %v6862_v17 }
 0x456   :  { %6212 = vmatpush3.bf16.msra.mxu1 %v6873_v20  ;;  %6207 = vmatprep.subr.bf16.mxu0 %v6494_v48 }
 0x457   :  { %6213 = vmatprep.subr.bf16.mxu1 %v6494_v48  ;;  %5776 = vmatprep.mubr.msk.f32.mxu0 %vm6495_vm5, %v6496_v3 }
 0x458   :  { %5787 = vmatprep.mubr.msk.f32.mxu1 %vm6495_vm5, %v6496_v3 }
 0x459   :  { %6209 = vmatpush3.bf16.msra.mxu0 %v6884_v23 }
 0x45a   :  { %6215 = vmatpush3.bf16.msra.mxu1 %v6890_v24  ;;  %6216 = vmatprep.subr.bf16.mxu0 %v6494_v48 }
 0x45b   :  { %6222 = vmatprep.subr.bf16.mxu1 %v6494_v48 }
 0x45c   :  { %5777 = vmatmul.mubr.msk.f32.vlgmr.msra.gmra.mrb[52].mxu0 %vm42_vm0, %v7245_v60 }
 0x45d   :  { %5788 = vmatmul.mubr.msk.f32.vlgmr.msra.gmra.mrb[52].mxu1 %vm42_vm0, %v7276_v15  ;;  %6218 = vmatpush3.bf16.msra.mxu0 %v6745_v55 }
 0x45e   :  { %6224 = vmatpush3.bf16.msra.mxu1 %v6749_v56  ;;  %6219 = vmatprep.subr.bf16.mxu0 %v6494_v48 }
 0x45f   :  { %6225 = vmatprep.subr.bf16.mxu1 %v6494_v48  ;;  %5798 = vmatprep.mubr.msk.f32.mxu0 %vm6495_vm5, %v6496_v3 }
 0x460   :  { %5809 = vmatprep.mubr.msk.f32.mxu1 %vm6495_vm5, %v6496_v3 }
 0x461   :  { %6221 = vmatpush3.bf16.msra.mxu0 %v6772_v61 }
 0x462   :  { %6227 = vmatpush3.bf16.msra.mxu1 %v6776_v62  ;;  %6228 = vmatprep.subr.bf16.mxu0 %v6494_v48 }
 0x463   :  { %6234 = vmatprep.subr.bf16.mxu1 %v6494_v48 }
 0x4c6   :  { %v2848_v42 = vpop.permute.xlu1 %2847 }
 0x4c7   :  { %4980 = vst.msk [vmem:[%s7573_s6 + $0x20] sm:$0xff] %vm1326_vm12, %v2848_v42 }
 0x51f   :  { %v2923_v18 = vpop.f32.mrb[48].mxu0  ;;  %v2993_v21 = vpop.f32.mrb[48].mxu1 }
 0x520   :  { %v3142_v22 = vadd.f32 %v3141_v19, %v2923_v18  ;;  %v5734_v25 = vpop.f32.mrb[49].mxu0  ;;  %v5745_v26 = vpop.f32.mrb[49].mxu1  ;;  %v3152_v29 = vadd.f32 %v3151_v28, %v2993_v21  ;;  %v3261_v21 = vld [vmem:[#allocation2 + $0x158] sm:$0xff] }
 0x522   :  { %v4985_v27 = vmul.f32 -1.442695, %v3142_v22  ;;  %v4986_v30 = vmul.f32 -1.442695, %v3152_v29 }
 0x524   :  { %6411 = vpow2.f32 %v4985_v27 }
 0x525   :  { %6413 = vpow2.f32 %v4986_v30 }
 0x527   :  { %v3066_v31 = vpop.f32.mrb[50].mxu0 }
 0x528   :  { %v3242_v63 = vadd.f32 %v3241_v34, %v3066_v31  ;;  %v3136_v35 = vpop.f32.mrb[50].mxu1  ;;  %v5756_v36 = vpop.f32.mrb[51].mxu0 }
 0x529   :  { %v5767_v39 = vpop.f32.mrb[51].mxu1  ;;  %v3252_v13 = vadd.f32 %v3251_v41, %v3136_v35 }
 0x52a   :  { %v4988_v40 = vmul.f32 -1.442695, %v3242_v63 }
 0x52b   :  { %v4989_v47 = vmul.f32 -1.442695, %v3252_v13 }
 0x52c   :  { %6415 = vpow2.f32 %v4988_v40  ;;  %v3636_v40 = vld [vmem:[#allocation2 + $0x28] sm:$0xff] }
 0x52e   :  { %v6412_v43 = vpop.eup %6411 }
 0x52f   :  { %v3146_v44 = vadd.f32 1.0, %v6412_v43  ;;  %v3228_v49 = vpop.f32.mrb[52].mxu0  ;;  %v6414_v54 = vpop.eup %6413 }
 0x530   :  { %v3328_v50 = vpop.f32.mrb[52].mxu1  ;;  %v5778_v51 = vpop.f32.mrb[53].mxu0  ;;  %v3156_v59 = vadd.f32 1.0, %v6414_v54  ;;  %v3229_v0 = vadd.f32 %v6984_v1, %v3228_v49  ;;  %v3646_v49 = vld [vmem:[#allocation2 + $0x68] sm:$0xff]  ;;  %v3736_v54 = vld [vmem:[#allocation2 + $0xd0] sm:$0xff] }
 0x531   :  { %6417 = vrcp.f32 %v3146_v44  ;;  %v5789_v52 = vpop.f32.mrb[53].mxu1  ;;  %v3329_v42 = vadd.f32 %v6990_v16, %v3328_v50 }
 0x532   :  { %6419 = vpow2.f32 %v4989_v47 }
 0x536   :  { %v6416_v57 = vpop.eup %6415 }
 0x537   :  { %v3246_v58 = vadd.f32 1.0, %v6416_v57 }
 0x539   :  { %6421 = vrcp.f32 %v3246_v58 }
 0x53a   :  { %6423 = vrcp.f32 %v3156_v59 }
 0x53b   :  { %v6418_v32 = vpop.eup %6417 }
 0x53c   :  { %v3232_v2 = vmul.f32 %v6418_v32, %v3229_v0  ;;  %v6420_v37 = vpop.eup %6419 }
 0x53d   :  { %v3256_v10 = vadd.f32 1.0, %v6420_v37 }
 0x53e   :  { %v3233_v9 = vadd.f32 %v3232_v2, %v3161_v6  ;;  %v3746_v2 = vld [vmem:[#allocation2 + $0x110] sm:$0xff] }
 0x540   :  { %6425 = vtanh.f32 %v3233_v9 }
 0x541   :  { %6427 = vrcp.f32 %v3256_v10 }
 0x543   :  { %v6422_v18 = vpop.eup %6421 }
 0x544   :  { %v3332_v19 = vmul.f32 %v6422_v18, %v3329_v42  ;;  %v6424_v22 = vpop.eup %6423 }
 0x545   :  { %v3235_v26 = vsub.f32 1.0, %v6424_v22  ;;  %v3237_v28 = vmul.f32 %v6424_v22, %v7245_v60 }
 0x546   :  { %v3333_v25 = vadd.f32 %v3332_v19, %v3261_v21 }
 0x548   :  { %6429 = vtanh.f32 %v3333_v25 }
 0x54a   :  { %v6426_v27 = vpop.eup %6425 }
 0x54b   :  { %v3236_v1 = vmul.f32 %v6426_v27, %v3235_v26  ;;  %v6428_v30 = vpop.eup %6427 }
 0x54c   :  { %v3335_v34 = vsub.f32 1.0, %v6428_v30 }
 0x54d   :  { %v3238_v29 = vadd.f32 %v3237_v28, %v3236_v1  ;;  %v7393_v1 = vld [vmem:[%s7572_s5] ss:$0 sm:$0xff] }
 0x54f   :  { %v3339_v31 = vsel %vm2844_vm3, %v3238_v29, 0.0  ;;  %v7323_v16 = vsel %vm2844_vm3, %v3238_v29, %v7245_v60  ;;  %v3337_v60 = vmul.f32 %v6428_v30, %v7276_v15 }
 0x550   :  { %4991 = vst.msk [vmem:[%s7573_s6 + $0x20] sm:$0xff] %vm42_vm0, %v3339_v31  ;;  %5799 = vmatmul.mubr.msk.f32.vlgmr.msra.gmra.mrb[54].mxu0 %vm42_vm0, %v7323_v16  ;;  %5810 = vmatmul.mubr.msk.f32.vlgmr.msra.gmra.mrb[54].mxu1 %vm42_vm0, %v7323_v16 }
 0x551   :  { %6230 = vmatpush3.bf16.msra.mxu0 %v6817_v4  ;;  %6236 = vmatpush3.bf16.msra.mxu1 %v6821_v5 }
 0x552   :  { %v6430_v63 = vpop.eup %6429  ;;  %6231 = vmatprep.subr.bf16.mxu0 %v6494_v48  ;;  %6237 = vmatprep.subr.bf16.mxu1 %v6494_v48 }
 0x553   :  { %5820 = vmatprep.mubr.msk.f32.mxu0 %vm6495_vm5, %v6496_v3  ;;  %5831 = vmatprep.mubr.msk.f32.mxu1 %vm6495_vm5, %v6496_v3  ;;  %v3336_v14 = vmul.f32 %v6430_v63, %v3335_v34  ;;  %v3656_v34 = vld [vmem:[#allocation2 + $0xa8] sm:$0xff] }
 0x555   :  { %6233 = vmatpush3.bf16.msra.mxu0 %v6838_v11  ;;  %6239 = vmatpush3.bf16.msra.mxu1 %v6842_v12  ;;  %v3338_v35 = vadd.f32 %v3337_v60, %v3336_v14  ;;  %v7399_v60 = vld [vmem:[%s7572_s5 + $0x1] ss:$0 sm:$0xff] }
 0x556   :  { %6240 = vmatprep.subr.bf16.mxu0 %v6494_v48  ;;  %6246 = vmatprep.subr.bf16.mxu1 %v6494_v48 }
 0x557   :  { %v3341_v36 = vsel %vm2836_vm2, %v3338_v35, 0.0  ;;  %v7351_v39 = vsel %vm2836_vm2, %v3338_v35, %v7276_v15 }
 0x558   :  { %3343 = vrot.lane.b32.xlu0 %v3341_v36, %s6497_s30  ;;  %5821 = vmatmul.mubr.msk.f32.vlgmr.msra.gmra.mrb[56].mxu0 %vm42_vm0, %v7351_v39 }
 0x559   :  { %5832 = vmatmul.mubr.msk.f32.vlgmr.msra.gmra.mrb[56].mxu1 %vm42_vm0, %v7351_v39  ;;  %6242 = vmatpush3.bf16.msra.mxu0 %v6862_v17 }
 0x55a   :  { %6248 = vmatpush3.bf16.msra.mxu1 %v6873_v20  ;;  %6243 = vmatprep.subr.bf16.mxu0 %v6494_v48 }
 0x55b   :  { %6249 = vmatprep.subr.bf16.mxu1 %v6494_v48  ;;  %5842 = vmatprep.mubr.msk.f32.mxu0 %vm6495_vm5, %v6496_v3 }
 0x55c   :  { %5853 = vmatprep.mubr.msk.f32.mxu1 %vm6495_vm5, %v6496_v3 }
 0x55d   :  { %6245 = vmatpush3.bf16.msra.mxu0 %v6884_v23 }
 0x55e   :  { %6251 = vmatpush3.bf16.msra.mxu1 %v6890_v24  ;;  %6252 = vmatprep.subr.bf16.mxu0 %v6494_v48 }
 0x55f   :  { %6258 = vmatprep.subr.bf16.mxu1 %v6494_v48 }
 0x560   :  { %5843 = vmatmul.mubr.msk.f32.vlgmr.msra.gmra.mrb[58].mxu0 %vm42_vm0, %v7323_v16 }
 0x561   :  { %5854 = vmatmul.mubr.msk.f32.vlgmr.msra.gmra.mrb[58].mxu1 %vm42_vm0, %v7351_v39  ;;  %6254 = vmatpush3.bf16.msra.mxu0 %v6745_v55 }
 0x562   :  { %6260 = vmatpush3.bf16.msra.mxu1 %v6749_v56  ;;  %6255 = vmatprep.subr.bf16.mxu0 %v6494_v48 }
 0x563   :  { %6261 = vmatprep.subr.bf16.mxu1 %v6494_v48  ;;  %5864 = vmatprep.mubr.msk.f32.mxu0 %vm6495_vm5, %v6496_v3 }
 0x564   :  { %5875 = vmatprep.mubr.msk.f32.mxu1 %vm6495_vm5, %v6496_v3 }
 0x565   :  { %6257 = vmatpush3.bf16.msra.mxu0 %v6772_v61 }
 0x566   :  { %6263 = vmatpush3.bf16.msra.mxu1 %v6776_v62  ;;  %6264 = vmatprep.subr.bf16.mxu0 %v6494_v48 }
 0x567   :  { %6270 = vmatprep.subr.bf16.mxu1 %v6494_v48 }
 0x5ca   :  { %v3344_v38 = vpop.permute.xlu0 %3343 }
 0x5cb   :  { %4992 = vst.msk [vmem:[%s7573_s6 + $0x18] sm:$0xff] %vm1326_vm12, %v3344_v38 }
 0x623   :  { %v3418_v15 = vpop.f32.mrb[54].mxu0  ;;  %v3488_v41 = vpop.f32.mrb[54].mxu1 }
 0x624   :  { %v3637_v13 = vadd.f32 %v3636_v40, %v3418_v15  ;;  %v5800_v43 = vpop.f32.mrb[55].mxu0  ;;  %v5811_v44 = vpop.f32.mrb[55].mxu1  ;;  %v3647_v50 = vadd.f32 %v3646_v49, %v3488_v41  ;;  %v3756_v15 = vld [vmem:[#allocation2 + $0x150] sm:$0xff] }
 0x626   :  { %v4997_v47 = vmul.f32 -1.442695, %v3637_v13  ;;  %v4998_v51 = vmul.f32 -1.442695, %v3647_v50 }
 0x628   :  { %6431 = vpow2.f32 %v4997_v47 }
 0x629   :  { %6433 = vpow2.f32 %v4998_v51 }
 0x62b   :  { %v3561_v52 = vpop.f32.mrb[56].mxu0 }
 0x62c   :  { %v3737_v57 = vadd.f32 %v3736_v54, %v3561_v52  ;;  %v3631_v58 = vpop.f32.mrb[56].mxu1  ;;  %v5822_v59 = vpop.f32.mrb[57].mxu0 }
 0x62d   :  { %v5833_v0 = vpop.f32.mrb[57].mxu1  ;;  %v3747_v37 = vadd.f32 %v3746_v2, %v3631_v58 }
 0x62e   :  { %v5000_v32 = vmul.f32 -1.442695, %v3737_v57 }
 0x62f   :  { %v5001_v10 = vmul.f32 -1.442695, %v3747_v37 }
 0x630   :  { %6435 = vpow2.f32 %v5000_v32 }
 0x632   :  { %v6432_v6 = vpop.eup %6431 }
 0x633   :  { %v3641_v9 = vadd.f32 1.0, %v6432_v6  ;;  %v3723_v42 = vpop.f32.mrb[58].mxu0  ;;  %v6434_v22 = vpop.eup %6433 }
 0x634   :  { %v3823_v18 = vpop.f32.mrb[58].mxu1  ;;  %v5844_v19 = vpop.f32.mrb[59].mxu0  ;;  %v3651_v27 = vadd.f32 1.0, %v6434_v22  ;;  %v3724_v28 = vadd.f32 %v7393_v1, %v3723_v42  ;;  %v4231_v42 = vld [vmem:[#allocation2 + $0xc8] sm:$0xff] }
 0x635   :  { %6437 = vrcp.f32 %v3641_v9  ;;  %v5855_v21 = vpop.f32.mrb[59].mxu1  ;;  %v3824_v35 = vadd.f32 %v7399_v60, %v3823_v18 }
 0x636   :  { %6439 = vpow2.f32 %v5001_v10 }
 0x63a   :  { %v6436_v25 = vpop.eup %6435 }
 0x63b   :  { %v3741_v26 = vadd.f32 1.0, %v6436_v25 }
 0x63d   :  { %6441 = vrcp.f32 %v3741_v26  ;;  %v4241_v26 = vld [vmem:[#allocation2 + $0x108] sm:$0xff] }
 0x63e   :  { %6443 = vrcp.f32 %v3651_v27 }
 0x63f   :  { %v6438_v29 = vpop.eup %6437 }
 0x640   :  { %v3727_v30 = vmul.f32 %v6438_v29, %v3724_v28  ;;  %v6440_v31 = vpop.eup %6439 }
 0x641   :  { %v3751_v14 = vadd.f32 1.0, %v6440_v31 }
 0x642   :  { %v3728_v63 = vadd.f32 %v3727_v30, %v3656_v34 }
 0x644   :  { %6445 = vtanh.f32 %v3728_v63 }
 0x645   :  { %6447 = vrcp.f32 %v3751_v14 }
 0x647   :  { %v6442_v36 = vpop.eup %6441 }
 0x648   :  { %v3827_v38 = vmul.f32 %v6442_v36, %v3824_v35  ;;  %v6444_v40 = vpop.eup %6443 }
 0x649   :  { %v3730_v13 = vsub.f32 1.0, %v6444_v40  ;;  %v3732_v47 = vmul.f32 %v6444_v40, %v7323_v16 }
 0x64a   :  { %v3828_v41 = vadd.f32 %v3827_v38, %v3756_v15 }
 0x64c   :  { %6449 = vtanh.f32 %v3828_v41 }
 0x64e   :  { %v6446_v43 = vpop.eup %6445 }
 0x64f   :  { %v3731_v44 = vmul.f32 %v6446_v43, %v3730_v13  ;;  %v6448_v50 = vpop.eup %6447 }
 0x650   :  { %v3830_v54 = vsub.f32 1.0, %v6448_v50 }
 0x651   :  { %v3733_v49 = vadd.f32 %v3732_v47, %v3731_v44  ;;  %v4151_v44 = vld [vmem:[#allocation2 + $0xb0] sm:$0xff] }
 0x653   :  { %v3834_v51 = vsel %vm2335_vm1, %v3733_v49, 0.0  ;;  %v7408_v52 = vsel %vm2335_vm1, %v3733_v49, %v7323_v16  ;;  %v3832_v16 = vmul.f32 %v6448_v50, %v7351_v39 }
 0x654   :  { %5003 = vst.msk [vmem:[%s7573_s6 + $0x28] sm:$0xff] %vm42_vm0, %v3834_v51  ;;  %5865 = vmatmul.mubr.msk.f32.vlgmr.msra.gmra.mrb[60].mxu0 %vm42_vm0, %v7408_v52  ;;  %5876 = vmatmul.mubr.msk.f32.vlgmr.msra.gmra.mrb[60].mxu1 %vm42_vm0, %v7408_v52 }
 0x655   :  { %6266 = vmatpush3.bf16.msra.mxu0 %v6817_v4  ;;  %6272 = vmatpush3.bf16.msra.mxu1 %v6821_v5 }
 0x656   :  { %v6450_v57 = vpop.eup %6449  ;;  %6267 = vmatprep.subr.bf16.mxu0 %v6494_v48  ;;  %6273 = vmatprep.subr.bf16.mxu1 %v6494_v48 }
 0x657   :  { %5886 = vmatprep.mubr.msk.f32.mxu0 %vm6495_vm5, %v6496_v3  ;;  %5897 = vmatprep.mubr.msk.f32.mxu1 %vm6495_vm5, %v6496_v3  ;;  %v3831_v46 = vmul.f32 %v6450_v57, %v3830_v54  ;;  %v4251_v57 = vld [vmem:[#allocation2 + $0x148] sm:$0xff] }
 0x659   :  { %6269 = vmatpush3.bf16.msra.mxu0 %v6838_v11  ;;  %6275 = vmatpush3.bf16.msra.mxu1 %v6842_v12  ;;  %v3833_v58 = vadd.f32 %v3832_v16, %v3831_v46 }
 0x65a   :  { %6276 = vmatprep.subr.bf16.mxu0 %v6494_v48  ;;  %6282 = vmatprep.subr.bf16.mxu1 %v6494_v48 }
 0x65b   :  { %v3836_v59 = vsel %vm2327_vm15, %v3833_v58, 0.0  ;;  %v7436_v0 = vsel %vm2327_vm15, %v3833_v58, %v7351_v39 }
 0x65c   :  { %3838 = vrot.lane.b32.xlu1 %v3836_v59, %s6497_s30  ;;  %5887 = vmatmul.mubr.msk.f32.vlgmr.msra.gmra.mrb[62].mxu0 %vm42_vm0, %v7436_v0 }
 0x65d   :  { %5898 = vmatmul.mubr.msk.f32.vlgmr.msra.gmra.mrb[62].mxu1 %vm42_vm0, %v7436_v0  ;;  %6278 = vmatpush3.bf16.msra.mxu0 %v6862_v17 }
 0x65e   :  { %6284 = vmatpush3.bf16.msra.mxu1 %v6873_v20  ;;  %6279 = vmatprep.subr.bf16.mxu0 %v6494_v48 }
 0x65f   :  { %6285 = vmatprep.subr.bf16.mxu1 %v6494_v48  ;;  %5908 = vmatprep.mubr.msk.f32.mxu0 %vm6495_vm5, %v6496_v3 }
 0x660   :  { %5919 = vmatprep.mubr.msk.f32.mxu1 %vm6495_vm5, %v6496_v3 }
 0x661   :  { %6281 = vmatpush3.bf16.msra.mxu0 %v6884_v23 }
 0x662   :  { %6287 = vmatpush3.bf16.msra.mxu1 %v6890_v24  ;;  %6288 = vmatprep.subr.bf16.mxu0 %v6494_v48 }
 0x663   :  { %6294 = vmatprep.subr.bf16.mxu1 %v6494_v48 }
 0x664   :  { %5909 = vmatmul.mubr.msk.f32.vlgmr.msra.gmra.mrb[64].mxu0 %vm42_vm0, %v7408_v52 }
 0x665   :  { %5920 = vmatmul.mubr.msk.f32.vlgmr.msra.gmra.mrb[64].mxu1 %vm42_vm0, %v7436_v0  ;;  %6290 = vmatpush3.bf16.msra.mxu0 %v6745_v55 }
 0x666   :  { %6296 = vmatpush3.bf16.msra.mxu1 %v6749_v56  ;;  %6291 = vmatprep.subr.bf16.mxu0 %v6494_v48 }
 0x667   :  { %6297 = vmatprep.subr.bf16.mxu1 %v6494_v48  ;;  %5930 = vmatprep.mubr.msk.f32.mxu0 %vm6495_vm5, %v6496_v3 }
 0x668   :  { %5941 = vmatprep.mubr.msk.f32.mxu1 %vm6495_vm5, %v6496_v3 }
 0x669   :  { %6293 = vmatpush3.bf16.msra.mxu0 %v6772_v61  ;;  %v4141_v61 = vld [vmem:[#allocation2 + $0x70] sm:$0xff] }
 0x66a   :  { %6299 = vmatpush3.bf16.msra.mxu1 %v6776_v62  ;;  %6300 = vmatprep.subr.bf16.mxu0 %v6494_v48 }
 0x66b   :  { %6306 = vmatprep.subr.bf16.mxu1 %v6494_v48 }
 0x6ce   :  { %v3839_v55 = vpop.permute.xlu1 %3838 }
 0x6cf   :  { %5004 = vst.msk [vmem:[%s7573_s6 + $0x10] sm:$0xff] %vm1326_vm12, %v3839_v55 }
 0x727   :  { %v3913_v56 = vpop.f32.mrb[60].mxu0  ;;  %v3983_v39 = vpop.f32.mrb[60].mxu1 }
 0x728   :  { %v4132_v32 = vadd.f32 %v4131_v7, %v3913_v56  ;;  %v5866_v2 = vpop.f32.mrb[61].mxu0  ;;  %v5877_v37 = vpop.f32.mrb[61].mxu1  ;;  %v4142_v9 = vadd.f32 %v4141_v61, %v3983_v39 }
 0x72a   :  { %v5009_v6 = vmul.f32 -1.442695, %v4132_v32  ;;  %v5010_v62 = vmul.f32 -1.442695, %v4142_v9 }
 0x72c   :  { %6451 = vpow2.f32 %v5009_v6 }
 0x72d   :  { %6453 = vpow2.f32 %v5010_v62 }
 0x72f   :  { %v4056_v10 = vpop.f32.mrb[62].mxu0 }
 0x730   :  { %v4232_v18 = vadd.f32 %v4231_v42, %v4056_v10  ;;  %v4126_v19 = vpop.f32.mrb[62].mxu1  ;;  %v5888_v21 = vpop.f32.mrb[63].mxu0  ;;  %v4726_v10 = vld [vmem:[#allocation2 + $0xc0] sm:$0xff] }
 0x731   :  { %v5899_v22 = vpop.f32.mrb[63].mxu1  ;;  %v4242_v27 = vadd.f32 %v4241_v26, %v4126_v19 }
 0x732   :  { %v5012_v25 = vmul.f32 -1.442695, %v4232_v18 }
 0x733   :  { %v5013_v30 = vmul.f32 -1.442695, %v4242_v27 }
 0x734   :  { %6455 = vpow2.f32 %v5012_v25  ;;  %v4736_v25 = vld [vmem:[#allocation2 + $0x100] sm:$0xff] }
 0x736   :  { %v6452_v28 = vpop.eup %6451 }
 0x737   :  { %v4136_v29 = vadd.f32 1.0, %v6452_v28  ;;  %v4218_v31 = vpop.f32.mrb[64].mxu0  ;;  %v6454_v35 = vpop.eup %6453 }
 0x738   :  { %v4318_v34 = vpop.f32.mrb[64].mxu1  ;;  %v5910_v63 = vpop.f32.mrb[65].mxu0  ;;  %v4146_v15 = vadd.f32 1.0, %v6454_v35  ;;  %v4219_v40 = vadd.f32 %v7393_v1, %v4218_v31 }
 0x739   :  { %6457 = vrcp.f32 %v4136_v29  ;;  %v5921_v14 = vpop.f32.mrb[65].mxu1  ;;  %v4319_v50 = vadd.f32 %v7399_v60, %v4318_v34 }
 0x73a   :  { %6459 = vpow2.f32 %v5013_v30 }
 0x73e   :  { %v6456_v36 = vpop.eup %6455 }
 0x73f   :  { %v4236_v38 = vadd.f32 1.0, %v6456_v36 }
 0x741   :  { %6461 = vrcp.f32 %v4236_v38 }
 0x742   :  { %6463 = vrcp.f32 %v4146_v15 }
 0x743   :  { %v6458_v41 = vpop.eup %6457 }
 0x744   :  { %v4222_v13 = vmul.f32 %v6458_v41, %v4219_v40  ;;  %v6460_v43 = vpop.eup %6459 }
 0x745   :  { %v4246_v49 = vadd.f32 1.0, %v6460_v43  ;;  %v4646_v43 = vld [vmem:[#allocation2 + $0xb8] sm:$0xff] }
 0x746   :  { %v4223_v47 = vadd.f32 %v4222_v13, %v4151_v44 }
 0x748   :  { %6465 = vtanh.f32 %v4223_v47 }
 0x749   :  { %6467 = vrcp.f32 %v4246_v49 }
 0x74b   :  { %v6462_v51 = vpop.eup %6461 }
 0x74c   :  { %v4322_v54 = vmul.f32 %v6462_v51, %v4319_v50  ;;  %v6464_v46 = vpop.eup %6463 }
 0x74d   :  { %v4225_v58 = vsub.f32 1.0, %v6464_v46  ;;  %v4227_v56 = vmul.f32 %v6464_v46, %v7408_v52 }
 0x74e   :  { %v4323_v16 = vadd.f32 %v4322_v54, %v4251_v57  ;;  %v4746_v54 = vld [vmem:[#allocation2 + $0x140] sm:$0xff] }
 0x750   :  { %6469 = vtanh.f32 %v4323_v16 }
 0x752   :  { %v6466_v59 = vpop.eup %6465 }
 0x753   :  { %v4226_v55 = vmul.f32 %v6466_v59, %v4225_v58  ;;  %v6468_v39 = vpop.eup %6467 }
 0x754   :  { %v4325_v37 = vsub.f32 1.0, %v6468_v39 }
 0x755   :  { %v4228_v7 = vadd.f32 %v4227_v56, %v4226_v55 }
 0x757   :  { %v4329_v32 = vsel %vm1826_vm14, %v4228_v7, 0.0  ;;  %v7483_v2 = vsel %vm1826_vm14, %v4228_v7, %v7408_v52  ;;  %v4327_v52 = vmul.f32 %v6468_v39, %v7436_v0 }
 0x758   :  { %5015 = vst.msk [vmem:[%s7573_s6 + $0x30] sm:$0xff] %vm42_vm0, %v4329_v32  ;;  %5931 = vmatmul.mubr.msk.f32.vlgmr.msra.gmra.mrb[66].mxu0 %vm42_vm0, %v7483_v2  ;;  %5942 = vmatmul.mubr.msk.f32.vlgmr.msra.gmra.mrb[66].mxu1 %vm42_vm0, %v7483_v2 }
 0x759   :  { %6302 = vmatpush3.bf16.msra.mxu0 %v6817_v4  ;;  %6308 = vmatpush3.bf16.msra.mxu1 %v6821_v5 }
 0x75a   :  { %v6470_v6 = vpop.eup %6469  ;;  %6303 = vmatprep.subr.bf16.mxu0 %v6494_v48  ;;  %6309 = vmatprep.subr.bf16.mxu1 %v6494_v48 }
 0x75b   :  { %5952 = vmatprep.mubr.msk.f32.mxu0 %vm6495_vm5, %v6496_v3  ;;  %5963 = vmatprep.mubr.msk.f32.mxu1 %vm6495_vm5, %v6496_v3  ;;  %v4326_v8 = vmul.f32 %v6470_v6, %v4325_v37 }
 0x75d   :  { %6305 = vmatpush3.bf16.msra.mxu0 %v6838_v11  ;;  %6311 = vmatpush3.bf16.msra.mxu1 %v6842_v12  ;;  %v4328_v4 = vadd.f32 %v4327_v52, %v4326_v8  ;;  %v4626_v12 = vld [vmem:[#allocation2 + $0x38] sm:$0xff] }
 0x75e   :  { %6312 = vmatprep.subr.bf16.mxu0 %v6494_v48  ;;  %6318 = vmatprep.subr.bf16.mxu1 %v6494_v48 }
 0x75f   :  { %v4331_v5 = vsel %vm1818_vm13, %v4328_v4, 0.0  ;;  %v7511_v61 = vsel %vm1818_vm13, %v4328_v4, %v7436_v0 }
 0x760   :  { %4333 = vrot.lane.b32.xlu0 %v4331_v5, %s6497_s30  ;;  %5953 = vmatmul.mubr.msk.f32.vlgmr.msra.gmra.mrb[68].mxu0 %vm42_vm0, %v7511_v61 }
 0x761   :  { %5964 = vmatmul.mubr.msk.f32.vlgmr.msra.gmra.mrb[68].mxu1 %vm42_vm0, %v7511_v61  ;;  %6314 = vmatpush3.bf16.msra.mxu0 %v6862_v17 }
 0x762   :  { %6320 = vmatpush3.bf16.msra.mxu1 %v6873_v20  ;;  %6315 = vmatprep.subr.bf16.mxu0 %v6494_v48 }
 0x763   :  { %6321 = vmatprep.subr.bf16.mxu1 %v6494_v48  ;;  %5974 = vmatprep.mubr.msk.f32.mxu0 %vm6495_vm5, %v6496_v3 }
 0x764   :  { %5985 = vmatprep.mubr.msk.f32.mxu1 %vm6495_vm5, %v6496_v3 }
 0x765   :  { %6317 = vmatpush3.bf16.msra.mxu0 %v6884_v23 }
 0x766   :  { %6323 = vmatpush3.bf16.msra.mxu1 %v6890_v24  ;;  %v4636_v24 = vld [vmem:[#allocation2 + $0x78] sm:$0xff] }
 0x768   :  { %5975 = vmatmul.mubr.msk.f32.vlgmr.msra.gmra.mrb[70].mxu0 %vm42_vm0, %v7483_v2 }
 0x769   :  { %5986 = vmatmul.mubr.msk.f32.vlgmr.msra.gmra.mrb[70].mxu1 %vm42_vm0, %v7511_v61 }
 0x7d2   :  { %v4334_v11 = vpop.permute.xlu0 %4333 }
 0x7d3   :  { %5016 = vst.msk [vmem:[%s7573_s6 + $0x8] sm:$0xff] %vm1326_vm12, %v4334_v11 }
 0x82b   :  { %v4408_v48 = vpop.f32.mrb[66].mxu0  ;;  %v4478_v17 = vpop.f32.mrb[66].mxu1 }
 0x82c   :  { %v4627_v3 = vadd.f32 %v4626_v12, %v4408_v48  ;;  %v5932_v20 = vpop.f32.mrb[67].mxu0  ;;  %v5943_v23 = vpop.f32.mrb[67].mxu1  ;;  %v4637_v0 = vadd.f32 %v4636_v24, %v4478_v17 }
 0x82e   :  { %v5021_v53 = vmul.f32 -1.442695, %v4627_v3  ;;  %v5022_v9 = vmul.f32 -1.442695, %v4637_v0 }
 0x830   :  { %6471 = vpow2.f32 %v5021_v53 }
 0x831   :  { %6473 = vpow2.f32 %v5022_v9 }
 0x833   :  { %v4551_v62 = vpop.f32.mrb[68].mxu0 }
 0x834   :  { %v4727_v42 = vadd.f32 %v4726_v10, %v4551_v62  ;;  %v4621_v18 = vpop.f32.mrb[68].mxu1  ;;  %v5954_v19 = vpop.f32.mrb[69].mxu0 }
 0x835   :  { %v5965_v21 = vpop.f32.mrb[69].mxu1  ;;  %v4737_v26 = vadd.f32 %v4736_v25, %v4621_v18 }
 0x836   :  { %v5024_v22 = vmul.f32 -1.442695, %v4727_v42 }
 0x837   :  { %v5025_v29 = vmul.f32 -1.442695, %v4737_v26 }
 0x838   :  { %6475 = vpow2.f32 %v5024_v22 }
 0x83a   :  { %v6472_v27 = vpop.eup %6471 }
 0x83b   :  { %v4631_v28 = vadd.f32 1.0, %v6472_v27  ;;  %v4713_v30 = vpop.f32.mrb[70].mxu0  ;;  %v6474_v14 = vpop.eup %6473 }
 0x83c   :  { %v4813_v31 = vpop.f32.mrb[70].mxu1  ;;  %v5976_v34 = vpop.f32.mrb[71].mxu0  ;;  %v4641_v38 = vadd.f32 1.0, %v6474_v14  ;;  %v4714_v15 = vadd.f32 %v7393_v1, %v4713_v30 }
 0x83d   :  { %6477 = vrcp.f32 %v4631_v28  ;;  %v5987_v63 = vpop.f32.mrb[71].mxu1  ;;  %v4814_v49 = vadd.f32 %v7399_v60, %v4813_v31 }
 0x83e   :  { %6479 = vpow2.f32 %v5025_v29 }
 0x842   :  { %v6476_v35 = vpop.eup %6475 }
 0x843   :  { %v4731_v36 = vadd.f32 1.0, %v6476_v35 }
 0x845   :  { %6481 = vrcp.f32 %v4731_v36 }
 0x846   :  { %6483 = vrcp.f32 %v4641_v38 }
 0x847   :  { %v6478_v40 = vpop.eup %6477 }
 0x848   :  { %v4717_v41 = vmul.f32 %v6478_v40, %v4714_v15  ;;  %v6480_v13 = vpop.eup %6479 }
 0x849   :  { %v4741_v47 = vadd.f32 1.0, %v6480_v13 }
 0x84a   :  { %v4718_v44 = vadd.f32 %v4717_v41, %v4646_v43 }
 0x84c   :  { %6485 = vtanh.f32 %v4718_v44 }
 0x84d   :  { %6487 = vrcp.f32 %v4741_v47 }
 0x84f   :  { %v6482_v50 = vpop.eup %6481 }
 0x850   :  { %v4817_v51 = vmul.f32 %v6482_v50, %v4814_v49  ;;  %v6484_v57 = vpop.eup %6483 }
 0x851   :  { %v4720_v16 = vsub.f32 1.0, %v6484_v57  ;;  %v4722_v1 = vmul.f32 %v6484_v57, %v7483_v2 }
 0x852   :  { %v4818_v46 = vadd.f32 %v4817_v51, %v4746_v54 }
 0x854   :  { %6489 = vtanh.f32 %v4818_v46 }
 0x856   :  { %v6486_v58 = vpop.eup %6485 }
 0x857   :  { %v4721_v59 = vmul.f32 %v6486_v58, %v4720_v16  ;;  %v6488_v56 = vpop.eup %6487 }
 0x858   :  { %v4820_v39 = vsub.f32 1.0, %v6488_v56  ;;  %v4822_v6 = vmul.f32 %v6488_v56, %v7511_v61 }
 0x859   :  { %v4723_v55 = vadd.f32 %v4722_v1, %v4721_v59 }
 0x85b   :  { %v4824_v7 = vsel %vm1319_vm10, %v4723_v55, 0.0  ;;  %v4832_v60 = vsel %vm1319_vm10, %v4723_v55, %v7483_v2 }
 0x85c   :  { %5027 = vst.msk [vmem:[%s7573_s6 + $0x38] sm:$0xff] %vm42_vm0, %v4824_v7  ;;  %4834 = vst.msk [vmem:[%s7574_s7] sm:$0xff] %vm42_vm0, %v4832_v60 }
 0x85e   :  { %v6490_v32 = vpop.eup %6489 }
 0x85f   :  { %v4821_v37 = vmul.f32 %v6490_v32, %v4820_v39 }
 0x861   :  { %v4823_v8 = vadd.f32 %v4822_v6, %v4821_v37 }
 0x863   :  { %v4826_v45 = vsel %vm1312_vm8, %v4823_v8, 0.0  ;;  %v4833_v2 = vsel %vm1312_vm8, %v4823_v8, %v7511_v61 }
 0x864   :  { %4835 = vst.msk [vmem:[%s7574_s7 + $0x8] sm:$0xff] %vm42_vm0, %v4833_v2  ;;  %4828 = vrot.lane.b32.xlu1 %v4826_v45, %s6497_s30 }
 0x8d6   :  { %v4829_v52 = vpop.permute.xlu1 %4828 }
 0x8d7   :  { %4831 = vst.msk [vmem:[%s7573_s6] sm:$0xff] %vm1326_vm12, %v4829_v52 }

// kernel: encoder_rnn_forward.3
= control target key start
LH: loop header
LB: loop body
LE: loop exit
PB: predicated region body
PF: predicated region fallthrough
CT: control target
= control target key end

     0   :  { %v6638_v7 = vmov 0   ;;  %vm46_vm0 = vcmask 523264   ;;  %vm6640_vm3 = vmmov 0   ;;  %vm176_vm7 = vcmask 261120   ;;  %s6642_s9 = smov 32   ;;  %s7784_s2 = inlined_call_operand.vmem [shape: f32[384,32], index: 2, kind: input, shape index: {}]   ;;  %s7785_s1 = inlined_call_operand.vmem [shape: f32[64,64], index: 1, kind: input, shape index: {}]   ;;  %s7786_s3 = inlined_call_operand.vmem [shape: f32[192,32], index: 3, kind: input, shape index: {}]   ;;  %s7787_s0 = inlined_call_operand.vmem [shape: s32[8,1], index: 0, kind: input, shape index: {}]   ;;  %s7788_s4 = inlined_call_operand.vmem [shape: f32[6,32], index: 4, kind: input, shape index: {}]   ;;  %s7789_s5 = inlined_call_operand.vmem [shape: f32[2,32], index: 5, kind: input, shape index: {}]   ;;  %s7790_s6 = inlined_call_operand.vmem [shape: f32[64,64], index: 6, kind: output, shape index: {0}]   ;;  %s7791_s7 = inlined_call_operand.vmem [shape: f32[16,32], index: 7, kind: output, shape index: {1}]  }
   0x1   :  { %v33_v0 = vld [vmem:[%s7784_s2] sm:$0xff]  ;;  %v34_v1 = vld [vmem:[%s7784_s2 + $0x8] sm:$0xff]  ;;  %v35_v5 = vld [vmem:[%s7784_s2 + $0x10] sm:$0xff]  ;;  %6474 = vset.pattern.permute.xlu0 %v6638_v7  ;;  %6475 = vset.pattern.permute.xlu1 %v6638_v7  ;;  %vm1351_vm13 = vcmask 523520  }
   0x2   :  { %v185_v2 = vld [vmem:[%s7784_s2 + $0x40] sm:$0xff]  ;;  %v6085_v3 = vpack.c.bf16 %v34_v1, %v33_v0  ;;  %v186_v4 = vld [vmem:[%s7784_s2 + $0x48] sm:$0xff]  ;;  %v36_v6 = vld [vmem:[%s7784_s2 + $0x18] sm:$0xff] }
   0x3   :  { %v6101_v8 = vpack.c.bf16 %v186_v4, %v185_v2  ;;  %v6089_v9 = vpack.c.bf16 %v36_v6, %v35_v5  ;;  %v187_v10 = vld [vmem:[%s7784_s2 + $0x50] sm:$0xff]  ;;  %v188_v11 = vld [vmem:[%s7784_s2 + $0x58] sm:$0xff]  ;;  %v37_v12 = vld [vmem:[%s7784_s2 + $0x20] sm:$0xff] }
   0x4   :  { %6086 = vmatprep.subr.bf16.mxu0 %v6085_v3  ;;  %v6105_v13 = vpack.c.bf16 %v188_v11, %v187_v10  ;;  %v38_v14 = vld [vmem:[%s7784_s2 + $0x28] sm:$0xff]  ;;  %v189_v15 = vld [vmem:[%s7784_s2 + $0x60] sm:$0xff]  ;;  %v39_v20 = vld [vmem:[%s7784_s2 + $0x30] sm:$0xff] }
   0x5   :  { %v190_v16 = vld [vmem:[%s7784_s2 + $0x68] sm:$0xff]  ;;  %6102 = vmatprep.subr.bf16.mxu1 %v6101_v8  ;;  %6088 = vmatpush3.bf16.msra.mxu0 %v6085_v3  ;;  %v6093_v17 = vpack.c.bf16 %v38_v14, %v37_v12  ;;  %v6724_v18 = vld [vmem:[%s7785_s1] sm:$0xff]  ;;  %v40_v21 = vld [vmem:[%s7784_s2 + $0x38] sm:$0xff] }
   0x6   :  { %6104 = vmatpush3.bf16.msra.mxu1 %v6101_v8  ;;  %6090 = vmatprep.subr.bf16.mxu0 %v6089_v9  ;;  %v6109_v19 = vpack.c.bf16 %v190_v16, %v189_v15  ;;  %v191_v22 = vld [vmem:[%s7784_s2 + $0x70] sm:$0xff]  ;;  %v192_v23 = vld [vmem:[%s7784_s2 + $0x78] sm:$0xff]  ;;  %v6097_v24 = vpack.c.bf16 %v40_v21, %v39_v20  ;;  %v311_v26 = vld [vmem:[%s7784_s2 + $0x80] sm:$0xff] }
   0x7   :  { %6106 = vmatprep.subr.bf16.mxu1 %v6105_v13  ;;  %5405 = vmatprep.mubr.msk.f32.mxu0 %vm46_vm0, %v6724_v18  ;;  %v6113_v25 = vpack.c.bf16 %v192_v23, %v191_v22  ;;  %v312_v27 = vld [vmem:[%s7784_s2 + $0x88] sm:$0xff]  ;;  %v437_v28 = vld [vmem:[%s7784_s2 + $0xc0] sm:$0xff]  ;;  %v313_v32 = vld [vmem:[%s7784_s2 + $0x90] sm:$0xff] }
   0x8   :  { %5433 = vmatprep.mubr.msk.f32.mxu1 %vm46_vm0, %v6724_v18  ;;  %v438_v29 = vld [vmem:[%s7784_s2 + $0xc8] sm:$0xff]  ;;  %v6117_v30 = vpack.c.bf16 %v312_v27, %v311_v26  ;;  %v314_v33 = vld [vmem:[%s7784_s2 + $0x98] sm:$0xff]  ;;  %v439_v35 = vld [vmem:[%s7784_s2 + $0xd0] sm:$0xff] }
   0x9   :  { %6092 = vmatpush3.bf16.msra.mxu0 %v6089_v9  ;;  %v6133_v31 = vpack.c.bf16 %v438_v29, %v437_v28  ;;  %v6763_v34 = vld [vmem:[%s7785_s1 + $0x8] sm:$0xff]  ;;  %v440_v36 = vld [vmem:[%s7784_s2 + $0xd8] sm:$0xff]  ;;  %v6774_v37 = vld [vmem:[%s7785_s1 + $0x10] sm:$0xff]  ;;  %v6121_v38 = vpack.c.bf16 %v314_v33, %v313_v32 }
   0xa   :  { %6108 = vmatpush3.bf16.msra.mxu1 %v6105_v13  ;;  %6094 = vmatprep.subr.bf16.mxu0 %v6093_v17  ;;  %v6137_v39 = vpack.c.bf16 %v440_v36, %v439_v35  ;;  %v315_v40 = vld [vmem:[%s7784_s2 + $0xa0] sm:$0xff]  ;;  %v316_v41 = vld [vmem:[%s7784_s2 + $0xa8] sm:$0xff]  ;;  %v6789_v42 = vld [vmem:[%s7785_s1 + $0x18] sm:$0xff] }
   0xb   :  { %6110 = vmatprep.subr.bf16.mxu1 %v6109_v19  ;;  %v441_v43 = vld [vmem:[%s7784_s2 + $0xe0] sm:$0xff]  ;;  %v442_v44 = vld [vmem:[%s7784_s2 + $0xe8] sm:$0xff]  ;;  %v6125_v46 = vpack.c.bf16 %v316_v41, %v315_v40  ;;  %v317_v48 = vld [vmem:[%s7784_s2 + $0xb0] sm:$0xff] }
   0xc   :  { %v6804_v45 = vld [vmem:[%s7785_s1 + $0x20] sm:$0xff]  ;;  %v6141_v47 = vpack.c.bf16 %v442_v44, %v441_v43  ;;  %v318_v49 = vld [vmem:[%s7784_s2 + $0xb8] sm:$0xff]  ;;  %v6819_v50 = vld [vmem:[%s7785_s1 + $0x28] sm:$0xff] }
   0xd   :  { %6096 = vmatpush3.bf16.msra.mxu0 %v6093_v17  ;;  %v443_v51 = vld [vmem:[%s7784_s2 + $0xf0] sm:$0xff]  ;;  %v444_v52 = vld [vmem:[%s7784_s2 + $0xf8] sm:$0xff]  ;;  %v6129_v54 = vpack.c.bf16 %v318_v49, %v317_v48  ;;  %v563_v56 = vld [vmem:[%s7784_s2 + $0x100] sm:$0xff] }
   0xe   :  { %6112 = vmatpush3.bf16.msra.mxu1 %v6109_v19  ;;  %6098 = vmatprep.subr.bf16.mxu0 %v6097_v24  ;;  %v6834_v53 = vld [vmem:[%s7785_s1 + $0x30] sm:$0xff]  ;;  %v6145_v55 = vpack.c.bf16 %v444_v52, %v443_v51  ;;  %v564_v57 = vld [vmem:[%s7784_s2 + $0x108] sm:$0xff]  ;;  %v6849_v58 = vld [vmem:[%s7785_s1 + $0x38] sm:$0xff] }
   0xf   :  { %6114 = vmatprep.subr.bf16.mxu1 %v6113_v25  ;;  %v689_v59 = vld [vmem:[%s7784_s2 + $0x140] sm:$0xff]  ;;  %v690_v60 = vld [vmem:[%s7784_s2 + $0x148] sm:$0xff]  ;;  %v6149_v61 = vpack.c.bf16 %v564_v57, %v563_v56  ;;  %v565_v63 = vld [vmem:[%s7784_s2 + $0x110] sm:$0xff] }
  0x10   :  { %v6165_v62 = vpack.c.bf16 %v690_v60, %v689_v59  ;;  %v566_v0 = vld [vmem:[%s7784_s2 + $0x118] sm:$0xff]  ;;  %v691_v1 = vld [vmem:[%s7784_s2 + $0x150] sm:$0xff]  ;;  %v567_v5 = vld [vmem:[%s7784_s2 + $0x120] sm:$0xff] }
  0x11   :  { %6100 = vmatpush3.bf16.msra.mxu0 %v6097_v24  ;;  %v692_v2 = vld [vmem:[%s7784_s2 + $0x158] sm:$0xff]  ;;  %v6153_v3 = vpack.c.bf16 %v566_v0, %v565_v63  ;;  %v568_v6 = vld [vmem:[%s7784_s2 + $0x128] sm:$0xff]  ;;  %v693_v8 = vld [vmem:[%s7784_s2 + $0x160] sm:$0xff]  ;;  %v6639_v24 = vmov 0.0|0.0  }
  0x12   :  { %6116 = vmatpush3.bf16.msra.mxu1 %v6113_v25  ;;  %6118 = vmatprep.subr.bf16.mxu0 %v6117_v30  ;;  %v6169_v4 = vpack.c.bf16 %v692_v2, %v691_v1  ;;  %v694_v9 = vld [vmem:[%s7784_s2 + $0x168] sm:$0xff]  ;;  %v6157_v10 = vpack.c.bf16 %v568_v6, %v567_v5  ;;  %v569_v12 = vld [vmem:[%s7784_s2 + $0x130] sm:$0xff]  ;;  %v570_v13 = vld [vmem:[%s7784_s2 + $0x138] sm:$0xff] }
  0x13   :  { %6134 = vmatprep.subr.bf16.mxu1 %v6133_v31  ;;  %v6173_v11 = vpack.c.bf16 %v694_v9, %v693_v8  ;;  %v695_v14 = vld [vmem:[%s7784_s2 + $0x170] sm:$0xff]  ;;  %v696_v15 = vld [vmem:[%s7784_s2 + $0x178] sm:$0xff]  ;;  %v6161_v16 = vpack.c.bf16 %v570_v13, %v569_v12  ;;  %v815_v19 = vld [vmem:[%s7786_s3] sm:$0xff] }
  0x14   :  { %5406 = vmatmul.mubr.msk.f32.vlgmr.msra.gmra.mrb[0].mxu0 %vm46_vm0, %v6763_v34  ;;  %v6177_v17 = vpack.c.bf16 %v696_v15, %v695_v14  ;;  %v816_v20 = vld [vmem:[%s7786_s3 + $0x8] sm:$0xff]  ;;  %v819_v21 = vld [vmem:[%s7786_s3 + $0x20] sm:$0xff]  ;;  %v817_v26 = vld [vmem:[%s7786_s3 + $0x10] sm:$0xff] }
  0x15   :  { %5434 = vmatmul.mubr.msk.f32.vlgmr.msra.gmra.mrb[0].mxu1 %vm46_vm0, %v6763_v34  ;;  %6120 = vmatpush3.bf16.msra.mxu0 %v6117_v30  ;;  %v820_v22 = vld [vmem:[%s7786_s3 + $0x28] sm:$0xff]  ;;  %v6945_v23 = vpack.c.bf16 %v816_v20, %v815_v19  ;;  %v818_v27 = vld [vmem:[%s7786_s3 + $0x18] sm:$0xff]  ;;  %v6975_v29 = vld [vmem:[%s7787_s0] sm:$0xff] }
  0x16   :  { %6136 = vmatpush3.bf16.msra.mxu1 %v6133_v31  ;;  %5408 = vmatprep.mubr.msk.f32.mxu0 %vm46_vm0, %v6774_v37  ;;  %v6952_v25 = vpack.c.bf16 %v820_v22, %v819_v21  ;;  %v822_v28 = vld [vmem:[%s7786_s3 + $0x38] sm:$0xff]  ;;  %v6981_v30 = vpack.c.bf16 %v818_v27, %v817_v26  ;;  %vm1331_vm1 = vcmp.gt.s32.totalorder %v6975_v29, 0  ;;  %vm1332_vm2 = vcmp.gt.s32.totalorder %v6975_v29, 7  ;;  %v827_v33 = vld [vmem:[%s7786_s3 + $0x60] sm:$0xff]  ;;  %v832_v36 = vld [vmem:[%s7786_s3 + $0x88] sm:$0xff] }
  0x17   :  { %5436 = vmatprep.mubr.msk.f32.mxu1 %vm46_vm0, %v6774_v37  ;;  %6122 = vmatprep.subr.bf16.mxu0 %v6121_v38  ;;  %v1333_v32 = vsel %vm1331_vm1, 1, %v6638_v7  ;;  %v831_v35 = vld [vmem:[%s7786_s3 + $0x80] sm:$0xff]  ;;  %v829_v41 = vld [vmem:[%s7786_s3 + $0x70] sm:$0xff]  ;;  %vm2346_vm4 = vcmp.gt.s32.totalorder %v6975_v29, 2  ;;  %v834_v44 = vld [vmem:[%s7786_s3 + $0x98] sm:$0xff]  ;;  %vm2855_vm5 = vcmp.gt.s32.totalorder %v6975_v29, 3 }
  0x18   :  { %5409 = vmatmul.mubr.msk.f32.gmra.mrb[2].mxu0 %vm46_vm0, %v6789_v42  ;;  %6138 = vmatprep.subr.bf16.mxu1 %v6137_v39  ;;  %v7034_v40 = vpack.c.bf16 %v832_v36, %v831_v35  ;;  %v833_v43 = vld [vmem:[%s7786_s3 + $0x90] sm:$0xff]  ;;  %v823_v48 = vld [vmem:[%s7786_s3 + $0x40] sm:$0xff]  ;;  %v824_v49 = vld [vmem:[%s7786_s3 + $0x48] sm:$0xff]  ;;  %vm1837_vm6 = vcmp.gt.s32.totalorder %v6975_v29, 1  ;;  %vm1838_vm8 = vcmp.gt.s32.totalorder %v6975_v29, 6  ;;  %vm2347_vm10 = vcmp.gt.s32.totalorder %v6975_v29, 5 }
  0x19   :  { %5437 = vmatmul.mubr.msk.f32.gmra.mrb[2].mxu1 %vm46_vm0, %v6789_v42  ;;  %6124 = vmatpush3.bf16.msra.mxu0 %v6121_v38  ;;  %v6641_v38 = vmov 0.0   ;;  %v836_v51 = vld [vmem:[%s7786_s3 + $0xa8] sm:$0xff]  ;;  %v7078_v52 = vpack.c.bf16 %v824_v49, %v823_v48  ;;  %v837_v57 = vld [vmem:[%s7786_s3 + $0xb0] sm:$0xff]  ;;  %v4918_v63 = vld [vmem:[%s7788_s4 + $0x1] ss:$0 sm:$0xff]  ;;  %vm2856_vm12 = vcmp.gt.s32.totalorder %v6975_v29, 4 }
  0x1a   :  { %6140 = vmatpush3.bf16.msra.mxu1 %v6137_v39  ;;  %5411 = vmatprep.mubr.msk.f32.mxu0 %vm46_vm0, %v6804_v45  ;;  %v4927_v36 = vld [vmem:[%s7788_s4 + $0x2] ss:$0 sm:$0xff] }
  0x1b   :  { %5439 = vmatprep.mubr.msk.f32.mxu1 %vm46_vm0, %v6804_v45  ;;  %6126 = vmatprep.subr.bf16.mxu0 %v6125_v46 }
  0x1c   :  { %5412 = vmatmul.mubr.msk.f32.gmra.mrb[4].mxu0 %vm46_vm0, %v6819_v50  ;;  %6142 = vmatprep.subr.bf16.mxu1 %v6141_v47 }
  0x1d   :  { %5440 = vmatmul.mubr.msk.f32.gmra.mrb[4].mxu1 %vm46_vm0, %v6819_v50  ;;  %6128 = vmatpush3.bf16.msra.mxu0 %v6125_v46  ;;  %v2348_v46 = vsel %vm2346_vm4, 1, %v6638_v7 }
  0x1e   :  { %6144 = vmatpush3.bf16.msra.mxu1 %v6141_v47  ;;  %5414 = vmatprep.mubr.msk.f32.mxu0 %vm46_vm0, %v6834_v53  ;;  %v7057_v47 = vpack.c.bf16 %v834_v44, %v833_v43  ;;  %v4936_v43 = vld [vmem:[%s7788_s4 + $0x3] ss:$0 sm:$0xff] }
  0x1f   :  { %5442 = vmatprep.mubr.msk.f32.mxu1 %vm46_vm0, %v6834_v53  ;;  %6130 = vmatprep.subr.bf16.mxu0 %v6129_v54 }
  0x20   :  { %5415 = vmatmul.mubr.msk.f32.gmra.mrb[6].mxu0 %vm46_vm0, %v6849_v58  ;;  %6146 = vmatprep.subr.bf16.mxu1 %v6145_v55 }
  0x21   :  { %5443 = vmatmul.mubr.msk.f32.gmra.mrb[6].mxu1 %vm46_vm0, %v6849_v58  ;;  %6132 = vmatpush3.bf16.msra.mxu0 %v6129_v54  ;;  %v825_v54 = vld [vmem:[%s7786_s3 + $0x50] sm:$0xff] }
  0x22   :  { %6148 = vmatpush3.bf16.msra.mxu1 %v6145_v55  ;;  %5461 = vmatprep.mubr.msk.f32.mxu0 %vm46_vm0, %v6724_v18  ;;  %v826_v55 = vld [vmem:[%s7786_s3 + $0x58] sm:$0xff] }
  0x23   :  { %5489 = vmatprep.mubr.msk.f32.mxu1 %vm46_vm0, %v6724_v18  ;;  %6150 = vmatprep.subr.bf16.mxu0 %v6149_v61  ;;  %v7101_v59 = vpack.c.bf16 %v826_v55, %v825_v54 }
  0x24   :  { %5462 = vmatmul.mubr.msk.f32.vlgmr.msra.gmra.mrb[8].mxu0 %vm46_vm0, %v6763_v34  ;;  %6166 = vmatprep.subr.bf16.mxu1 %v6165_v62 }
  0x25   :  { %5490 = vmatmul.mubr.msk.f32.vlgmr.msra.gmra.mrb[8].mxu1 %vm46_vm0, %v6763_v34  ;;  %6152 = vmatpush3.bf16.msra.mxu0 %v6149_v61  ;;  %v1839_v61 = vsel %vm1837_vm6, 1, %v6638_v7 }
  0x26   :  { %6168 = vmatpush3.bf16.msra.mxu1 %v6165_v62  ;;  %5464 = vmatprep.mubr.msk.f32.mxu0 %vm46_vm0, %v6774_v37  ;;  %v4909_v62 = vld [vmem:[%s7788_s4] ss:$0 sm:$0xff] }
  0x27   :  { %5492 = vmatprep.mubr.msk.f32.mxu1 %vm46_vm0, %v6774_v37  ;;  %6154 = vmatprep.subr.bf16.mxu0 %v6153_v3 }
  0x28   :  { %5465 = vmatmul.mubr.msk.f32.gmra.mrb[10].mxu0 %vm46_vm0, %v6789_v42  ;;  %6170 = vmatprep.subr.bf16.mxu1 %v6169_v4 }
  0x29   :  { %5493 = vmatmul.mubr.msk.f32.gmra.mrb[10].mxu1 %vm46_vm0, %v6789_v42  ;;  %6156 = vmatpush3.bf16.msra.mxu0 %v6153_v3 }
  0x2a   :  { %6172 = vmatpush3.bf16.msra.mxu1 %v6169_v4  ;;  %5467 = vmatprep.mubr.msk.f32.mxu0 %vm46_vm0, %v6804_v45 }
  0x2b   :  { %5495 = vmatprep.mubr.msk.f32.mxu1 %vm46_vm0, %v6804_v45  ;;  %6158 = vmatprep.subr.bf16.mxu0 %v6157_v10 }
  0x2c   :  { %5468 = vmatmul.mubr.msk.f32.gmra.mrb[12].mxu0 %vm46_vm0, %v6819_v50  ;;  %6174 = vmatprep.subr.bf16.mxu1 %v6173_v11 }
  0x2d   :  { %5496 = vmatmul.mubr.msk.f32.gmra.mrb[12].mxu1 %vm46_vm0, %v6819_v50  ;;  %6160 = vmatpush3.bf16.msra.mxu0 %v6157_v10 }
  0x2e   :  { %6176 = vmatpush3.bf16.msra.mxu1 %v6173_v11  ;;  %5470 = vmatprep.mubr.msk.f32.mxu0 %vm46_vm0, %v6834_v53 }
  0x2f   :  { %5498 = vmatprep.mubr.msk.f32.mxu1 %vm46_vm0, %v6834_v53  ;;  %6162 = vmatprep.subr.bf16.mxu0 %v6161_v16 }
  0x30   :  { %5471 = vmatmul.mubr.msk.f32.gmra.mrb[14].mxu0 %vm46_vm0, %v6849_v58  ;;  %6178 = vmatprep.subr.bf16.mxu1 %v6177_v17 }
  0x31   :  { %5499 = vmatmul.mubr.msk.f32.gmra.mrb[14].mxu1 %vm46_vm0, %v6849_v58  ;;  %6164 = vmatpush3.bf16.msra.mxu0 %v6161_v16 }
  0x32   :  { %6180 = vmatpush3.bf16.msra.mxu1 %v6177_v17  ;;  %5517 = vmatprep.mubr.msk.f32.mxu0 %vm46_vm0, %v6724_v18 }
  0x33   :  { %5545 = vmatprep.mubr.msk.f32.mxu1 %vm46_vm0, %v6724_v18  ;;  %6181 = vmatprep.subr.bf16.mxu0 %v6639_v24  ;;  %v821_v18 = vld [vmem:[%s7786_s3 + $0x30] sm:$0xff] }
  0x34   :  { %5518 = vmatmul.mubr.msk.f32.vlgmr.msra.gmra.mrb[16].mxu0 %vm46_vm0, %v6763_v34  ;;  %6187 = vmatprep.subr.bf16.mxu1 %v6639_v24  ;;  %v6985_v31 = vpack.c.bf16 %v822_v28, %v821_v18 }
  0x35   :  { %5546 = vmatmul.mubr.msk.f32.vlgmr.msra.gmra.mrb[16].mxu1 %vm46_vm0, %v6763_v34  ;;  %6183 = vmatpush3.bf16.msra.mxu0 %v6945_v23  ;;  %v828_v34 = vld [vmem:[%s7786_s3 + $0x68] sm:$0xff] }
  0x36   :  { %5520 = vmatprep.mubr.msk.f32.mxu0 %vm46_vm0, %v6774_v37  ;;  %5548 = vmatprep.mubr.msk.f32.mxu1 %vm46_vm0, %v6774_v37  ;;  %v1340_v37 = vsel %vm1332_vm2, 1, %v6638_v7  ;;  %v7030_v39 = vpack.c.bf16 %v828_v34, %v827_v33 }
  0x37   :  { %6184 = vmatprep.subr.bf16.mxu0 %v6639_v24  ;;  %6189 = vmatpush3.bf16.msra.mxu1 %v6952_v25 }
  0x38   :  { %5521 = vmatmul.mubr.msk.f32.gmra.mrb[18].mxu0 %vm46_vm0, %v6789_v42  ;;  %6190 = vmatprep.subr.bf16.mxu1 %v6639_v24 }
  0x39   :  { %5549 = vmatmul.mubr.msk.f32.gmra.mrb[18].mxu1 %vm46_vm0, %v6789_v42  ;;  %5523 = vmatprep.mubr.msk.f32.mxu0 %vm46_vm0, %v6804_v45  ;;  %v830_v42 = vld [vmem:[%s7786_s3 + $0x78] sm:$0xff] }
  0x3a   :  { %5551 = vmatprep.mubr.msk.f32.mxu1 %vm46_vm0, %v6804_v45  ;;  %6186 = vmatpush3.bf16.msra.mxu0 %v6981_v30  ;;  %v7052_v45 = vpack.c.bf16 %v830_v42, %v829_v41 }
  0x3b   :  { %6192 = vmatpush3.bf16.msra.mxu1 %v6985_v31  ;;  %6193 = vmatprep.subr.bf16.mxu0 %v6639_v24 }
  0x3c   :  { %5524 = vmatmul.mubr.msk.f32.gmra.mrb[20].mxu0 %vm46_vm0, %v6819_v50  ;;  %6199 = vmatprep.subr.bf16.mxu1 %v6639_v24 }
  0x3d   :  { %5552 = vmatmul.mubr.msk.f32.gmra.mrb[20].mxu1 %vm46_vm0, %v6819_v50  ;;  %5526 = vmatprep.mubr.msk.f32.mxu0 %vm46_vm0, %v6834_v53  ;;  %v835_v50 = vld [vmem:[%s7786_s3 + $0xa0] sm:$0xff] }
  0x3e   :  { %5554 = vmatprep.mubr.msk.f32.mxu1 %vm46_vm0, %v6834_v53  ;;  %1335 = vperm.xlu0 %6474, %v1333_v32   ;;  %v2857_v53 = vsel %vm2855_vm5, 1, %v6638_v7  ;;  %v7090_v56 = vpack.c.bf16 %v836_v51, %v835_v50 }
  0x3f   :  { %1841 = vperm.xlu1 %6475, %v1839_v61  }
  0x40   :  { %5527 = vmatmul.mubr.msk.f32.gmra.mrb[22].mxu0 %vm46_vm0, %v6849_v58 }
  0x41   :  { %5555 = vmatmul.mubr.msk.f32.gmra.mrb[22].mxu1 %vm46_vm0, %v6849_v58  ;;  %5565 = vmatprep.mubr.msk.f32.mxu0 %vm6640_vm3, %v6641_v38  ;;  %v838_v58 = vld [vmem:[%s7786_s3 + $0xb8] sm:$0xff] }
  0x42   :  { %5576 = vmatprep.mubr.msk.f32.mxu1 %vm6640_vm3, %v6641_v38  ;;  %1342 = vperm.xlu0 %6474, %v1340_v37   ;;  %v7107_v60 = vpack.c.bf16 %v838_v58, %v837_v57 }
  0x44   :  { %5566 = vmatmul.mubr.f32.vlgmr.msra.gmra.mrb[24].mxu0 %v6641_v38 }
  0x45   :  { %5577 = vmatmul.mubr.f32.vlgmr.msra.gmra.mrb[24].mxu1 %v6641_v38  ;;  %6195 = vmatpush3.bf16.msra.mxu0 %v7030_v39 }
  0x46   :  { %6201 = vmatpush3.bf16.msra.mxu1 %v7034_v40  ;;  %6196 = vmatprep.subr.bf16.mxu0 %v6639_v24 }
  0x47   :  { %6202 = vmatprep.subr.bf16.mxu1 %v6639_v24  ;;  %5587 = vmatprep.mubr.msk.f32.mxu0 %vm6640_vm3, %v6641_v38 }
  0x48   :  { %5598 = vmatprep.mubr.msk.f32.mxu1 %vm6640_vm3, %v6641_v38  ;;  %2350 = vperm.xlu0 %6474, %v2348_v46  }
  0x49   :  { %6198 = vmatpush3.bf16.msra.mxu0 %v7052_v45 }
  0x4a   :  { %6204 = vmatpush3.bf16.msra.mxu1 %v7057_v47  ;;  %6205 = vmatprep.subr.bf16.mxu0 %v6639_v24 }
  0x4b   :  { %6211 = vmatprep.subr.bf16.mxu1 %v6639_v24 }
  0x4c   :  { %5588 = vmatmul.mubr.f32.vlgmr.msra.gmra.mrb[26].mxu0 %v6641_v38  ;;  %2859 = vperm.xlu0 %6474, %v2857_v53  }
  0x4d   :  { %5599 = vmatmul.mubr.f32.vlgmr.msra.gmra.mrb[26].mxu1 %v6641_v38  ;;  %6207 = vmatpush3.bf16.msra.mxu0 %v7078_v52 }
  0x4e   :  { %6208 = vmatprep.subr.bf16.mxu0 %v6639_v24  ;;  %5609 = vmatprep.mubr.msk.f32.mxu0 %vm6640_vm3, %v6641_v38 }
  0x4f   :  { %6213 = vmatpush3.bf16.msra.mxu1 %v7090_v56  ;;  %5620 = vmatprep.mubr.msk.f32.mxu1 %vm6640_vm3, %v6641_v38 }
  0x50   :  { %6214 = vmatprep.subr.bf16.mxu1 %v6639_v24 }
  0x51   :  { %6210 = vmatpush3.bf16.msra.mxu0 %v7101_v59 }
  0x52   :  { %6217 = vmatprep.subr.bf16.mxu0 %v6639_v24 }
  0x53   :  { %6216 = vmatpush3.bf16.msra.mxu1 %v7107_v60 }
  0x54   :  { %5610 = vmatmul.mubr.f32.vlgmr.msra.gmra.mrb[28].mxu0 %v6641_v38  ;;  %6223 = vmatprep.subr.bf16.mxu1 %v6639_v24 }
  0x55   :  { %6219 = vmatpush3.bf16.msra.mxu0 %v6945_v23  ;;  %5631 = vmatprep.mubr.msk.f32.mxu0 %vm6640_vm3, %v6641_v38 }
  0x56   :  { %5621 = vmatmul.mubr.f32.vlgmr.msra.gmra.mrb[28].mxu1 %v6641_v38  ;;  %6220 = vmatprep.subr.bf16.mxu0 %v6639_v24 }
  0x57   :  { %6225 = vmatpush3.bf16.msra.mxu1 %v6952_v25  ;;  %5642 = vmatprep.mubr.msk.f32.mxu1 %vm6640_vm3, %v6641_v38 }
  0x58   :  { %6226 = vmatprep.subr.bf16.mxu1 %v6639_v24 }
  0x59   :  { %6222 = vmatpush3.bf16.msra.mxu0 %v6981_v30 }
  0x5a   :  { %6229 = vmatprep.subr.bf16.mxu0 %v6639_v24 }
  0x5b   :  { %6228 = vmatpush3.bf16.msra.mxu1 %v6985_v31 }
  0x5c   :  { %6235 = vmatprep.subr.bf16.mxu1 %v6639_v24 }
  0xe7   :  { %v5407_v0 = vpop.f32.mrb[0].mxu0 }
  0xe8   :  { %v143_v1 = vadd.f32 %v5407_v0, %v4909_v62  ;;  %v137_v2 = vpop.f32.mrb[1].mxu0  ;;  %v5435_v3 = vpop.f32.mrb[0].mxu1 }
  0xe9   :  { %v138_v4 = vadd.f32 %v4909_v62, %v137_v2  ;;  %v270_v5 = vadd.f32 %v5435_v3, %v4918_v63  ;;  %v264_v6 = vpop.f32.mrb[1].mxu1 }
  0xea   :  { %178 = vst.msk [vmem:[#allocation2 + $0x8] sm:$0xff] %vm176_vm7, %v143_v1  ;;  %v265_v8 = vadd.f32 %v4918_v63, %v264_v6 }
  0xeb   :  { %177 = vst.msk [vmem:[#allocation2] sm:$0xff] %vm176_vm7, %v138_v4  ;;  %v5410_v9 = vpop.f32.mrb[2].mxu0  ;;  %304 = vst.msk [vmem:[#allocation2 + $0x48] sm:$0xff] %vm176_vm7, %v270_v5 }
  0xec   :  { %v153_v10 = vadd.f32 %v5410_v9, %v4909_v62  ;;  %v147_v11 = vpop.f32.mrb[3].mxu0  ;;  %303 = vst.msk [vmem:[#allocation2 + $0x40] sm:$0xff] %vm176_vm7, %v265_v8  ;;  %v5438_v12 = vpop.f32.mrb[2].mxu1 }
  0xed   :  { %v148_v13 = vadd.f32 %v4909_v62, %v147_v11  ;;  %v280_v14 = vadd.f32 %v5438_v12, %v4918_v63  ;;  %v274_v15 = vpop.f32.mrb[3].mxu1 }
  0xee   :  { %180 = vst.msk [vmem:[#allocation2 + $0x18] sm:$0xff] %vm176_vm7, %v153_v10  ;;  %v275_v16 = vadd.f32 %v4918_v63, %v274_v15 }
  0xef   :  { %179 = vst.msk [vmem:[#allocation2 + $0x10] sm:$0xff] %vm176_vm7, %v148_v13  ;;  %v5413_v17 = vpop.f32.mrb[4].mxu0  ;;  %306 = vst.msk [vmem:[#allocation2 + $0x58] sm:$0xff] %vm176_vm7, %v280_v14 }
  0xf0   :  { %v163_v19 = vadd.f32 %v5413_v17, %v4909_v62  ;;  %v157_v20 = vpop.f32.mrb[5].mxu0  ;;  %305 = vst.msk [vmem:[#allocation2 + $0x50] sm:$0xff] %vm176_vm7, %v275_v16  ;;  %v5441_v21 = vpop.f32.mrb[4].mxu1  ;;  %v4945_v16 = vld [vmem:[%s7788_s4 + $0x4] ss:$0 sm:$0xff] }
  0xf1   :  { %v158_v22 = vadd.f32 %v4909_v62, %v157_v20  ;;  %v290_v26 = vadd.f32 %v5441_v21, %v4918_v63  ;;  %v284_v27 = vpop.f32.mrb[5].mxu1  ;;  %v4954_v21 = vld [vmem:[%s7788_s4 + $0x5] ss:$0 sm:$0xff] }
  0xf2   :  { %182 = vst.msk [vmem:[#allocation2 + $0x28] sm:$0xff] %vm176_vm7, %v163_v19  ;;  %v285_v18 = vadd.f32 %v4918_v63, %v284_v27 }
  0xf3   :  { %181 = vst.msk [vmem:[#allocation2 + $0x20] sm:$0xff] %vm176_vm7, %v158_v22  ;;  %v5416_v28 = vpop.f32.mrb[6].mxu0  ;;  %308 = vst.msk [vmem:[#allocation2 + $0x68] sm:$0xff] %vm176_vm7, %v290_v26 }
  0xf4   :  { %v173_v32 = vadd.f32 %v5416_v28, %v4909_v62  ;;  %v167_v33 = vpop.f32.mrb[7].mxu0  ;;  %307 = vst.msk [vmem:[#allocation2 + $0x60] sm:$0xff] %vm176_vm7, %v285_v18  ;;  %v5444_v34 = vpop.f32.mrb[6].mxu1 }
  0xf5   :  { %v168_v35 = vadd.f32 %v4909_v62, %v167_v33  ;;  %v300_v37 = vadd.f32 %v5444_v34, %v4918_v63  ;;  %v294_v41 = vpop.f32.mrb[7].mxu1 }
  0xf6   :  { %184 = vst.msk [vmem:[#allocation2 + $0x38] sm:$0xff] %vm176_vm7, %v173_v32  ;;  %v295_v42 = vadd.f32 %v4918_v63, %v294_v41 }
  0xf7   :  { %183 = vst.msk [vmem:[#allocation2 + $0x30] sm:$0xff] %vm176_vm7, %v168_v35  ;;  %v5463_v44 = vpop.f32.mrb[8].mxu0  ;;  %310 = vst.msk [vmem:[#allocation2 + $0x78] sm:$0xff] %vm176_vm7, %v300_v37 }
  0xf8   :  { %v396_v46 = vadd.f32 %v5463_v44, %v4927_v36  ;;  %v390_v48 = vpop.f32.mrb[9].mxu0  ;;  %309 = vst.msk [vmem:[#allocation2 + $0x70] sm:$0xff] %vm176_vm7, %v295_v42  ;;  %v5491_v49 = vpop.f32.mrb[8].mxu1 }
  0xf9   :  { %v391_v50 = vadd.f32 %v4927_v36, %v390_v48  ;;  %v522_v51 = vadd.f32 %v5491_v49, %v4936_v43  ;;  %v516_v53 = vpop.f32.mrb[9].mxu1 }
  0xfa   :  { %430 = vst.msk [vmem:[#allocation2 + $0x88] sm:$0xff] %vm176_vm7, %v396_v46  ;;  %v517_v54 = vadd.f32 %v4936_v43, %v516_v53 }
  0xfb   :  { %429 = vst.msk [vmem:[#allocation2 + $0x80] sm:$0xff] %vm176_vm7, %v391_v50  ;;  %v5466_v55 = vpop.f32.mrb[10].mxu0  ;;  %556 = vst.msk [vmem:[#allocation2 + $0xc8] sm:$0xff] %vm176_vm7, %v522_v51 }
  0xfc   :  { %v406_v57 = vadd.f32 %v5466_v55, %v4927_v36  ;;  %v400_v58 = vpop.f32.mrb[11].mxu0  ;;  %555 = vst.msk [vmem:[#allocation2 + $0xc0] sm:$0xff] %vm176_vm7, %v517_v54  ;;  %v5494_v61 = vpop.f32.mrb[10].mxu1 }
  0xfd   :  { %v401_v62 = vadd.f32 %v4927_v36, %v400_v58  ;;  %v532_v63 = vadd.f32 %v5494_v61, %v4936_v43  ;;  %v526_v0 = vpop.f32.mrb[11].mxu1 }
  0xfe   :  { %432 = vst.msk [vmem:[#allocation2 + $0x98] sm:$0xff] %vm176_vm7, %v406_v57  ;;  %v527_v1 = vadd.f32 %v4936_v43, %v526_v0 }
  0xff   :  { %431 = vst.msk [vmem:[#allocation2 + $0x90] sm:$0xff] %vm176_vm7, %v401_v62  ;;  %v5469_v2 = vpop.f32.mrb[12].mxu0  ;;  %558 = vst.msk [vmem:[#allocation2 + $0xd8] sm:$0xff] %vm176_vm7, %v532_v63 }
 0x100   :  { %v416_v3 = vadd.f32 %v5469_v2, %v4927_v36  ;;  %v410_v4 = vpop.f32.mrb[13].mxu0  ;;  %557 = vst.msk [vmem:[#allocation2 + $0xd0] sm:$0xff] %vm176_vm7, %v527_v1  ;;  %v5497_v5 = vpop.f32.mrb[12].mxu1 }
 0x101   :  { %v411_v6 = vadd.f32 %v4927_v36, %v410_v4  ;;  %v542_v8 = vadd.f32 %v5497_v5, %v4936_v43  ;;  %v536_v9 = vpop.f32.mrb[13].mxu1  ;;  %v1133_v5 = vld [vmem:[#allocation2] sm:$0xff] }
 0x102   :  { %434 = vst.msk [vmem:[#allocation2 + $0xa8] sm:$0xff] %vm176_vm7, %v416_v3  ;;  %v537_v10 = vadd.f32 %v4936_v43, %v536_v9 }
 0x103   :  { %433 = vst.msk [vmem:[#allocation2 + $0xa0] sm:$0xff] %vm176_vm7, %v411_v6  ;;  %v5472_v11 = vpop.f32.mrb[14].mxu0  ;;  %560 = vst.msk [vmem:[#allocation2 + $0xe8] sm:$0xff] %vm176_vm7, %v542_v8 }
 0x104   :  { %v426_v12 = vadd.f32 %v5472_v11, %v4927_v36  ;;  %v420_v13 = vpop.f32.mrb[15].mxu0  ;;  %559 = vst.msk [vmem:[#allocation2 + $0xe0] sm:$0xff] %vm176_vm7, %v537_v10  ;;  %v5500_v14 = vpop.f32.mrb[14].mxu1 }
 0x105   :  { %v421_v15 = vadd.f32 %v4927_v36, %v420_v13  ;;  %v552_v17 = vadd.f32 %v5500_v14, %v4936_v43  ;;  %v546_v19 = vpop.f32.mrb[15].mxu1 }
 0x106   :  { %436 = vst.msk [vmem:[#allocation2 + $0xb8] sm:$0xff] %vm176_vm7, %v426_v12  ;;  %v547_v20 = vadd.f32 %v4936_v43, %v546_v19  ;;  %v1143_v12 = vld [vmem:[#allocation2 + $0x40] sm:$0xff] }
 0x107   :  { %435 = vst.msk [vmem:[#allocation2 + $0xb0] sm:$0xff] %vm176_vm7, %v421_v15  ;;  %v5519_v22 = vpop.f32.mrb[16].mxu0  ;;  %562 = vst.msk [vmem:[#allocation2 + $0xf8] sm:$0xff] %vm176_vm7, %v552_v17 }
 0x108   :  { %v648_v26 = vadd.f32 %v5519_v22, %v4945_v16  ;;  %v642_v27 = vpop.f32.mrb[17].mxu0  ;;  %561 = vst.msk [vmem:[#allocation2 + $0xf0] sm:$0xff] %vm176_vm7, %v547_v20  ;;  %v5547_v18 = vpop.f32.mrb[16].mxu1 }
 0x109   :  { %v643_v28 = vadd.f32 %v4945_v16, %v642_v27  ;;  %v774_v32 = vadd.f32 %v5547_v18, %v4954_v21  ;;  %v768_v33 = vpop.f32.mrb[17].mxu1 }
 0x10a   :  { %682 = vst.msk [vmem:[#allocation2 + $0x108] sm:$0xff] %vm176_vm7, %v648_v26  ;;  %v769_v34 = vadd.f32 %v4954_v21, %v768_v33 }
 0x10b   :  { %681 = vst.msk [vmem:[#allocation2 + $0x100] sm:$0xff] %vm176_vm7, %v643_v28  ;;  %v5522_v35 = vpop.f32.mrb[18].mxu0  ;;  %808 = vst.msk [vmem:[#allocation2 + $0x148] sm:$0xff] %vm176_vm7, %v774_v32 }
 0x10c   :  { %v658_v36 = vadd.f32 %v5522_v35, %v4945_v16  ;;  %v652_v37 = vpop.f32.mrb[19].mxu0  ;;  %807 = vst.msk [vmem:[#allocation2 + $0x140] sm:$0xff] %vm176_vm7, %v769_v34  ;;  %v5550_v41 = vpop.f32.mrb[18].mxu1 }
 0x10d   :  { %v653_v42 = vadd.f32 %v4945_v16, %v652_v37  ;;  %v784_v43 = vadd.f32 %v5550_v41, %v4954_v21  ;;  %v778_v44 = vpop.f32.mrb[19].mxu1  ;;  %v7201_v41 = vld [vmem:[%s7789_s5] ss:$0 sm:$0xff] }
 0x10e   :  { %684 = vst.msk [vmem:[#allocation2 + $0x118] sm:$0xff] %vm176_vm7, %v658_v36  ;;  %v779_v46 = vadd.f32 %v4954_v21, %v778_v44 }
 0x10f   :  { %683 = vst.msk [vmem:[#allocation2 + $0x110] sm:$0xff] %vm176_vm7, %v653_v42  ;;  %v5525_v48 = vpop.f32.mrb[20].mxu0  ;;  %810 = vst.msk [vmem:[#allocation2 + $0x158] sm:$0xff] %vm176_vm7, %v784_v43 }
 0x110   :  { %v668_v49 = vadd.f32 %v5525_v48, %v4945_v16  ;;  %v662_v50 = vpop.f32.mrb[21].mxu0  ;;  %809 = vst.msk [vmem:[#allocation2 + $0x150] sm:$0xff] %vm176_vm7, %v779_v46  ;;  %v5553_v51 = vpop.f32.mrb[20].mxu1 }
 0x111   :  { %v663_v53 = vadd.f32 %v4945_v16, %v662_v50  ;;  %v794_v54 = vadd.f32 %v5553_v51, %v4954_v21  ;;  %v788_v55 = vpop.f32.mrb[21].mxu1  ;;  %v1153_v51 = vld [vmem:[#allocation2 + $0x80] sm:$0xff] }
 0x112   :  { %686 = vst.msk [vmem:[#allocation2 + $0x128] sm:$0xff] %vm176_vm7, %v668_v49  ;;  %v789_v57 = vadd.f32 %v4954_v21, %v788_v55 }
 0x113   :  { %685 = vst.msk [vmem:[#allocation2 + $0x120] sm:$0xff] %vm176_vm7, %v663_v53  ;;  %v5528_v58 = vpop.f32.mrb[22].mxu0  ;;  %812 = vst.msk [vmem:[#allocation2 + $0x168] sm:$0xff] %vm176_vm7, %v794_v54  ;;  %v7207_v53 = vld [vmem:[%s7789_s5 + $0x1] ss:$0 sm:$0xff] }
 0x114   :  { %v678_v61 = vadd.f32 %v5528_v58, %v4945_v16  ;;  %v672_v62 = vpop.f32.mrb[23].mxu0  ;;  %811 = vst.msk [vmem:[#allocation2 + $0x160] sm:$0xff] %vm176_vm7, %v789_v57  ;;  %v5556_v63 = vpop.f32.mrb[22].mxu1 }
 0x115   :  { %v673_v0 = vadd.f32 %v4945_v16, %v672_v62  ;;  %v804_v1 = vadd.f32 %v5556_v63, %v4954_v21  ;;  %v798_v2 = vpop.f32.mrb[23].mxu1  ;;  %v1233_v16 = vld [vmem:[#allocation2 + $0xf8] sm:$0xff] }
 0x116   :  { %688 = vst.msk [vmem:[#allocation2 + $0x138] sm:$0xff] %vm176_vm7, %v678_v61  ;;  %v799_v3 = vadd.f32 %v4954_v21, %v798_v2 }
 0x117   :  { %687 = vst.msk [vmem:[#allocation2 + $0x130] sm:$0xff] %vm176_vm7, %v673_v0  ;;  %814 = vst.msk [vmem:[#allocation2 + $0x178] sm:$0xff] %vm176_vm7, %v804_v1  ;;  %v919_v4 = vpop.f32.mrb[24].mxu0 }
 0x118   :  { %813 = vst.msk [vmem:[#allocation2 + $0x170] sm:$0xff] %vm176_vm7, %v799_v3  ;;  %v1134_v6 = vadd.f32 %v1133_v5, %v919_v4  ;;  %v989_v8 = vpop.f32.mrb[24].mxu1  ;;  %v5567_v9 = vpop.f32.mrb[25].mxu0 }
 0x119   :  { %v5578_v10 = vpop.f32.mrb[25].mxu1  ;;  %v1144_v13 = vadd.f32 %v1143_v12, %v989_v8  ;;  %v7211_v5 = vpop.permute.xlu0 %1335  ;;  %v2356_v12 = vsel %vm2347_vm10, 1, %v6638_v7 }
 0x11a   :  { %v4965_v11 = vmul.f32 -1.442695, %v1134_v6  ;;  %v1847_v6 = vsel %vm1838_vm8, 1, %v6638_v7  ;;  %vm1337_vm9 = vcmp.eq.s32.totalorder %v7211_v5, 1 }
 0x11b   :  { %v4966_v14 = vmul.f32 -1.442695, %v1144_v13  ;;  %1849 = vperm.xlu1 %6475, %v1847_v6  }
 0x11c   :  { %6476 = vpow2.f32 %v4965_v11 }
 0x11d   :  { %v1243_v20 = vld [vmem:[#allocation2 + $0x138] sm:$0xff]  ;;  %6478 = vpow2.f32 %v4966_v14 }
 0x11e   :  { %v1253_v62 = vld [vmem:[#allocation2 + $0x178] sm:$0xff] }
 0x11f   :  { %v1059_v15 = vpop.f32.mrb[26].mxu0  ;;  %2358 = vperm.xlu1 %6475, %v2356_v12  }
 0x120   :  { %v1234_v17 = vadd.f32 %v1233_v16, %v1059_v15  ;;  %v1129_v19 = vpop.f32.mrb[26].mxu1  ;;  %v5589_v21 = vpop.f32.mrb[27].mxu0 }
 0x121   :  { %v5600_v22 = vpop.f32.mrb[27].mxu1  ;;  %v1244_v27 = vadd.f32 %v1243_v20, %v1129_v19  ;;  %v2865_v20 = vsel %vm2856_vm12, 1, %v6638_v7 }
 0x122   :  { %v4967_v26 = vmul.f32 -1.442695, %v1234_v17  ;;  %v7238_v17 = vpop.permute.xlu0 %1342 }
 0x123   :  { %v4968_v32 = vmul.f32 -1.442695, %v1244_v27  ;;  %vm1344_vm11 = vcmp.eq.s32.totalorder %v7238_v17, 1  ;;  %2867 = vperm.xlu1 %6475, %v2865_v20   ;;  %v1759_v20 = vld [vmem:[#allocation2 + $0x170] sm:$0xff] }
 0x124   :  { %6480 = vpow2.f32 %v4967_v26  ;;  %v1639_v26 = vld [vmem:[#allocation2 + $0x8] sm:$0xff] }
 0x126   :  { %v6477_v18 = vpop.eup %6476  ;;  %v7285_v7 = vpop.permute.xlu0 %2350 }
 0x127   :  { %v1138_v28 = vadd.f32 1.0, %v6477_v18  ;;  %v1220_v33 = vpop.f32.mrb[28].mxu0  ;;  %v6479_v37 = vpop.eup %6478  ;;  %vm2352_vm0 = vcmp.eq.s32.totalorder %v7285_v7, 1  ;;  %v4156_v7 = vld [vmem:[#allocation2 + $0x30] sm:$0xff] }
 0x128   :  { %v5611_v34 = vpop.f32.mrb[29].mxu0  ;;  %v1148_v44 = vadd.f32 1.0, %v6479_v37  ;;  %v1221_v46 = vadd.f32 %v7201_v41, %v1220_v33 }
 0x129   :  { %6482 = vrcp.f32 %v1138_v28  ;;  %v1320_v35 = vpop.f32.mrb[28].mxu1  ;;  %v1649_v34 = vld [vmem:[#allocation2 + $0x48] sm:$0xff] }
 0x12a   :  { %v5622_v36 = vpop.f32.mrb[29].mxu1  ;;  %6484 = vpow2.f32 %v4968_v32  ;;  %v1321_v57 = vadd.f32 %v7207_v53, %v1320_v35  ;;  %v7287_v29 = vpop.permute.xlu0 %2859 }
 0x12b   :  { %vm2861_vm2 = vcmp.eq.s32.totalorder %v7287_v29, 1 }
 0x12e   :  { %v6481_v42 = vpop.eup %6480 }
 0x12f   :  { %v1238_v43 = vadd.f32 1.0, %v6481_v42  ;;  %v1739_v42 = vld [vmem:[#allocation2 + $0xf0] sm:$0xff] }
 0x131   :  { %6486 = vrcp.f32 %v1238_v43 }
 0x132   :  { %6488 = vrcp.f32 %v1148_v44 }
 0x133   :  { %v6483_v48 = vpop.eup %6482 }
 0x134   :  { %v1224_v49 = vmul.f32 %v6483_v48, %v1221_v46  ;;  %v6485_v50 = vpop.eup %6484 }
 0x135   :  { %v1248_v55 = vadd.f32 1.0, %v6485_v50  ;;  %v1749_v50 = vld [vmem:[#allocation2 + $0x130] sm:$0xff] }
 0x136   :  { %v1225_v54 = vadd.f32 %v1224_v49, %v1153_v51 }
 0x138   :  { %6490 = vtanh.f32 %v1225_v54 }
 0x139   :  { %6492 = vrcp.f32 %v1248_v55 }
 0x13b   :  { %v6487_v58 = vpop.eup %6486 }
 0x13c   :  { %v1324_v61 = vmul.f32 %v6487_v58, %v1321_v57  ;;  %v6489_v63 = vpop.eup %6488 }
 0x13d   :  { %v1227_v1 = vsub.f32 1.0, %v6489_v63  ;;  %v1229_v4 = vmul.f32 0.0, %v6489_v63 }
 0x13e   :  { %v1325_v0 = vadd.f32 %v1324_v61, %v1253_v62 }
 0x140   :  { %6494 = vtanh.f32 %v1325_v0 }
 0x142   :  { %v6491_v2 = vpop.eup %6490 }
 0x143   :  { %v1228_v3 = vmul.f32 %v6491_v2, %v1227_v1  ;;  %v6493_v9 = vpop.eup %6492 }
 0x144   :  { %v1327_v11 = vsub.f32 1.0, %v6493_v9  ;;  %v1329_v15 = vmul.f32 0.0, %v6493_v9 }
 0x145   :  { %v1230_v8 = vadd.f32 %v1229_v4, %v1228_v3 }
 0x147   :  { %v7218_v10 = vsel %vm1337_vm9, %v1230_v8, 0.0 }
 0x148   :  { %5632 = vmatmul.mubr.msk.f32.vlgmr.msra.gmra.mrb[30].mxu0 %vm176_vm7, %v7218_v10  ;;  %5643 = vmatmul.mubr.msk.f32.vlgmr.msra.gmra.mrb[30].mxu1 %vm176_vm7, %v7218_v10  ;;  %1339 = vst.msk [vmem:[%s7790_s6] sm:$0xff] %vm176_vm7, %v7218_v10 }
 0x149   :  { %6231 = vmatpush3.bf16.msra.mxu0 %v7030_v39  ;;  %6237 = vmatpush3.bf16.msra.mxu1 %v7034_v40 }
 0x14a   :  { %v6495_v13 = vpop.eup %6494  ;;  %6232 = vmatprep.subr.bf16.mxu0 %v6639_v24  ;;  %6238 = vmatprep.subr.bf16.mxu1 %v6639_v24 }
 0x14b   :  { %v1328_v14 = vmul.f32 %v6495_v13, %v1327_v11  ;;  %5653 = vmatprep.mubr.msk.f32.mxu0 %vm6640_vm3, %v6641_v38  ;;  %5664 = vmatprep.mubr.msk.f32.mxu1 %vm6640_vm3, %v6641_v38  ;;  %v1659_v11 = vld [vmem:[#allocation2 + $0x88] sm:$0xff] }
 0x14d   :  { %v1330_v16 = vadd.f32 %v1329_v15, %v1328_v14  ;;  %6234 = vmatpush3.bf16.msra.mxu0 %v7052_v45  ;;  %6240 = vmatpush3.bf16.msra.mxu1 %v7057_v47 }
 0x14e   :  { %6241 = vmatprep.subr.bf16.mxu0 %v6639_v24  ;;  %6247 = vmatprep.subr.bf16.mxu1 %v6639_v24 }
 0x14f   :  { %v7248_v19 = vsel %vm1344_vm11, %v1330_v16, 0.0 }
 0x150   :  { %1347 = vrot.lane.b32.xlu0 %v7248_v19, %s6642_s9  ;;  %5654 = vmatmul.mubr.msk.f32.vlgmr.msra.gmra.mrb[32].mxu0 %vm176_vm7, %v7248_v19 }
 0x151   :  { %5665 = vmatmul.mubr.msk.f32.vlgmr.msra.gmra.mrb[32].mxu1 %vm176_vm7, %v7248_v19  ;;  %6243 = vmatpush3.bf16.msra.mxu0 %v7078_v52 }
 0x152   :  { %6249 = vmatpush3.bf16.msra.mxu1 %v7090_v56  ;;  %6244 = vmatprep.subr.bf16.mxu0 %v6639_v24 }
 0x153   :  { %6250 = vmatprep.subr.bf16.mxu1 %v6639_v24  ;;  %5675 = vmatprep.mubr.msk.f32.mxu0 %vm6640_vm3, %v6641_v38 }
 0x154   :  { %5686 = vmatprep.mubr.msk.f32.mxu1 %vm6640_vm3, %v6641_v38 }
 0x155   :  { %6246 = vmatpush3.bf16.msra.mxu0 %v7101_v59 }
 0x156   :  { %6252 = vmatpush3.bf16.msra.mxu1 %v7107_v60  ;;  %6253 = vmatprep.subr.bf16.mxu0 %v6639_v24 }
 0x157   :  { %6259 = vmatprep.subr.bf16.mxu1 %v6639_v24 }
 0x158   :  { %5676 = vmatmul.mubr.msk.f32.vlgmr.msra.gmra.mrb[34].mxu0 %vm176_vm7, %v7218_v10 }
 0x159   :  { %5687 = vmatmul.mubr.msk.f32.vlgmr.msra.gmra.mrb[34].mxu1 %vm176_vm7, %v7248_v19  ;;  %6255 = vmatpush3.bf16.msra.mxu0 %v6945_v23 }
 0x15a   :  { %6261 = vmatpush3.bf16.msra.mxu1 %v6952_v25  ;;  %6256 = vmatprep.subr.bf16.mxu0 %v6639_v24 }
 0x15b   :  { %6262 = vmatprep.subr.bf16.mxu1 %v6639_v24  ;;  %5697 = vmatprep.mubr.msk.f32.mxu0 %vm6640_vm3, %v6641_v38 }
 0x15c   :  { %5708 = vmatprep.mubr.msk.f32.mxu1 %vm6640_vm3, %v6641_v38 }
 0x15d   :  { %6258 = vmatpush3.bf16.msra.mxu0 %v6981_v30 }
 0x15e   :  { %6264 = vmatpush3.bf16.msra.mxu1 %v6985_v31  ;;  %6265 = vmatprep.subr.bf16.mxu0 %v6639_v24 }
 0x15f   :  { %6271 = vmatprep.subr.bf16.mxu1 %v6639_v24 }
 0x1c2   :  { %v1348_v21 = vpop.permute.xlu0 %1347 }
 0x1c3   :  { %4969 = vst.msk [vmem:[%s7790_s6 + $0x38] sm:$0xff] %vm1351_vm13, %v1348_v21 }
 0x21b   :  { %v1422_v22 = vpop.f32.mrb[30].mxu0  ;;  %v1492_v27 = vpop.f32.mrb[30].mxu1 }
 0x21c   :  { %v1640_v18 = vadd.f32 %v1639_v26, %v1422_v22  ;;  %v5633_v28 = vpop.f32.mrb[31].mxu0  ;;  %v5644_v32 = vpop.f32.mrb[31].mxu1  ;;  %v1650_v35 = vadd.f32 %v1649_v34, %v1492_v27 }
 0x21e   :  { %v4974_v33 = vmul.f32 -1.442695, %v1640_v18  ;;  %v4975_v36 = vmul.f32 -1.442695, %v1650_v35  ;;  %v7295_v18 = vpop.permute.xlu1 %1841 }
 0x21f   :  { %vm1843_vm14 = vcmp.eq.s32.totalorder %v7295_v18, 1 }
 0x220   :  { %6496 = vpow2.f32 %v4974_v33 }
 0x221   :  { %6498 = vpow2.f32 %v4975_v36 }
 0x223   :  { %v1564_v37 = vpop.f32.mrb[32].mxu0 }
 0x224   :  { %v1740_v43 = vadd.f32 %v1739_v42, %v1564_v37  ;;  %v1634_v44 = vpop.f32.mrb[32].mxu1  ;;  %v5655_v46 = vpop.f32.mrb[33].mxu0 }
 0x225   :  { %v5666_v48 = vpop.f32.mrb[33].mxu1  ;;  %v1750_v51 = vadd.f32 %v1749_v50, %v1634_v44  ;;  %v7323_v44 = vpop.permute.xlu1 %1849 }
 0x226   :  { %v4977_v49 = vmul.f32 -1.442695, %v1740_v43  ;;  %vm1851_vm15 = vcmp.eq.s32.totalorder %v7323_v44, 1 }
 0x227   :  { %v4978_v57 = vmul.f32 -1.442695, %v1750_v51 }
 0x228   :  { %6500 = vpow2.f32 %v4977_v49 }
 0x22a   :  { %v6497_v54 = vpop.eup %6496 }
 0x22b   :  { %v1644_v55 = vadd.f32 1.0, %v6497_v54  ;;  %v1726_v58 = vpop.f32.mrb[34].mxu0  ;;  %v6499_v0 = vpop.eup %6498 }
 0x22c   :  { %v1826_v61 = vpop.f32.mrb[34].mxu1  ;;  %v5677_v62 = vpop.f32.mrb[35].mxu0  ;;  %v1654_v3 = vadd.f32 1.0, %v6499_v0  ;;  %v1727_v4 = vadd.f32 %v7201_v41, %v1726_v58  ;;  %v2158_v0 = vld [vmem:[#allocation2 + $0x50] sm:$0xff] }
 0x22d   :  { %6502 = vrcp.f32 %v1644_v55  ;;  %v5688_v63 = vpop.f32.mrb[35].mxu1  ;;  %v1827_v14 = vadd.f32 %v7207_v53, %v1826_v61  ;;  %v2148_v55 = vld [vmem:[#allocation2 + $0x10] sm:$0xff] }
 0x22e   :  { %6504 = vpow2.f32 %v4978_v57 }
 0x232   :  { %v6501_v1 = vpop.eup %6500 }
 0x233   :  { %v1744_v2 = vadd.f32 1.0, %v6501_v1 }
 0x235   :  { %6506 = vrcp.f32 %v1744_v2 }
 0x236   :  { %6508 = vrcp.f32 %v1654_v3 }
 0x237   :  { %v6503_v6 = vpop.eup %6502 }
 0x238   :  { %v1730_v8 = vmul.f32 %v6503_v6, %v1727_v4  ;;  %v6505_v9 = vpop.eup %6504  ;;  %v2248_v4 = vld [vmem:[#allocation2 + $0xe8] sm:$0xff] }
 0x239   :  { %v1754_v13 = vadd.f32 1.0, %v6505_v9 }
 0x23a   :  { %v1731_v12 = vadd.f32 %v1730_v8, %v1659_v11 }
 0x23c   :  { %6510 = vtanh.f32 %v1731_v12 }
 0x23d   :  { %6512 = vrcp.f32 %v1754_v13  ;;  %v2258_v13 = vld [vmem:[#allocation2 + $0x128] sm:$0xff] }
 0x23f   :  { %v6507_v15 = vpop.eup %6506 }
 0x240   :  { %v1830_v16 = vmul.f32 %v6507_v15, %v1827_v14  ;;  %v6509_v21 = vpop.eup %6508 }
 0x241   :  { %v1733_v26 = vsub.f32 1.0, %v6509_v21  ;;  %v1735_v32 = vmul.f32 %v6509_v21, %v7218_v10 }
 0x242   :  { %v1831_v22 = vadd.f32 %v1830_v16, %v1759_v20 }
 0x244   :  { %6514 = vtanh.f32 %v1831_v22 }
 0x246   :  { %v6511_v27 = vpop.eup %6510 }
 0x247   :  { %v1734_v28 = vmul.f32 %v6511_v27, %v1733_v26  ;;  %v6513_v34 = vpop.eup %6512 }
 0x248   :  { %v1833_v37 = vsub.f32 1.0, %v6513_v34  ;;  %v1835_v43 = vmul.f32 %v6513_v34, %v7248_v19 }
 0x249   :  { %v1736_v33 = vadd.f32 %v1735_v32, %v1734_v28 }
 0x24b   :  { %v1844_v35 = vsel %vm1843_vm14, %v1736_v33, 0.0  ;;  %v7304_v36 = vsel %vm1843_vm14, %v1736_v33, %v7218_v10 }
 0x24c   :  { %4980 = vst.msk [vmem:[%s7790_s6 + $0x8] sm:$0xff] %vm176_vm7, %v1844_v35  ;;  %5698 = vmatmul.mubr.msk.f32.vlgmr.msra.gmra.mrb[36].mxu0 %vm176_vm7, %v7304_v36  ;;  %5709 = vmatmul.mubr.msk.f32.vlgmr.msra.gmra.mrb[36].mxu1 %vm176_vm7, %v7304_v36 }
 0x24d   :  { %6267 = vmatpush3.bf16.msra.mxu0 %v7030_v39  ;;  %6273 = vmatpush3.bf16.msra.mxu1 %v7034_v40 }
 0x24e   :  { %v6515_v42 = vpop.eup %6514  ;;  %6268 = vmatprep.subr.bf16.mxu0 %v6639_v24  ;;  %6274 = vmatprep.subr.bf16.mxu1 %v6639_v24 }
 0x24f   :  { %5719 = vmatprep.mubr.msk.f32.mxu0 %vm6640_vm3, %v6641_v38  ;;  %5730 = vmatprep.mubr.msk.f32.mxu1 %vm6640_vm3, %v6641_v38  ;;  %v1834_v10 = vmul.f32 %v6515_v42, %v1833_v37 }
 0x251   :  { %6270 = vmatpush3.bf16.msra.mxu0 %v7052_v45  ;;  %6276 = vmatpush3.bf16.msra.mxu1 %v7057_v47  ;;  %v1836_v46 = vadd.f32 %v1835_v43, %v1834_v10  ;;  %v2168_v43 = vld [vmem:[#allocation2 + $0x90] sm:$0xff] }
 0x252   :  { %6277 = vmatprep.subr.bf16.mxu0 %v6639_v24  ;;  %6283 = vmatprep.subr.bf16.mxu1 %v6639_v24 }
 0x253   :  { %v1852_v48 = vsel %vm1851_vm15, %v1836_v46, 0.0  ;;  %v7335_v49 = vsel %vm1851_vm15, %v1836_v46, %v7248_v19  ;;  %v7370_v19 = vpop.permute.xlu1 %2358 }
 0x254   :  { %1854 = vrot.lane.b32.xlu1 %v1852_v48, %s6642_s9  ;;  %5720 = vmatmul.mubr.msk.f32.vlgmr.msra.gmra.mrb[38].mxu0 %vm176_vm7, %v7335_v49  ;;  %vm2360_vm1 = vcmp.eq.s32.totalorder %v7370_v19, 1 }
 0x255   :  { %5731 = vmatmul.mubr.msk.f32.vlgmr.msra.gmra.mrb[38].mxu1 %vm176_vm7, %v7335_v49  ;;  %6279 = vmatpush3.bf16.msra.mxu0 %v7078_v52 }
 0x256   :  { %6285 = vmatpush3.bf16.msra.mxu1 %v7090_v56  ;;  %6280 = vmatprep.subr.bf16.mxu0 %v6639_v24 }
 0x257   :  { %6286 = vmatprep.subr.bf16.mxu1 %v6639_v24  ;;  %5741 = vmatprep.mubr.msk.f32.mxu0 %vm6640_vm3, %v6641_v38  ;;  %v7372_v50 = vpop.permute.xlu1 %2867 }
 0x258   :  { %5752 = vmatprep.mubr.msk.f32.mxu1 %vm6640_vm3, %v6641_v38  ;;  %vm2869_vm4 = vcmp.eq.s32.totalorder %v7372_v50, 1 }
 0x259   :  { %6282 = vmatpush3.bf16.msra.mxu0 %v7101_v59 }
 0x25a   :  { %6288 = vmatpush3.bf16.msra.mxu1 %v7107_v60  ;;  %6289 = vmatprep.subr.bf16.mxu0 %v6639_v24 }
 0x25b   :  { %6295 = vmatprep.subr.bf16.mxu1 %v6639_v24 }
 0x25c   :  { %5742 = vmatmul.mubr.msk.f32.vlgmr.msra.gmra.mrb[40].mxu0 %vm176_vm7, %v7304_v36 }
 0x25d   :  { %5753 = vmatmul.mubr.msk.f32.vlgmr.msra.gmra.mrb[40].mxu1 %vm176_vm7, %v7335_v49  ;;  %6291 = vmatpush3.bf16.msra.mxu0 %v6945_v23 }
 0x25e   :  { %6297 = vmatpush3.bf16.msra.mxu1 %v6952_v25  ;;  %6292 = vmatprep.subr.bf16.mxu0 %v6639_v24 }
 0x25f   :  { %6298 = vmatprep.subr.bf16.mxu1 %v6639_v24  ;;  %5763 = vmatprep.mubr.msk.f32.mxu0 %vm6640_vm3, %v6641_v38 }
 0x260   :  { %5774 = vmatprep.mubr.msk.f32.mxu1 %vm6640_vm3, %v6641_v38 }
 0x261   :  { %6294 = vmatpush3.bf16.msra.mxu0 %v6981_v30 }
 0x262   :  { %6300 = vmatpush3.bf16.msra.mxu1 %v6985_v31  ;;  %6301 = vmatprep.subr.bf16.mxu0 %v6639_v24 }
 0x263   :  { %6307 = vmatprep.subr.bf16.mxu1 %v6639_v24 }
 0x2c6   :  { %v1855_v51 = vpop.permute.xlu1 %1854 }
 0x2c7   :  { %4981 = vst.msk [vmem:[%s7790_s6 + $0x30] sm:$0xff] %vm1351_vm13, %v1855_v51 }
 0x31f   :  { %v1930_v54 = vpop.f32.mrb[36].mxu0  ;;  %v2000_v57 = vpop.f32.mrb[36].mxu1 }
 0x320   :  { %v2149_v58 = vadd.f32 %v2148_v55, %v1930_v54  ;;  %v5699_v61 = vpop.f32.mrb[37].mxu0  ;;  %v5710_v62 = vpop.f32.mrb[37].mxu1  ;;  %v2159_v1 = vadd.f32 %v2158_v0, %v2000_v57  ;;  %v2268_v57 = vld [vmem:[#allocation2 + $0x168] sm:$0xff] }
 0x322   :  { %v4986_v63 = vmul.f32 -1.442695, %v2149_v58  ;;  %v4987_v2 = vmul.f32 -1.442695, %v2159_v1 }
 0x324   :  { %6516 = vpow2.f32 %v4986_v63 }
 0x325   :  { %6518 = vpow2.f32 %v4987_v2 }
 0x327   :  { %v2073_v3 = vpop.f32.mrb[38].mxu0 }
 0x328   :  { %v2249_v6 = vadd.f32 %v2248_v4, %v2073_v3  ;;  %v2143_v8 = vpop.f32.mrb[38].mxu1  ;;  %v5721_v9 = vpop.f32.mrb[39].mxu0 }
 0x329   :  { %v5732_v11 = vpop.f32.mrb[39].mxu1  ;;  %v2259_v14 = vadd.f32 %v2258_v13, %v2143_v8 }
 0x32a   :  { %v4989_v12 = vmul.f32 -1.442695, %v2249_v6 }
 0x32b   :  { %v4990_v20 = vmul.f32 -1.442695, %v2259_v14 }
 0x32c   :  { %6520 = vpow2.f32 %v4989_v12 }
 0x32e   :  { %v6517_v15 = vpop.eup %6516 }
 0x32f   :  { %v2153_v16 = vadd.f32 1.0, %v6517_v15  ;;  %v2235_v21 = vpop.f32.mrb[40].mxu0  ;;  %v6519_v28 = vpop.eup %6518 }
 0x330   :  { %v2335_v22 = vpop.f32.mrb[40].mxu1  ;;  %v5743_v26 = vpop.f32.mrb[41].mxu0  ;;  %v2163_v34 = vadd.f32 1.0, %v6519_v28  ;;  %v2236_v35 = vadd.f32 %v7201_v41, %v2235_v21  ;;  %v2667_v28 = vld [vmem:[#allocation2 + $0x58] sm:$0xff] }
 0x331   :  { %6522 = vrcp.f32 %v2153_v16  ;;  %v5754_v27 = vpop.f32.mrb[41].mxu1  ;;  %v2336_v51 = vadd.f32 %v7207_v53, %v2335_v22  ;;  %v2657_v16 = vld [vmem:[#allocation2 + $0x18] sm:$0xff] }
 0x332   :  { %6524 = vpow2.f32 %v4990_v20 }
 0x336   :  { %v6521_v32 = vpop.eup %6520 }
 0x337   :  { %v2253_v33 = vadd.f32 1.0, %v6521_v32 }
 0x339   :  { %6526 = vrcp.f32 %v2253_v33 }
 0x33a   :  { %6528 = vrcp.f32 %v2163_v34 }
 0x33b   :  { %v6523_v37 = vpop.eup %6522 }
 0x33c   :  { %v2239_v42 = vmul.f32 %v6523_v37, %v2236_v35  ;;  %v6525_v10 = vpop.eup %6524  ;;  %v2757_v35 = vld [vmem:[#allocation2 + $0xe0] sm:$0xff] }
 0x33d   :  { %v2263_v48 = vadd.f32 1.0, %v6525_v10 }
 0x33e   :  { %v2240_v46 = vadd.f32 %v2239_v42, %v2168_v43 }
 0x340   :  { %6530 = vtanh.f32 %v2240_v46 }
 0x341   :  { %6532 = vrcp.f32 %v2263_v48  ;;  %v2767_v48 = vld [vmem:[#allocation2 + $0x120] sm:$0xff] }
 0x343   :  { %v6527_v54 = vpop.eup %6526 }
 0x344   :  { %v2339_v55 = vmul.f32 %v6527_v54, %v2336_v51  ;;  %v6529_v58 = vpop.eup %6528 }
 0x345   :  { %v2242_v62 = vsub.f32 1.0, %v6529_v58  ;;  %v2244_v1 = vmul.f32 %v6529_v58, %v7304_v36 }
 0x346   :  { %v2340_v61 = vadd.f32 %v2339_v55, %v2268_v57 }
 0x348   :  { %6534 = vtanh.f32 %v2340_v61 }
 0x34a   :  { %v6531_v63 = vpop.eup %6530 }
 0x34b   :  { %v2243_v0 = vmul.f32 %v6531_v63, %v2242_v62  ;;  %v6533_v3 = vpop.eup %6532 }
 0x34c   :  { %v2344_v11 = vmul.f32 %v6533_v3, %v7335_v49 }
 0x34d   :  { %v2245_v2 = vadd.f32 %v2244_v1, %v2243_v0 }
 0x34f   :  { %v7385_v4 = vsel %vm2352_vm0, %v2245_v2, %v7304_v36  ;;  %v2353_v6 = vsel %vm2352_vm0, %v2245_v2, 0.0  ;;  %v2342_v36 = vsub.f32 1.0, %v6533_v3 }
 0x350   :  { %5764 = vmatmul.mubr.msk.f32.vlgmr.msra.gmra.mrb[42].mxu0 %vm176_vm7, %v7385_v4  ;;  %5775 = vmatmul.mubr.msk.f32.vlgmr.msra.gmra.mrb[42].mxu1 %vm176_vm7, %v7385_v4  ;;  %4992 = vst.msk [vmem:[%s7790_s6 + $0x10] sm:$0xff] %vm176_vm7, %v2353_v6 }
 0x351   :  { %6303 = vmatpush3.bf16.msra.mxu0 %v7030_v39  ;;  %6309 = vmatpush3.bf16.msra.mxu1 %v7034_v40 }
 0x352   :  { %v6535_v8 = vpop.eup %6534  ;;  %6304 = vmatprep.subr.bf16.mxu0 %v6639_v24  ;;  %6310 = vmatprep.subr.bf16.mxu1 %v6639_v24 }
 0x353   :  { %5785 = vmatprep.mubr.msk.f32.mxu0 %vm6640_vm3, %v6641_v38  ;;  %5796 = vmatprep.mubr.msk.f32.mxu1 %vm6640_vm3, %v6641_v38  ;;  %v2343_v9 = vmul.f32 %v6535_v8, %v2342_v36 }
 0x355   :  { %6306 = vmatpush3.bf16.msra.mxu0 %v7052_v45  ;;  %6312 = vmatpush3.bf16.msra.mxu1 %v7057_v47  ;;  %v2345_v12 = vadd.f32 %v2344_v11, %v2343_v9  ;;  %v2677_v11 = vld [vmem:[#allocation2 + $0x98] sm:$0xff] }
 0x356   :  { %6313 = vmatprep.subr.bf16.mxu0 %v6639_v24  ;;  %6319 = vmatprep.subr.bf16.mxu1 %v6639_v24 }
 0x357   :  { %v2361_v13 = vsel %vm2360_vm1, %v2345_v12, 0.0  ;;  %v7416_v14 = vsel %vm2360_vm1, %v2345_v12, %v7335_v49 }
 0x358   :  { %2363 = vrot.lane.b32.xlu0 %v2361_v13, %s6642_s9  ;;  %5786 = vmatmul.mubr.msk.f32.vlgmr.msra.gmra.mrb[44].mxu0 %vm176_vm7, %v7416_v14 }
 0x359   :  { %5797 = vmatmul.mubr.msk.f32.vlgmr.msra.gmra.mrb[44].mxu1 %vm176_vm7, %v7416_v14  ;;  %6315 = vmatpush3.bf16.msra.mxu0 %v7078_v52 }
 0x35a   :  { %6321 = vmatpush3.bf16.msra.mxu1 %v7090_v56  ;;  %6316 = vmatprep.subr.bf16.mxu0 %v6639_v24 }
 0x35b   :  { %6322 = vmatprep.subr.bf16.mxu1 %v6639_v24  ;;  %5807 = vmatprep.mubr.msk.f32.mxu0 %vm6640_vm3, %v6641_v38 }
 0x35c   :  { %5818 = vmatprep.mubr.msk.f32.mxu1 %vm6640_vm3, %v6641_v38 }
 0x35d   :  { %6318 = vmatpush3.bf16.msra.mxu0 %v7101_v59 }
 0x35e   :  { %6324 = vmatpush3.bf16.msra.mxu1 %v7107_v60  ;;  %6325 = vmatprep.subr.bf16.mxu0 %v6639_v24 }
 0x35f   :  { %6331 = vmatprep.subr.bf16.mxu1 %v6639_v24 }
 0x360   :  { %5808 = vmatmul.mubr.msk.f32.vlgmr.msra.gmra.mrb[46].mxu0 %vm176_vm7, %v7385_v4 }
 0x361   :  { %5819 = vmatmul.mubr.msk.f32.vlgmr.msra.gmra.mrb[46].mxu1 %vm176_vm7, %v7416_v14  ;;  %6327 = vmatpush3.bf16.msra.mxu0 %v6945_v23 }
 0x362   :  { %6333 = vmatpush3.bf16.msra.mxu1 %v6952_v25  ;;  %6328 = vmatprep.subr.bf16.mxu0 %v6639_v24 }
 0x363   :  { %6334 = vmatprep.subr.bf16.mxu1 %v6639_v24  ;;  %5829 = vmatprep.mubr.msk.f32.mxu0 %vm6640_vm3, %v6641_v38 }
 0x364   :  { %5840 = vmatprep.mubr.msk.f32.mxu1 %vm6640_vm3, %v6641_v38 }
 0x365   :  { %6330 = vmatpush3.bf16.msra.mxu0 %v6981_v30 }
 0x366   :  { %6336 = vmatpush3.bf16.msra.mxu1 %v6985_v31  ;;  %6337 = vmatprep.subr.bf16.mxu0 %v6639_v24 }
 0x367   :  { %6343 = vmatprep.subr.bf16.mxu1 %v6639_v24 }
 0x3ca   :  { %v2364_v49 = vpop.permute.xlu0 %2363 }
 0x3cb   :  { %4993 = vst.msk [vmem:[%s7790_s6 + $0x28] sm:$0xff] %vm1351_vm13, %v2364_v49 }
 0x423   :  { %v2439_v15 = vpop.f32.mrb[42].mxu0  ;;  %v2509_v20 = vpop.f32.mrb[42].mxu1 }
 0x424   :  { %v2658_v21 = vadd.f32 %v2657_v16, %v2439_v15  ;;  %v5765_v22 = vpop.f32.mrb[43].mxu0  ;;  %v5776_v26 = vpop.f32.mrb[43].mxu1  ;;  %v2668_v32 = vadd.f32 %v2667_v28, %v2509_v20  ;;  %v2777_v20 = vld [vmem:[#allocation2 + $0x160] sm:$0xff] }
 0x426   :  { %v4998_v27 = vmul.f32 -1.442695, %v2658_v21  ;;  %v4999_v33 = vmul.f32 -1.442695, %v2668_v32 }
 0x428   :  { %6536 = vpow2.f32 %v4998_v27 }
 0x429   :  { %6538 = vpow2.f32 %v4999_v33 }
 0x42b   :  { %v2582_v34 = vpop.f32.mrb[44].mxu0 }
 0x42c   :  { %v2758_v37 = vadd.f32 %v2757_v35, %v2582_v34  ;;  %v2652_v42 = vpop.f32.mrb[44].mxu1  ;;  %v5787_v10 = vpop.f32.mrb[45].mxu0 }
 0x42d   :  { %v5798_v43 = vpop.f32.mrb[45].mxu1  ;;  %v2768_v51 = vadd.f32 %v2767_v48, %v2652_v42 }
 0x42e   :  { %v5001_v46 = vmul.f32 -1.442695, %v2758_v37 }
 0x42f   :  { %v5002_v57 = vmul.f32 -1.442695, %v2768_v51 }
 0x430   :  { %6540 = vpow2.f32 %v5001_v46 }
 0x432   :  { %v6537_v54 = vpop.eup %6536 }
 0x433   :  { %v2662_v55 = vadd.f32 1.0, %v6537_v54  ;;  %v2744_v58 = vpop.f32.mrb[46].mxu0  ;;  %v6539_v0 = vpop.eup %6538 }
 0x434   :  { %v2844_v61 = vpop.f32.mrb[46].mxu1  ;;  %v5809_v62 = vpop.f32.mrb[47].mxu0  ;;  %v2672_v3 = vadd.f32 1.0, %v6539_v0  ;;  %v2745_v6 = vadd.f32 %v7201_v41, %v2744_v58  ;;  %v3176_v0 = vld [vmem:[#allocation2 + $0x60] sm:$0xff] }
 0x435   :  { %6542 = vrcp.f32 %v2662_v55  ;;  %v5820_v63 = vpop.f32.mrb[47].mxu1  ;;  %v2845_v49 = vadd.f32 %v7207_v53, %v2844_v61  ;;  %v3166_v55 = vld [vmem:[#allocation2 + $0x20] sm:$0xff] }
 0x436   :  { %6544 = vpow2.f32 %v5002_v57 }
 0x43a   :  { %v6541_v1 = vpop.eup %6540 }
 0x43b   :  { %v2762_v2 = vadd.f32 1.0, %v6541_v1 }
 0x43d   :  { %6546 = vrcp.f32 %v2762_v2 }
 0x43e   :  { %6548 = vrcp.f32 %v2672_v3 }
 0x43f   :  { %v6543_v36 = vpop.eup %6542 }
 0x440   :  { %v2748_v8 = vmul.f32 %v6543_v36, %v2745_v6  ;;  %v6545_v9 = vpop.eup %6544  ;;  %v3266_v6 = vld [vmem:[#allocation2 + $0xd8] sm:$0xff] }
 0x441   :  { %v2772_v13 = vadd.f32 1.0, %v6545_v9 }
 0x442   :  { %v2749_v12 = vadd.f32 %v2748_v8, %v2677_v11 }
 0x444   :  { %6550 = vtanh.f32 %v2749_v12 }
 0x445   :  { %6552 = vrcp.f32 %v2772_v13  ;;  %v3276_v13 = vld [vmem:[#allocation2 + $0x118] sm:$0xff] }
 0x447   :  { %v6547_v15 = vpop.eup %6546 }
 0x448   :  { %v2848_v16 = vmul.f32 %v6547_v15, %v2845_v49  ;;  %v6549_v21 = vpop.eup %6548 }
 0x449   :  { %v2751_v26 = vsub.f32 1.0, %v6549_v21  ;;  %v2753_v32 = vmul.f32 %v6549_v21, %v7385_v4 }
 0x44a   :  { %v2849_v22 = vadd.f32 %v2848_v16, %v2777_v20 }
 0x44c   :  { %6554 = vtanh.f32 %v2849_v22 }
 0x44e   :  { %v6551_v27 = vpop.eup %6550 }
 0x44f   :  { %v2752_v28 = vmul.f32 %v6551_v27, %v2751_v26  ;;  %v6553_v34 = vpop.eup %6552 }
 0x450   :  { %v2853_v43 = vmul.f32 %v6553_v34, %v7416_v14 }
 0x451   :  { %v2754_v33 = vadd.f32 %v2753_v32, %v2752_v28 }
 0x453   :  { %v7462_v35 = vsel %vm2861_vm2, %v2754_v33, %v7385_v4  ;;  %v2862_v37 = vsel %vm2861_vm2, %v2754_v33, 0.0  ;;  %v2851_v4 = vsub.f32 1.0, %v6553_v34 }
 0x454   :  { %5830 = vmatmul.mubr.msk.f32.vlgmr.msra.gmra.mrb[48].mxu0 %vm176_vm7, %v7462_v35  ;;  %5841 = vmatmul.mubr.msk.f32.vlgmr.msra.gmra.mrb[48].mxu1 %vm176_vm7, %v7462_v35  ;;  %5004 = vst.msk [vmem:[%s7790_s6 + $0x18] sm:$0xff] %vm176_vm7, %v2862_v37 }
 0x455   :  { %6339 = vmatpush3.bf16.msra.mxu0 %v7030_v39  ;;  %6345 = vmatpush3.bf16.msra.mxu1 %v7034_v40 }
 0x456   :  { %v6555_v42 = vpop.eup %6554  ;;  %6340 = vmatprep.subr.bf16.mxu0 %v6639_v24  ;;  %6346 = vmatprep.subr.bf16.mxu1 %v6639_v24 }
 0x457   :  { %5851 = vmatprep.mubr.msk.f32.mxu0 %vm6640_vm3, %v6641_v38  ;;  %5862 = vmatprep.mubr.msk.f32.mxu1 %vm6640_vm3, %v6641_v38  ;;  %v2852_v10 = vmul.f32 %v6555_v42, %v2851_v4 }
 0x459   :  { %6342 = vmatpush3.bf16.msra.mxu0 %v7052_v45  ;;  %6348 = vmatpush3.bf16.msra.mxu1 %v7057_v47  ;;  %v2854_v46 = vadd.f32 %v2853_v43, %v2852_v10  ;;  %v3186_v43 = vld [vmem:[#allocation2 + $0xa0] sm:$0xff] }
 0x45a   :  { %6349 = vmatprep.subr.bf16.mxu0 %v6639_v24  ;;  %6355 = vmatprep.subr.bf16.mxu1 %v6639_v24 }
 0x45b   :  { %v2870_v48 = vsel %vm2869_vm4, %v2854_v46, 0.0  ;;  %v7493_v51 = vsel %vm2869_vm4, %v2854_v46, %v7416_v14 }
 0x45c   :  { %2872 = vrot.lane.b32.xlu1 %v2870_v48, %s6642_s9  ;;  %5852 = vmatmul.mubr.msk.f32.vlgmr.msra.gmra.mrb[50].mxu0 %vm176_vm7, %v7493_v51 }
 0x45d   :  { %5863 = vmatmul.mubr.msk.f32.vlgmr.msra.gmra.mrb[50].mxu1 %vm176_vm7, %v7493_v51  ;;  %6351 = vmatpush3.bf16.msra.mxu0 %v7078_v52 }
 0x45e   :  { %6357 = vmatpush3.bf16.msra.mxu1 %v7090_v56  ;;  %6352 = vmatprep.subr.bf16.mxu0 %v6639_v24 }
 0x45f   :  { %6358 = vmatprep.subr.bf16.mxu1 %v6639_v24  ;;  %5873 = vmatprep.mubr.msk.f32.mxu0 %vm6640_vm3, %v6641_v38 }
 0x460   :  { %5884 = vmatprep.mubr.msk.f32.mxu1 %vm6640_vm3, %v6641_v38 }
 0x461   :  { %6354 = vmatpush3.bf16.msra.mxu0 %v7101_v59 }
 0x462   :  { %6360 = vmatpush3.bf16.msra.mxu1 %v7107_v60  ;;  %6361 = vmatprep.subr.bf16.mxu0 %v6639_v24 }
 0x463   :  { %6367 = vmatprep.subr.bf16.mxu1 %v6639_v24 }
 0x464   :  { %5874 = vmatmul.mubr.msk.f32.vlgmr.msra.gmra.mrb[52].mxu0 %vm176_vm7, %v7462_v35 }
 0x465   :  { %5885 = vmatmul.mubr.msk.f32.vlgmr.msra.gmra.mrb[52].mxu1 %vm176_vm7, %v7493_v51  ;;  %6363 = vmatpush3.bf16.msra.mxu0 %v6945_v23 }
 0x466   :  { %6369 = vmatpush3.bf16.msra.mxu1 %v6952_v25  ;;  %6364 = vmatprep.subr.bf16.mxu0 %v6639_v24 }
 0x467   :  { %6370 = vmatprep.subr.bf16.mxu1 %v6639_v24  ;;  %5895 = vmatprep.mubr.msk.f32.mxu0 %vm6640_vm3, %v6641_v38 }
 0x468   :  { %5906 = vmatprep.mubr.msk.f32.mxu1 %vm6640_vm3, %v6641_v38 }
 0x469   :  { %6366 = vmatpush3.bf16.msra.mxu0 %v6981_v30 }
 0x46a   :  { %6372 = vmatpush3.bf16.msra.mxu1 %v6985_v31  ;;  %6373 = vmatprep.subr.bf16.mxu0 %v6639_v24 }
 0x46b   :  { %6379 = vmatprep.subr.bf16.mxu1 %v6639_v24 }
 0x4ce   :  { %v2873_v14 = vpop.permute.xlu1 %2872 }
 0x4cf   :  { %5005 = vst.msk [vmem:[%s7790_s6 + $0x20] sm:$0xff] %vm1351_vm13, %v2873_v14 }
 0x527   :  { %v2948_v54 = vpop.f32.mrb[48].mxu0  ;;  %v3018_v57 = vpop.f32.mrb[48].mxu1 }
 0x528   :  { %v3167_v58 = vadd.f32 %v3166_v55, %v2948_v54  ;;  %v5831_v61 = vpop.f32.mrb[49].mxu0  ;;  %v5842_v62 = vpop.f32.mrb[49].mxu1  ;;  %v3177_v1 = vadd.f32 %v3176_v0, %v3018_v57  ;;  %v3286_v57 = vld [vmem:[#allocation2 + $0x158] sm:$0xff] }
 0x52a   :  { %v5010_v63 = vmul.f32 -1.442695, %v3167_v58  ;;  %v5011_v2 = vmul.f32 -1.442695, %v3177_v1 }
 0x52c   :  { %6556 = vpow2.f32 %v5010_v63 }
 0x52d   :  { %6558 = vpow2.f32 %v5011_v2 }
 0x52f   :  { %v3091_v3 = vpop.f32.mrb[50].mxu0 }
 0x530   :  { %v3267_v36 = vadd.f32 %v3266_v6, %v3091_v3  ;;  %v3161_v8 = vpop.f32.mrb[50].mxu1  ;;  %v5853_v9 = vpop.f32.mrb[51].mxu0 }
 0x531   :  { %v5864_v11 = vpop.f32.mrb[51].mxu1  ;;  %v3277_v49 = vadd.f32 %v3276_v13, %v3161_v8 }
 0x532   :  { %v5013_v12 = vmul.f32 -1.442695, %v3267_v36 }
 0x533   :  { %v5014_v20 = vmul.f32 -1.442695, %v3277_v49 }
 0x534   :  { %6560 = vpow2.f32 %v5013_v12  ;;  %v3661_v12 = vld [vmem:[#allocation2 + $0x28] sm:$0xff] }
 0x536   :  { %v6557_v15 = vpop.eup %6556 }
 0x537   :  { %v3171_v16 = vadd.f32 1.0, %v6557_v15  ;;  %v3253_v21 = vpop.f32.mrb[52].mxu0  ;;  %v6559_v28 = vpop.eup %6558 }
 0x538   :  { %v3353_v22 = vpop.f32.mrb[52].mxu1  ;;  %v5875_v26 = vpop.f32.mrb[53].mxu0  ;;  %v3181_v34 = vadd.f32 1.0, %v6559_v28  ;;  %v3254_v37 = vadd.f32 %v7201_v41, %v3253_v21  ;;  %v3671_v21 = vld [vmem:[#allocation2 + $0x68] sm:$0xff]  ;;  %v3761_v28 = vld [vmem:[#allocation2 + $0xd0] sm:$0xff] }
 0x539   :  { %6562 = vrcp.f32 %v3171_v16  ;;  %v5886_v27 = vpop.f32.mrb[53].mxu1  ;;  %v3354_v14 = vadd.f32 %v7207_v53, %v3353_v22 }
 0x53a   :  { %6564 = vpow2.f32 %v5014_v20 }
 0x53e   :  { %v6561_v32 = vpop.eup %6560 }
 0x53f   :  { %v3271_v33 = vadd.f32 1.0, %v6561_v32 }
 0x541   :  { %6566 = vrcp.f32 %v3271_v33 }
 0x542   :  { %6568 = vrcp.f32 %v3181_v34 }
 0x543   :  { %v6563_v4 = vpop.eup %6562 }
 0x544   :  { %v3257_v42 = vmul.f32 %v6563_v4, %v3254_v37  ;;  %v6565_v10 = vpop.eup %6564 }
 0x545   :  { %v3281_v48 = vadd.f32 1.0, %v6565_v10 }
 0x546   :  { %v3258_v46 = vadd.f32 %v3257_v42, %v3186_v43  ;;  %v3771_v42 = vld [vmem:[#allocation2 + $0x110] sm:$0xff] }
 0x548   :  { %6570 = vtanh.f32 %v3258_v46 }
 0x549   :  { %6572 = vrcp.f32 %v3281_v48 }
 0x54b   :  { %v6567_v54 = vpop.eup %6566 }
 0x54c   :  { %v3357_v55 = vmul.f32 %v6567_v54, %v3354_v14  ;;  %v6569_v58 = vpop.eup %6568 }
 0x54d   :  { %v3260_v62 = vsub.f32 1.0, %v6569_v58  ;;  %v3262_v0 = vmul.f32 %v6569_v58, %v7462_v35 }
 0x54e   :  { %v3358_v61 = vadd.f32 %v3357_v55, %v3286_v57 }
 0x550   :  { %6574 = vtanh.f32 %v3358_v61 }
 0x552   :  { %v6571_v63 = vpop.eup %6570 }
 0x553   :  { %v3261_v41 = vmul.f32 %v6571_v63, %v3260_v62  ;;  %v6573_v2 = vpop.eup %6572 }
 0x554   :  { %v3360_v6 = vsub.f32 1.0, %v6573_v2 }
 0x555   :  { %v3263_v1 = vadd.f32 %v3262_v0, %v3261_v41  ;;  %v7610_v41 = vld [vmem:[%s7789_s5] ss:$0 sm:$0xff] }
 0x557   :  { %v3364_v3 = vsel %vm2869_vm4, %v3263_v1, 0.0  ;;  %v7540_v53 = vsel %vm2869_vm4, %v3263_v1, %v7462_v35  ;;  %v3362_v35 = vmul.f32 %v6573_v2, %v7493_v51 }
 0x558   :  { %5016 = vst.msk [vmem:[%s7790_s6 + $0x20] sm:$0xff] %vm176_vm7, %v3364_v3  ;;  %5896 = vmatmul.mubr.msk.f32.vlgmr.msra.gmra.mrb[54].mxu0 %vm176_vm7, %v7540_v53  ;;  %5907 = vmatmul.mubr.msk.f32.vlgmr.msra.gmra.mrb[54].mxu1 %vm176_vm7, %v7540_v53 }
 0x559   :  { %6375 = vmatpush3.bf16.msra.mxu0 %v7030_v39  ;;  %6381 = vmatpush3.bf16.msra.mxu1 %v7034_v40 }
 0x55a   :  { %v6575_v36 = vpop.eup %6574  ;;  %6376 = vmatprep.subr.bf16.mxu0 %v6639_v24  ;;  %6382 = vmatprep.subr.bf16.mxu1 %v6639_v24 }
 0x55b   :  { %5917 = vmatprep.mubr.msk.f32.mxu0 %vm6640_vm3, %v6641_v38  ;;  %5928 = vmatprep.mubr.msk.f32.mxu1 %vm6640_vm3, %v6641_v38  ;;  %v3361_v50 = vmul.f32 %v6575_v36, %v3360_v6  ;;  %v3681_v6 = vld [vmem:[#allocation2 + $0xa8] sm:$0xff] }
 0x55d   :  { %6378 = vmatpush3.bf16.msra.mxu0 %v7052_v45  ;;  %6384 = vmatpush3.bf16.msra.mxu1 %v7057_v47  ;;  %v3363_v8 = vadd.f32 %v3362_v35, %v3361_v50  ;;  %v7616_v35 = vld [vmem:[%s7789_s5 + $0x1] ss:$0 sm:$0xff] }
 0x55e   :  { %6385 = vmatprep.subr.bf16.mxu0 %v6639_v24  ;;  %6391 = vmatprep.subr.bf16.mxu1 %v6639_v24 }
 0x55f   :  { %v3366_v9 = vsel %vm2861_vm2, %v3363_v8, 0.0  ;;  %v7568_v11 = vsel %vm2861_vm2, %v3363_v8, %v7493_v51 }
 0x560   :  { %3368 = vrot.lane.b32.xlu0 %v3366_v9, %s6642_s9  ;;  %5918 = vmatmul.mubr.msk.f32.vlgmr.msra.gmra.mrb[56].mxu0 %vm176_vm7, %v7568_v11 }
 0x561   :  { %5929 = vmatmul.mubr.msk.f32.vlgmr.msra.gmra.mrb[56].mxu1 %vm176_vm7, %v7568_v11  ;;  %6387 = vmatpush3.bf16.msra.mxu0 %v7078_v52 }
 0x562   :  { %6393 = vmatpush3.bf16.msra.mxu1 %v7090_v56  ;;  %6388 = vmatprep.subr.bf16.mxu0 %v6639_v24 }
 0x563   :  { %6394 = vmatprep.subr.bf16.mxu1 %v6639_v24  ;;  %5939 = vmatprep.mubr.msk.f32.mxu0 %vm6640_vm3, %v6641_v38 }
 0x564   :  { %5950 = vmatprep.mubr.msk.f32.mxu1 %vm6640_vm3, %v6641_v38 }
 0x565   :  { %6390 = vmatpush3.bf16.msra.mxu0 %v7101_v59 }
 0x566   :  { %6396 = vmatpush3.bf16.msra.mxu1 %v7107_v60  ;;  %6397 = vmatprep.subr.bf16.mxu0 %v6639_v24 }
 0x567   :  { %6403 = vmatprep.subr.bf16.mxu1 %v6639_v24 }
 0x568   :  { %5940 = vmatmul.mubr.msk.f32.vlgmr.msra.gmra.mrb[58].mxu0 %vm176_vm7, %v7540_v53 }
 0x569   :  { %5951 = vmatmul.mubr.msk.f32.vlgmr.msra.gmra.mrb[58].mxu1 %vm176_vm7, %v7568_v11  ;;  %6399 = vmatpush3.bf16.msra.mxu0 %v6945_v23 }
 0x56a   :  { %6405 = vmatpush3.bf16.msra.mxu1 %v6952_v25  ;;  %6400 = vmatprep.subr.bf16.mxu0 %v6639_v24 }
 0x56b   :  { %6406 = vmatprep.subr.bf16.mxu1 %v6639_v24  ;;  %5961 = vmatprep.mubr.msk.f32.mxu0 %vm6640_vm3, %v6641_v38 }
 0x56c   :  { %5972 = vmatprep.mubr.msk.f32.mxu1 %vm6640_vm3, %v6641_v38 }
 0x56d   :  { %6402 = vmatpush3.bf16.msra.mxu0 %v6981_v30 }
 0x56e   :  { %6408 = vmatpush3.bf16.msra.mxu1 %v6985_v31  ;;  %6409 = vmatprep.subr.bf16.mxu0 %v6639_v24 }
 0x56f   :  { %6415 = vmatprep.subr.bf16.mxu1 %v6639_v24 }
 0x5d2   :  { %v3369_v29 = vpop.permute.xlu0 %3368 }
 0x5d3   :  { %5017 = vst.msk [vmem:[%s7790_s6 + $0x18] sm:$0xff] %vm1351_vm13, %v3369_v29 }
 0x62b   :  { %v3443_v51 = vpop.f32.mrb[54].mxu0  ;;  %v3513_v13 = vpop.f32.mrb[54].mxu1 }
 0x62c   :  { %v3662_v49 = vadd.f32 %v3661_v12, %v3443_v51  ;;  %v5897_v15 = vpop.f32.mrb[55].mxu0  ;;  %v5908_v16 = vpop.f32.mrb[55].mxu1  ;;  %v3672_v22 = vadd.f32 %v3671_v21, %v3513_v13  ;;  %v3781_v51 = vld [vmem:[#allocation2 + $0x150] sm:$0xff] }
 0x62e   :  { %v5022_v20 = vmul.f32 -1.442695, %v3662_v49  ;;  %v5023_v26 = vmul.f32 -1.442695, %v3672_v22 }
 0x630   :  { %6576 = vpow2.f32 %v5022_v20 }
 0x631   :  { %6578 = vpow2.f32 %v5023_v26 }
 0x633   :  { %v3586_v27 = vpop.f32.mrb[56].mxu0 }
 0x634   :  { %v3762_v32 = vadd.f32 %v3761_v28, %v3586_v27  ;;  %v3656_v33 = vpop.f32.mrb[56].mxu1  ;;  %v5919_v34 = vpop.f32.mrb[57].mxu0 }
 0x635   :  { %v5930_v37 = vpop.f32.mrb[57].mxu1  ;;  %v3772_v10 = vadd.f32 %v3771_v42, %v3656_v33 }
 0x636   :  { %v5025_v4 = vmul.f32 -1.442695, %v3762_v32 }
 0x637   :  { %v5026_v48 = vmul.f32 -1.442695, %v3772_v10 }
 0x638   :  { %6580 = vpow2.f32 %v5025_v4 }
 0x63a   :  { %v6577_v43 = vpop.eup %6576 }
 0x63b   :  { %v3666_v46 = vadd.f32 1.0, %v6577_v43  ;;  %v3748_v14 = vpop.f32.mrb[58].mxu0  ;;  %v6579_v58 = vpop.eup %6578 }
 0x63c   :  { %v3848_v54 = vpop.f32.mrb[58].mxu1  ;;  %v5941_v55 = vpop.f32.mrb[59].mxu0  ;;  %v3676_v63 = vadd.f32 1.0, %v6579_v58  ;;  %v3749_v0 = vadd.f32 %v7610_v41, %v3748_v14  ;;  %v4256_v14 = vld [vmem:[#allocation2 + $0xc8] sm:$0xff] }
 0x63d   :  { %6582 = vrcp.f32 %v3666_v46  ;;  %v5952_v57 = vpop.f32.mrb[59].mxu1  ;;  %v3849_v8 = vadd.f32 %v7616_v35, %v3848_v54 }
 0x63e   :  { %6584 = vpow2.f32 %v5026_v48 }
 0x642   :  { %v6581_v61 = vpop.eup %6580 }
 0x643   :  { %v3766_v62 = vadd.f32 1.0, %v6581_v61 }
 0x645   :  { %6586 = vrcp.f32 %v3766_v62  ;;  %v4266_v62 = vld [vmem:[#allocation2 + $0x108] sm:$0xff] }
 0x646   :  { %6588 = vrcp.f32 %v3676_v63 }
 0x647   :  { %v6583_v1 = vpop.eup %6582 }
 0x648   :  { %v3752_v2 = vmul.f32 %v6583_v1, %v3749_v0  ;;  %v6585_v3 = vpop.eup %6584 }
 0x649   :  { %v3776_v50 = vadd.f32 1.0, %v6585_v3 }
 0x64a   :  { %v3753_v36 = vadd.f32 %v3752_v2, %v3681_v6 }
 0x64c   :  { %6590 = vtanh.f32 %v3753_v36 }
 0x64d   :  { %6592 = vrcp.f32 %v3776_v50 }
 0x64f   :  { %v6587_v9 = vpop.eup %6586 }
 0x650   :  { %v3852_v29 = vmul.f32 %v6587_v9, %v3849_v8  ;;  %v6589_v12 = vpop.eup %6588 }
 0x651   :  { %v3755_v49 = vsub.f32 1.0, %v6589_v12  ;;  %v3757_v20 = vmul.f32 %v6589_v12, %v7540_v53 }
 0x652   :  { %v3853_v13 = vadd.f32 %v3852_v29, %v3781_v51 }
 0x654   :  { %6594 = vtanh.f32 %v3853_v13 }
 0x656   :  { %v6591_v15 = vpop.eup %6590 }
 0x657   :  { %v3756_v16 = vmul.f32 %v6591_v15, %v3755_v49  ;;  %v6593_v22 = vpop.eup %6592 }
 0x658   :  { %v3855_v28 = vsub.f32 1.0, %v6593_v22 }
 0x659   :  { %v3758_v21 = vadd.f32 %v3757_v20, %v3756_v16  ;;  %v4176_v16 = vld [vmem:[#allocation2 + $0xb0] sm:$0xff] }
 0x65b   :  { %v3859_v26 = vsel %vm2360_vm1, %v3758_v21, 0.0  ;;  %v7625_v27 = vsel %vm2360_vm1, %v3758_v21, %v7540_v53  ;;  %v3857_v53 = vmul.f32 %v6593_v22, %v7568_v11 }
 0x65c   :  { %5028 = vst.msk [vmem:[%s7790_s6 + $0x28] sm:$0xff] %vm176_vm7, %v3859_v26  ;;  %5962 = vmatmul.mubr.msk.f32.vlgmr.msra.gmra.mrb[60].mxu0 %vm176_vm7, %v7625_v27  ;;  %5973 = vmatmul.mubr.msk.f32.vlgmr.msra.gmra.mrb[60].mxu1 %vm176_vm7, %v7625_v27 }
 0x65d   :  { %6411 = vmatpush3.bf16.msra.mxu0 %v7030_v39  ;;  %6417 = vmatpush3.bf16.msra.mxu1 %v7034_v40 }
 0x65e   :  { %v6595_v32 = vpop.eup %6594  ;;  %6412 = vmatprep.subr.bf16.mxu0 %v6639_v24  ;;  %6418 = vmatprep.subr.bf16.mxu1 %v6639_v24 }
 0x65f   :  { %5983 = vmatprep.mubr.msk.f32.mxu0 %vm6640_vm3, %v6641_v38  ;;  %5994 = vmatprep.mubr.msk.f32.mxu1 %vm6640_vm3, %v6641_v38  ;;  %v3856_v19 = vmul.f32 %v6595_v32, %v3855_v28  ;;  %v4276_v32 = vld [vmem:[#allocation2 + $0x148] sm:$0xff] }
 0x661   :  { %6414 = vmatpush3.bf16.msra.mxu0 %v7052_v45  ;;  %6420 = vmatpush3.bf16.msra.mxu1 %v7057_v47  ;;  %v3858_v33 = vadd.f32 %v3857_v53, %v3856_v19 }
 0x662   :  { %6421 = vmatprep.subr.bf16.mxu0 %v6639_v24  ;;  %6427 = vmatprep.subr.bf16.mxu1 %v6639_v24 }
 0x663   :  { %v3861_v34 = vsel %vm2352_vm0, %v3858_v33, 0.0  ;;  %v7653_v37 = vsel %vm2352_vm0, %v3858_v33, %v7568_v11 }
 0x664   :  { %3863 = vrot.lane.b32.xlu1 %v3861_v34, %s6642_s9  ;;  %5984 = vmatmul.mubr.msk.f32.vlgmr.msra.gmra.mrb[62].mxu0 %vm176_vm7, %v7653_v37 }
 0x665   :  { %5995 = vmatmul.mubr.msk.f32.vlgmr.msra.gmra.mrb[62].mxu1 %vm176_vm7, %v7653_v37  ;;  %6423 = vmatpush3.bf16.msra.mxu0 %v7078_v52 }
 0x666   :  { %6429 = vmatpush3.bf16.msra.mxu1 %v7090_v56  ;;  %6424 = vmatprep.subr.bf16.mxu0 %v6639_v24 }
 0x667   :  { %6430 = vmatprep.subr.bf16.mxu1 %v6639_v24  ;;  %6005 = vmatprep.mubr.msk.f32.mxu0 %vm6640_vm3, %v6641_v38 }
 0x668   :  { %6016 = vmatprep.mubr.msk.f32.mxu1 %vm6640_vm3, %v6641_v38 }
 0x669   :  { %6426 = vmatpush3.bf16.msra.mxu0 %v7101_v59 }
 0x66a   :  { %6432 = vmatpush3.bf16.msra.mxu1 %v7107_v60  ;;  %6433 = vmatprep.subr.bf16.mxu0 %v6639_v24 }
 0x66b   :  { %6439 = vmatprep.subr.bf16.mxu1 %v6639_v24 }
 0x66c   :  { %6006 = vmatmul.mubr.msk.f32.vlgmr.msra.gmra.mrb[64].mxu0 %vm176_vm7, %v7625_v27 }
 0x66d   :  { %6017 = vmatmul.mubr.msk.f32.vlgmr.msra.gmra.mrb[64].mxu1 %vm176_vm7, %v7653_v37  ;;  %6435 = vmatpush3.bf16.msra.mxu0 %v6945_v23 }
 0x66e   :  { %6441 = vmatpush3.bf16.msra.mxu1 %v6952_v25  ;;  %6436 = vmatprep.subr.bf16.mxu0 %v6639_v24 }
 0x66f   :  { %6442 = vmatprep.subr.bf16.mxu1 %v6639_v24  ;;  %6027 = vmatprep.mubr.msk.f32.mxu0 %vm6640_vm3, %v6641_v38 }
 0x670   :  { %6038 = vmatprep.mubr.msk.f32.mxu1 %vm6640_vm3, %v6641_v38 }
 0x671   :  { %6438 = vmatpush3.bf16.msra.mxu0 %v6981_v30  ;;  %v4166_v30 = vld [vmem:[#allocation2 + $0x70] sm:$0xff] }
 0x672   :  { %6444 = vmatpush3.bf16.msra.mxu1 %v6985_v31  ;;  %6445 = vmatprep.subr.bf16.mxu0 %v6639_v24 }
 0x673   :  { %6451 = vmatprep.subr.bf16.mxu1 %v6639_v24 }
 0x6d6   :  { %v3864_v23 = vpop.permute.xlu1 %3863 }
 0x6d7   :  { %5029 = vst.msk [vmem:[%s7790_s6 + $0x10] sm:$0xff] %vm1351_vm13, %v3864_v23 }
 0x72f   :  { %v3938_v25 = vpop.f32.mrb[60].mxu0  ;;  %v4008_v11 = vpop.f32.mrb[60].mxu1 }
 0x730   :  { %v4157_v4 = vadd.f32 %v4156_v7, %v3938_v25  ;;  %v5963_v42 = vpop.f32.mrb[61].mxu0  ;;  %v5974_v10 = vpop.f32.mrb[61].mxu1  ;;  %v4167_v46 = vadd.f32 %v4166_v30, %v4008_v11 }
 0x732   :  { %v5034_v43 = vmul.f32 -1.442695, %v4157_v4  ;;  %v5035_v31 = vmul.f32 -1.442695, %v4167_v46 }
 0x734   :  { %6596 = vpow2.f32 %v5034_v43 }
 0x735   :  { %6598 = vpow2.f32 %v5035_v31 }
 0x737   :  { %v4081_v48 = vpop.f32.mrb[62].mxu0 }
 0x738   :  { %v4257_v54 = vadd.f32 %v4256_v14, %v4081_v48  ;;  %v4151_v55 = vpop.f32.mrb[62].mxu1  ;;  %v5985_v57 = vpop.f32.mrb[63].mxu0  ;;  %v4751_v48 = vld [vmem:[#allocation2 + $0xc0] sm:$0xff] }
 0x739   :  { %v5996_v58 = vpop.f32.mrb[63].mxu1  ;;  %v4267_v63 = vadd.f32 %v4266_v62, %v4151_v55 }
 0x73a   :  { %v5037_v61 = vmul.f32 -1.442695, %v4257_v54 }
 0x73b   :  { %v5038_v2 = vmul.f32 -1.442695, %v4267_v63 }
 0x73c   :  { %6600 = vpow2.f32 %v5037_v61  ;;  %v4761_v61 = vld [vmem:[#allocation2 + $0x100] sm:$0xff] }
 0x73e   :  { %v6597_v0 = vpop.eup %6596 }
 0x73f   :  { %v4161_v1 = vadd.f32 1.0, %v6597_v0  ;;  %v4243_v3 = vpop.f32.mrb[64].mxu0  ;;  %v6599_v8 = vpop.eup %6598 }
 0x740   :  { %v4343_v6 = vpop.f32.mrb[64].mxu1  ;;  %v6007_v36 = vpop.f32.mrb[65].mxu0  ;;  %v4171_v51 = vadd.f32 1.0, %v6599_v8  ;;  %v4244_v12 = vadd.f32 %v7610_v41, %v4243_v3 }
 0x741   :  { %6602 = vrcp.f32 %v4161_v1  ;;  %v6018_v50 = vpop.f32.mrb[65].mxu1  ;;  %v4344_v22 = vadd.f32 %v7616_v35, %v4343_v6 }
 0x742   :  { %6604 = vpow2.f32 %v5038_v2 }
 0x746   :  { %v6601_v9 = vpop.eup %6600 }
 0x747   :  { %v4261_v29 = vadd.f32 1.0, %v6601_v9 }
 0x749   :  { %6606 = vrcp.f32 %v4261_v29 }
 0x74a   :  { %6608 = vrcp.f32 %v4171_v51 }
 0x74b   :  { %v6603_v13 = vpop.eup %6602 }
 0x74c   :  { %v4247_v49 = vmul.f32 %v6603_v13, %v4244_v12  ;;  %v6605_v15 = vpop.eup %6604 }
 0x74d   :  { %v4271_v21 = vadd.f32 1.0, %v6605_v15  ;;  %v4671_v15 = vld [vmem:[#allocation2 + $0xb8] sm:$0xff] }
 0x74e   :  { %v4248_v20 = vadd.f32 %v4247_v49, %v4176_v16 }
 0x750   :  { %6610 = vtanh.f32 %v4248_v20 }
 0x751   :  { %6612 = vrcp.f32 %v4271_v21 }
 0x753   :  { %v6607_v26 = vpop.eup %6606 }
 0x754   :  { %v4347_v28 = vmul.f32 %v6607_v26, %v4344_v22  ;;  %v6609_v19 = vpop.eup %6608 }
 0x755   :  { %v4250_v33 = vsub.f32 1.0, %v6609_v19  ;;  %v4252_v25 = vmul.f32 %v6609_v19, %v7625_v27 }
 0x756   :  { %v4348_v53 = vadd.f32 %v4347_v28, %v4276_v32  ;;  %v4771_v28 = vld [vmem:[#allocation2 + $0x140] sm:$0xff] }
 0x758   :  { %6614 = vtanh.f32 %v4348_v53 }
 0x75a   :  { %v6611_v34 = vpop.eup %6610 }
 0x75b   :  { %v4251_v23 = vmul.f32 %v6611_v34, %v4250_v33  ;;  %v6613_v11 = vpop.eup %6612 }
 0x75c   :  { %v4350_v10 = vsub.f32 1.0, %v6613_v11 }
 0x75d   :  { %v4253_v7 = vadd.f32 %v4252_v25, %v4251_v23 }
 0x75f   :  { %v4354_v4 = vsel %vm1851_vm15, %v4253_v7, 0.0  ;;  %v7700_v42 = vsel %vm1851_vm15, %v4253_v7, %v7625_v27  ;;  %v4352_v27 = vmul.f32 %v6613_v11, %v7653_v37 }
 0x760   :  { %5040 = vst.msk [vmem:[%s7790_s6 + $0x30] sm:$0xff] %vm176_vm7, %v4354_v4  ;;  %6028 = vmatmul.mubr.msk.f32.vlgmr.msra.gmra.mrb[66].mxu0 %vm176_vm7, %v7700_v42  ;;  %6039 = vmatmul.mubr.msk.f32.vlgmr.msra.gmra.mrb[66].mxu1 %vm176_vm7, %v7700_v42 }
 0x761   :  { %6447 = vmatpush3.bf16.msra.mxu0 %v7030_v39  ;;  %6453 = vmatpush3.bf16.msra.mxu1 %v7034_v40 }
 0x762   :  { %v6615_v43 = vpop.eup %6614  ;;  %6448 = vmatprep.subr.bf16.mxu0 %v6639_v24  ;;  %6454 = vmatprep.subr.bf16.mxu1 %v6639_v24 }
 0x763   :  { %6049 = vmatprep.mubr.msk.f32.mxu0 %vm6640_vm3, %v6641_v38  ;;  %6060 = vmatprep.mubr.msk.f32.mxu1 %vm6640_vm3, %v6641_v38  ;;  %v4351_v44 = vmul.f32 %v6615_v43, %v4350_v10 }
 0x765   :  { %6450 = vmatpush3.bf16.msra.mxu0 %v7052_v45  ;;  %6456 = vmatpush3.bf16.msra.mxu1 %v7057_v47  ;;  %v4353_v39 = vadd.f32 %v4352_v27, %v4351_v44  ;;  %v4651_v47 = vld [vmem:[#allocation2 + $0x38] sm:$0xff] }
 0x766   :  { %6457 = vmatprep.subr.bf16.mxu0 %v6639_v24  ;;  %6463 = vmatprep.subr.bf16.mxu1 %v6639_v24 }
 0x767   :  { %v4356_v40 = vsel %vm1843_vm14, %v4353_v39, 0.0  ;;  %v7728_v30 = vsel %vm1843_vm14, %v4353_v39, %v7653_v37 }
 0x768   :  { %4358 = vrot.lane.b32.xlu0 %v4356_v40, %s6642_s9  ;;  %6050 = vmatmul.mubr.msk.f32.vlgmr.msra.gmra.mrb[68].mxu0 %vm176_vm7, %v7728_v30 }
 0x769   :  { %6061 = vmatmul.mubr.msk.f32.vlgmr.msra.gmra.mrb[68].mxu1 %vm176_vm7, %v7728_v30  ;;  %6459 = vmatpush3.bf16.msra.mxu0 %v7078_v52 }
 0x76a   :  { %6465 = vmatpush3.bf16.msra.mxu1 %v7090_v56  ;;  %6460 = vmatprep.subr.bf16.mxu0 %v6639_v24 }
 0x76b   :  { %6466 = vmatprep.subr.bf16.mxu1 %v6639_v24  ;;  %6071 = vmatprep.mubr.msk.f32.mxu0 %vm6640_vm3, %v6641_v38 }
 0x76c   :  { %6082 = vmatprep.mubr.msk.f32.mxu1 %vm6640_vm3, %v6641_v38 }
 0x76d   :  { %6462 = vmatpush3.bf16.msra.mxu0 %v7101_v59 }
 0x76e   :  { %6468 = vmatpush3.bf16.msra.mxu1 %v7107_v60  ;;  %v4661_v60 = vld [vmem:[#allocation2 + $0x78] sm:$0xff] }
 0x770   :  { %6072 = vmatmul.mubr.msk.f32.vlgmr.msra.gmra.mrb[70].mxu0 %vm176_vm7, %v7700_v42 }
 0x771   :  { %6083 = vmatmul.mubr.msk.f32.vlgmr.msra.gmra.mrb[70].mxu1 %vm176_vm7, %v7728_v30 }
 0x7da   :  { %v4359_v45 = vpop.permute.xlu0 %4358 }
 0x7db   :  { %5041 = vst.msk [vmem:[%s7790_s6 + $0x8] sm:$0xff] %vm1351_vm13, %v4359_v45 }
 0x833   :  { %v4433_v24 = vpop.f32.mrb[66].mxu0  ;;  %v4503_v52 = vpop.f32.mrb[66].mxu1 }
 0x834   :  { %v4652_v38 = vadd.f32 %v4651_v47, %v4433_v24  ;;  %v6029_v56 = vpop.f32.mrb[67].mxu0  ;;  %v6040_v59 = vpop.f32.mrb[67].mxu1  ;;  %v4662_v37 = vadd.f32 %v4661_v60, %v4503_v52 }
 0x836   :  { %v5046_v18 = vmul.f32 -1.442695, %v4652_v38  ;;  %v5047_v46 = vmul.f32 -1.442695, %v4662_v37 }
 0x838   :  { %6616 = vpow2.f32 %v5046_v18 }
 0x839   :  { %6618 = vpow2.f32 %v5047_v46 }
 0x83b   :  { %v4576_v31 = vpop.f32.mrb[68].mxu0 }
 0x83c   :  { %v4752_v14 = vadd.f32 %v4751_v48, %v4576_v31  ;;  %v4646_v54 = vpop.f32.mrb[68].mxu1  ;;  %v6051_v55 = vpop.f32.mrb[69].mxu0 }
 0x83d   :  { %v6062_v57 = vpop.f32.mrb[69].mxu1  ;;  %v4762_v62 = vadd.f32 %v4761_v61, %v4646_v54 }
 0x83e   :  { %v5049_v58 = vmul.f32 -1.442695, %v4752_v14 }
 0x83f   :  { %v5050_v1 = vmul.f32 -1.442695, %v4762_v62 }
 0x840   :  { %6620 = vpow2.f32 %v5049_v58 }
 0x842   :  { %v6617_v63 = vpop.eup %6616 }
 0x843   :  { %v4656_v0 = vadd.f32 1.0, %v6617_v63  ;;  %v4738_v2 = vpop.f32.mrb[70].mxu0  ;;  %v6619_v50 = vpop.eup %6618 }
 0x844   :  { %v4838_v3 = vpop.f32.mrb[70].mxu1  ;;  %v6073_v6 = vpop.f32.mrb[71].mxu0  ;;  %v4666_v29 = vadd.f32 1.0, %v6619_v50  ;;  %v4739_v51 = vadd.f32 %v7610_v41, %v4738_v2 }
 0x845   :  { %6622 = vrcp.f32 %v4656_v0  ;;  %v6084_v36 = vpop.f32.mrb[71].mxu1  ;;  %v4839_v21 = vadd.f32 %v7616_v35, %v4838_v3 }
 0x846   :  { %6624 = vpow2.f32 %v5050_v1 }
 0x84a   :  { %v6621_v8 = vpop.eup %6620 }
 0x84b   :  { %v4756_v9 = vadd.f32 1.0, %v6621_v8 }
 0x84d   :  { %6626 = vrcp.f32 %v4756_v9 }
 0x84e   :  { %6628 = vrcp.f32 %v4666_v29 }
 0x84f   :  { %v6623_v12 = vpop.eup %6622 }
 0x850   :  { %v4742_v13 = vmul.f32 %v6623_v12, %v4739_v51  ;;  %v6625_v49 = vpop.eup %6624 }
 0x851   :  { %v4766_v20 = vadd.f32 1.0, %v6625_v49 }
 0x852   :  { %v4743_v16 = vadd.f32 %v4742_v13, %v4671_v15 }
 0x854   :  { %6630 = vtanh.f32 %v4743_v16 }
 0x855   :  { %6632 = vrcp.f32 %v4766_v20 }
 0x857   :  { %v6627_v22 = vpop.eup %6626 }
 0x858   :  { %v4842_v26 = vmul.f32 %v6627_v22, %v4839_v21  ;;  %v6629_v32 = vpop.eup %6628 }
 0x859   :  { %v4745_v53 = vsub.f32 1.0, %v6629_v32  ;;  %v4747_v41 = vmul.f32 %v6629_v32, %v7700_v42 }
 0x85a   :  { %v4843_v19 = vadd.f32 %v4842_v26, %v4771_v28 }
 0x85c   :  { %6634 = vtanh.f32 %v4843_v19 }
 0x85e   :  { %v6631_v33 = vpop.eup %6630 }
 0x85f   :  { %v4746_v34 = vmul.f32 %v6631_v33, %v4745_v53  ;;  %v6633_v25 = vpop.eup %6632 }
 0x860   :  { %v4845_v11 = vsub.f32 1.0, %v6633_v25  ;;  %v4847_v43 = vmul.f32 %v6633_v25, %v7728_v30 }
 0x861   :  { %v4748_v23 = vadd.f32 %v4747_v41, %v4746_v34 }
 0x863   :  { %v4849_v7 = vsel %vm1344_vm11, %v4748_v23, 0.0  ;;  %v4857_v35 = vsel %vm1344_vm11, %v4748_v23, %v7700_v42 }
 0x864   :  { %5052 = vst.msk [vmem:[%s7790_s6 + $0x38] sm:$0xff] %vm176_vm7, %v4849_v7  ;;  %4859 = vst.msk [vmem:[%s7791_s7] sm:$0xff] %vm176_vm7, %v4857_v35 }
 0x866   :  { %v6635_v4 = vpop.eup %6634 }
 0x867   :  { %v4846_v10 = vmul.f32 %v6635_v4, %v4845_v11 }
 0x869   :  { %v4848_v44 = vadd.f32 %v4847_v43, %v4846_v10 }
 0x86b   :  { %v4851_v17 = vsel %vm1337_vm9, %v4848_v44, 0.0  ;;  %v4858_v42 = vsel %vm1337_vm9, %v4848_v44, %v7728_v30 }
 0x86c   :  { %4860 = vst.msk [vmem:[%s7791_s7 + $0x8] sm:$0xff] %vm176_vm7, %v4858_v42  ;;  %4853 = vrot.lane.b32.xlu1 %v4851_v17, %s6642_s9 }
 0x8de   :  { %v4854_v27 = vpop.permute.xlu1 %4853 }
 0x8df   :  { %4856 = vst.msk [vmem:[%s7790_s6] sm:$0xff] %vm1351_vm13, %v4854_v27 }

</bundles_post_ra>
